<compile_context>
chip_gen: v7x
topology: tpu7x:2x2x1
jax: 0.10.0
libtpu: 0.0.40
codegen_flags: <defaults>
</compile_context>

<pallas_src>
import numpy as np
import jax
import jax.numpy as jnp
from jax import lax
from jax.experimental import pallas as pl
from jax.experimental.pallas import tpu as pltpu

BATCH = 2
IMAGE_SIZE = 20                 # small spatial size (module default is 224)
FEAT = IMAGE_SIZE - 15          # spatial size after the three conv+pool stages
FC1_IN = 128 * FEAT * FEAT
NUM_CLASSES = 30
KSZ = 5

W = IMAGE_SIZE
NPIX = W * W
# widths ("number of wide columns") needed per stage
_POOL_SH = W + 1                      # max lane shift used by the 2x2 pool
_CONV_SH = (KSZ - 1) * W + (KSZ - 1)  # max lane shift used by a 5x5 conv tap
NP3 = (FEAT - 1) * W + FEAT           # 85  : columns read by fc1
NY3 = NP3 + _POOL_SH                  # 106 : conv3 output columns
NP2 = NY3 + _CONV_SH                  # 190 : pool2 output columns
NY2 = NP2 + _POOL_SH                  # 211 : conv2 output columns
NP1 = NY2 + _CONV_SH                  # 295 : pool1 output columns
NY1 = NP1 + _POOL_SH                  # 316 : conv1 output columns
assert NY1 <= NPIX


# ---------------------------------------------------------------------------
# Kernel helpers (operate on values; all slices are static)
# ---------------------------------------------------------------------------
def _pool(y, out_w):
    """MaxPool2d(kernel=2, stride=1) in wide layout: max of 4 shifted windows."""
    return jnp.maximum(
        jnp.maximum(y[:, 0:out_w], y[:, 1:out_w + 1]),
        jnp.maximum(y[:, W:W + out_w], y[:, W + 1:W + 1 + out_w]))


def _conv_wide(x, w_ref, b_ref, out_w):
    """5x5 VALID conv + bias + ReLU in wide layout, as ONE MXU matmul.

    x: (Cin, n_in) bf16, w_ref: (Cout, KSZ*KSZ*Cin) bf16, b_ref: (Cout, 1) f32.
    The im2col slab stacks all 25 lane-shifted windows along the sublane axis
    (kh outer, kw inner, cin innermost), so the whole contraction (K=25*Cin)
    runs inside the MXU.  Returns (Cout, out_w) f32.
    """
    slab = jnp.concatenate(
        [x[:, kh * W + kw: kh * W + kw + out_w]
         for kh in range(KSZ) for kw in range(KSZ)], axis=0)
    acc = jnp.dot(w_ref[...], slab, preferred_element_type=jnp.float32)
    return jnp.maximum(acc + b_ref[...], 0.0)


# ---------------------------------------------------------------------------
# Fused forward kernel (one grid step = one image)
# ---------------------------------------------------------------------------
def _convnet_kernel(xcol_ref, w1_ref, w2_ref, w3_ref, wf1_ref, wf2_ref,
                    b1_ref, b2_ref, b3_ref, bf1_ref, bf2_ref, o_ref):
    # stage 1: conv1 im2col'ed in the wrapper -> single (32,75)@(75,400) matmul
    y1 = jnp.dot(w1_ref[...], xcol_ref[0], preferred_element_type=jnp.float32)
    y1 = jnp.maximum(y1 + b1_ref[...], 0.0)              # (32, 400) f32
    p1 = _pool(y1, NP1).astype(jnp.bfloat16)             # (32, 295) bf16

    # stage 2: conv2 + ReLU + pool (single matmul, K = 800)
    y2 = _conv_wide(p1, w2_ref, b2_ref, NY2)             # (64, 211) f32
    p2 = _pool(y2, NP2).astype(jnp.bfloat16)             # (64, 190) bf16

    # stage 3: conv3 + ReLU + pool (single matmul, K = 1600)
    y3 = _conv_wide(p2, w3_ref, b3_ref, NY3)             # (128, 106) f32
    p3 = _pool(y3, NP3).astype(jnp.bfloat16)             # (128, 85) bf16

    # fc1 (NCHW flatten folded into the pre-permuted weight) + ReLU
    h = jnp.zeros((128, 1), jnp.float32)
    for s in range(FEAT * FEAT):
        col = (s // FEAT) * W + (s % FEAT)
        h = h + jnp.dot(wf1_ref[s], p3[:, col:col + 1],
                        preferred_element_type=jnp.float32)
    h = jnp.maximum(h + bf1_ref[...], 0.0)               # (128, 1) f32

    # fc2
    logits = jnp.dot(wf2_ref[...], h.astype(jnp.bfloat16),
                     preferred_element_type=jnp.float32) + bf2_ref[...]
    o_ref[0] = logits.astype(o_ref.dtype)                # (30, 1)


# ---------------------------------------------------------------------------
# Wrapper: layer-1 im2col, weight re-layouts, single pallas_call
# ---------------------------------------------------------------------------
def convnet_forward(x_nchw, p):
    B = x_nchw.shape[0]
    bf16 = jnp.bfloat16

    # layer-1 im2col in wide layout: row (kh*5+kw)*3+ci, col j -> x[ci, j + kh*W+kw]
    xf = x_nchw.reshape(B, 3, NPIX)
    xcol = jnp.concatenate(
        [jnp.roll(xf, -(kh * W + kw), axis=2)
         for kh in range(KSZ) for kw in range(KSZ)], axis=1).astype(bf16)   # (B, 75, 400)

    # weight re-layouts (pure data movement; MXU inputs pre-cast to bf16)
    # K ordering for conv matmuls: kh outer, kw middle, cin innermost -- matches
    # the in-kernel slab build order.
    w1t = p["w1"].reshape(KSZ * KSZ * 3, 32).T.astype(bf16)                  # (32, 75)
    w2t = p["w2"].reshape(KSZ * KSZ * 32, 64).T.astype(bf16)                 # (64, 800)
    w3t = p["w3"].reshape(KSZ * KSZ * 64, 128).T.astype(bf16)                # (128, 1600)
    # fc1 rows are NCHW-flatten order c*25 + s; repack to [s, out, c]
    wf1r = p["wf1"].reshape(128, FEAT * FEAT, 128).transpose(1, 2, 0).astype(bf16)  # (25,128,128)
    wf2t = p["wf2"].T.astype(bf16)                                           # (30, 128)

    b1 = p["b1"].reshape(32, 1)
    b2 = p["b2"].reshape(64, 1)
    b3 = p["b3"].reshape(128, 1)
    bf1 = p["bf1"].reshape(128, 1)
    bf2 = p["bf2"].reshape(NUM_CLASSES, 1)

    def full(shape):
        return pl.BlockSpec(shape, lambda b, _s=shape: (0,) * len(_s))

    out = pl.pallas_call(
        _convnet_kernel,
        out_shape=jax.ShapeDtypeStruct((B, NUM_CLASSES, 1), jnp.float32),
        grid=(B,),
        in_specs=[
            pl.BlockSpec((1, KSZ * KSZ * 3, NPIX), lambda b: (b, 0, 0)),   # xcol
            full((32, KSZ * KSZ * 3)),
            full((64, KSZ * KSZ * 32)),
            full((128, KSZ * KSZ * 64)),
            full((FEAT * FEAT, 128, 128)),
            full((NUM_CLASSES, 128)),
            full((32, 1)),
            full((64, 1)),
            full((128, 1)),
            full((128, 1)),
            full((NUM_CLASSES, 1)),
        ],
        out_specs=pl.BlockSpec((1, NUM_CLASSES, 1), lambda b: (b, 0, 0)),
        compiler_params=pltpu.CompilerParams(
            dimension_semantics=("parallel",)),        # v7x: one image per core
    )(xcol, w1t, w2t, w3t, wf1r, wf2t, b1, b2, b3, bf1, bf2)
    return out[:, :, 0]


# ---------------------------------------------------------------------------
# Parameters (PyTorch-default-style uniform(-1/sqrt(fan_in), 1/sqrt(fan_in)))
# ---------------------------------------------------------------------------
def init_params(key):
    def uni(k, shape, fan_in):
        bound = 1.0 / np.sqrt(fan_in)
        return jax.random.uniform(k, shape, jnp.float32, -bound, bound)

    ks = jax.random.split(key, 10)
    return {
        "w1": uni(ks[0], (KSZ, KSZ, 3, 32), 3 * KSZ * KSZ),
        "b1": uni(ks[1], (32,), 3 * KSZ * KSZ),
        "w2": uni(ks[2], (KSZ, KSZ, 32, 64), 32 * KSZ * KSZ),
        "b2": uni(ks[3], (64,), 32 * KSZ * KSZ),
        "w3": uni(ks[4], (KSZ, KSZ, 64, 128), 64 * KSZ * KSZ),
        "b3": uni(ks[5], (128,), 64 * KSZ * KSZ),
        "wf1": uni(ks[6], (FC1_IN, 128), FC1_IN),
        "bf1": uni(ks[7], (128,), FC1_IN),
        "wf2": uni(ks[8], (128, NUM_CLASSES), 128),
        "bf2": uni(ks[9], (NUM_CLASSES,), 128),
    }


# ---------------------------------------------------------------------------
# Pure-JAX reference (same bf16-inputs / f32-accumulation math)
# ---------------------------------------------------------------------------
def reference_forward(x_nchw, p):
    def block(a, w, b):
        y = lax.conv_general_dilated(
            a.astype(jnp.bfloat16), w.astype(jnp.bfloat16), (1, 1), "VALID",
            dimension_numbers=("NCHW", "HWIO", "NCHW"),
            preferred_element_type=jnp.float32)
        y = jnp.maximum(y + b.reshape(1, -1, 1, 1), 0.0)
        return lax.reduce_window(y, -jnp.inf, lax.max,
                                 (1, 1, 2, 2), (1, 1, 1, 1), "VALID")

    a = block(x_nchw, p["w1"], p["b1"])
    a = block(a, p["w2"], p["b2"])
    a = block(a, p["w3"], p["b3"])
    B = a.shape[0]
    flat = a.reshape(B, -1)                       # NCHW flatten, like x.view(...)
    h = jnp.maximum(
        jnp.dot(flat.astype(jnp.bfloat16), p["wf1"].astype(jnp.bfloat16),
                preferred_element_type=jnp.float32) + p["bf1"], 0.0)
    return jnp.dot(h.astype(jnp.bfloat16), p["wf2"].astype(jnp.bfloat16),
                   preferred_element_type=jnp.float32) + p["bf2"]


if __name__ == "__main__":
    key = jax.random.PRNGKey(0)
    xkey, pkey = jax.random.split(key)
    x = jax.random.normal(xkey, (BATCH, 3, IMAGE_SIZE, IMAGE_SIZE), jnp.float32)  # NCHW
    params = init_params(pkey)

    out = jax.jit(convnet_forward)(x, params)
    out = jax.block_until_ready(out)
    assert out.shape == (BATCH, NUM_CLASSES), out.shape

    ref = reference_forward(x, params)
    np.testing.assert_allclose(np.asarray(out), np.asarray(ref), rtol=2e-2, atol=2e-2)

    print("KERNEL_OK")
</pallas_src>

<mosaic_0001>
module attributes {stable_mosaic.version = 11 : i64} {
  func.func @_convnet_kernel(%arg0: i32, %arg1: memref<1x75x400xbf16, #tpu.memory_space<vmem>>, %arg2: memref<32x75xbf16, #tpu.memory_space<vmem>>, %arg3: memref<64x800xbf16, #tpu.memory_space<vmem>>, %arg4: memref<128x1600xbf16, #tpu.memory_space<vmem>>, %arg5: memref<25x128x128xbf16, #tpu.memory_space<vmem>>, %arg6: memref<30x128xbf16, #tpu.memory_space<vmem>>, %arg7: memref<32x1xf32, #tpu.memory_space<vmem>>, %arg8: memref<64x1xf32, #tpu.memory_space<vmem>>, %arg9: memref<128x1xf32, #tpu.memory_space<vmem>>, %arg10: memref<128x1xf32, #tpu.memory_space<vmem>>, %arg11: memref<30x1xf32, #tpu.memory_space<vmem>>, %arg12: memref<1x30x1xf32, #tpu.memory_space<vmem>>) attributes {dimension_semantics = [#tpu.dimension_semantics<parallel>], iteration_bounds = array<i64: 2>, scalar_prefetch = 0 : i64, scratch_operands = 0 : i64, tpu.core_type = #tpu.core_type<tc>, window_params = [{transform_indices = @transform_0, window_bounds = array<i64: 1, 75, 400>}, {pipeline_mode = #tpu.pipeline_mode<synchronous>, transform_indices = @transform_1, window_bounds = array<i64: 32, 75>}, {pipeline_mode = #tpu.pipeline_mode<synchronous>, transform_indices = @transform_2, window_bounds = array<i64: 64, 800>}, {pipeline_mode = #tpu.pipeline_mode<synchronous>, transform_indices = @transform_3, window_bounds = array<i64: 128, 1600>}, {pipeline_mode = #tpu.pipeline_mode<synchronous>, transform_indices = @transform_4, window_bounds = array<i64: 25, 128, 128>}, {pipeline_mode = #tpu.pipeline_mode<synchronous>, transform_indices = @transform_5, window_bounds = array<i64: 30, 128>}, {pipeline_mode = #tpu.pipeline_mode<synchronous>, transform_indices = @transform_6, window_bounds = array<i64: 32, 1>}, {pipeline_mode = #tpu.pipeline_mode<synchronous>, transform_indices = @transform_7, window_bounds = array<i64: 64, 1>}, {pipeline_mode = #tpu.pipeline_mode<synchronous>, transform_indices = @transform_8, window_bounds = array<i64: 128, 1>}, {pipeline_mode = #tpu.pipeline_mode<synchronous>, transform_indices = @transform_9, window_bounds = array<i64: 128, 1>}, {pipeline_mode = #tpu.pipeline_mode<synchronous>, transform_indices = @transform_10, window_bounds = array<i64: 30, 1>}, {transform_indices = @transform_11, window_bounds = array<i64: 1, 30, 1>}]} {
    %c0 = arith.constant 0 : index
    %c0_0 = arith.constant 0 : index
    %0 = vector.load %arg2[%c0, %c0_0] : memref<32x75xbf16, #tpu.memory_space<vmem>>, vector<32x75xbf16>
    %c0_1 = arith.constant 0 : index
    %c0_2 = arith.constant 0 : index
    %c0_3 = arith.constant 0 : index
    %1 = vector.load %arg1[%c0_1, %c0_2, %c0_3] : memref<1x75x400xbf16, #tpu.memory_space<vmem>>, vector<1x75x400xbf16>
    %2 = vector.shape_cast %1 : vector<1x75x400xbf16> to vector<75x400xbf16>
    %cst = arith.constant dense<0.000000e+00> : vector<32x400xf32>
    %3 = tpu.matmul %0, %2, %cst {dimension_numbers = #tpu.dot_dimension_numbers<[1], [0], [0], [1], [0, 0, 1, 1], [], []>} : vector<32x75xbf16>, vector<75x400xbf16>, vector<32x400xf32> -> vector<32x400xf32>
    %c0_4 = arith.constant 0 : index
    %c0_5 = arith.constant 0 : index
    %4 = vector.load %arg7[%c0_4, %c0_5] : memref<32x1xf32, #tpu.memory_space<vmem>>, vector<32x1xf32>
    %5 = vector.broadcast %4 : vector<32x1xf32> to vector<32x400xf32>
    %6 = arith.addf %3, %5 : vector<32x400xf32>
    %cst_6 = arith.constant 0.000000e+00 : f32
    %7 = vector.broadcast %cst_6 : f32 to vector<32x400xf32>
    %8 = arith.maximumf %6, %7 : vector<32x400xf32>
    %9 = vector.extract_strided_slice %8 {offsets = [0, 0], sizes = [32, 295], strides = [1, 1]} : vector<32x400xf32> to vector<32x295xf32>
    %10 = vector.extract_strided_slice %8 {offsets = [0, 1], sizes = [32, 295], strides = [1, 1]} : vector<32x400xf32> to vector<32x295xf32>
    %11 = arith.maximumf %9, %10 : vector<32x295xf32>
    %12 = vector.extract_strided_slice %8 {offsets = [0, 20], sizes = [32, 295], strides = [1, 1]} : vector<32x400xf32> to vector<32x295xf32>
    %13 = vector.extract_strided_slice %8 {offsets = [0, 21], sizes = [32, 295], strides = [1, 1]} : vector<32x400xf32> to vector<32x295xf32>
    %14 = arith.maximumf %12, %13 : vector<32x295xf32>
    %15 = arith.maximumf %11, %14 : vector<32x295xf32>
    %16 = arith.truncf %15 : vector<32x295xf32> to vector<32x295xbf16>
    %17 = vector.extract_strided_slice %16 {offsets = [0, 0], sizes = [32, 211], strides = [1, 1]} : vector<32x295xbf16> to vector<32x211xbf16>
    %18 = vector.extract_strided_slice %16 {offsets = [0, 1], sizes = [32, 211], strides = [1, 1]} : vector<32x295xbf16> to vector<32x211xbf16>
    %19 = vector.extract_strided_slice %16 {offsets = [0, 2], sizes = [32, 211], strides = [1, 1]} : vector<32x295xbf16> to vector<32x211xbf16>
    %20 = vector.extract_strided_slice %16 {offsets = [0, 3], sizes = [32, 211], strides = [1, 1]} : vector<32x295xbf16> to vector<32x211xbf16>
    %21 = vector.extract_strided_slice %16 {offsets = [0, 4], sizes = [32, 211], strides = [1, 1]} : vector<32x295xbf16> to vector<32x211xbf16>
    %22 = vector.extract_strided_slice %16 {offsets = [0, 20], sizes = [32, 211], strides = [1, 1]} : vector<32x295xbf16> to vector<32x211xbf16>
    %23 = vector.extract_strided_slice %16 {offsets = [0, 21], sizes = [32, 211], strides = [1, 1]} : vector<32x295xbf16> to vector<32x211xbf16>
    %24 = vector.extract_strided_slice %16 {offsets = [0, 22], sizes = [32, 211], strides = [1, 1]} : vector<32x295xbf16> to vector<32x211xbf16>
    %25 = vector.extract_strided_slice %16 {offsets = [0, 23], sizes = [32, 211], strides = [1, 1]} : vector<32x295xbf16> to vector<32x211xbf16>
    %26 = vector.extract_strided_slice %16 {offsets = [0, 24], sizes = [32, 211], strides = [1, 1]} : vector<32x295xbf16> to vector<32x211xbf16>
    %27 = vector.extract_strided_slice %16 {offsets = [0, 40], sizes = [32, 211], strides = [1, 1]} : vector<32x295xbf16> to vector<32x211xbf16>
    %28 = vector.extract_strided_slice %16 {offsets = [0, 41], sizes = [32, 211], strides = [1, 1]} : vector<32x295xbf16> to vector<32x211xbf16>
    %29 = vector.extract_strided_slice %16 {offsets = [0, 42], sizes = [32, 211], strides = [1, 1]} : vector<32x295xbf16> to vector<32x211xbf16>
    %30 = vector.extract_strided_slice %16 {offsets = [0, 43], sizes = [32, 211], strides = [1, 1]} : vector<32x295xbf16> to vector<32x211xbf16>
    %31 = vector.extract_strided_slice %16 {offsets = [0, 44], sizes = [32, 211], strides = [1, 1]} : vector<32x295xbf16> to vector<32x211xbf16>
    %32 = vector.extract_strided_slice %16 {offsets = [0, 60], sizes = [32, 211], strides = [1, 1]} : vector<32x295xbf16> to vector<32x211xbf16>
    %33 = vector.extract_strided_slice %16 {offsets = [0, 61], sizes = [32, 211], strides = [1, 1]} : vector<32x295xbf16> to vector<32x211xbf16>
    %34 = vector.extract_strided_slice %16 {offsets = [0, 62], sizes = [32, 211], strides = [1, 1]} : vector<32x295xbf16> to vector<32x211xbf16>
    %35 = vector.extract_strided_slice %16 {offsets = [0, 63], sizes = [32, 211], strides = [1, 1]} : vector<32x295xbf16> to vector<32x211xbf16>
    %36 = vector.extract_strided_slice %16 {offsets = [0, 64], sizes = [32, 211], strides = [1, 1]} : vector<32x295xbf16> to vector<32x211xbf16>
    %37 = vector.extract_strided_slice %16 {offsets = [0, 80], sizes = [32, 211], strides = [1, 1]} : vector<32x295xbf16> to vector<32x211xbf16>
    %38 = vector.extract_strided_slice %16 {offsets = [0, 81], sizes = [32, 211], strides = [1, 1]} : vector<32x295xbf16> to vector<32x211xbf16>
    %39 = vector.extract_strided_slice %16 {offsets = [0, 82], sizes = [32, 211], strides = [1, 1]} : vector<32x295xbf16> to vector<32x211xbf16>
    %40 = vector.extract_strided_slice %16 {offsets = [0, 83], sizes = [32, 211], strides = [1, 1]} : vector<32x295xbf16> to vector<32x211xbf16>
    %41 = vector.extract_strided_slice %16 {offsets = [0, 84], sizes = [32, 211], strides = [1, 1]} : vector<32x295xbf16> to vector<32x211xbf16>
    %42 = tpu.concatenate %17, %18, %19, %20, %21, %22, %23, %24, %25, %26, %27, %28, %29, %30, %31, %32 in 0 : vector<32x211xbf16>, vector<32x211xbf16>, vector<32x211xbf16>, vector<32x211xbf16>, vector<32x211xbf16>, vector<32x211xbf16>, vector<32x211xbf16>, vector<32x211xbf16>, vector<32x211xbf16>, vector<32x211xbf16>, vector<32x211xbf16>, vector<32x211xbf16>, vector<32x211xbf16>, vector<32x211xbf16>, vector<32x211xbf16>, vector<32x211xbf16> -> vector<512x211xbf16>
    %43 = tpu.concatenate %33, %34, %35, %36, %37, %38, %39, %40, %41 in 0 : vector<32x211xbf16>, vector<32x211xbf16>, vector<32x211xbf16>, vector<32x211xbf16>, vector<32x211xbf16>, vector<32x211xbf16>, vector<32x211xbf16>, vector<32x211xbf16>, vector<32x211xbf16> -> vector<288x211xbf16>
    %44 = tpu.concatenate %42, %43 in 0 : vector<512x211xbf16>, vector<288x211xbf16> -> vector<800x211xbf16>
    %c0_7 = arith.constant 0 : index
    %c0_8 = arith.constant 0 : index
    %45 = vector.load %arg3[%c0_7, %c0_8] : memref<64x800xbf16, #tpu.memory_space<vmem>>, vector<64x800xbf16>
    %cst_9 = arith.constant dense<0.000000e+00> : vector<64x211xf32>
    %46 = tpu.matmul %45, %44, %cst_9 {dimension_numbers = #tpu.dot_dimension_numbers<[1], [0], [0], [1], [0, 0, 1, 1], [], []>} : vector<64x800xbf16>, vector<800x211xbf16>, vector<64x211xf32> -> vector<64x211xf32>
    %c0_10 = arith.constant 0 : index
    %c0_11 = arith.constant 0 : index
    %47 = vector.load %arg8[%c0_10, %c0_11] : memref<64x1xf32, #tpu.memory_space<vmem>>, vector<64x1xf32>
    %48 = vector.broadcast %47 : vector<64x1xf32> to vector<64x211xf32>
    %49 = arith.addf %46, %48 : vector<64x211xf32>
    %cst_12 = arith.constant 0.000000e+00 : f32
    %50 = vector.broadcast %cst_12 : f32 to vector<64x211xf32>
    %51 = arith.maximumf %49, %50 : vector<64x211xf32>
    %52 = vector.extract_strided_slice %51 {offsets = [0, 0], sizes = [64, 190], strides = [1, 1]} : vector<64x211xf32> to vector<64x190xf32>
    %53 = vector.extract_strided_slice %51 {offsets = [0, 1], sizes = [64, 190], strides = [1, 1]} : vector<64x211xf32> to vector<64x190xf32>
    %54 = arith.maximumf %52, %53 : vector<64x190xf32>
    %55 = vector.extract_strided_slice %51 {offsets = [0, 20], sizes = [64, 190], strides = [1, 1]} : vector<64x211xf32> to vector<64x190xf32>
    %56 = vector.extract_strided_slice %51 {offsets = [0, 21], sizes = [64, 190], strides = [1, 1]} : vector<64x211xf32> to vector<64x190xf32>
    %57 = arith.maximumf %55, %56 : vector<64x190xf32>
    %58 = arith.maximumf %54, %57 : vector<64x190xf32>
    %59 = arith.truncf %58 : vector<64x190xf32> to vector<64x190xbf16>
    %60 = vector.extract_strided_slice %59 {offsets = [0, 0], sizes = [64, 106], strides = [1, 1]} : vector<64x190xbf16> to vector<64x106xbf16>
    %61 = vector.extract_strided_slice %59 {offsets = [0, 1], sizes = [64, 106], strides = [1, 1]} : vector<64x190xbf16> to vector<64x106xbf16>
    %62 = vector.extract_strided_slice %59 {offsets = [0, 2], sizes = [64, 106], strides = [1, 1]} : vector<64x190xbf16> to vector<64x106xbf16>
    %63 = vector.extract_strided_slice %59 {offsets = [0, 3], sizes = [64, 106], strides = [1, 1]} : vector<64x190xbf16> to vector<64x106xbf16>
    %64 = vector.extract_strided_slice %59 {offsets = [0, 4], sizes = [64, 106], strides = [1, 1]} : vector<64x190xbf16> to vector<64x106xbf16>
    %65 = vector.extract_strided_slice %59 {offsets = [0, 20], sizes = [64, 106], strides = [1, 1]} : vector<64x190xbf16> to vector<64x106xbf16>
    %66 = vector.extract_strided_slice %59 {offsets = [0, 21], sizes = [64, 106], strides = [1, 1]} : vector<64x190xbf16> to vector<64x106xbf16>
    %67 = vector.extract_strided_slice %59 {offsets = [0, 22], sizes = [64, 106], strides = [1, 1]} : vector<64x190xbf16> to vector<64x106xbf16>
    %68 = vector.extract_strided_slice %59 {offsets = [0, 23], sizes = [64, 106], strides = [1, 1]} : vector<64x190xbf16> to vector<64x106xbf16>
    %69 = vector.extract_strided_slice %59 {offsets = [0, 24], sizes = [64, 106], strides = [1, 1]} : vector<64x190xbf16> to vector<64x106xbf16>
    %70 = vector.extract_strided_slice %59 {offsets = [0, 40], sizes = [64, 106], strides = [1, 1]} : vector<64x190xbf16> to vector<64x106xbf16>
    %71 = vector.extract_strided_slice %59 {offsets = [0, 41], sizes = [64, 106], strides = [1, 1]} : vector<64x190xbf16> to vector<64x106xbf16>
    %72 = vector.extract_strided_slice %59 {offsets = [0, 42], sizes = [64, 106], strides = [1, 1]} : vector<64x190xbf16> to vector<64x106xbf16>
    %73 = vector.extract_strided_slice %59 {offsets = [0, 43], sizes = [64, 106], strides = [1, 1]} : vector<64x190xbf16> to vector<64x106xbf16>
    %74 = vector.extract_strided_slice %59 {offsets = [0, 44], sizes = [64, 106], strides = [1, 1]} : vector<64x190xbf16> to vector<64x106xbf16>
    %75 = vector.extract_strided_slice %59 {offsets = [0, 60], sizes = [64, 106], strides = [1, 1]} : vector<64x190xbf16> to vector<64x106xbf16>
    %76 = vector.extract_strided_slice %59 {offsets = [0, 61], sizes = [64, 106], strides = [1, 1]} : vector<64x190xbf16> to vector<64x106xbf16>
    %77 = vector.extract_strided_slice %59 {offsets = [0, 62], sizes = [64, 106], strides = [1, 1]} : vector<64x190xbf16> to vector<64x106xbf16>
    %78 = vector.extract_strided_slice %59 {offsets = [0, 63], sizes = [64, 106], strides = [1, 1]} : vector<64x190xbf16> to vector<64x106xbf16>
    %79 = vector.extract_strided_slice %59 {offsets = [0, 64], sizes = [64, 106], strides = [1, 1]} : vector<64x190xbf16> to vector<64x106xbf16>
    %80 = vector.extract_strided_slice %59 {offsets = [0, 80], sizes = [64, 106], strides = [1, 1]} : vector<64x190xbf16> to vector<64x106xbf16>
    %81 = vector.extract_strided_slice %59 {offsets = [0, 81], sizes = [64, 106], strides = [1, 1]} : vector<64x190xbf16> to vector<64x106xbf16>
    %82 = vector.extract_strided_slice %59 {offsets = [0, 82], sizes = [64, 106], strides = [1, 1]} : vector<64x190xbf16> to vector<64x106xbf16>
    %83 = vector.extract_strided_slice %59 {offsets = [0, 83], sizes = [64, 106], strides = [1, 1]} : vector<64x190xbf16> to vector<64x106xbf16>
    %84 = vector.extract_strided_slice %59 {offsets = [0, 84], sizes = [64, 106], strides = [1, 1]} : vector<64x190xbf16> to vector<64x106xbf16>
    %85 = tpu.concatenate %60, %61, %62, %63, %64, %65, %66, %67, %68, %69, %70, %71, %72, %73, %74, %75 in 0 : vector<64x106xbf16>, vector<64x106xbf16>, vector<64x106xbf16>, vector<64x106xbf16>, vector<64x106xbf16>, vector<64x106xbf16>, vector<64x106xbf16>, vector<64x106xbf16>, vector<64x106xbf16>, vector<64x106xbf16>, vector<64x106xbf16>, vector<64x106xbf16>, vector<64x106xbf16>, vector<64x106xbf16>, vector<64x106xbf16>, vector<64x106xbf16> -> vector<1024x106xbf16>
    %86 = tpu.concatenate %76, %77, %78, %79, %80, %81, %82, %83, %84 in 0 : vector<64x106xbf16>, vector<64x106xbf16>, vector<64x106xbf16>, vector<64x106xbf16>, vector<64x106xbf16>, vector<64x106xbf16>, vector<64x106xbf16>, vector<64x106xbf16>, vector<64x106xbf16> -> vector<576x106xbf16>
    %87 = tpu.concatenate %85, %86 in 0 : vector<1024x106xbf16>, vector<576x106xbf16> -> vector<1600x106xbf16>
    %c0_13 = arith.constant 0 : index
    %c0_14 = arith.constant 0 : index
    %88 = vector.load %arg4[%c0_13, %c0_14] : memref<128x1600xbf16, #tpu.memory_space<vmem>>, vector<128x1600xbf16>
    %cst_15 = arith.constant dense<0.000000e+00> : vector<128x106xf32>
    %89 = tpu.matmul %88, %87, %cst_15 {dimension_numbers = #tpu.dot_dimension_numbers<[1], [0], [0], [1], [0, 0, 1, 1], [], []>} : vector<128x1600xbf16>, vector<1600x106xbf16>, vector<128x106xf32> -> vector<128x106xf32>
    %c0_16 = arith.constant 0 : index
    %c0_17 = arith.constant 0 : index
    %90 = vector.load %arg9[%c0_16, %c0_17] : memref<128x1xf32, #tpu.memory_space<vmem>>, vector<128x1xf32>
    %91 = vector.broadcast %90 : vector<128x1xf32> to vector<128x106xf32>
    %92 = arith.addf %89, %91 : vector<128x106xf32>
    %cst_18 = arith.constant 0.000000e+00 : f32
    %93 = vector.broadcast %cst_18 : f32 to vector<128x106xf32>
    %94 = arith.maximumf %92, %93 : vector<128x106xf32>
    %95 = vector.extract_strided_slice %94 {offsets = [0, 0], sizes = [128, 85], strides = [1, 1]} : vector<128x106xf32> to vector<128x85xf32>
    %96 = vector.extract_strided_slice %94 {offsets = [0, 1], sizes = [128, 85], strides = [1, 1]} : vector<128x106xf32> to vector<128x85xf32>
    %97 = arith.maximumf %95, %96 : vector<128x85xf32>
    %98 = vector.extract_strided_slice %94 {offsets = [0, 20], sizes = [128, 85], strides = [1, 1]} : vector<128x106xf32> to vector<128x85xf32>
    %99 = vector.extract_strided_slice %94 {offsets = [0, 21], sizes = [128, 85], strides = [1, 1]} : vector<128x106xf32> to vector<128x85xf32>
    %100 = arith.maximumf %98, %99 : vector<128x85xf32>
    %101 = arith.maximumf %97, %100 : vector<128x85xf32>
    %102 = arith.truncf %101 : vector<128x85xf32> to vector<128x85xbf16>
    %cst_19 = arith.constant 0.000000e+00 : f32
    %103 = vector.broadcast %cst_19 : f32 to vector<128x1xf32>
    %c0_20 = arith.constant 0 : index
    %c0_21 = arith.constant 0 : index
    %c0_22 = arith.constant 0 : index
    %104 = vector.load %arg5[%c0_20, %c0_21, %c0_22] : memref<25x128x128xbf16, #tpu.memory_space<vmem>>, vector<1x128x128xbf16>
    %105 = vector.shape_cast %104 : vector<1x128x128xbf16> to vector<128x128xbf16>
    %106 = vector.extract_strided_slice %102 {offsets = [0, 0], sizes = [128, 1], strides = [1, 1]} : vector<128x85xbf16> to vector<128x1xbf16>
    %cst_23 = arith.constant dense<0.000000e+00> : vector<128x1xf32>
    %107 = tpu.matmul %105, %106, %cst_23 {dimension_numbers = #tpu.dot_dimension_numbers<[1], [0], [0], [1], [0, 0, 1, 1], [], []>} : vector<128x128xbf16>, vector<128x1xbf16>, vector<128x1xf32> -> vector<128x1xf32>
    %108 = arith.addf %103, %107 : vector<128x1xf32>
    %c1 = arith.constant 1 : index
    %c0_24 = arith.constant 0 : index
    %c0_25 = arith.constant 0 : index
    %109 = vector.load %arg5[%c1, %c0_24, %c0_25] : memref<25x128x128xbf16, #tpu.memory_space<vmem>>, vector<1x128x128xbf16>
    %110 = vector.shape_cast %109 : vector<1x128x128xbf16> to vector<128x128xbf16>
    %111 = vector.extract_strided_slice %102 {offsets = [0, 1], sizes = [128, 1], strides = [1, 1]} : vector<128x85xbf16> to vector<128x1xbf16>
    %cst_26 = arith.constant dense<0.000000e+00> : vector<128x1xf32>
    %112 = tpu.matmul %110, %111, %cst_26 {dimension_numbers = #tpu.dot_dimension_numbers<[1], [0], [0], [1], [0, 0, 1, 1], [], []>} : vector<128x128xbf16>, vector<128x1xbf16>, vector<128x1xf32> -> vector<128x1xf32>
    %113 = arith.addf %108, %112 : vector<128x1xf32>
    %c2 = arith.constant 2 : index
    %c0_27 = arith.constant 0 : index
    %c0_28 = arith.constant 0 : index
    %114 = vector.load %arg5[%c2, %c0_27, %c0_28] : memref<25x128x128xbf16, #tpu.memory_space<vmem>>, vector<1x128x128xbf16>
    %115 = vector.shape_cast %114 : vector<1x128x128xbf16> to vector<128x128xbf16>
    %116 = vector.extract_strided_slice %102 {offsets = [0, 2], sizes = [128, 1], strides = [1, 1]} : vector<128x85xbf16> to vector<128x1xbf16>
    %cst_29 = arith.constant dense<0.000000e+00> : vector<128x1xf32>
    %117 = tpu.matmul %115, %116, %cst_29 {dimension_numbers = #tpu.dot_dimension_numbers<[1], [0], [0], [1], [0, 0, 1, 1], [], []>} : vector<128x128xbf16>, vector<128x1xbf16>, vector<128x1xf32> -> vector<128x1xf32>
    %118 = arith.addf %113, %117 : vector<128x1xf32>
    %c3 = arith.constant 3 : index
    %c0_30 = arith.constant 0 : index
    %c0_31 = arith.constant 0 : index
    %119 = vector.load %arg5[%c3, %c0_30, %c0_31] : memref<25x128x128xbf16, #tpu.memory_space<vmem>>, vector<1x128x128xbf16>
    %120 = vector.shape_cast %119 : vector<1x128x128xbf16> to vector<128x128xbf16>
    %121 = vector.extract_strided_slice %102 {offsets = [0, 3], sizes = [128, 1], strides = [1, 1]} : vector<128x85xbf16> to vector<128x1xbf16>
    %cst_32 = arith.constant dense<0.000000e+00> : vector<128x1xf32>
    %122 = tpu.matmul %120, %121, %cst_32 {dimension_numbers = #tpu.dot_dimension_numbers<[1], [0], [0], [1], [0, 0, 1, 1], [], []>} : vector<128x128xbf16>, vector<128x1xbf16>, vector<128x1xf32> -> vector<128x1xf32>
    %123 = arith.addf %118, %122 : vector<128x1xf32>
    %c4 = arith.constant 4 : index
    %c0_33 = arith.constant 0 : index
    %c0_34 = arith.constant 0 : index
    %124 = vector.load %arg5[%c4, %c0_33, %c0_34] : memref<25x128x128xbf16, #tpu.memory_space<vmem>>, vector<1x128x128xbf16>
    %125 = vector.shape_cast %124 : vector<1x128x128xbf16> to vector<128x128xbf16>
    %126 = vector.extract_strided_slice %102 {offsets = [0, 4], sizes = [128, 1], strides = [1, 1]} : vector<128x85xbf16> to vector<128x1xbf16>
    %cst_35 = arith.constant dense<0.000000e+00> : vector<128x1xf32>
    %127 = tpu.matmul %125, %126, %cst_35 {dimension_numbers = #tpu.dot_dimension_numbers<[1], [0], [0], [1], [0, 0, 1, 1], [], []>} : vector<128x128xbf16>, vector<128x1xbf16>, vector<128x1xf32> -> vector<128x1xf32>
    %128 = arith.addf %123, %127 : vector<128x1xf32>
    %c5 = arith.constant 5 : index
    %c0_36 = arith.constant 0 : index
    %c0_37 = arith.constant 0 : index
    %129 = vector.load %arg5[%c5, %c0_36, %c0_37] : memref<25x128x128xbf16, #tpu.memory_space<vmem>>, vector<1x128x128xbf16>
    %130 = vector.shape_cast %129 : vector<1x128x128xbf16> to vector<128x128xbf16>
    %131 = vector.extract_strided_slice %102 {offsets = [0, 20], sizes = [128, 1], strides = [1, 1]} : vector<128x85xbf16> to vector<128x1xbf16>
    %cst_38 = arith.constant dense<0.000000e+00> : vector<128x1xf32>
    %132 = tpu.matmul %130, %131, %cst_38 {dimension_numbers = #tpu.dot_dimension_numbers<[1], [0], [0], [1], [0, 0, 1, 1], [], []>} : vector<128x128xbf16>, vector<128x1xbf16>, vector<128x1xf32> -> vector<128x1xf32>
    %133 = arith.addf %128, %132 : vector<128x1xf32>
    %c6 = arith.constant 6 : index
    %c0_39 = arith.constant 0 : index
    %c0_40 = arith.constant 0 : index
    %134 = vector.load %arg5[%c6, %c0_39, %c0_40] : memref<25x128x128xbf16, #tpu.memory_space<vmem>>, vector<1x128x128xbf16>
    %135 = vector.shape_cast %134 : vector<1x128x128xbf16> to vector<128x128xbf16>
    %136 = vector.extract_strided_slice %102 {offsets = [0, 21], sizes = [128, 1], strides = [1, 1]} : vector<128x85xbf16> to vector<128x1xbf16>
    %cst_41 = arith.constant dense<0.000000e+00> : vector<128x1xf32>
    %137 = tpu.matmul %135, %136, %cst_41 {dimension_numbers = #tpu.dot_dimension_numbers<[1], [0], [0], [1], [0, 0, 1, 1], [], []>} : vector<128x128xbf16>, vector<128x1xbf16>, vector<128x1xf32> -> vector<128x1xf32>
    %138 = arith.addf %133, %137 : vector<128x1xf32>
    %c7 = arith.constant 7 : index
    %c0_42 = arith.constant 0 : index
    %c0_43 = arith.constant 0 : index
    %139 = vector.load %arg5[%c7, %c0_42, %c0_43] : memref<25x128x128xbf16, #tpu.memory_space<vmem>>, vector<1x128x128xbf16>
    %140 = vector.shape_cast %139 : vector<1x128x128xbf16> to vector<128x128xbf16>
    %141 = vector.extract_strided_slice %102 {offsets = [0, 22], sizes = [128, 1], strides = [1, 1]} : vector<128x85xbf16> to vector<128x1xbf16>
    %cst_44 = arith.constant dense<0.000000e+00> : vector<128x1xf32>
    %142 = tpu.matmul %140, %141, %cst_44 {dimension_numbers = #tpu.dot_dimension_numbers<[1], [0], [0], [1], [0, 0, 1, 1], [], []>} : vector<128x128xbf16>, vector<128x1xbf16>, vector<128x1xf32> -> vector<128x1xf32>
    %143 = arith.addf %138, %142 : vector<128x1xf32>
    %c8 = arith.constant 8 : index
    %c0_45 = arith.constant 0 : index
    %c0_46 = arith.constant 0 : index
    %144 = vector.load %arg5[%c8, %c0_45, %c0_46] : memref<25x128x128xbf16, #tpu.memory_space<vmem>>, vector<1x128x128xbf16>
    %145 = vector.shape_cast %144 : vector<1x128x128xbf16> to vector<128x128xbf16>
    %146 = vector.extract_strided_slice %102 {offsets = [0, 23], sizes = [128, 1], strides = [1, 1]} : vector<128x85xbf16> to vector<128x1xbf16>
    %cst_47 = arith.constant dense<0.000000e+00> : vector<128x1xf32>
    %147 = tpu.matmul %145, %146, %cst_47 {dimension_numbers = #tpu.dot_dimension_numbers<[1], [0], [0], [1], [0, 0, 1, 1], [], []>} : vector<128x128xbf16>, vector<128x1xbf16>, vector<128x1xf32> -> vector<128x1xf32>
    %148 = arith.addf %143, %147 : vector<128x1xf32>
    %c9 = arith.constant 9 : index
    %c0_48 = arith.constant 0 : index
    %c0_49 = arith.constant 0 : index
    %149 = vector.load %arg5[%c9, %c0_48, %c0_49] : memref<25x128x128xbf16, #tpu.memory_space<vmem>>, vector<1x128x128xbf16>
    %150 = vector.shape_cast %149 : vector<1x128x128xbf16> to vector<128x128xbf16>
    %151 = vector.extract_strided_slice %102 {offsets = [0, 24], sizes = [128, 1], strides = [1, 1]} : vector<128x85xbf16> to vector<128x1xbf16>
    %cst_50 = arith.constant dense<0.000000e+00> : vector<128x1xf32>
    %152 = tpu.matmul %150, %151, %cst_50 {dimension_numbers = #tpu.dot_dimension_numbers<[1], [0], [0], [1], [0, 0, 1, 1], [], []>} : vector<128x128xbf16>, vector<128x1xbf16>, vector<128x1xf32> -> vector<128x1xf32>
    %153 = arith.addf %148, %152 : vector<128x1xf32>
    %c10 = arith.constant 10 : index
    %c0_51 = arith.constant 0 : index
    %c0_52 = arith.constant 0 : index
    %154 = vector.load %arg5[%c10, %c0_51, %c0_52] : memref<25x128x128xbf16, #tpu.memory_space<vmem>>, vector<1x128x128xbf16>
    %155 = vector.shape_cast %154 : vector<1x128x128xbf16> to vector<128x128xbf16>
    %156 = vector.extract_strided_slice %102 {offsets = [0, 40], sizes = [128, 1], strides = [1, 1]} : vector<128x85xbf16> to vector<128x1xbf16>
    %cst_53 = arith.constant dense<0.000000e+00> : vector<128x1xf32>
    %157 = tpu.matmul %155, %156, %cst_53 {dimension_numbers = #tpu.dot_dimension_numbers<[1], [0], [0], [1], [0, 0, 1, 1], [], []>} : vector<128x128xbf16>, vector<128x1xbf16>, vector<128x1xf32> -> vector<128x1xf32>
    %158 = arith.addf %153, %157 : vector<128x1xf32>
    %c11 = arith.constant 11 : index
    %c0_54 = arith.constant 0 : index
    %c0_55 = arith.constant 0 : index
    %159 = vector.load %arg5[%c11, %c0_54, %c0_55] : memref<25x128x128xbf16, #tpu.memory_space<vmem>>, vector<1x128x128xbf16>
    %160 = vector.shape_cast %159 : vector<1x128x128xbf16> to vector<128x128xbf16>
    %161 = vector.extract_strided_slice %102 {offsets = [0, 41], sizes = [128, 1], strides = [1, 1]} : vector<128x85xbf16> to vector<128x1xbf16>
    %cst_56 = arith.constant dense<0.000000e+00> : vector<128x1xf32>
    %162 = tpu.matmul %160, %161, %cst_56 {dimension_numbers = #tpu.dot_dimension_numbers<[1], [0], [0], [1], [0, 0, 1, 1], [], []>} : vector<128x128xbf16>, vector<128x1xbf16>, vector<128x1xf32> -> vector<128x1xf32>
    %163 = arith.addf %158, %162 : vector<128x1xf32>
    %c12 = arith.constant 12 : index
    %c0_57 = arith.constant 0 : index
    %c0_58 = arith.constant 0 : index
    %164 = vector.load %arg5[%c12, %c0_57, %c0_58] : memref<25x128x128xbf16, #tpu.memory_space<vmem>>, vector<1x128x128xbf16>
    %165 = vector.shape_cast %164 : vector<1x128x128xbf16> to vector<128x128xbf16>
    %166 = vector.extract_strided_slice %102 {offsets = [0, 42], sizes = [128, 1], strides = [1, 1]} : vector<128x85xbf16> to vector<128x1xbf16>
    %cst_59 = arith.constant dense<0.000000e+00> : vector<128x1xf32>
    %167 = tpu.matmul %165, %166, %cst_59 {dimension_numbers = #tpu.dot_dimension_numbers<[1], [0], [0], [1], [0, 0, 1, 1], [], []>} : vector<128x128xbf16>, vector<128x1xbf16>, vector<128x1xf32> -> vector<128x1xf32>
    %168 = arith.addf %163, %167 : vector<128x1xf32>
    %c13 = arith.constant 13 : index
    %c0_60 = arith.constant 0 : index
    %c0_61 = arith.constant 0 : index
    %169 = vector.load %arg5[%c13, %c0_60, %c0_61] : memref<25x128x128xbf16, #tpu.memory_space<vmem>>, vector<1x128x128xbf16>
    %170 = vector.shape_cast %169 : vector<1x128x128xbf16> to vector<128x128xbf16>
    %171 = vector.extract_strided_slice %102 {offsets = [0, 43], sizes = [128, 1], strides = [1, 1]} : vector<128x85xbf16> to vector<128x1xbf16>
    %cst_62 = arith.constant dense<0.000000e+00> : vector<128x1xf32>
    %172 = tpu.matmul %170, %171, %cst_62 {dimension_numbers = #tpu.dot_dimension_numbers<[1], [0], [0], [1], [0, 0, 1, 1], [], []>} : vector<128x128xbf16>, vector<128x1xbf16>, vector<128x1xf32> -> vector<128x1xf32>
    %173 = arith.addf %168, %172 : vector<128x1xf32>
    %c14 = arith.constant 14 : index
    %c0_63 = arith.constant 0 : index
    %c0_64 = arith.constant 0 : index
    %174 = vector.load %arg5[%c14, %c0_63, %c0_64] : memref<25x128x128xbf16, #tpu.memory_space<vmem>>, vector<1x128x128xbf16>
    %175 = vector.shape_cast %174 : vector<1x128x128xbf16> to vector<128x128xbf16>
    %176 = vector.extract_strided_slice %102 {offsets = [0, 44], sizes = [128, 1], strides = [1, 1]} : vector<128x85xbf16> to vector<128x1xbf16>
    %cst_65 = arith.constant dense<0.000000e+00> : vector<128x1xf32>
    %177 = tpu.matmul %175, %176, %cst_65 {dimension_numbers = #tpu.dot_dimension_numbers<[1], [0], [0], [1], [0, 0, 1, 1], [], []>} : vector<128x128xbf16>, vector<128x1xbf16>, vector<128x1xf32> -> vector<128x1xf32>
    %178 = arith.addf %173, %177 : vector<128x1xf32>
    %c15 = arith.constant 15 : index
    %c0_66 = arith.constant 0 : index
    %c0_67 = arith.constant 0 : index
    %179 = vector.load %arg5[%c15, %c0_66, %c0_67] : memref<25x128x128xbf16, #tpu.memory_space<vmem>>, vector<1x128x128xbf16>
    %180 = vector.shape_cast %179 : vector<1x128x128xbf16> to vector<128x128xbf16>
    %181 = vector.extract_strided_slice %102 {offsets = [0, 60], sizes = [128, 1], strides = [1, 1]} : vector<128x85xbf16> to vector<128x1xbf16>
    %cst_68 = arith.constant dense<0.000000e+00> : vector<128x1xf32>
    %182 = tpu.matmul %180, %181, %cst_68 {dimension_numbers = #tpu.dot_dimension_numbers<[1], [0], [0], [1], [0, 0, 1, 1], [], []>} : vector<128x128xbf16>, vector<128x1xbf16>, vector<128x1xf32> -> vector<128x1xf32>
    %183 = arith.addf %178, %182 : vector<128x1xf32>
    %c16 = arith.constant 16 : index
    %c0_69 = arith.constant 0 : index
    %c0_70 = arith.constant 0 : index
    %184 = vector.load %arg5[%c16, %c0_69, %c0_70] : memref<25x128x128xbf16, #tpu.memory_space<vmem>>, vector<1x128x128xbf16>
    %185 = vector.shape_cast %184 : vector<1x128x128xbf16> to vector<128x128xbf16>
    %186 = vector.extract_strided_slice %102 {offsets = [0, 61], sizes = [128, 1], strides = [1, 1]} : vector<128x85xbf16> to vector<128x1xbf16>
    %cst_71 = arith.constant dense<0.000000e+00> : vector<128x1xf32>
    %187 = tpu.matmul %185, %186, %cst_71 {dimension_numbers = #tpu.dot_dimension_numbers<[1], [0], [0], [1], [0, 0, 1, 1], [], []>} : vector<128x128xbf16>, vector<128x1xbf16>, vector<128x1xf32> -> vector<128x1xf32>
    %188 = arith.addf %183, %187 : vector<128x1xf32>
    %c17 = arith.constant 17 : index
    %c0_72 = arith.constant 0 : index
    %c0_73 = arith.constant 0 : index
    %189 = vector.load %arg5[%c17, %c0_72, %c0_73] : memref<25x128x128xbf16, #tpu.memory_space<vmem>>, vector<1x128x128xbf16>
    %190 = vector.shape_cast %189 : vector<1x128x128xbf16> to vector<128x128xbf16>
    %191 = vector.extract_strided_slice %102 {offsets = [0, 62], sizes = [128, 1], strides = [1, 1]} : vector<128x85xbf16> to vector<128x1xbf16>
    %cst_74 = arith.constant dense<0.000000e+00> : vector<128x1xf32>
    %192 = tpu.matmul %190, %191, %cst_74 {dimension_numbers = #tpu.dot_dimension_numbers<[1], [0], [0], [1], [0, 0, 1, 1], [], []>} : vector<128x128xbf16>, vector<128x1xbf16>, vector<128x1xf32> -> vector<128x1xf32>
    %193 = arith.addf %188, %192 : vector<128x1xf32>
    %c18 = arith.constant 18 : index
    %c0_75 = arith.constant 0 : index
    %c0_76 = arith.constant 0 : index
    %194 = vector.load %arg5[%c18, %c0_75, %c0_76] : memref<25x128x128xbf16, #tpu.memory_space<vmem>>, vector<1x128x128xbf16>
    %195 = vector.shape_cast %194 : vector<1x128x128xbf16> to vector<128x128xbf16>
    %196 = vector.extract_strided_slice %102 {offsets = [0, 63], sizes = [128, 1], strides = [1, 1]} : vector<128x85xbf16> to vector<128x1xbf16>
    %cst_77 = arith.constant dense<0.000000e+00> : vector<128x1xf32>
    %197 = tpu.matmul %195, %196, %cst_77 {dimension_numbers = #tpu.dot_dimension_numbers<[1], [0], [0], [1], [0, 0, 1, 1], [], []>} : vector<128x128xbf16>, vector<128x1xbf16>, vector<128x1xf32> -> vector<128x1xf32>
    %198 = arith.addf %193, %197 : vector<128x1xf32>
    %c19 = arith.constant 19 : index
    %c0_78 = arith.constant 0 : index
    %c0_79 = arith.constant 0 : index
    %199 = vector.load %arg5[%c19, %c0_78, %c0_79] : memref<25x128x128xbf16, #tpu.memory_space<vmem>>, vector<1x128x128xbf16>
    %200 = vector.shape_cast %199 : vector<1x128x128xbf16> to vector<128x128xbf16>
    %201 = vector.extract_strided_slice %102 {offsets = [0, 64], sizes = [128, 1], strides = [1, 1]} : vector<128x85xbf16> to vector<128x1xbf16>
    %cst_80 = arith.constant dense<0.000000e+00> : vector<128x1xf32>
    %202 = tpu.matmul %200, %201, %cst_80 {dimension_numbers = #tpu.dot_dimension_numbers<[1], [0], [0], [1], [0, 0, 1, 1], [], []>} : vector<128x128xbf16>, vector<128x1xbf16>, vector<128x1xf32> -> vector<128x1xf32>
    %203 = arith.addf %198, %202 : vector<128x1xf32>
    %c20 = arith.constant 20 : index
    %c0_81 = arith.constant 0 : index
    %c0_82 = arith.constant 0 : index
    %204 = vector.load %arg5[%c20, %c0_81, %c0_82] : memref<25x128x128xbf16, #tpu.memory_space<vmem>>, vector<1x128x128xbf16>
    %205 = vector.shape_cast %204 : vector<1x128x128xbf16> to vector<128x128xbf16>
    %206 = vector.extract_strided_slice %102 {offsets = [0, 80], sizes = [128, 1], strides = [1, 1]} : vector<128x85xbf16> to vector<128x1xbf16>
    %cst_83 = arith.constant dense<0.000000e+00> : vector<128x1xf32>
    %207 = tpu.matmul %205, %206, %cst_83 {dimension_numbers = #tpu.dot_dimension_numbers<[1], [0], [0], [1], [0, 0, 1, 1], [], []>} : vector<128x128xbf16>, vector<128x1xbf16>, vector<128x1xf32> -> vector<128x1xf32>
    %208 = arith.addf %203, %207 : vector<128x1xf32>
    %c21 = arith.constant 21 : index
    %c0_84 = arith.constant 0 : index
    %c0_85 = arith.constant 0 : index
    %209 = vector.load %arg5[%c21, %c0_84, %c0_85] : memref<25x128x128xbf16, #tpu.memory_space<vmem>>, vector<1x128x128xbf16>
    %210 = vector.shape_cast %209 : vector<1x128x128xbf16> to vector<128x128xbf16>
    %211 = vector.extract_strided_slice %102 {offsets = [0, 81], sizes = [128, 1], strides = [1, 1]} : vector<128x85xbf16> to vector<128x1xbf16>
    %cst_86 = arith.constant dense<0.000000e+00> : vector<128x1xf32>
    %212 = tpu.matmul %210, %211, %cst_86 {dimension_numbers = #tpu.dot_dimension_numbers<[1], [0], [0], [1], [0, 0, 1, 1], [], []>} : vector<128x128xbf16>, vector<128x1xbf16>, vector<128x1xf32> -> vector<128x1xf32>
    %213 = arith.addf %208, %212 : vector<128x1xf32>
    %c22 = arith.constant 22 : index
    %c0_87 = arith.constant 0 : index
    %c0_88 = arith.constant 0 : index
    %214 = vector.load %arg5[%c22, %c0_87, %c0_88] : memref<25x128x128xbf16, #tpu.memory_space<vmem>>, vector<1x128x128xbf16>
    %215 = vector.shape_cast %214 : vector<1x128x128xbf16> to vector<128x128xbf16>
    %216 = vector.extract_strided_slice %102 {offsets = [0, 82], sizes = [128, 1], strides = [1, 1]} : vector<128x85xbf16> to vector<128x1xbf16>
    %cst_89 = arith.constant dense<0.000000e+00> : vector<128x1xf32>
    %217 = tpu.matmul %215, %216, %cst_89 {dimension_numbers = #tpu.dot_dimension_numbers<[1], [0], [0], [1], [0, 0, 1, 1], [], []>} : vector<128x128xbf16>, vector<128x1xbf16>, vector<128x1xf32> -> vector<128x1xf32>
    %218 = arith.addf %213, %217 : vector<128x1xf32>
    %c23 = arith.constant 23 : index
    %c0_90 = arith.constant 0 : index
    %c0_91 = arith.constant 0 : index
    %219 = vector.load %arg5[%c23, %c0_90, %c0_91] : memref<25x128x128xbf16, #tpu.memory_space<vmem>>, vector<1x128x128xbf16>
    %220 = vector.shape_cast %219 : vector<1x128x128xbf16> to vector<128x128xbf16>
    %221 = vector.extract_strided_slice %102 {offsets = [0, 83], sizes = [128, 1], strides = [1, 1]} : vector<128x85xbf16> to vector<128x1xbf16>
    %cst_92 = arith.constant dense<0.000000e+00> : vector<128x1xf32>
    %222 = tpu.matmul %220, %221, %cst_92 {dimension_numbers = #tpu.dot_dimension_numbers<[1], [0], [0], [1], [0, 0, 1, 1], [], []>} : vector<128x128xbf16>, vector<128x1xbf16>, vector<128x1xf32> -> vector<128x1xf32>
    %223 = arith.addf %218, %222 : vector<128x1xf32>
    %c24 = arith.constant 24 : index
    %c0_93 = arith.constant 0 : index
    %c0_94 = arith.constant 0 : index
    %224 = vector.load %arg5[%c24, %c0_93, %c0_94] : memref<25x128x128xbf16, #tpu.memory_space<vmem>>, vector<1x128x128xbf16>
    %225 = vector.shape_cast %224 : vector<1x128x128xbf16> to vector<128x128xbf16>
    %226 = vector.extract_strided_slice %102 {offsets = [0, 84], sizes = [128, 1], strides = [1, 1]} : vector<128x85xbf16> to vector<128x1xbf16>
    %cst_95 = arith.constant dense<0.000000e+00> : vector<128x1xf32>
    %227 = tpu.matmul %225, %226, %cst_95 {dimension_numbers = #tpu.dot_dimension_numbers<[1], [0], [0], [1], [0, 0, 1, 1], [], []>} : vector<128x128xbf16>, vector<128x1xbf16>, vector<128x1xf32> -> vector<128x1xf32>
    %228 = arith.addf %223, %227 : vector<128x1xf32>
    %c0_96 = arith.constant 0 : index
    %c0_97 = arith.constant 0 : index
    %229 = vector.load %arg10[%c0_96, %c0_97] : memref<128x1xf32, #tpu.memory_space<vmem>>, vector<128x1xf32>
    %230 = arith.addf %228, %229 : vector<128x1xf32>
    %cst_98 = arith.constant 0.000000e+00 : f32
    %231 = vector.broadcast %cst_98 : f32 to vector<128x1xf32>
    %232 = arith.maximumf %230, %231 : vector<128x1xf32>
    %c0_99 = arith.constant 0 : index
    %c0_100 = arith.constant 0 : index
    %233 = vector.load %arg6[%c0_99, %c0_100] : memref<30x128xbf16, #tpu.memory_space<vmem>>, vector<30x128xbf16>
    %234 = arith.truncf %232 : vector<128x1xf32> to vector<128x1xbf16>
    %cst_101 = arith.constant dense<0.000000e+00> : vector<30x1xf32>
    %235 = tpu.matmul %233, %234, %cst_101 {dimension_numbers = #tpu.dot_dimension_numbers<[1], [0], [0], [1], [0, 0, 1, 1], [], []>} : vector<30x128xbf16>, vector<128x1xbf16>, vector<30x1xf32> -> vector<30x1xf32>
    %c0_102 = arith.constant 0 : index
    %c0_103 = arith.constant 0 : index
    %236 = vector.load %arg11[%c0_102, %c0_103] : memref<30x1xf32, #tpu.memory_space<vmem>>, vector<30x1xf32>
    %237 = arith.addf %235, %236 : vector<30x1xf32>
    %c0_104 = arith.constant 0 : index
    %c0_105 = arith.constant 0 : index
    %c0_106 = arith.constant 0 : index
    %238 = vector.load %arg12[%c0_104, %c0_105, %c0_106] : memref<1x30x1xf32, #tpu.memory_space<vmem>>, vector<1x30x1xf32>
    %239 = vector.shape_cast %238 : vector<1x30x1xf32> to vector<30x1xf32>
    %240 = vector.shape_cast %237 : vector<30x1xf32> to vector<1x30x1xf32>
    tpu.vector_store %arg12[%c0_104, %c0_105, %c0_106], %240 {strides = array<i32>} : memref<1x30x1xf32, #tpu.memory_space<vmem>>, vector<1x30x1xf32>,
    return
  }
  func.func @transform_0(%arg0: i32) -> (i32, i32, i32) {
    %c0_i32 = arith.constant 0 : i32
    %c0_i32_0 = arith.constant 0 : i32
    %c0_i32_1 = arith.constant 0 : i32
    return %arg0, %c0_i32, %c0_i32_0 : i32, i32, i32
  }
  func.func @transform_1(%arg0: i32) -> (i32, i32) {
    %c0_i32 = arith.constant 0 : i32
    %c0_i32_0 = arith.constant 0 : i32
    %c0_i32_1 = arith.constant 0 : i32
    return %c0_i32, %c0_i32_0 : i32, i32
  }
  func.func @transform_2(%arg0: i32) -> (i32, i32) {
    %c0_i32 = arith.constant 0 : i32
    %c0_i32_0 = arith.constant 0 : i32
    %c0_i32_1 = arith.constant 0 : i32
    return %c0_i32, %c0_i32_0 : i32, i32
  }
  func.func @transform_3(%arg0: i32) -> (i32, i32) {
    %c0_i32 = arith.constant 0 : i32
    %c0_i32_0 = arith.constant 0 : i32
    %c0_i32_1 = arith.constant 0 : i32
    return %c0_i32, %c0_i32_0 : i32, i32
  }
  func.func @transform_4(%arg0: i32) -> (i32, i32, i32) {
    %c0_i32 = arith.constant 0 : i32
    %c0_i32_0 = arith.constant 0 : i32
    %c0_i32_1 = arith.constant 0 : i32
    %c0_i32_2 = arith.constant 0 : i32
    return %c0_i32, %c0_i32_0, %c0_i32_1 : i32, i32, i32
  }
  func.func @transform_5(%arg0: i32) -> (i32, i32) {
    %c0_i32 = arith.constant 0 : i32
    %c0_i32_0 = arith.constant 0 : i32
    %c0_i32_1 = arith.constant 0 : i32
    return %c0_i32, %c0_i32_0 : i32, i32
  }
  func.func @transform_6(%arg0: i32) -> (i32, i32) {
    %c0_i32 = arith.constant 0 : i32
    %c0_i32_0 = arith.constant 0 : i32
    %c0_i32_1 = arith.constant 0 : i32
    return %c0_i32, %c0_i32_0 : i32, i32
  }
  func.func @transform_7(%arg0: i32) -> (i32, i32) {
    %c0_i32 = arith.constant 0 : i32
    %c0_i32_0 = arith.constant 0 : i32
    %c0_i32_1 = arith.constant 0 : i32
    return %c0_i32, %c0_i32_0 : i32, i32
  }
  func.func @transform_8(%arg0: i32) -> (i32, i32) {
    %c0_i32 = arith.constant 0 : i32
    %c0_i32_0 = arith.constant 0 : i32
    %c0_i32_1 = arith.constant 0 : i32
    return %c0_i32, %c0_i32_0 : i32, i32
  }
  func.func @transform_9(%arg0: i32) -> (i32, i32) {
    %c0_i32 = arith.constant 0 : i32
    %c0_i32_0 = arith.constant 0 : i32
    %c0_i32_1 = arith.constant 0 : i32
    return %c0_i32, %c0_i32_0 : i32, i32
  }
  func.func @transform_10(%arg0: i32) -> (i32, i32) {
    %c0_i32 = arith.constant 0 : i32
    %c0_i32_0 = arith.constant 0 : i32
    %c0_i32_1 = arith.constant 0 : i32
    return %c0_i32, %c0_i32_0 : i32, i32
  }
  func.func @transform_11(%arg0: i32) -> (i32, i32, i32) {
    %c0_i32 = arith.constant 0 : i32
    %c0_i32_0 = arith.constant 0 : i32
    %c0_i32_1 = arith.constant 0 : i32
    return %arg0, %c0_i32, %c0_i32_0 : i32, i32, i32
  }
}

</mosaic_0001>

<bundles_post_ra>
// kernel: convnet_forward.1
= control target key start
LH: loop header
LB: loop body
LE: loop exit
PB: predicated region body
PF: predicated region fallthrough
CT: control target
= control target key end

     0   :  { %s13064_s17 = smov 0   ;;  %s17119_s0 = inlined_call_operand.vmem [shape: bf16[2,75,400], index: 0, kind: input, shape index: {}]   ;;  %s17120_s1 = inlined_call_operand.vmem [shape: bf16[32,75], index: 1, kind: input, shape index: {}]   ;;  %s17121_s2 = inlined_call_operand.vmem [shape: bf16[64,800], index: 2, kind: input, shape index: {}]   ;;  %s17122_s3 = inlined_call_operand.vmem [shape: bf16[128,1600], index: 3, kind: input, shape index: {}]   ;;  %s17123_s4 = inlined_call_operand.vmem [shape: bf16[25,128,128], index: 4, kind: input, shape index: {}]   ;;  %s17124_s5 = inlined_call_operand.vmem [shape: bf16[30,128], index: 5, kind: input, shape index: {}]   ;;  %s17125_s6 = inlined_call_operand.vmem [shape: f32[32,1], index: 6, kind: input, shape index: {}]   ;;  %s17126_s7 = inlined_call_operand.vmem [shape: f32[64,1], index: 7, kind: input, shape index: {}]   ;;  %s17127_s8 = inlined_call_operand.vmem [shape: f32[128,1], index: 8, kind: input, shape index: {}]   ;;  %s17128_s9 = inlined_call_operand.vmem [shape: f32[128,1], index: 9, kind: input, shape index: {}]   ;;  %s17129_s10 = inlined_call_operand.vmem [shape: f32[30,1], index: 10, kind: input, shape index: {}]   ;;  %s17130_s11 = inlined_call_operand.vmem [shape: f32[2,30,1], index: 11, kind: output, shape index: {}]  }
   0x1 LB: > { %s9420_s18 = sadd.s32 4294967295, %s12975_s17   ;;  %p9424_p0 = scmp.ge.s32.totalorder %s12975_s17, 1  ;;  %s12975_s17 = sphi %s13064_s17, %s21_s17  }
   0x2   : > { %p337_p1 = scmp.lt.s32.totalorder %s12975_s17, 3 }
   0x4   : > { %p338_p2 = pnand %p9424_p0, %p337_p1 }
   0x6   : > { %341 = sbr.rel (%p338_p2) target bundleno = 3791 (0xecf), region = 64 }
   0xd   : > { %p377_p3 = scmp.lt.s32.totalorder %s9420_s18, 1  ;;  %v12977_v0 = vmov 0   ;;  %v412_v1 = vld [vmem:[%s17125_s6] sm:$0xff]  ;;  %v413_v2 = vld [vmem:[%s17125_s6 + $0x8] sm:$0xff]  ;;  %v414_v3 = vld [vmem:[%s17125_s6 + $0x10] sm:$0xff]  ;;  %vm549_vm0 = vcmask 1044480  }
   0xe   : > { %597 = vmatprep.mubr.bf16.mxu0 %v12977_v0  ;;  %650 = vmatprep.mubr.bf16.mxu1 %v12977_v0  ;;  %v415_v4 = vld [vmem:[%s17125_s6 + $0x18] sm:$0xff]  ;;  %vm550_vm1 = vcmask 1045504   ;;  %v12978_v14 = vmov 65535   ;;  %v12573_v32 = vld [vmem:[%s17120_s1] sm:$0xff]   ;;  %vm542_vm2 = vcmask 613376   ;;  %v12574_v33 = vld [vmem:[%s17120_s1 + $0x8] sm:$0xff]  }
   0xf   : > { %s17280_s18 = smov (!%p377_p3, %s9420_s18), 1  ;;  %12321 = vset.pattern.permute.xlu0 %v12977_v0  ;;  %12322 = vset.pattern.permute.xlu1 %v12977_v0  ;;  %v551_v15 = vsel %vm549_vm0, 4294967295, %v12978_v14  ;;  %s12979_s16 = smov 127   ;;  %vm715_vm3 = vcmask 1039360   ;;  %vm784_vm4 = vcmask 883712   ;;  %vm850_vm5 = vcmask 1031168  }
  0x10   : > { %s12285_s23 = smul.u32 160, %s17280_s18  ;;  %418 = vperm.xlu0 %12321, %v412_v1   ;;  %428 = vperm.xlu1 %12322, %v414_v3   ;;  %v552_v23 = vsel %vm550_vm1, %v551_v15, 0  ;;  %s12980_s19 = smov 108   ;;  %vm865_vm6 = vcmask 1022976   ;;  %vm1090_vm7 = vcmask 891904   ;;  %vm880_vm8 = vcmask 1014784  }
  0x11   : > { %s17135_s20 = smov 109   ;;  %s17148_s21 = smov 126   ;;  %vm910_vm9 = vcmask 875520   ;;  %vm925_vm10 = vcmask 867328   ;;  %vm940_vm11 = vcmask 859136   ;;  %vm955_vm12 = vcmask 850944  }
  0x12   : > { %s13094_s30 = scalar_lea.vmem %s17119_s0, %s12285_s23  ;;  %s17131_s22 = smov 125   ;;  %vm970_vm13 = vcmask 719872   ;;  %vm985_vm14 = vcmask 711680   ;;  %vm1000_vm15 = vcmask 703488   ;;  %vm1015_vm0 = vcmask 695296  }
  0x13   : > { %v12543_v5 = vld [vmem:[%s13094_s30 + $0x4] ss:$16 sps:$4 sm:$0xff]   ;;  %v12545_v6 = vld [vmem:[%s13094_s30 + $0xc] ss:$16 sps:$4 sm:$0xff]   ;;  %v12547_v7 = vld [vmem:[%s13094_s30] ss:$16 sps:$4 sm:$0xff]  }
  0x14   : > { %423 = vperm.xlu0 %12321, %v413_v2   ;;  %565 = vmatprep.subr.bf16.mxu0 %v12543_v5  ;;  %v12548_v8 = vld [vmem:[%s13094_s30 + $0x8] ss:$16 sps:$4 sm:$0xff]   ;;  %v12549_v9 = vld [vmem:[%s13094_s30 + $0x24] ss:$16 sps:$4 sm:$0xff]   ;;  %v12551_v10 = vld [vmem:[%s13094_s30 + $0x2c] ss:$16 sps:$4 sm:$0xff]  }
  0x15   : > { %433 = vperm.xlu1 %12322, %v415_v4   ;;  %618 = vmatprep.subr.bf16.mxu1 %v12545_v6  ;;  %v12553_v11 = vld [vmem:[%s13094_s30 + $0x20] ss:$16 sps:$4 sm:$0xff]   ;;  %v12554_v12 = vld [vmem:[%s13094_s30 + $0x28] ss:$16 sps:$4 sm:$0xff]   ;;  %v12555_v13 = vld [vmem:[%s13094_s30 + $0x44] ss:$16 sps:$4 sm:$0xff]  }
  0x16   : > { %566 = vmatpush1.bf16.msra.mxu0 %v12547_v7  ;;  %619 = vmatpush1.bf16.msra.mxu1 %v12548_v8  ;;  %v12557_v16 = vld [vmem:[%s13094_s30 + $0x4c] ss:$16 sps:$4 sm:$0xff]   ;;  %v12559_v17 = vld [vmem:[%s13094_s30 + $0x40] ss:$16 sps:$4 sm:$0xff]   ;;  %v12560_v18 = vld [vmem:[%s13094_s30 + $0x48] ss:$16 sps:$4 sm:$0xff]  }
  0x17   : > { %567 = vmatprep.subr.bf16.mxu0 %v12549_v9  ;;  %620 = vmatprep.subr.bf16.mxu1 %v12551_v10  ;;  %v12561_v19 = vld [vmem:[%s13094_s30 + $0x64] ss:$16 sps:$4 sm:$0xff]   ;;  %v12563_v20 = vld [vmem:[%s13094_s30 + $0x6c] ss:$16 sps:$4 sm:$0xff]   ;;  %v12565_v21 = vld [vmem:[%s13094_s30 + $0x60] ss:$16 sps:$4 sm:$0xff]  }
  0x18   : > { %v12566_v22 = vld [vmem:[%s13094_s30 + $0x68] ss:$16 sps:$4 sm:$0xff]   ;;  %v12567_v24 = vld [vmem:[%s13094_s30 + $0x84] ss:$16 sps:$4 sm:$0x3f]   ;;  %s17133_s23 = smov 124  }
  0x19   : > { %v12569_v25 = vld [vmem:[%s13094_s30 + $0x8c] ss:$16 sps:$4 sm:$0x3f]   ;;  %v557_v26 = vand.u32 %v12567_v24, %v552_v23  ;;  %v12571_v27 = vld [vmem:[%s13094_s30 + $0x80] ss:$16 sps:$4 sm:$0x3f]  }
  0x1a   : > { %568 = vmatpush1.bf16.msra.mxu0 %v12553_v11  ;;  %621 = vmatpush1.bf16.msra.mxu1 %v12554_v12  ;;  %v12572_v28 = vld [vmem:[%s13094_s30 + $0x88] ss:$16 sps:$4 sm:$0x3f]   ;;  %v563_v29 = vand.u32 %v12569_v25, %v552_v23  ;;  %v554_v30 = vand.u32 %v12571_v27, %v552_v23  ;;  %s17177_s24 = smov 107   ;;  %s17175_s25 = smov 106   ;;  %vm1030_vm1 = vcmask 687104  }
  0x1b   : > { %569 = vmatprep.subr.bf16.mxu0 %v12555_v13  ;;  %622 = vmatprep.subr.bf16.mxu1 %v12557_v16  ;;  %v560_v31 = vand.u32 %v12572_v28, %v552_v23  ;;  %s17163_s26 = smov 105   ;;  %s17154_s27 = smov 104  }
  0x1c   : > { %s17150_s28 = smov 88   ;;  %s17152_s29 = smov 87  }
  0x1d   : > { %s17141_s30 = smov 86   ;;  %s17137_s12 = smov 85  }
  0x1e   : > { %570 = vmatpush1.bf16.msra.mxu0 %v12559_v17  ;;  %623 = vmatpush1.bf16.msra.mxu1 %v12560_v18  ;;  %s17145_s13 = smov 84   ;;  %s17139_s14 = smov 68  }
  0x1f   : > { %571 = vmatprep.subr.bf16.mxu0 %v12561_v19  ;;  %624 = vmatprep.subr.bf16.mxu1 %v12563_v20  ;;  %s17143_s15 = smov 67  }
  0x22   : > { %572 = vmatpush1.bf16.msra.mxu0 %v12565_v21  ;;  %625 = vmatpush1.bf16.msra.mxu1 %v12566_v22 }
  0x23   : > { %573 = vmatprep.subr.bf16.mxu0 %v557_v26  ;;  %626 = vmatprep.subr.bf16.mxu1 %v563_v29 }
  0x26   : > { %574 = vmatpush1.bf16.msra.mxu0 %v554_v30  ;;  %627 = vmatpush1.bf16.msra.mxu1 %v560_v31 }
  0x29   : > { %9450 = vmatmul.mubr.msk.bf16.vlgmr.msra.gmra.mrb[0].mxu0 %vm542_vm2, %v12573_v32  ;;  %9452 = vmatmul.mubr.msk.bf16.vlgmr.msra.gmra.mrb[0].mxu1 %vm542_vm2, %v12573_v32 }
  0x2a   : > { %607 = vmatprep.mubr.bf16.mxu0 %v12977_v0  ;;  %658 = vmatprep.mubr.bf16.mxu1 %v12977_v0 }
  0x31   : > { %9451 = vmatmul.mubr.msk.bf16.gmra.mrb[4].mxu0 %vm542_vm2, %v12574_v33  ;;  %9453 = vmatmul.mubr.msk.bf16.gmra.mrb[4].mxu1 %vm542_vm2, %v12574_v33  ;;  %vm1051_vm2 = vcmask 556032  }
  0x8f   : > { %v419_v34 = vpop.permute.xlu0 %418  ;;  %v429_v36 = vpop.permute.xlu1 %428 }
  0x93   : > { %v424_v35 = vpop.permute.xlu0 %423 }
  0x94   : > { %v434_v59 = vpop.permute.xlu1 %433 }
  0xfc   : > { %v599_v37 = vpop.f32.mrb[0].mxu0  ;;  %v652_v38 = vpop.f32.mrb[0].mxu1 }
  0xfd   : > { %v600_v39 = vadd.f32 %v599_v37, %v419_v34  ;;  %v13124_v40 = vadd.f32 %v652_v38, %v419_v34  ;;  %v601_v41 = vpop.f32.mrb[1].mxu0  ;;  %v654_v42 = vpop.f32.mrb[1].mxu1 }
  0xfe   : > { %v602_v43 = vadd.f32 %v601_v41, %v419_v34  ;;  %v603_v44 = vpop.f32.mrb[2].mxu0  ;;  %v655_v45 = vpop.f32.mrb[2].mxu1 }
  0xff   : > { %v667_v46 = vmax.f32 %v600_v39, 0.0  ;;  %v13126_v47 = vadd.f32 %v603_v44, %v424_v35  ;;  %v656_v48 = vadd.f32 %v655_v45, %v424_v35  ;;  %v605_v49 = vpop.f32.mrb[3].mxu0  ;;  %v657_v50 = vpop.f32.mrb[3].mxu1  ;;  %v669_v53 = vmax.f32 %v13124_v40, 0.0 }
 0x100   : > { %v668_v51 = vmax.f32 %v602_v43, 0.0  ;;  %v606_v52 = vadd.f32 %v605_v49, %v424_v35 }
 0x101   : > { %v670_v54 = vmax.f32 %v13126_v47, 0.0  ;;  %v672_v56 = vmax.f32 %v656_v48, 0.0 }
 0x102   : > { %v12323_v55 = vpack.i.bf16 %v668_v51, %v667_v46  ;;  %v671_v57 = vmax.f32 %v606_v52, 0.0 }
 0x103   : > { %v12328_v58 = vpack.i.bf16 %v670_v54, %v669_v53 }
 0x104   : > { %v609_v60 = vpop.f32.mrb[4].mxu0  ;;  %12324 = vrot.lane.b32.xlu0 %v12323_v55, %s12979_s16  ;;  %v660_v61 = vpop.f32.mrb[4].mxu1  ;;  %v12333_v3 = vpack.i.bf16 %v672_v56, %v671_v57 }
 0x105   : > { %v13131_v62 = vadd.f32 %v609_v60, %v429_v36  ;;  %v611_v63 = vpop.f32.mrb[5].mxu0  ;;  %12329 = vrot.lane.b32.xlu1 %v12328_v58, %s12979_s16  ;;  %v13134_v1 = vadd.f32 %v660_v61, %v429_v36  ;;  %v662_v2 = vpop.f32.mrb[5].mxu1 }
 0x106   : > { %v612_v4 = vadd.f32 %v611_v63, %v429_v36  ;;  %v613_v5 = vpop.f32.mrb[6].mxu0  ;;  %v663_v6 = vpop.f32.mrb[6].mxu1 }
 0x107   : > { %v673_v7 = vmax.f32 %v13131_v62, 0.0  ;;  %v13137_v8 = vadd.f32 %v613_v5, %v434_v59  ;;  %v675_v9 = vmax.f32 %v13134_v1, 0.0  ;;  %v615_v10 = vpop.f32.mrb[7].mxu0  ;;  %v664_v11 = vadd.f32 %v663_v6, %v434_v59  ;;  %v665_v12 = vpop.f32.mrb[7].mxu1 }
 0x108   : > { %v674_v13 = vmax.f32 %v612_v4, 0.0  ;;  %12334 = vrot.lane.b32.xlu0 %v12333_v3, %s12979_s16  ;;  %v616_v14 = vadd.f32 %v615_v10, %v434_v59 }
 0x109   : > { %v676_v15 = vmax.f32 %v13137_v8, 0.0  ;;  %v678_v16 = vmax.f32 %v664_v11, 0.0 }
 0x10a   : > { %v12338_v17 = vpack.i.bf16 %v674_v13, %v673_v7  ;;  %v677_v18 = vmax.f32 %v616_v14, 0.0 }
 0x10b   : > { %v12343_v19 = vpack.i.bf16 %v676_v15, %v675_v9 }
 0x10c   : > { %v12348_v20 = vpack.i.bf16 %v678_v16, %v677_v18  ;;  %12339 = vrot.lane.b32.xlu1 %v12338_v17, %s12979_s16 }
 0x10d   : > { %12344 = vrot.lane.b32.xlu0 %v12343_v19, %s12979_s16 }
 0x110   : > { %12349 = vrot.lane.b32.xlu1 %v12348_v20, %s12979_s16 }
 0x176   : > { %v12325_v21 = vpop.permute.xlu0 %12324 }
 0x177   : > { %v12327_v22 = vunpack.i.h.bf16 %v12325_v21  ;;  %v12326_v23 = vunpack.i.l.bf16 %v12325_v21  ;;  %v12330_v24 = vpop.permute.xlu1 %12329 }
 0x178   : > { %v12331_v25 = vunpack.i.l.bf16 %v12330_v24  ;;  %v12332_v30 = vunpack.i.h.bf16 %v12330_v24 }
 0x179   : > { %v716_v26 = vsel %vm715_vm3, %v12326_v23, %v12327_v22 }
 0x17a   : > { %v12335_v27 = vpop.permute.xlu0 %12334  ;;  %v717_v28 = vsel %vm715_vm3, %v12327_v22, %v12331_v25  ;;  %v13147_v29 = vmax.f32 %v667_v46, %v716_v26  ;;  %v738_v38 = vmax.f32 %v669_v53, %v12331_v25 }
 0x17b   : > { %v12337_v31 = vunpack.i.h.bf16 %v12335_v27  ;;  %v12336_v32 = vunpack.i.l.bf16 %v12335_v27  ;;  %v13149_v33 = vmax.f32 %v668_v51, %v717_v28 }
 0x17d   : > { %v741_v34 = vmax.f32 %v672_v56, %v12337_v31  ;;  %v12353_v35 = vpack.i.bf16 %v13149_v33, %v13147_v29  ;;  %v718_v36 = vsel %vm715_vm3, %v12332_v30, %v12336_v32  ;;  %v719_v37 = vsel %vm715_vm3, %v12336_v32, %v12337_v31 }
 0x17e   : > { %v12340_v39 = vpop.permute.xlu1 %12339  ;;  %v739_v40 = vmax.f32 %v670_v54, %v718_v36  ;;  %v740_v41 = vmax.f32 %v671_v57, %v719_v37 }
 0x17f   : > { %v12342_v42 = vunpack.i.h.bf16 %v12340_v39  ;;  %v12341_v43 = vunpack.i.l.bf16 %v12340_v39  ;;  %v12345_v44 = vpop.permute.xlu0 %12344  ;;  %12354 = vrot.lane.b32.xlu0 %v12353_v35, %s12980_s19 }
 0x180   : > { %v12346_v45 = vunpack.i.l.bf16 %v12345_v44  ;;  %v12358_v46 = vpack.i.bf16 %v739_v40, %v738_v38  ;;  %v12363_v47 = vpack.i.bf16 %v741_v34, %v740_v41  ;;  %v12347_v48 = vunpack.i.h.bf16 %v12345_v44 }
 0x181   : > { %v720_v49 = vsel %vm715_vm3, %v12341_v43, %v12342_v42 }
 0x182   : > { %v12350_v50 = vpop.permute.xlu1 %12349  ;;  %12359 = vrot.lane.b32.xlu1 %v12358_v46, %s12980_s19  ;;  %v721_v51 = vsel %vm715_vm3, %v12342_v42, %v12346_v45  ;;  %v13159_v52 = vmax.f32 %v673_v7, %v720_v49  ;;  %v13170_v60 = vmax.f32 %v675_v9, %v12346_v45  ;;  %v12577_v49 = vld [vmem:[%s17121_s2 + $0x4] ss:$28 sps:$4 sm:$0xff]  }
 0x183   : > { %v12352_v53 = vunpack.i.h.bf16 %v12350_v50  ;;  %v12351_v54 = vunpack.i.l.bf16 %v12350_v50  ;;  %12364 = vrot.lane.b32.xlu0 %v12363_v47, %s12980_s19  ;;  %v13162_v55 = vmax.f32 %v674_v13, %v721_v51  ;;  %1565 = vmatprep.mubr.bf16.mxu1 %v12577_v49 }
 0x185   : > { %v13164_v56 = vmax.f32 %v678_v16, %v12352_v53  ;;  %v12368_v57 = vpack.i.bf16 %v13162_v55, %v13159_v52  ;;  %v722_v58 = vsel %vm715_vm3, %v12347_v48, %v12351_v54  ;;  %v723_v59 = vsel %vm715_vm3, %v12351_v54, %v12352_v53 }
 0x186   : > { %v745_v61 = vmax.f32 %v676_v15, %v722_v58  ;;  %v746_v62 = vmax.f32 %v677_v18, %v723_v59 }
 0x187   : > { %12369 = vrot.lane.b32.xlu1 %v12368_v57, %s12980_s19 }
 0x188   : > { %v12373_v63 = vpack.i.bf16 %v745_v61, %v13170_v60  ;;  %v12378_v1 = vpack.i.bf16 %v13164_v56, %v746_v62 }
 0x18a   : > { %12374 = vrot.lane.b32.xlu0 %v12373_v63, %s12980_s19 }
 0x18b   : > { %12379 = vrot.lane.b32.xlu1 %v12378_v1, %s12980_s19 }
 0x1f1   : > { %v12355_v2 = vpop.permute.xlu0 %12354 }
 0x1f2   : > { %v12357_v3 = vunpack.i.h.bf16 %v12355_v2  ;;  %v12356_v4 = vunpack.i.l.bf16 %v12355_v2 }
 0x1f4   : > { %v12360_v5 = vpop.permute.xlu1 %12359  ;;  %v785_v9 = vsel %vm784_vm4, %v12356_v4, %v12357_v3 }
 0x1f5   : > { %v12362_v6 = vunpack.i.h.bf16 %v12360_v5  ;;  %v12361_v7 = vunpack.i.l.bf16 %v12360_v5  ;;  %v12365_v8 = vpop.permute.xlu0 %12364  ;;  %v805_v18 = vmax.f32 %v13147_v29, %v785_v9 }
 0x1f6   : > { %v12367_v10 = vunpack.i.h.bf16 %v12365_v8  ;;  %v12366_v11 = vunpack.i.l.bf16 %v12365_v8 }
 0x1f7   : > { %v786_v12 = vsel %vm784_vm4, %v12357_v3, %v12361_v7  ;;  %v807_v13 = vmax.f32 %v738_v38, %v12361_v7 }
 0x1f8   : > { %v806_v14 = vmax.f32 %v13149_v33, %v786_v12  ;;  %v810_v15 = vmax.f32 %v741_v34, %v12367_v10  ;;  %v787_v16 = vsel %vm784_vm4, %v12362_v6, %v12366_v11  ;;  %v788_v17 = vsel %vm784_vm4, %v12366_v11, %v12367_v10 }
 0x1f9   : > { %v808_v19 = vmax.f32 %v739_v40, %v787_v16  ;;  %v809_v20 = vmax.f32 %v740_v41, %v788_v17  ;;  %v12370_v21 = vpop.permute.xlu1 %12369 }
 0x1fa   : > { %v13183_v22 = vpack.c.bf16 %v810_v15, %v807_v13  ;;  %v12372_v23 = vunpack.i.h.bf16 %v12370_v21  ;;  %v12371_v24 = vunpack.i.l.bf16 %v12370_v21 }
 0x1fb   : > { %v13185_v25 = vpack.c.bf16 %v808_v19, %v805_v18  ;;  %v13187_v26 = vpack.c.bf16 %v809_v20, %v806_v14 }
 0x1fc   : > { %v12375_v27 = vpop.permute.xlu0 %12374  ;;  %1082 = vrot.lane.b32.xlu1 %v13183_v22, %s17135_s20  ;;  %1060 = vrot.lane.b32.xlu0 %v13183_v22, %s12979_s16  ;;  %v789_v31 = vsel %vm784_vm4, %v12371_v24, %v12372_v23 }
 0x1fd   : > { %v12377_v28 = vunpack.i.h.bf16 %v12375_v27  ;;  %v12376_v29 = vunpack.i.l.bf16 %v12375_v27  ;;  %v12380_v30 = vpop.permute.xlu1 %12379  ;;  %1533 = vmatprep.subr.bf16.mxu1 %v13187_v26  ;;  %v811_v38 = vmax.f32 %v13159_v52, %v789_v31 }
 0x1fe   : > { %v12382_v32 = vunpack.i.h.bf16 %v12380_v30  ;;  %v12381_v33 = vunpack.i.l.bf16 %v12380_v30  ;;  %1534 = vmatpush1.bf16.msra.mxu1 %v13185_v25 }
 0x1ff   : > { %v790_v34 = vsel %vm784_vm4, %v12372_v23, %v12376_v29  ;;  %v813_v43 = vmax.f32 %v13170_v60, %v12376_v29 }
 0x200   : > { %v812_v35 = vmax.f32 %v13162_v55, %v790_v34  ;;  %v791_v36 = vsel %vm784_vm4, %v12377_v28, %v12381_v33  ;;  %v792_v37 = vsel %vm784_vm4, %v12381_v33, %v12382_v32  ;;  %1066 = vrot.lane.b32.xlu0 %v13183_v22, %s17148_s21  ;;  %829 = vrot.lane.b32.xlu1 %v13187_v26, %s12979_s16 }
 0x201   : > { %v814_v39 = vmax.f32 %v745_v61, %v791_v36  ;;  %v815_v40 = vmax.f32 %v746_v62, %v792_v37  ;;  %v816_v44 = vmax.f32 %v13164_v56, %v12382_v32 }
 0x203   : > { %v13205_v41 = vpack.c.bf16 %v814_v39, %v811_v38  ;;  %v13207_v42 = vpack.c.bf16 %v815_v40, %v812_v35  ;;  %v13265_v45 = vpack.c.bf16 %v816_v44, %v813_v43 }
 0x204   : > { %1072 = vrot.lane.b32.xlu0 %v13183_v22, %s17131_s22  ;;  %844 = vrot.lane.b32.xlu1 %v13187_v26, %s17148_s21 }
 0x205   : > { %1535 = vmatprep.subr.bf16.mxu1 %v13207_v42 }
 0x206   : > { %1536 = vmatpush1.bf16.msra.mxu1 %v13205_v41 }
 0x208   : > { %1095 = vrot.lane.b32.xlu0 %v13183_v22, %s12980_s19  ;;  %859 = vrot.lane.b32.xlu1 %v13187_v26, %s17131_s22 }
 0x20c   : > { %827 = vrot.lane.b32.xlu0 %v13185_v25, %s12979_s16  ;;  %874 = vrot.lane.b32.xlu1 %v13187_v26, %s17133_s23 }
 0x210   : > { %842 = vrot.lane.b32.xlu0 %v13185_v25, %s17148_s21  ;;  %889 = vrot.lane.b32.xlu1 %v13187_v26, %s12980_s19 }
 0x214   : > { %857 = vrot.lane.b32.xlu0 %v13185_v25, %s17131_s22  ;;  %904 = vrot.lane.b32.xlu1 %v13187_v26, %s17177_s24 }
 0x218   : > { %872 = vrot.lane.b32.xlu0 %v13185_v25, %s17133_s23  ;;  %919 = vrot.lane.b32.xlu1 %v13187_v26, %s17175_s25 }
 0x21c   : > { %887 = vrot.lane.b32.xlu0 %v13185_v25, %s12980_s19  ;;  %934 = vrot.lane.b32.xlu1 %v13187_v26, %s17163_s26 }
 0x220   : > { %902 = vrot.lane.b32.xlu0 %v13185_v25, %s17177_s24  ;;  %949 = vrot.lane.b32.xlu1 %v13187_v26, %s17154_s27 }
 0x224   : > { %917 = vrot.lane.b32.xlu0 %v13185_v25, %s17175_s25  ;;  %962 = vrot.lane.b32.xlu1 %v13185_v25, %s17150_s28 }
 0x228   : > { %932 = vrot.lane.b32.xlu0 %v13185_v25, %s17163_s26  ;;  %977 = vrot.lane.b32.xlu1 %v13185_v25, %s17152_s29 }
 0x22c   : > { %947 = vrot.lane.b32.xlu0 %v13185_v25, %s17154_s27  ;;  %992 = vrot.lane.b32.xlu1 %v13185_v25, %s17141_s30 }
 0x230   : > { %964 = vrot.lane.b32.xlu0 %v13187_v26, %s17150_s28  ;;  %1007 = vrot.lane.b32.xlu1 %v13185_v25, %s17137_s12 }
 0x234   : > { %979 = vrot.lane.b32.xlu0 %v13187_v26, %s17152_s29  ;;  %1022 = vrot.lane.b32.xlu1 %v13185_v25, %s17145_s13 }
 0x238   : > { %994 = vrot.lane.b32.xlu0 %v13187_v26, %s17141_s30  ;;  %1062 = vrot.lane.b32.xlu1 %v13265_v45, %s12979_s16 }
 0x23c   : > { %1080 = vrot.lane.b32.xlu0 %v13187_v26, %s17135_s20  ;;  %1068 = vrot.lane.b32.xlu1 %v13265_v45, %s17148_s21 }
 0x240   : > { %1078 = vrot.lane.b32.xlu0 %v13185_v25, %s17135_s20  ;;  %1074 = vrot.lane.b32.xlu1 %v13265_v45, %s17131_s22 }
 0x244   : > { %1009 = vrot.lane.b32.xlu0 %v13187_v26, %s17137_s12  ;;  %1097 = vrot.lane.b32.xlu1 %v13265_v45, %s12980_s19 }
 0x248   : > { %1088 = vrot.lane.b32.xlu0 %v13265_v45, %s17135_s20  ;;  %833 = vrot.lane.b32.xlu1 %v13207_v42, %s12979_s16 }
 0x24c   : > { %831 = vrot.lane.b32.xlu0 %v13205_v41, %s12979_s16  ;;  %1041 = vrot.lane.b32.xlu1 %v13187_v26, %s17139_s14 }
 0x250   : > { %1024 = vrot.lane.b32.xlu0 %v13187_v26, %s17145_s13  ;;  %848 = vrot.lane.b32.xlu1 %v13207_v42, %s17148_s21 }
 0x254   : > { %846 = vrot.lane.b32.xlu0 %v13205_v41, %s17148_s21  ;;  %1039 = vrot.lane.b32.xlu1 %v13185_v25, %s17139_s14 }
 0x258   : > { %1101 = vrot.lane.b32.xlu0 %v13183_v22, %s17177_s24  ;;  %863 = vrot.lane.b32.xlu1 %v13207_v42, %s17131_s22 }
 0x25c   : > { %861 = vrot.lane.b32.xlu0 %v13205_v41, %s17131_s22  ;;  %878 = vrot.lane.b32.xlu1 %v13207_v42, %s17133_s23  ;;  %s17185_s22 = smov 68  }
 0x260   : > { %1043 = vrot.lane.b32.xlu0 %v13183_v22, %s17139_s14  ;;  %893 = vrot.lane.b32.xlu1 %v13207_v42, %s12980_s19 }
 0x264   : > { %876 = vrot.lane.b32.xlu0 %v13205_v41, %s17133_s23  ;;  %1121 = vrot.lane.b32.xlu1 %v13187_v26, %s17143_s15  ;;  %s17188_s23 = smov 85  }
 0x268   : > { %1103 = vrot.lane.b32.xlu0 %v13265_v45, %s17177_s24  ;;  %908 = vrot.lane.b32.xlu1 %v13207_v42, %s17177_s24 }
 0x26c   : > { %891 = vrot.lane.b32.xlu0 %v13205_v41, %s12980_s19  ;;  %1109 = vrot.lane.b32.xlu1 %v13265_v45, %s17175_s25 }
 0x26e   : > { %v13323_v46 = vpop.permute.xlu1 %1082  ;;  %v13325_v47 = vpop.permute.xlu0 %1060 }
 0x270   : > { %1049 = vrot.lane.b32.xlu0 %v13265_v45, %s17139_s14  ;;  %923 = vrot.lane.b32.xlu1 %v13207_v42, %s17175_s25 }
 0x272   : > { %v13331_v48 = vpop.permute.xlu0 %1066  ;;  %v830_v50 = vpop.permute.xlu1 %829 }
 0x273   : > { %1537 = vmatprep.subr.bf16.mxu1 %v830_v50  ;;  %v1064_v17 = vsel %vm715_vm3, %v830_v50, %v13325_v47 }
 0x274   : > { %906 = vrot.lane.b32.xlu0 %v13205_v41, %s17177_s24  ;;  %938 = vrot.lane.b32.xlu1 %v13207_v42, %s17163_s26 }
 0x276   : > { %v13340_v51 = vpop.permute.xlu0 %1072  ;;  %v13342_v52 = vpop.permute.xlu1 %844 }
 0x278   : > { %1107 = vrot.lane.b32.xlu0 %v13183_v22, %s17175_s25  ;;  %1113 = vrot.lane.b32.xlu1 %v13183_v22, %s17163_s26 }
 0x27a   : > { %v13348_v53 = vpop.permute.xlu0 %1095  ;;  %v13350_v54 = vpop.permute.xlu1 %859 }
 0x27b   : > { %v1076_v28 = vsel %vm865_vm6, %v13350_v54, %v13340_v51 }
 0x27c   : > { %921 = vrot.lane.b32.xlu0 %v13205_v41, %s17175_s25  ;;  %1115 = vrot.lane.b32.xlu1 %v13265_v45, %s17163_s26 }
 0x27e   : > { %v828_v55 = vpop.permute.xlu0 %827  ;;  %v13356_v56 = vpop.permute.xlu1 %874 }
 0x27f   : > { %v836_v57 = vsel %vm715_vm3, %v828_v55, %v830_v50 }
 0x280   : > { %1123 = vrot.lane.b32.xlu0 %v13183_v22, %s17143_s15  ;;  %1538 = vmatpush1.bf16.msra.mxu1 %v836_v57  ;;  %v1070_v22 = vsel %vm850_vm5, %v13342_v52, %v13331_v48 }
 0x281   : > { %953 = vrot.lane.b32.xlu1 %v13207_v42, %s17154_s27 }
 0x282   : > { %v843_v58 = vpop.permute.xlu0 %842  ;;  %v13363_v59 = vpop.permute.xlu1 %889 }
 0x283   : > { %v851_v24 = vsel %vm850_vm5, %v843_v58, %v13342_v52 }
 0x284   : > { %936 = vrot.lane.b32.xlu0 %v13205_v41, %s17163_s26 }
 0x285   : > { %968 = vrot.lane.b32.xlu1 %v13207_v42, %s17150_s28 }
 0x286   : > { %v13369_v60 = vpop.permute.xlu0 %857  ;;  %v13371_v61 = vpop.permute.xlu1 %904 }
 0x287   : > { %v866_v30 = vsel %vm865_vm6, %v13369_v60, %v13350_v54 }
 0x288   : > { %1119 = vrot.lane.b32.xlu0 %v13185_v25, %s17143_s15 }
 0x289   : > { %983 = vrot.lane.b32.xlu1 %v13207_v42, %s17152_s29 }
 0x28a   : > { %v13377_v62 = vpop.permute.xlu0 %872  ;;  %v13379_v63 = vpop.permute.xlu1 %919 }
 0x28b   : > { %v881_v49 = vsel %vm880_vm8, %v13377_v62, %v13356_v56 }
 0x28c   : > { %951 = vrot.lane.b32.xlu0 %v13205_v41, %s17154_s27 }
 0x28d   : > { %998 = vrot.lane.b32.xlu1 %v13207_v42, %s17141_s30 }
 0x28e   : > { %v13385_v1 = vpop.permute.xlu0 %887  ;;  %v13387_v2 = vpop.permute.xlu1 %934 }
 0x290   : > { %1129 = vrot.lane.b32.xlu0 %v13265_v45, %s17143_s15 }
 0x291   : > { %1086 = vrot.lane.b32.xlu1 %v13207_v42, %s17135_s20 }
 0x292   : > { %v13393_v3 = vpop.permute.xlu0 %902  ;;  %v13395_v4 = vpop.permute.xlu1 %949 }
 0x294   : > { %966 = vrot.lane.b32.xlu0 %v13205_v41, %s17150_s28 }
 0x295   : > { %1084 = vrot.lane.b32.xlu1 %v13205_v41, %s17135_s20  ;;  %s17179_s20 = smov 124  }
 0x296   : > { %v13401_v5 = vpop.permute.xlu0 %917  ;;  %v13403_v6 = vpop.permute.xlu1 %962 }
 0x298   : > { %981 = vrot.lane.b32.xlu0 %v13205_v41, %s17152_s29 }
 0x299   : > { %1013 = vrot.lane.b32.xlu1 %v13207_v42, %s17137_s12 }
 0x29a   : > { %v13409_v7 = vpop.permute.xlu0 %932  ;;  %v13411_v8 = vpop.permute.xlu1 %977 }
 0x29c   : > { %996 = vrot.lane.b32.xlu0 %v13205_v41, %s17141_s30  ;;  %s17195_s30 = smov 67  }
 0x29d   : > { %1028 = vrot.lane.b32.xlu1 %v13207_v42, %s17145_s13 }
 0x29e   : > { %v13417_v9 = vpop.permute.xlu0 %947  ;;  %v13419_v10 = vpop.permute.xlu1 %992 }
 0x2a0   : > { %1011 = vrot.lane.b32.xlu0 %v13205_v41, %s17137_s12  ;;  %s17180_s12 = smov 125  }
 0x2a1   : > { %1047 = vrot.lane.b32.xlu1 %v13207_v42, %s17139_s14 }
 0x2a2   : > { %v13425_v11 = vpop.permute.xlu0 %964  ;;  %v13427_v12 = vpop.permute.xlu1 %1007 }
 0x2a4   : > { %1026 = vrot.lane.b32.xlu0 %v13205_v41, %s17145_s13  ;;  %s17275_s13 = smov 104  }
 0x2a5   : > { %1045 = vrot.lane.b32.xlu1 %v13205_v41, %s17139_s14  ;;  %s17182_s14 = smov 86  }
 0x2a6   : > { %v13433_v13 = vpop.permute.xlu0 %979  ;;  %v13435_v14 = vpop.permute.xlu1 %1022 }
 0x2a8   : > { %1171 = vrot.lane.b32.xlu0 %v13323_v46, %s17143_s15 }
 0x2a9   : > { %1127 = vrot.lane.b32.xlu1 %v13207_v42, %s17143_s15 }
 0x2aa   : > { %v13441_v15 = vpop.permute.xlu0 %994  ;;  %v1063_v16 = vpop.permute.xlu1 %1062 }
 0x2ac   : > { %1133 = vrot.lane.b32.xlu0 %v1064_v17, %s17143_s15 }
 0x2ad   : > { %1125 = vrot.lane.b32.xlu1 %v13205_v41, %s17143_s15  ;;  %v1099_v41 = vsel %vm784_vm4, %v13363_v59, %v13348_v53 }
 0x2ae   : > { %v1081_v18 = vpop.permute.xlu0 %1080  ;;  %v1069_v19 = vpop.permute.xlu1 %1068 }
 0x2af   : > { %v1092_v33 = vsel %vm1090_vm7, %v1081_v18, %v13323_v46 }
 0x2b0   : > { %1131 = vrot.lane.b32.xlu0 %v836_v57, %s17143_s15 }
 0x2b1   : > { %1135 = vrot.lane.b32.xlu1 %v13325_v47, %s17143_s15 }
 0x2b2   : > { %v1079_v20 = vpop.permute.xlu0 %1078  ;;  %v1075_v21 = vpop.permute.xlu1 %1074 }
 0x2b3   : > { %v1091_v35 = vsel %vm1090_vm7, %v1079_v20, %v1081_v18 }
 0x2b4   : > { %1145 = vrot.lane.b32.xlu0 %v1070_v22, %s17143_s15 }
 0x2b5   : > { %1147 = vrot.lane.b32.xlu1 %v13331_v48, %s17143_s15 }
 0x2b6   : > { %v13457_v23 = vpop.permute.xlu0 %1009  ;;  %v13461_v25 = vpop.permute.xlu1 %1097 }
 0x2b8   : > { %1143 = vrot.lane.b32.xlu0 %v851_v24, %s17143_s15 }
 0x2b9   : > { %1159 = vrot.lane.b32.xlu1 %v13340_v51, %s17143_s15 }
 0x2ba   : > { %v13466_v26 = vpop.permute.xlu0 %1088  ;;  %v834_v27 = vpop.permute.xlu1 %833 }
 0x2bb   : > { %1539 = vmatprep.subr.bf16.mxu1 %v834_v27  ;;  %v1065_v37 = vsel %vm715_vm3, %v834_v27, %v1063_v16 }
 0x2bc   : > { %1157 = vrot.lane.b32.xlu0 %v1076_v28, %s17143_s15  ;;  %v12578_v28 = vld [vmem:[%s17121_s2 + $0x3c] ss:$28 sps:$4 sm:$0xff]  }
 0x2bd   : > { %1183 = vrot.lane.b32.xlu1 %v13348_v53, %s17143_s15 }
 0x2be   : > { %v832_v29 = vpop.permute.xlu0 %831  ;;  %v13477_v31 = vpop.permute.xlu1 %1041 }
 0x2bf   : > { %v837_v32 = vsel %vm715_vm3, %v832_v29, %v834_v27 }
 0x2c0   : > { %1155 = vrot.lane.b32.xlu0 %v866_v30, %s17143_s15  ;;  %1540 = vmatpush1.bf16.msra.mxu1 %v837_v32 }
 0x2c1   : > { %1169 = vrot.lane.b32.xlu1 %v1092_v33, %s17143_s15  ;;  %1541 = vmatprep.subr.bf16.mxu1 %v13342_v52 }
 0x2c2   : > { %v13485_v34 = vpop.permute.xlu0 %1024  ;;  %v849_v36 = vpop.permute.xlu1 %848 }
 0x2c3   : > { %v1071_v44 = vsel %vm850_vm5, %v849_v36, %v1069_v19 }
 0x2c4   : > { %1167 = vrot.lane.b32.xlu0 %v1091_v35, %s17143_s15  ;;  %1542 = vmatpush1.bf16.msra.mxu1 %v851_v24 }
 0x2c5   : > { %1139 = vrot.lane.b32.xlu1 %v1065_v37, %s17143_s15  ;;  %1543 = vmatprep.subr.bf16.mxu1 %v849_v36 }
 0x2c6   : > { %v847_v38 = vpop.permute.xlu0 %846  ;;  %v13491_v39 = vpop.permute.xlu1 %1039 }
 0x2c7   : > { %v852_v40 = vsel %vm850_vm5, %v847_v38, %v849_v36 }
 0x2c8   : > { %1181 = vrot.lane.b32.xlu0 %v1099_v41, %s17143_s15  ;;  %1544 = vmatpush1.bf16.msra.mxu1 %v852_v40 }
 0x2c9   : > { %1137 = vrot.lane.b32.xlu1 %v837_v32, %s17143_s15  ;;  %1545 = vmatprep.subr.bf16.mxu1 %v13350_v54 }
 0x2ca   : > { %v1102_v42 = vpop.permute.xlu0 %1101  ;;  %v864_v43 = vpop.permute.xlu1 %863 }
 0x2cb   : > { %v1077_v51 = vsel %vm865_vm6, %v864_v43, %v1075_v21  ;;  %v1105_v20 = vsel %vm910_vm9, %v13371_v61, %v1102_v42 }
 0x2cc   : > { %1141 = vrot.lane.b32.xlu0 %v1063_v16, %s17143_s15  ;;  %1546 = vmatpush1.bf16.msra.mxu1 %v866_v30  ;;  %v941_v30 = vsel %vm940_vm11, %v13409_v7, %v13387_v2  ;;  %v12580_v7 = vld [vmem:[%s17121_s2 + $0x38] ss:$28 sps:$4 sm:$0xff]  }
 0x2cd   : > { %1151 = vrot.lane.b32.xlu1 %v1071_v44, %s17143_s15  ;;  %1547 = vmatprep.subr.bf16.mxu1 %v864_v43 }
 0x2ce   : > { %v862_v45 = vpop.permute.xlu0 %861  ;;  %v879_v46 = vpop.permute.xlu1 %878 }
 0x2cf   : > { %v867_v47 = vsel %vm865_vm6, %v862_v45, %v864_v43 }
 0x2d0   : > { %1153 = vrot.lane.b32.xlu0 %v1069_v19, %s17143_s15  ;;  %1548 = vmatpush1.bf16.msra.mxu1 %v867_v47 }
 0x2d1   : > { %1149 = vrot.lane.b32.xlu1 %v852_v40, %s17143_s15  ;;  %1549 = vmatprep.subr.bf16.mxu1 %v13356_v56  ;;  %v896_v56 = vsel %vm784_vm4, %v13385_v1, %v13363_v59  ;;  %v911_v1 = vsel %vm910_vm9, %v13393_v3, %v13371_v61  ;;  %v956_v40 = vsel %vm955_vm12, %v13417_v9, %v13395_v4 }
 0x2d2   : > { %v13507_v48 = vpop.permute.xlu0 %1043  ;;  %v13511_v50 = vpop.permute.xlu1 %893 }
 0x2d4   : > { %1165 = vrot.lane.b32.xlu0 %v1075_v21, %s17143_s15  ;;  %1550 = vmatpush1.bf16.msra.mxu1 %v881_v49  ;;  %v926_v21 = vsel %vm925_vm10, %v13401_v5, %v13379_v63  ;;  %v12575_v5 = vld [vmem:[%s17121_s2] ss:$28 sps:$4 sm:$0xff]  }
 0x2d5   : > { %1163 = vrot.lane.b32.xlu1 %v1077_v51, %s17143_s15  ;;  %1551 = vmatprep.subr.bf16.mxu1 %v879_v46 }
 0x2d6   : > { %v877_v52 = vpop.permute.xlu0 %876  ;;  %v13516_v53 = vpop.permute.xlu1 %1121 }
 0x2d7   : > { %v882_v54 = vsel %vm880_vm8, %v877_v52, %v879_v46  ;;  %v12584_v46 = vld [vmem:[%s17121_s2 + $0xac] ss:$28 sps:$4 sm:$0xff]   ;;  %vm17147_vm8 = vcmask 547840  }
 0x2d8   : > { %1177 = vrot.lane.b32.xlu0 %v13466_v26, %s17143_s15  ;;  %1552 = vmatpush1.bf16.msra.mxu1 %v882_v54 }
 0x2d9   : > { %1195 = vrot.lane.b32.xlu1 %v1102_v42, %s17143_s15  ;;  %1553 = vmatprep.subr.bf16.mxu1 %v13363_v59 }
 0x2da   : > { %v13522_v55 = vpop.permute.xlu0 %1103  ;;  %v13527_v57 = vpop.permute.xlu1 %908 }
 0x2dc   : > { %1161 = vrot.lane.b32.xlu0 %v867_v47, %s17143_s15  ;;  %1554 = vmatpush1.bf16.msra.mxu1 %v896_v56 }
 0x2dd   : > { %1555 = vmatprep.subr.bf16.mxu1 %v13511_v50 }
 0x2de   : > { %v892_v58 = vpop.permute.xlu0 %891  ;;  %v13531_v60 = vpop.permute.xlu1 %1109 }
 0x2df   : > { %v13535_v62 = vsel %vm784_vm4, %v892_v58, %v13511_v50  ;;  %v12589_v58 = vld [vmem:[%s17121_s2 + $0xc] ss:$28 sps:$4 sm:$0xff]  }
 0x2e0   : > { %1179 = vrot.lane.b32.xlu0 %v896_v56, %s17143_s15  ;;  %1556 = vmatpush1.bf16.msra.mxu1 %v13535_v62  ;;  %v12586_v56 = vld [vmem:[%s17121_s2 + $0xa8] ss:$28 sps:$4 sm:$0xff]  }
 0x2e1   : > { %1557 = vmatprep.subr.bf16.mxu1 %v13371_v61 }
 0x2e2   : > { %v13540_v59 = vpop.permute.xlu0 %1049  ;;  %v13545_v16 = vpop.permute.xlu1 %923 }
 0x2e4   : > { %1189 = vrot.lane.b32.xlu0 %v13461_v25, %s17143_s15  ;;  %1558 = vmatpush1.bf16.msra.mxu1 %v911_v1 }
 0x2e5   : > { %1559 = vmatprep.subr.bf16.mxu1 %v13527_v57 }
 0x2e6   : > { %v907_v17 = vpop.permute.xlu0 %906  ;;  %v13550_v18 = vpop.permute.xlu1 %938 }
 0x2e7   : > { %v13554_v19 = vsel %vm910_vm9, %v907_v17, %v13527_v57  ;;  %v986_v17 = vsel %vm985_vm14, %v13411_v8, %v13433_v13  ;;  %v1336_v8 = vld [vmem:[%s17126_s7 + $0x20] sm:$0xff] }
 0x2e8   : > { %1193 = vrot.lane.b32.xlu0 %v1105_v20, %s17143_s15  ;;  %1560 = vmatpush1.bf16.msra.mxu1 %v13554_v19  ;;  %v1100_v20 = vsel %vm784_vm4, %v13511_v50, %v13461_v25  ;;  %v1001_v50 = vsel %vm1000_vm15, %v13419_v10, %v13441_v15 }
 0x2e9   : > { %1561 = vmatprep.subr.bf16.mxu1 %v13379_v63 }
 0x2ea   : > { %v1108_v3 = vpop.permute.xlu0 %1107  ;;  %v13564_v22 = vpop.permute.xlu1 %1113 }
 0x2eb   : > { %1207 = vrot.lane.b32.xlu1 %v1108_v3, %s17143_s15  ;;  %v1111_v33 = vsel %vm925_vm10, %v13379_v63, %v1108_v3  ;;  %v12581_v63 = vld [vmem:[%s17121_s2 + $0x74] ss:$28 sps:$4 sm:$0xff]   ;;  %v1117_v45 = vsel %vm940_vm11, %v13387_v2, %v13564_v22 }
 0x2ec   : > { %1191 = vrot.lane.b32.xlu0 %v911_v1, %s17143_s15  ;;  %1562 = vmatpush1.bf16.msra.mxu1 %v926_v21  ;;  %v1334_v3 = vld [vmem:[%s17126_s7 + $0x10] sm:$0xff] }
 0x2ed   : > { %1563 = vmatprep.subr.bf16.mxu1 %v13545_v16 }
 0x2ee   : > { %v922_v61 = vpop.permute.xlu0 %921  ;;  %v13569_v24 = vpop.permute.xlu1 %1115 }
 0x2ef   : > { %v13573_v27 = vsel %vm925_vm10, %v922_v61, %v13545_v16 }
 0x2f0   : > { %1201 = vrot.lane.b32.xlu0 %v13522_v55, %s17143_s15  ;;  %1564 = vmatpush1.bf16.msra.mxu1 %v13573_v27 }
 0x2f1   : > { %1606 = vmatprep.subr.bf16.mxu1 %v13387_v2  ;;  %v971_v2 = vsel %vm970_vm13, %v13403_v6, %v13425_v11 }
 0x2f2   : > { %v13585_v29 = vpop.permute.xlu0 %1123 }
 0x2f3   : > { %v954_v32 = vpop.permute.xlu1 %953  ;;  %1566 = vmatmul.mubr.bf16.vlgmr.msra.gmra.mrb[8].mxu1 %v12575_v5 }
 0x2f4   : > { %1205 = vrot.lane.b32.xlu0 %v1111_v33, %s17143_s15  ;;  %1607 = vmatpush1.bf16.msra.mxu1 %v941_v30 }
 0x2f5   : > { %1608 = vmatprep.subr.bf16.mxu1 %v13550_v18  ;;  %1575 = vmatprep.mubr.bf16.mxu1 %v12578_v28  ;;  %v1106_v28 = vsel %vm910_vm9, %v13527_v57, %v13522_v55  ;;  %v1016_v55 = vsel %vm1015_vm0, %v13427_v12, %v13457_v23  ;;  %v1112_v57 = vsel %vm925_vm10, %v13545_v16, %v13531_v60 }
 0x2f6   : > { %v937_v35 = vpop.permute.xlu0 %936 }
 0x2f7   : > { %v969_v36 = vpop.permute.xlu1 %968  ;;  %v13596_v37 = vsel %vm940_vm11, %v937_v35, %v13550_v18 }
 0x2f8   : > { %1203 = vrot.lane.b32.xlu0 %v926_v21, %s17143_s15  ;;  %1609 = vmatpush1.bf16.msra.mxu1 %v13596_v37 }
 0x2f9   : > { %1610 = vmatprep.subr.bf16.mxu1 %v13395_v4  ;;  %v12583_v4 = vld [vmem:[%s17121_s2 + $0x70] ss:$28 sps:$4 sm:$0xff]  }
 0x2fa   : > { %v13607_v38 = vpop.permute.xlu0 %1119 }
 0x2fb   : > { %v984_v41 = vpop.permute.xlu1 %983  ;;  %1576 = vmatmul.mubr.bf16.gmra.mrb[12].mxu1 %v12580_v7 }
 0x2fc   : > { %1213 = vrot.lane.b32.xlu0 %v13531_v60, %s17143_s15  ;;  %1611 = vmatpush1.bf16.msra.mxu1 %v956_v40  ;;  %v1031_v60 = vsel %vm1030_vm1, %v13435_v14, %v13485_v34  ;;  %v1053_v14 = vsel %vm1051_vm2, %v13477_v31, %v13507_v48 }
 0x2fd   : > { %1612 = vmatprep.subr.bf16.mxu1 %v954_v32  ;;  %1585 = vmatprep.mubr.bf16.mxu1 %v12581_v63 }
 0x2fe   : > { %v952_v42 = vpop.permute.xlu0 %951 }
 0x2ff   : > { %v999_v43 = vpop.permute.xlu1 %998  ;;  %v957_v44 = vsel %vm955_vm12, %v952_v42, %v954_v32 }
 0x300   : > { %1217 = vrot.lane.b32.xlu0 %v1117_v45, %s17143_s15  ;;  %1613 = vmatpush1.bf16.msra.mxu1 %v957_v44  ;;  %v1228_v44 = vsel %vm17147_vm8, %v13607_v38, %v13516_v53 }
 0x301   : > { %1614 = vmatprep.subr.bf16.mxu1 %v13425_v11  ;;  %v1332_v11 = vld [vmem:[%s17126_s7] sm:$0xff] }
 0x302   : > { %v13623_v9 = vpop.permute.xlu0 %1129 }
 0x303   : > { %v1087_v47 = vpop.permute.xlu1 %1086  ;;  %1586 = vmatmul.mubr.bf16.gmra.mrb[16].mxu1 %v12583_v4 }
 0x304   : > { %1215 = vrot.lane.b32.xlu0 %v941_v30, %s17143_s15  ;;  %v1094_v49 = vsel %vm1090_vm7, %v1087_v47, %v13466_v26  ;;  %1615 = vmatpush1.bf16.msra.mxu1 %v971_v2 }
 0x305   : > { %1175 = vrot.lane.b32.xlu1 %v1094_v49, %s17143_s15  ;;  %1616 = vmatprep.subr.bf16.mxu1 %v969_v36 }
 0x306   : > { %v967_v51 = vpop.permute.xlu0 %966  ;;  %1595 = vmatprep.mubr.bf16.mxu1 %v12584_v46  ;;  %v1337_v46 = vld [vmem:[%s17126_s7 + $0x28] sm:$0xff] }
 0x307   : > { %v1085_v52 = vpop.permute.xlu1 %1084  ;;  %v972_v54 = vsel %vm970_vm13, %v967_v51, %v969_v36  ;;  %v1339_v51 = vld [vmem:[%s17126_s7 + $0x38] sm:$0xff] }
 0x308   : > { %v1093_v6 = vsel %vm1090_vm7, %v1085_v52, %v1087_v47  ;;  %1225 = vrot.lane.b32.xlu0 %v13569_v24, %s17143_s15  ;;  %1617 = vmatpush1.bf16.msra.mxu1 %v972_v54 }
 0x309   : > { %1173 = vrot.lane.b32.xlu1 %v1093_v6, %s17143_s15  ;;  %1618 = vmatprep.subr.bf16.mxu1 %v13433_v13 }
 0x30a   : > { %v982_v26 = vpop.permute.xlu0 %981 }
 0x30b   : > { %v1014_v1 = vpop.permute.xlu1 %1013  ;;  %1596 = vmatmul.mubr.bf16.gmra.mrb[20].mxu1 %v12586_v56  ;;  %v987_v61 = vsel %vm985_vm14, %v982_v26, %v984_v41  ;;  %v12595_v26 = vld [vmem:[%s17121_s2 + $0x78] ss:$28 sps:$4 sm:$0xff]  }
 0x30c   : > { %1342 = vperm.xlu0 %12321, %v1332_v11   ;;  %1619 = vmatpush1.bf16.msra.mxu1 %v986_v17 }
 0x30d   : > { %1187 = vrot.lane.b32.xlu1 %v1100_v20, %s17143_s15  ;;  %1620 = vmatprep.subr.bf16.mxu1 %v984_v41 }
 0x30e   : > { %v997_v21 = vpop.permute.xlu0 %996  ;;  %1638 = vmatprep.mubr.bf16.mxu1 %v12589_v58 }
 0x30f   : > { %v1029_v5 = vpop.permute.xlu1 %1028  ;;  %v1002_v32 = vsel %vm1000_vm15, %v997_v21, %v999_v43 }
 0x310   : > { %1352 = vperm.xlu0 %12321, %v1334_v3   ;;  %1621 = vmatpush1.bf16.msra.mxu1 %v987_v61 }
 0x311   : > { %1185 = vrot.lane.b32.xlu1 %v13535_v62, %s17143_s15  ;;  %1622 = vmatprep.subr.bf16.mxu1 %v13441_v15  ;;  %v1338_v62 = vld [vmem:[%s17126_s7 + $0x30] sm:$0xff] }
 0x312   : > { %v1012_v13 = vpop.permute.xlu0 %1011 }
 0x313   : > { %v1048_v25 = vpop.permute.xlu1 %1047 }
 0x314   : > { %1362 = vperm.xlu0 %12321, %v1336_v8   ;;  %1623 = vmatpush1.bf16.msra.mxu1 %v1001_v50  ;;  %v1055_v41 = vsel %vm1051_vm2, %v1048_v25, %v13540_v59  ;;  %v1229_v59 = vsel %vm17147_vm8, %v13516_v53, %v13585_v29  ;;  %v12592_v53 = vld [vmem:[%s17121_s2 + $0x40] ss:$28 sps:$4 sm:$0xff]   ;;  %v12598_v8 = vld [vmem:[%s17121_s2 + $0xb0] ss:$28 sps:$4 sm:$0xff]  }
 0x315   : > { %1199 = vrot.lane.b32.xlu1 %v1106_v28, %s17143_s15  ;;  %1624 = vmatprep.subr.bf16.mxu1 %v999_v43  ;;  %v1335_v43 = vld [vmem:[%s17126_s7 + $0x18] sm:$0xff] }
 0x316   : > { %v1027_v30 = vpop.permute.xlu0 %1026 }
 0x317   : > { %v1046_v33 = vpop.permute.xlu1 %1045  ;;  %v1032_v7 = vsel %vm1030_vm1, %v1027_v30, %v1029_v5 }
 0x318   : > { %1372 = vperm.xlu0 %12321, %v1338_v62   ;;  %1625 = vmatpush1.bf16.msra.mxu1 %v1002_v32 }
 0x319   : > { %1197 = vrot.lane.b32.xlu1 %v13554_v19, %s17143_s15  ;;  %1626 = vmatprep.subr.bf16.mxu1 %v13457_v23  ;;  %v1017_v19 = vsel %vm1015_vm0, %v1012_v13, %v1014_v1 }
 0x31a   : > { %v13681_v10 = vpop.permute.xlu0 %1171 }
 0x31b   : > { %v1128_v15 = vpop.permute.xlu1 %1127 }
 0x31c   : > { %1627 = vmatpush1.bf16.msra.mxu1 %v1016_v55  ;;  %v1231_v29 = vsel %vm17147_vm8, %v1128_v15, %v13623_v9  ;;  %v12593_v9 = vld [vmem:[%s17121_s2 + $0x7c] ss:$28 sps:$4 sm:$0xff]  }
 0x31d   : > { %1211 = vrot.lane.b32.xlu1 %v1112_v57, %s17143_s15  ;;  %1628 = vmatprep.subr.bf16.mxu1 %v1014_v1  ;;  %v12596_v1 = vld [vmem:[%s17121_s2 + $0xb4] ss:$28 sps:$4 sm:$0xff]  }
 0x31e   : > { %v13690_v35 = vpop.permute.xlu0 %1133 }
 0x31f   : > { %v1126_v36 = vpop.permute.xlu1 %1125 }
 0x320   : > { %1629 = vmatpush1.bf16.msra.mxu1 %v1017_v19  ;;  %v1230_v47 = vsel %vm17147_vm8, %v1126_v36, %v1128_v15 }
 0x321   : > { %1209 = vrot.lane.b32.xlu1 %v13573_v27, %s17143_s15  ;;  %1630 = vmatprep.subr.bf16.mxu1 %v13485_v34  ;;  %v1118_v27 = vsel %vm940_vm11, %v13550_v18, %v13569_v24  ;;  %v1333_v18 = vld [vmem:[%s17126_s7 + $0x8] sm:$0xff]  ;;  %v1054_v24 = vsel %vm1051_vm2, %v1046_v33, %v1048_v25  ;;  %v12601_v25 = vld [vmem:[%s17121_s2 + $0x14] ss:$28 sps:$4 sm:$0xff]  }
 0x322   : > { %v1132_v12 = vpop.permute.xlu0 %1131 }
 0x323   : > { %v1136_v23 = vpop.permute.xlu1 %1135  ;;  %v1232_v52 = vsel %vm17147_vm8, %v1132_v12, %v13690_v35 }
 0x324   : > { %1631 = vmatpush1.bf16.msra.mxu1 %v1031_v60  ;;  %v1233_v38 = vsel %vm17147_vm8, %v13690_v35, %v1136_v23 }
 0x325   : > { %1219 = vrot.lane.b32.xlu1 %v13564_v22, %s17143_s15  ;;  %1632 = vmatprep.subr.bf16.mxu1 %v1029_v5  ;;  %v1052_v22 = vsel %vm1051_vm2, %v13491_v39, %v13477_v31  ;;  %v12587_v39 = vld [vmem:[%s17121_s2 + $0x8] ss:$28 sps:$4 sm:$0xff]  }
 0x326   : > { %v13701_v16 = vpop.permute.xlu0 %1145 }
 0x327   : > { %v1148_v63 = vpop.permute.xlu1 %1147 }
 0x328   : > { %1633 = vmatpush1.bf16.msra.mxu1 %v1032_v7  ;;  %v1237_v17 = vsel %vm17147_vm8, %v13701_v16, %v1148_v63 }
 0x329   : > { %1223 = vrot.lane.b32.xlu1 %v1118_v27, %s17143_s15  ;;  %1634 = vmatprep.subr.bf16.mxu1 %v1053_v14 }
 0x32a   : > { %v1144_v34 = vpop.permute.xlu0 %1143 }
 0x32b   : > { %v13714_v40 = vpop.permute.xlu1 %1159  ;;  %v1236_v3 = vsel %vm17147_vm8, %v1144_v34, %v13701_v16 }
 0x32c   : > { %1635 = vmatpush1.bf16.msra.mxu1 %v1052_v22 }
 0x32d   : > { %1221 = vrot.lane.b32.xlu1 %v13596_v37, %s17143_s15  ;;  %1636 = vmatprep.subr.bf16.mxu1 %v1055_v41  ;;  %v12590_v37 = vld [vmem:[%s17121_s2 + $0x44] ss:$28 sps:$4 sm:$0xff]   ;;  %s17181_s15 = smov 84  }
 0x32e   : > { %v13720_v48 = vpop.permute.xlu0 %1157 }
 0x32f   : > { %v13726_v31 = vpop.permute.xlu1 %1183  ;;  %v1241_v50 = vsel %vm17147_vm8, %v13720_v48, %v13714_v40 }
 0x330   : > { %1637 = vmatpush1.bf16.msra.mxu1 %v1054_v24 }
 0x331   : > { %1347 = vperm.xlu1 %12322, %v1333_v18   ;;  %1679 = vmatprep.subr.bf16.mxu1 %v1229_v59 }
 0x332   : > { %v1156_v42 = vpop.permute.xlu0 %1155 }
 0x333   : > { %v13743_v45 = vpop.permute.xlu1 %1169  ;;  %1639 = vmatmul.mubr.bf16.vlgmr.msra.gmra.mrb[8].mxu1 %v12587_v39  ;;  %v1240_v30 = vsel %vm17147_vm8, %v1156_v42, %v13720_v48 }
 0x334   : > { %1680 = vmatpush1.bf16.msra.mxu1 %v1228_v44  ;;  %1648 = vmatprep.mubr.bf16.mxu1 %v12590_v37  ;;  %v1245_v55 = vsel %vm17147_vm8, %v13743_v45, %v13681_v10 }
 0x335   : > { %1357 = vperm.xlu1 %12322, %v1335_v43   ;;  %1681 = vmatprep.subr.bf16.mxu1 %v1231_v29 }
 0x336   : > { %v1168_v4 = vpop.permute.xlu0 %1167 }
 0x337   : > { %v1140_v2 = vpop.permute.xlu1 %1139  ;;  %v1244_v57 = vsel %vm17147_vm8, %v1168_v4, %v13743_v45 }
 0x338   : > { %1682 = vmatpush1.bf16.msra.mxu1 %v1230_v47 }
 0x339   : > { %1367 = vperm.xlu1 %12322, %v1337_v46   ;;  %1683 = vmatprep.subr.bf16.mxu1 %v1233_v38  ;;  %v12599_v38 = vld [vmem:[%s17121_s2 + $0x10] ss:$28 sps:$4 sm:$0xff]  }
 0x33a   : > { %v13759_v49 = vpop.permute.xlu0 %1181 }
 0x33b   : > { %v1138_v54 = vpop.permute.xlu1 %1137  ;;  %1649 = vmatmul.mubr.bf16.gmra.mrb[12].mxu1 %v12592_v53  ;;  %v1249_v34 = vsel %vm17147_vm8, %v13759_v49, %v13726_v31 }
 0x33c   : > { %1684 = vmatpush1.bf16.msra.mxu1 %v1232_v52  ;;  %1658 = vmatprep.mubr.bf16.mxu1 %v12593_v9  ;;  %v1234_v58 = vsel %vm17147_vm8, %v1138_v54, %v1140_v2 }
 0x33d   : > { %1377 = vperm.xlu1 %12322, %v1339_v51  }
 0x33e   : > { %v1142_v56 = vpop.permute.xlu0 %1141 }
 0x33f   : > { %v1152_v6 = vpop.permute.xlu1 %1151  ;;  %v1235_v11 = vsel %vm17147_vm8, %v1140_v2, %v1142_v56 }
 0x340   : > { %1685 = vmatprep.subr.bf16.mxu1 %v1235_v11 }
 0x341   : > { %1686 = vmatpush1.bf16.msra.mxu1 %v1234_v58  ;;  %v12605_v58 = vld [vmem:[%s17121_s2 + $0x84] ss:$28 sps:$4 sm:$0xff]  }
 0x342   : > { %v1154_v20 = vpop.permute.xlu0 %1153  ;;  %1687 = vmatprep.subr.bf16.mxu1 %v1237_v17 }
 0x343   : > { %1659 = vmatmul.mubr.bf16.gmra.mrb[16].mxu1 %v12595_v26  ;;  %v1150_v21 = vpop.permute.xlu1 %1149  ;;  %v1239_v61 = vsel %vm17147_vm8, %v1152_v6, %v1154_v20  ;;  %v12604_v26 = vld [vmem:[%s17121_s2 + $0x48] ss:$28 sps:$4 sm:$0xff]   ;;  %v12607_v20 = vld [vmem:[%s17121_s2 + $0x80] ss:$28 sps:$4 sm:$0xff]  }
 0x344   : > { %1668 = vmatprep.mubr.bf16.mxu1 %v12596_v1  ;;  %v1238_v13 = vsel %vm17147_vm8, %v1150_v21, %v1152_v6  ;;  %v12610_v21 = vld [vmem:[%s17121_s2 + $0xb8] ss:$28 sps:$4 sm:$0xff]  }
 0x345   : > { %1688 = vmatpush1.bf16.msra.mxu1 %v1236_v3  ;;  %v12608_v3 = vld [vmem:[%s17121_s2 + $0xbc] ss:$28 sps:$4 sm:$0xff]  }
 0x346   : > { %v1166_v5 = vpop.permute.xlu0 %1165  ;;  %1689 = vmatprep.subr.bf16.mxu1 %v1239_v61  ;;  %v12611_v61 = vld [vmem:[%s17121_s2 + $0x18] ss:$28 sps:$4 sm:$0xff]  }
 0x347   : > { %v1164_v28 = vpop.permute.xlu1 %1163 }
 0x348   : > { %v1243_v32 = vsel %vm17147_vm8, %v1164_v28, %v1166_v5  ;;  %v12612_v5 = vld [vmem:[%s17121_s2 + $0x50] ss:$28 sps:$4 sm:$0xff]  }
 0x349   : > { %1690 = vmatpush1.bf16.msra.mxu1 %v1238_v13  ;;  %v12614_v13 = vld [vmem:[%s17121_s2 + $0xc0] ss:$28 sps:$4 sm:$0xff]  }
 0x34a   : > { %v1178_v62 = vpop.permute.xlu0 %1177  ;;  %1691 = vmatprep.subr.bf16.mxu1 %v1241_v50 }
 0x34b   : > { %1669 = vmatmul.mubr.bf16.gmra.mrb[20].mxu1 %v12598_v8  ;;  %v1196_v12 = vpop.permute.xlu1 %1195  ;;  %v12613_v8 = vld [vmem:[%s17121_s2 + $0x88] ss:$28 sps:$4 sm:$0xff]  }
 0x34c   : > { %1711 = vmatprep.mubr.bf16.mxu1 %v12601_v25 }
 0x34d   : > { %1692 = vmatpush1.bf16.msra.mxu1 %v1240_v30 }
 0x34e   : > { %v1162_v33 = vpop.permute.xlu0 %1161  ;;  %1693 = vmatprep.subr.bf16.mxu1 %v1243_v32 }
 0x34f   : > { %v1242_v15 = vsel %vm17147_vm8, %v1162_v33, %v1164_v28 }
 0x351   : > { %1694 = vmatpush1.bf16.msra.mxu1 %v1242_v15 }
 0x352   : > { %1695 = vmatprep.subr.bf16.mxu1 %v1245_v55  ;;  %v1180_v35 = vpop.permute.xlu0 %1179 }
 0x353   : > { %v1248_v40 = vsel %vm17147_vm8, %v1180_v35, %v13759_v49  ;;  %v12602_v49 = vld [vmem:[%s17121_s2 + $0x4c] ss:$28 sps:$4 sm:$0xff]  }
 0x355   : > { %1696 = vmatpush1.bf16.msra.mxu1 %v1244_v57 }
 0x356   : > { %v1190_v19 = vpop.permute.xlu0 %1189 }
 0x35a   : > { %v1194_v36 = vpop.permute.xlu0 %1193 }
 0x35b   : > { %v1253_v39 = vsel %vm17147_vm8, %v1194_v36, %v1196_v12 }
 0x35d   : > { %v1208_v60 = vpop.permute.xlu1 %1207 }
 0x35e   : > { %v1192_v23 = vpop.permute.xlu0 %1191 }
 0x35f   : > { %v1252_v31 = vsel %vm17147_vm8, %v1192_v23, %v1194_v36 }
 0x362   : > { %v1202_v16 = vpop.permute.xlu0 %1201 }
 0x366   : > { %v1206_v10 = vpop.permute.xlu0 %1205 }
 0x367   : > { %v1257_v45 = vsel %vm17147_vm8, %v1206_v10, %v1208_v60 }
 0x36a   : > { %v1204_v48 = vpop.permute.xlu0 %1203 }
 0x36b   : > { %v1256_v46 = vsel %vm17147_vm8, %v1204_v48, %v1206_v10 }
 0x36e   : > { %v1214_v42 = vpop.permute.xlu0 %1213 }
 0x372   : > { %v1218_v29 = vpop.permute.xlu0 %1217 }
 0x376   : > { %v1216_v9 = vpop.permute.xlu0 %1215 }
 0x377   : > { %v1176_v7 = vpop.permute.xlu1 %1175  ;;  %v1260_v54 = vsel %vm17147_vm8, %v1216_v9, %v1218_v29 }
 0x378   : > { %v1247_v63 = vsel %vm17147_vm8, %v1176_v7, %v1178_v62 }
 0x379   : > { %1697 = vmatprep.subr.bf16.mxu1 %v1247_v63 }
 0x37a   : > { %v1226_v56 = vpop.permute.xlu0 %1225 }
 0x37b   : > { %v1174_v27 = vpop.permute.xlu1 %1173 }
 0x37c   : > { %v1246_v14 = vsel %vm17147_vm8, %v1174_v27, %v1176_v7 }
 0x37d   : > { %1698 = vmatpush1.bf16.msra.mxu1 %v1246_v14 }
 0x37e   : > { %1699 = vmatprep.subr.bf16.mxu1 %v1249_v34 }
 0x37f   : > { %v1188_v22 = vpop.permute.xlu1 %1187 }
 0x380   : > { %v1251_v41 = vsel %vm17147_vm8, %v1188_v22, %v1190_v19 }
 0x381   : > { %1700 = vmatpush1.bf16.msra.mxu1 %v1248_v40 }
 0x382   : > { %1701 = vmatprep.subr.bf16.mxu1 %v1251_v41 }
 0x383   : > { %v1186_v18 = vpop.permute.xlu1 %1185 }
 0x384   : > { %v1250_v24 = vsel %vm17147_vm8, %v1186_v18, %v1188_v22 }
 0x385   : > { %1702 = vmatpush1.bf16.msra.mxu1 %v1250_v24 }
 0x386   : > { %1703 = vmatprep.subr.bf16.mxu1 %v1253_v39 }
 0x387   : > { %v1200_v59 = vpop.permute.xlu1 %1199 }
 0x388   : > { %v1255_v37 = vsel %vm17147_vm8, %v1200_v59, %v1202_v16 }
 0x389   : > { %1704 = vmatpush1.bf16.msra.mxu1 %v1252_v31 }
 0x38a   : > { %1705 = vmatprep.subr.bf16.mxu1 %v1255_v37 }
 0x38b   : > { %v1198_v43 = vpop.permute.xlu1 %1197  ;;  %v1343_v25 = vpop.permute.xlu0 %1342 }
 0x38c   : > { %v1254_v44 = vsel %vm17147_vm8, %v1198_v43, %v1200_v59 }
 0x38d   : > { %1706 = vmatpush1.bf16.msra.mxu1 %v1254_v44 }
 0x38e   : > { %1707 = vmatprep.subr.bf16.mxu1 %v1257_v45 }
 0x38f   : > { %v1212_v4 = vpop.permute.xlu1 %1211  ;;  %v1353_v23 = vpop.permute.xlu0 %1352 }
 0x390   : > { %v1259_v47 = vsel %vm17147_vm8, %v1212_v4, %v1214_v42 }
 0x391   : > { %1708 = vmatpush1.bf16.msra.mxu1 %v1256_v46 }
 0x392   : > { %1709 = vmatprep.subr.bf16.mxu1 %v1259_v47 }
 0x393   : > { %v1210_v2 = vpop.permute.xlu1 %1209  ;;  %v1363_v59 = vpop.permute.xlu0 %1362 }
 0x394   : > { %v1258_v53 = vsel %vm17147_vm8, %v1210_v2, %v1212_v4 }
 0x395   : > { %1710 = vmatpush1.bf16.msra.mxu1 %v1258_v53 }
 0x397   : > { %v1220_v51 = vpop.permute.xlu1 %1219 }
 0x398   : > { %1712 = vmatmul.mubr.bf16.vlgmr.msra.gmra.mrb[8].mxu1 %v12599_v38  ;;  %v1261_v52 = vsel %vm17147_vm8, %v1218_v29, %v1220_v51  ;;  %v1373_v51 = vpop.permute.xlu0 %1372 }
 0x399   : > { %1752 = vmatprep.subr.bf16.mxu1 %v1261_v52  ;;  %1721 = vmatprep.mubr.bf16.mxu1 %v12602_v49 }
 0x39a   : > { %1753 = vmatpush1.bf16.msra.mxu1 %v1260_v54 }
 0x39b   : > { %v1224_v6 = vpop.permute.xlu1 %1223 }
 0x39c   : > { %v1263_v11 = vsel %vm17147_vm8, %v1224_v6, %v1226_v56 }
 0x39d   : > { %1754 = vmatprep.subr.bf16.mxu1 %v1263_v11 }
 0x39f   : > { %v1222_v1 = vpop.permute.xlu1 %1221 }
 0x3a0   : > { %v1262_v17 = vsel %vm17147_vm8, %v1222_v1, %v1224_v6  ;;  %1722 = vmatmul.mubr.bf16.gmra.mrb[12].mxu1 %v12604_v26  ;;  %vm1520_vm8 = vcmask 261120  }
 0x3a1   : > { %1755 = vmatpush1.bf16.msra.mxu1 %v1262_v17  ;;  %1731 = vmatprep.mubr.bf16.mxu1 %v12605_v58 }
 0x3a8   : > { %1732 = vmatmul.mubr.bf16.gmra.mrb[16].mxu1 %v12607_v20 }
 0x3a9   : > { %1741 = vmatprep.mubr.bf16.mxu1 %v12608_v3 }
 0x3b0   : > { %1742 = vmatmul.mubr.bf16.gmra.mrb[20].mxu1 %v12610_v21  ;;  %v1348_v30 = vpop.permute.xlu1 %1347 }
 0x3b1   : > { %1784 = vmatprep.mubr.bf16.mxu1 %v12977_v0 }
 0x3b4   : > { %v1358_v27 = vpop.permute.xlu1 %1357 }
 0x3b8   : > { %9482 = vmatmul.mubr.msk.bf16.vlgmr.msra.gmra.mrb[8].mxu1 %vm1520_vm8, %v12611_v61  ;;  %v1368_v44 = vpop.permute.xlu1 %1367 }
 0x3b9   : > { %1794 = vmatprep.mubr.bf16.mxu1 %v12977_v0 }
 0x3bc   : > { %v1378_v11 = vpop.permute.xlu1 %1377 }
 0x3c0   : > { %9483 = vmatmul.mubr.msk.bf16.gmra.mrb[12].mxu1 %vm1520_vm8, %v12612_v5 }
 0x3c1   : > { %1804 = vmatprep.mubr.bf16.mxu1 %v12977_v0 }
 0x3c8   : > { %9484 = vmatmul.mubr.msk.bf16.gmra.mrb[16].mxu1 %vm1520_vm8, %v12613_v8 }
 0x3c9   : > { %1814 = vmatprep.mubr.bf16.mxu1 %v12977_v0 }
 0x3d0   : > { %9485 = vmatmul.mubr.msk.bf16.gmra.mrb[20].mxu1 %vm1520_vm8, %v12614_v13 }
 0x48b   : > { %v1786_v50 = vpop.f32.mrb[8].mxu1 }
 0x48c   : > { %v13856_v28 = vadd.f32 %v1786_v50, %v1343_v25  ;;  %v1788_v62 = vpop.f32.mrb[9].mxu1 }
 0x48d   : > { %v13858_v32 = vadd.f32 %v1788_v62, %v1343_v25  ;;  %v1790_v33 = vpop.f32.mrb[10].mxu1 }
 0x48e   : > { %v1825_v15 = vmax.f32 %v13856_v28, 0.0  ;;  %v13861_v55 = vadd.f32 %v1790_v33, %v1348_v30  ;;  %v1792_v57 = vpop.f32.mrb[11].mxu1 }
 0x48f   : > { %v1826_v0 = vmax.f32 %v13858_v32, 0.0  ;;  %v13864_v35 = vadd.f32 %v1792_v57, %v1348_v30 }
 0x490   : > { %v1827_v19 = vmax.f32 %v13861_v55, 0.0 }
 0x491   : > { %v12383_v36 = vpack.i.bf16 %v1826_v0, %v1825_v15  ;;  %v1828_v12 = vmax.f32 %v13864_v35, 0.0 }
 0x493   : > { %v12388_v60 = vpack.i.bf16 %v1828_v12, %v1827_v19  ;;  %v1796_v16 = vpop.f32.mrb[12].mxu1  ;;  %12384 = vrot.lane.b32.xlu0 %v12383_v36, %s12979_s16 }
 0x494   : > { %v13877_v7 = vadd.f32 %v1796_v16, %v1353_v23  ;;  %v1798_v63 = vpop.f32.mrb[13].mxu1 }
 0x495   : > { %v13879_v14 = vadd.f32 %v1798_v63, %v1353_v23  ;;  %v1800_v10 = vpop.f32.mrb[14].mxu1  ;;  %12389 = vrot.lane.b32.xlu1 %v12388_v60, %s12979_s16 }
 0x496   : > { %v1829_v34 = vmax.f32 %v13877_v7, 0.0  ;;  %v13883_v22 = vadd.f32 %v1800_v10, %v1358_v27  ;;  %v1802_v40 = vpop.f32.mrb[15].mxu1 }
 0x497   : > { %v1830_v41 = vmax.f32 %v13879_v14, 0.0  ;;  %v13886_v48 = vadd.f32 %v1802_v40, %v1358_v27 }
 0x498   : > { %v1831_v18 = vmax.f32 %v13883_v22, 0.0 }
 0x499   : > { %v12393_v24 = vpack.i.bf16 %v1830_v41, %v1829_v34  ;;  %v1832_v39 = vmax.f32 %v13886_v48, 0.0 }
 0x49b   : > { %v12398_v31 = vpack.i.bf16 %v1832_v39, %v1831_v18  ;;  %v1806_v37 = vpop.f32.mrb[16].mxu1  ;;  %12394 = vrot.lane.b32.xlu0 %v12393_v24, %s12979_s16 }
 0x49c   : > { %v13899_v42 = vadd.f32 %v1806_v37, %v1363_v59  ;;  %v1808_v43 = vpop.f32.mrb[17].mxu1 }
 0x49d   : > { %v13901_v45 = vadd.f32 %v1808_v43, %v1363_v59  ;;  %v1810_v29 = vpop.f32.mrb[18].mxu1  ;;  %12399 = vrot.lane.b32.xlu1 %v12398_v31, %s12979_s16 }
 0x49e   : > { %v1833_v4 = vmax.f32 %v13899_v42, 0.0  ;;  %v13905_v46 = vadd.f32 %v1810_v29, %v1368_v44  ;;  %v1812_v47 = vpop.f32.mrb[19].mxu1 }
 0x49f   : > { %v1834_v2 = vmax.f32 %v13901_v45, 0.0  ;;  %v13908_v53 = vadd.f32 %v1812_v47, %v1368_v44 }
 0x4a0   : > { %v1835_v38 = vmax.f32 %v13905_v46, 0.0 }
 0x4a1   : > { %v12403_v9 = vpack.i.bf16 %v1834_v2, %v1833_v4  ;;  %v1836_v49 = vmax.f32 %v13908_v53, 0.0 }
 0x4a3   : > { %v12408_v52 = vpack.i.bf16 %v1836_v49, %v1835_v38  ;;  %v1816_v54 = vpop.f32.mrb[20].mxu1  ;;  %12404 = vrot.lane.b32.xlu0 %v12403_v9, %s12979_s16 }
 0x4a4   : > { %v13919_v56 = vadd.f32 %v1816_v54, %v1373_v51  ;;  %v1818_v6 = vpop.f32.mrb[21].mxu1 }
 0x4a5   : > { %v13921_v26 = vadd.f32 %v1818_v6, %v1373_v51  ;;  %v1820_v58 = vpop.f32.mrb[22].mxu1  ;;  %12409 = vrot.lane.b32.xlu1 %v12408_v52, %s12979_s16 }
 0x4a6   : > { %v1837_v1 = vmax.f32 %v13919_v56, 0.0  ;;  %v13925_v17 = vadd.f32 %v1820_v58, %v1378_v11  ;;  %v1822_v20 = vpop.f32.mrb[23].mxu1 }
 0x4a7   : > { %v1838_v3 = vmax.f32 %v13921_v26, 0.0  ;;  %v13928_v21 = vadd.f32 %v1822_v20, %v1378_v11 }
 0x4a8   : > { %v1839_v61 = vmax.f32 %v13925_v17, 0.0 }
 0x4a9   : > { %v12413_v5 = vpack.i.bf16 %v1838_v3, %v1837_v1  ;;  %v1840_v8 = vmax.f32 %v13928_v21, 0.0 }
 0x4ab   : > { %v12418_v13 = vpack.i.bf16 %v1840_v8, %v1839_v61  ;;  %12414 = vrot.lane.b32.xlu0 %v12413_v5, %s12979_s16 }
 0x4ad   : > { %12419 = vrot.lane.b32.xlu1 %v12418_v13, %s12979_s16 }
 0x505   : > { %v12385_v25 = vpop.permute.xlu0 %12384 }
 0x506   : > { %v12387_v50 = vunpack.i.h.bf16 %v12385_v25  ;;  %v12386_v62 = vunpack.i.l.bf16 %v12385_v25 }
 0x507   : > { %v12390_v30 = vpop.permute.xlu1 %12389 }
 0x508   : > { %v13940_v33 = vmax.f32 %v1826_v0, %v12387_v50  ;;  %v1889_v57 = vsel %vm715_vm3, %v12386_v62, %v12387_v50  ;;  %v12392_v36 = vunpack.i.h.bf16 %v12390_v30  ;;  %v12391_v23 = vunpack.i.l.bf16 %v12390_v30 }
 0x509   : > { %v13945_v60 = vmax.f32 %v1825_v15, %v1889_v57 }
 0x50a   : > { %v13949_v16 = vmax.f32 %v1828_v12, %v12392_v36  ;;  %v1890_v63 = vsel %vm715_vm3, %v12391_v23, %v12392_v36 }
 0x50b   : > { %v13954_v27 = vmax.f32 %v1827_v19, %v1890_v63  ;;  %v12423_v32 = vpack.i.bf16 %v13940_v33, %v13945_v60 }
 0x50d   : > { %v12395_v0 = vpop.permute.xlu0 %12394  ;;  %12424 = vrot.lane.b32.xlu0 %v12423_v32, %s12980_s19  ;;  %v12428_v28 = vpack.i.bf16 %v13949_v16, %v13954_v27 }
 0x50e   : > { %v12397_v15 = vunpack.i.h.bf16 %v12395_v0  ;;  %v12396_v10 = vunpack.i.l.bf16 %v12395_v0 }
 0x50f   : > { %v12400_v35 = vpop.permute.xlu1 %12399  ;;  %12429 = vrot.lane.b32.xlu1 %v12428_v28, %s12980_s19 }
 0x510   : > { %v13964_v12 = vmax.f32 %v1830_v41, %v12397_v15  ;;  %v1891_v55 = vsel %vm715_vm3, %v12396_v10, %v12397_v15  ;;  %v12402_v19 = vunpack.i.h.bf16 %v12400_v35  ;;  %v12401_v40 = vunpack.i.l.bf16 %v12400_v35 }
 0x511   : > { %v13969_v24 = vmax.f32 %v1829_v34, %v1891_v55 }
 0x512   : > { %v13973_v59 = vmax.f32 %v1832_v39, %v12402_v19  ;;  %v1892_v31 = vsel %vm715_vm3, %v12401_v40, %v12402_v19 }
 0x513   : > { %v13978_v37 = vmax.f32 %v1831_v18, %v1892_v31  ;;  %v12433_v14 = vpack.i.bf16 %v13964_v12, %v13969_v24 }
 0x515   : > { %v12405_v41 = vpop.permute.xlu0 %12404  ;;  %12434 = vrot.lane.b32.xlu0 %v12433_v14, %s12980_s19  ;;  %v12438_v7 = vpack.i.bf16 %v13973_v59, %v13978_v37 }
 0x516   : > { %v12407_v34 = vunpack.i.h.bf16 %v12405_v41  ;;  %v12406_v43 = vunpack.i.l.bf16 %v12405_v41 }
 0x517   : > { %v12410_v48 = vpop.permute.xlu1 %12409  ;;  %12439 = vrot.lane.b32.xlu1 %v12438_v7, %s12980_s19 }
 0x518   : > { %v13986_v39 = vmax.f32 %v1834_v2, %v12407_v34  ;;  %v1893_v22 = vsel %vm715_vm3, %v12406_v43, %v12407_v34  ;;  %v12412_v18 = vunpack.i.h.bf16 %v12410_v48  ;;  %v12411_v44 = vunpack.i.l.bf16 %v12410_v48 }
 0x519   : > { %v13991_v45 = vmax.f32 %v1833_v4, %v1893_v22 }
 0x51a   : > { %v13995_v29 = vmax.f32 %v1836_v49, %v12412_v18  ;;  %v1894_v47 = vsel %vm715_vm3, %v12411_v44, %v12412_v18 }
 0x51b   : > { %v14000_v9 = vmax.f32 %v1835_v38, %v1894_v47  ;;  %v12443_v2 = vpack.i.bf16 %v13986_v39, %v13991_v45 }
 0x51d   : > { %v12415_v51 = vpop.permute.xlu0 %12414  ;;  %12444 = vrot.lane.b32.xlu0 %v12443_v2, %s12980_s19  ;;  %v12448_v42 = vpack.i.bf16 %v13995_v29, %v14000_v9 }
 0x51e   : > { %v12417_v4 = vunpack.i.h.bf16 %v12415_v51  ;;  %v12416_v52 = vunpack.i.l.bf16 %v12415_v51 }
 0x51f   : > { %v12420_v53 = vpop.permute.xlu1 %12419  ;;  %12449 = vrot.lane.b32.xlu1 %v12448_v42, %s12980_s19 }
 0x520   : > { %v14008_v49 = vmax.f32 %v1838_v3, %v12417_v4  ;;  %v1895_v46 = vsel %vm715_vm3, %v12416_v52, %v12417_v4  ;;  %v12422_v38 = vunpack.i.h.bf16 %v12420_v53  ;;  %v12421_v54 = vunpack.i.l.bf16 %v12420_v53  ;;  %v12617_v52 = vld [vmem:[%s17122_s3 + $0x4] ss:$52 sps:$4 sm:$0xff]  }
 0x521   : > { %v14013_v6 = vmax.f32 %v1837_v1, %v1895_v46  ;;  %3402 = vmatprep.mubr.bf16.mxu1 %v12617_v52 }
 0x522   : > { %v14015_v11 = vmax.f32 %v1840_v8, %v12422_v38  ;;  %v1896_v26 = vsel %vm715_vm3, %v12421_v54, %v12422_v38 }
 0x523   : > { %v14020_v58 = vmax.f32 %v1839_v61, %v1896_v26  ;;  %v12453_v20 = vpack.i.bf16 %v14008_v49, %v14013_v6 }
 0x525   : > { %12454 = vrot.lane.b32.xlu0 %v12453_v20, %s12980_s19  ;;  %v12458_v3 = vpack.i.bf16 %v14015_v11, %v14020_v58 }
 0x527   : > { %12459 = vrot.lane.b32.xlu1 %v12458_v3, %s12980_s19 }
 0x57f   : > { %v14028_v56 = vpop.permute.xlu0 %12424 }
 0x580   : > { %v12427_v1 = vunpack.i.h.bf16 %v14028_v56  ;;  %v12426_v21 = vunpack.i.l.bf16 %v14028_v56 }
 0x581   : > { %v12430_v5 = vpop.permute.xlu1 %12429 }
 0x582   : > { %v1977_v17 = vsel %vm784_vm4, %v12426_v21, %v12427_v1  ;;  %v12432_v61 = vunpack.i.h.bf16 %v12430_v5  ;;  %v12431_v8 = vunpack.i.l.bf16 %v12430_v5  ;;  %v2002_v4 = vmax.f32 %v13940_v33, %v12427_v1 }
 0x583   : > { %v2001_v25 = vmax.f32 %v13945_v60, %v1977_v17 }
 0x584   : > { %v1978_v13 = vsel %vm784_vm4, %v12431_v8, %v12432_v61  ;;  %v2004_v42 = vmax.f32 %v13949_v16, %v12432_v61 }
 0x585   : > { %v2003_v50 = vmax.f32 %v13954_v27, %v1978_v13 }
 0x586   : > { %v14117_v53 = vpack.c.bf16 %v2004_v42, %v2002_v4  ;;  %v12627_v42 = vld [vmem:[%s17122_s3 + $0x1a4] ss:$52 sps:$4 sm:$0xff]  }
 0x587   : > { %v14038_v62 = vpack.c.bf16 %v2003_v50, %v2001_v25  ;;  %v14040_v30 = vpop.permute.xlu0 %12434 }
 0x588   : > { %v12437_v36 = vunpack.i.h.bf16 %v14040_v30  ;;  %v12436_v23 = vunpack.i.l.bf16 %v14040_v30 }
 0x589   : > { %v14042_v57 = vpop.permute.xlu1 %12439  ;;  %2029 = vrot.lane.b32.xlu1 %v14038_v62, %s12979_s16  ;;  %2041 = vrot.lane.b32.xlu0 %v14038_v62, %s17148_s21 }
 0x58a   : > { %v12442_v60 = vunpack.i.h.bf16 %v14042_v57  ;;  %v12441_v63 = vunpack.i.l.bf16 %v14042_v57  ;;  %v1979_v32 = vsel %vm784_vm4, %v12436_v23, %v12437_v36  ;;  %v2006_v16 = vmax.f32 %v13964_v12, %v12437_v36 }
 0x58b   : > { %v2005_v28 = vmax.f32 %v13969_v24, %v1979_v32 }
 0x58c   : > { %v1980_v27 = vsel %vm784_vm4, %v12441_v63, %v12442_v60  ;;  %v2008_v33 = vmax.f32 %v13973_v59, %v12442_v60 }
 0x58d   : > { %2065 = vrot.lane.b32.xlu1 %v14038_v62, %s17179_s20  ;;  %2053 = vrot.lane.b32.xlu0 %v14038_v62, %s17180_s12  ;;  %v2007_v0 = vmax.f32 %v13978_v37, %v1980_v27 }
 0x58e   : > { %v14133_v46 = vpack.c.bf16 %v2008_v33, %v2006_v16 }
 0x58f   : > { %v14064_v15 = vpack.c.bf16 %v2007_v0, %v2005_v28  ;;  %v12445_v35 = vpop.permute.xlu0 %12444 }
 0x590   : > { %v12447_v40 = vunpack.i.h.bf16 %v12445_v35  ;;  %v12446_v24 = vunpack.i.l.bf16 %v12445_v35  ;;  %v12615_v35 = vld [vmem:[%s17122_s3] ss:$52 sps:$4 sm:$0xff]  }
 0x591   : > { %2077 = vrot.lane.b32.xlu1 %v14038_v62, %s12980_s19  ;;  %2089 = vrot.lane.b32.xlu0 %v14038_v62, %s17177_s24  ;;  %v12450_v10 = vpop.permute.xlu1 %12449 }
 0x592   : > { %v12452_v55 = vunpack.i.h.bf16 %v12450_v10  ;;  %v12451_v19 = vunpack.i.l.bf16 %v12450_v10  ;;  %v1981_v14 = vsel %vm784_vm4, %v12446_v24, %v12447_v40  ;;  %v2010_v59 = vmax.f32 %v13986_v39, %v12447_v40  ;;  %v12618_v40 = vld [vmem:[%s17122_s3 + $0x6c] ss:$52 sps:$4 sm:$0xff]  }
 0x593   : > { %v2009_v48 = vmax.f32 %v13991_v45, %v1981_v14 }
 0x594   : > { %v1982_v31 = vsel %vm784_vm4, %v12451_v19, %v12452_v55  ;;  %v2012_v38 = vmax.f32 %v13995_v29, %v12452_v55 }
 0x595   : > { %2043 = vrot.lane.b32.xlu1 %v14064_v15, %s17148_s21  ;;  %2101 = vrot.lane.b32.xlu0 %v14038_v62, %s17175_s25  ;;  %v2011_v41 = vmax.f32 %v14000_v9, %v1982_v31 }
 0x596   : > { %v14145_v12 = vpack.c.bf16 %v2012_v38, %v2010_v59  ;;  %v12629_v38 = vld [vmem:[%s17122_s3 + $0x1a0] ss:$52 sps:$4 sm:$0xff]  }
 0x597   : > { %v12455_v7 = vpop.permute.xlu0 %12454  ;;  %v14086_v44 = vpack.c.bf16 %v2011_v41, %v2009_v48  ;;  %v12623_v48 = vld [vmem:[%s17122_s3 + $0xd0] ss:$52 sps:$4 sm:$0xff]   ;;  %v12630_v59 = vld [vmem:[%s17122_s3 + $0x20c] ss:$52 sps:$4 sm:$0xff]  }
 0x598   : > { %v12457_v22 = vunpack.i.h.bf16 %v12455_v7  ;;  %v12456_v18 = vunpack.i.l.bf16 %v12455_v7  ;;  %v12621_v7 = vld [vmem:[%s17122_s3 + $0xd4] ss:$52 sps:$4 sm:$0xff]  }
 0x599   : > { %2031 = vrot.lane.b32.xlu1 %v14064_v15, %s12979_s16  ;;  %2055 = vrot.lane.b32.xlu0 %v14064_v15, %s17180_s12  ;;  %v12460_v37 = vpop.permute.xlu1 %12459 }
 0x59a   : > { %v12462_v34 = vunpack.i.h.bf16 %v12460_v37  ;;  %v12461_v43 = vunpack.i.l.bf16 %v12460_v37  ;;  %v1983_v45 = vsel %vm784_vm4, %v12456_v18, %v12457_v22  ;;  %v2014_v29 = vmax.f32 %v14008_v49, %v12457_v22  ;;  %v12620_v37 = vld [vmem:[%s17122_s3 + $0x68] ss:$52 sps:$4 sm:$0xff]  }
 0x59b   : > { %v2013_v2 = vmax.f32 %v14013_v6, %v1983_v45  ;;  %v12624_v22 = vld [vmem:[%s17122_s3 + $0x13c] ss:$52 sps:$4 sm:$0xff]  }
 0x59c   : > { %v1984_v47 = vsel %vm784_vm4, %v12461_v43, %v12462_v34  ;;  %v2016_v54 = vmax.f32 %v14015_v11, %v12462_v34 }
 0x59d   : > { %2067 = vrot.lane.b32.xlu1 %v14064_v15, %s17179_s20  ;;  %2091 = vrot.lane.b32.xlu0 %v14064_v15, %s17177_s24  ;;  %v2015_v9 = vmax.f32 %v14020_v58, %v1984_v47 }
 0x59e   : > { %v14157_v39 = vpack.c.bf16 %v2016_v54, %v2014_v29 }
 0x59f   : > { %v14100_v51 = vpack.c.bf16 %v2015_v9, %v2013_v2  ;;  %v12626_v2 = vld [vmem:[%s17122_s3 + $0x138] ss:$52 sps:$4 sm:$0xff]  }
 0x5a1   : > { %2079 = vrot.lane.b32.xlu1 %v14064_v15, %s12980_s19  ;;  %2103 = vrot.lane.b32.xlu0 %v14064_v15, %s17175_s25 }
 0x5a5   : > { %2033 = vrot.lane.b32.xlu1 %v14086_v44, %s12979_s16  ;;  %2045 = vrot.lane.b32.xlu0 %v14086_v44, %s17148_s21 }
 0x5a9   : > { %2069 = vrot.lane.b32.xlu1 %v14086_v44, %s17179_s20  ;;  %2057 = vrot.lane.b32.xlu0 %v14086_v44, %s17180_s12 }
 0x5ad   : > { %2047 = vrot.lane.b32.xlu1 %v14100_v51, %s17148_s21  ;;  %2093 = vrot.lane.b32.xlu0 %v14086_v44, %s17177_s24 }
 0x5b1   : > { %2081 = vrot.lane.b32.xlu1 %v14086_v44, %s12980_s19  ;;  %2105 = vrot.lane.b32.xlu0 %v14086_v44, %s17175_s25 }
 0x5b5   : > { %2167 = vrot.lane.b32.xlu1 %v14117_v53, %s17150_s28  ;;  %2165 = vrot.lane.b32.xlu0 %v14038_v62, %s17150_s28 }
 0x5b9   : > { %2119 = vrot.lane.b32.xlu1 %v14117_v53, %s17163_s26  ;;  %2117 = vrot.lane.b32.xlu0 %v14038_v62, %s17163_s26 }
 0x5bd   : > { %2035 = vrot.lane.b32.xlu1 %v14100_v51, %s12979_s16  ;;  %2059 = vrot.lane.b32.xlu0 %v14100_v51, %s17180_s12 }
 0x5c1   : > { %2171 = vrot.lane.b32.xlu1 %v14133_v46, %s17150_s28  ;;  %2169 = vrot.lane.b32.xlu0 %v14064_v15, %s17150_s28 }
 0x5c5   : > { %2123 = vrot.lane.b32.xlu1 %v14133_v46, %s17163_s26  ;;  %2121 = vrot.lane.b32.xlu0 %v14064_v15, %s17163_s26 }
 0x5c9   : > { %2175 = vrot.lane.b32.xlu1 %v14145_v12, %s17150_s28  ;;  %2173 = vrot.lane.b32.xlu0 %v14086_v44, %s17150_s28 }
 0x5cd   : > { %2127 = vrot.lane.b32.xlu1 %v14145_v12, %s17163_s26  ;;  %2125 = vrot.lane.b32.xlu0 %v14086_v44, %s17163_s26 }
 0x5d1   : > { %2179 = vrot.lane.b32.xlu1 %v14157_v39, %s17150_s28  ;;  %2189 = vrot.lane.b32.xlu0 %v14038_v62, %s17152_s29 }
 0x5d5   : > { %2131 = vrot.lane.b32.xlu1 %v14157_v39, %s17163_s26  ;;  %2141 = vrot.lane.b32.xlu0 %v14038_v62, %s17154_s27 }
 0x5d9   : > { %2191 = vrot.lane.b32.xlu1 %v14117_v53, %s17152_s29  ;;  %2193 = vrot.lane.b32.xlu0 %v14064_v15, %s17152_s29 }
 0x5dd   : > { %2143 = vrot.lane.b32.xlu1 %v14117_v53, %s17154_s27  ;;  %2145 = vrot.lane.b32.xlu0 %v14064_v15, %s17154_s27 }
 0x5e1   : > { %2195 = vrot.lane.b32.xlu1 %v14133_v46, %s17152_s29  ;;  %2197 = vrot.lane.b32.xlu0 %v14086_v44, %s17152_s29 }
 0x5e5   : > { %2147 = vrot.lane.b32.xlu1 %v14133_v46, %s17154_s27  ;;  %2149 = vrot.lane.b32.xlu0 %v14086_v44, %s17154_s27 }
 0x5e9   : > { %2199 = vrot.lane.b32.xlu1 %v14145_v12, %s17152_s29  ;;  %2095 = vrot.lane.b32.xlu0 %v14100_v51, %s17177_s24 }
 0x5ed   : > { %2071 = vrot.lane.b32.xlu1 %v14100_v51, %s17179_s20  ;;  %2261 = vrot.lane.b32.xlu0 %v14038_v62, %s17181_s15 }
 0x5f1   : > { %2151 = vrot.lane.b32.xlu1 %v14145_v12, %s17154_s27  ;;  %2107 = vrot.lane.b32.xlu0 %v14100_v51, %s17175_s25 }
 0x5f5   : > { %2203 = vrot.lane.b32.xlu1 %v14157_v39, %s17152_s29  ;;  %2213 = vrot.lane.b32.xlu0 %v14038_v62, %s17182_s14 }
 0x5f9   : > { %2155 = vrot.lane.b32.xlu1 %v14157_v39, %s17154_s27  ;;  %2265 = vrot.lane.b32.xlu0 %v14064_v15, %s17181_s15 }
 0x5fb   : > { %v14203_v49 = vpop.permute.xlu1 %2029  ;;  %v14205_v6 = vpop.permute.xlu0 %2041 }
 0x5fc   : > { %10187 = vmatprep.subr.bf16.mxu1 %v14205_v6 }
 0x5fd   : > { %2083 = vrot.lane.b32.xlu1 %v14100_v51, %s12980_s19  ;;  %2217 = vrot.lane.b32.xlu0 %v14064_v15, %s17182_s14 }
 0x5fe   : > { %10188 = vmatpush3.bf16.msra.mxu1 %v14038_v62 }
 0x5ff   : > { %v14213_v11 = vpop.permute.xlu1 %2065  ;;  %v14215_v26 = vpop.permute.xlu0 %2053 }
 0x601   : > { %2263 = vrot.lane.b32.xlu1 %v14117_v53, %s17181_s15  ;;  %2321 = vrot.lane.b32.xlu0 %v14117_v53, %s17148_s21 }
 0x603   : > { %v14221_v58 = vpop.permute.xlu1 %2077  ;;  %v14223_v20 = vpop.permute.xlu0 %2089 }
 0x604   : > { %17183 = vst [vmem:[#allocation2_spill] sm:$0xff] %v14221_v58 }
 0x605   : > { %2215 = vrot.lane.b32.xlu1 %v14117_v53, %s17182_s14  ;;  %2271 = vrot.lane.b32.xlu0 %v14145_v12, %s17181_s15 }
 0x607   : > { %v14229_v3 = vpop.permute.xlu1 %2043  ;;  %v14231_v56 = vpop.permute.xlu0 %2101 }
 0x608   : > { %17184 = vst [vmem:[#allocation3_spill] sm:$0xff] %v14231_v56  ;;  %10189 = vmatprep.subr.bf16.mxu1 %v14229_v3 }
 0x609   : > { %2267 = vrot.lane.b32.xlu1 %v14133_v46, %s17181_s15  ;;  %2223 = vrot.lane.b32.xlu0 %v14145_v12, %s17182_s14 }
 0x60a   : > { %10190 = vmatpush3.bf16.msra.mxu1 %v14064_v15 }
 0x60b   : > { %v14239_v1 = vpop.permute.xlu1 %2031  ;;  %v14241_v21 = vpop.permute.xlu0 %2055 }
 0x60d   : > { %2219 = vrot.lane.b32.xlu1 %v14133_v46, %s17182_s14  ;;  %2325 = vrot.lane.b32.xlu0 %v14145_v12, %s17148_s21 }
 0x60f   : > { %v14247_v5 = vpop.permute.xlu1 %2067  ;;  %v14249_v17 = vpop.permute.xlu0 %2091 }
 0x611   : > { %2269 = vrot.lane.b32.xlu1 %v14086_v44, %s17181_s15  ;;  %2287 = vrot.lane.b32.xlu0 %v14117_v53, %s17185_s22 }
 0x613   : > { %v14255_v61 = vpop.permute.xlu1 %2079  ;;  %v14257_v8 = vpop.permute.xlu0 %2103 }
 0x614   : > { %17186 = vst [vmem:[#allocation4_spill] sm:$0xff] %v14255_v61  ;;  %17187 = vst [vmem:[#allocation5_spill] sm:$0xff] %v14257_v8 }
 0x615   : > { %2221 = vrot.lane.b32.xlu1 %v14086_v44, %s17182_s14  ;;  %2239 = vrot.lane.b32.xlu0 %v14117_v53, %s17188_s23 }
 0x617   : > { %v14263_v13 = vpop.permute.xlu1 %2033  ;;  %v14265_v25 = vpop.permute.xlu0 %2045 }
 0x618   : > { %10191 = vmatprep.subr.bf16.mxu1 %v14265_v25 }
 0x619   : > { %2323 = vrot.lane.b32.xlu1 %v14133_v46, %s17148_s21  ;;  %2289 = vrot.lane.b32.xlu0 %v14064_v15, %s17185_s22 }
 0x61a   : > { %10192 = vmatpush3.bf16.msra.mxu1 %v14086_v44 }
 0x61b   : > { %v2070_v50 = vpop.permute.xlu1 %2069  ;;  %v14273_v30 = vpop.permute.xlu0 %2057 }
 0x61d   : > { %2275 = vrot.lane.b32.xlu1 %v14157_v39, %s17181_s15  ;;  %2241 = vrot.lane.b32.xlu0 %v14064_v15, %s17188_s23 }
 0x61f   : > { %v14279_v57 = vpop.permute.xlu1 %2047  ;;  %v14281_v36 = vpop.permute.xlu0 %2093 }
 0x620   : > { %17189 = vst [vmem:[#allocation6_spill] sm:$0xff] %v14281_v36  ;;  %10193 = vmatprep.subr.bf16.mxu1 %v14279_v57 }
 0x621   : > { %2227 = vrot.lane.b32.xlu1 %v14157_v39, %s17182_s14  ;;  %2333 = vrot.lane.b32.xlu0 %v14117_v53, %s17180_s12 }
 0x622   : > { %10194 = vmatpush3.bf16.msra.mxu1 %v14100_v51 }
 0x623   : > { %10195 = vmatprep.subr.bf16.mxu1 %v14215_v26  ;;  %v14290_v23 = vpop.permute.xlu1 %2081  ;;  %v14292_v60 = vpop.permute.xlu0 %2105 }
 0x624   : > { %17190 = vst [vmem:[#allocation7_spill] sm:$0xff] %v14290_v23  ;;  %17191 = vst [vmem:[#allocation8_spill] sm:$0xff] %v14292_v60 }
 0x625   : > { %2285 = vrot.lane.b32.xlu1 %v14038_v62, %s17185_s22  ;;  %2293 = vrot.lane.b32.xlu0 %v14086_v44, %s17185_s22 }
 0x626   : > { %10196 = vmatpush3.bf16.msra.mxu1 %v14203_v49 }
 0x627   : > { %10197 = vmatprep.subr.bf16.mxu1 %v14241_v21  ;;  %v14300_v63 = vpop.permute.xlu1 %2167  ;;  %v14302_v27 = vpop.permute.xlu0 %2165 }
 0x629   : > { %2237 = vrot.lane.b32.xlu1 %v14038_v62, %s17188_s23  ;;  %2177 = vrot.lane.b32.xlu0 %v14100_v51, %s17150_s28 }
 0x62a   : > { %10198 = vmatpush3.bf16.msra.mxu1 %v14239_v1 }
 0x62b   : > { %10199 = vmatprep.subr.bf16.mxu1 %v14273_v30  ;;  %v14310_v32 = vpop.permute.xlu1 %2119  ;;  %v14312_v0 = vpop.permute.xlu0 %2117 }
 0x62c   : > { %17192 = vst [vmem:[#allocation9_spill] sm:$0xff] %v14310_v32 }
 0x62d   : > { %2327 = vrot.lane.b32.xlu1 %v14157_v39, %s17148_s21  ;;  %2129 = vrot.lane.b32.xlu0 %v14100_v51, %s17163_s26  ;;  %s12999_s26 = smov 48  }
 0x62e   : > { %10200 = vmatpush3.bf16.msra.mxu1 %v14263_v13 }
 0x62f   : > { %v14319_v28 = vpop.permute.xlu1 %2035  ;;  %v14321_v10 = vpop.permute.xlu0 %2059 }
 0x630   : > { %10201 = vmatprep.subr.bf16.mxu1 %v14321_v10 }
 0x631   : > { %2291 = vrot.lane.b32.xlu1 %v14133_v46, %s17185_s22  ;;  %2245 = vrot.lane.b32.xlu0 %v14086_v44, %s17188_s23 }
 0x632   : > { %10202 = vmatpush3.bf16.msra.mxu1 %v14319_v28 }
 0x633   : > { %10251 = vmatprep.subr.bf16.mxu1 %v14223_v20  ;;  %v14333_v55 = vpop.permute.xlu1 %2171  ;;  %v14335_v19 = vpop.permute.xlu0 %2169 }
 0x635   : > { %3403 = vmatmul.mubr.bf16.vlgmr.msra.gmra.mrb[24].mxu1 %v12615_v35  ;;  %2243 = vrot.lane.b32.xlu1 %v14133_v46, %s17188_s23  ;;  %v12633_v35 = vld [vmem:[%s17122_s3 + $0x274] ss:$52 sps:$4 sm:$0xff]  }
 0x636   : > { %2335 = vrot.lane.b32.xlu0 %v14133_v46, %s17180_s12  ;;  %10252 = vmatpush3.bf16.msra.mxu1 %v14213_v11 }
 0x637   : > { %10253 = vmatprep.subr.bf16.mxu1 %v14249_v17  ;;  %v14346_v24 = vpop.permute.xlu1 %2123  ;;  %v14348_v31 = vpop.permute.xlu0 %2121  ;;  %3410 = vmatprep.mubr.bf16.mxu1 %v12618_v40 }
 0x638   : > { %17193 = vst [vmem:[#allocation10_spill] sm:$0xff] %v14346_v24 }
 0x639   : > { %2309 = vrot.lane.b32.xlu1 %v14117_v53, %s12979_s16 }
 0x63a   : > { %2201 = vrot.lane.b32.xlu0 %v14100_v51, %s17152_s29  ;;  %10254 = vmatpush3.bf16.msra.mxu1 %v14247_v5  ;;  %s17277_s29 = smov 87  }
 0x63b   : > { %10255 = vmatprep.subr.bf16.mxu1 %v14281_v36  ;;  %v14359_v14 = vpop.permute.xlu1 %2175  ;;  %v14361_v41 = vpop.permute.xlu0 %2173 }
 0x63d   : > { %3411 = vmatmul.mubr.bf16.gmra.mrb[28].mxu1 %v12620_v37  ;;  %2295 = vrot.lane.b32.xlu1 %v14145_v12, %s17185_s22 }
 0x63e   : > { %2153 = vrot.lane.b32.xlu0 %v14100_v51, %s17154_s27  ;;  %10256 = vmatpush3.bf16.msra.mxu1 %v2070_v50  ;;  %s17196_s27 = smov 109   ;;  %v12632_v50 = vld [vmem:[%s17122_s3 + $0x208] ss:$52 sps:$4 sm:$0xff]  }
 0x63f   : > { %v14370_v34 = vpop.permute.xlu1 %2127  ;;  %v14372_v43 = vpop.permute.xlu0 %2125  ;;  %3418 = vmatprep.mubr.bf16.mxu1 %v12621_v7 }
 0x640   : > { %17194 = vst [vmem:[#allocation11_spill] sm:$0xff] %v14370_v34 }
 0x641   : > { %2247 = vrot.lane.b32.xlu1 %v14145_v12, %s17188_s23 }
 0x642   : > { %2337 = vrot.lane.b32.xlu0 %v14145_v12, %s17180_s12 }
 0x643   : > { %v14384_v18 = vpop.permute.xlu1 %2179  ;;  %v14386_v47 = vpop.permute.xlu0 %2189 }
 0x645   : > { %3419 = vmatmul.mubr.bf16.gmra.mrb[32].mxu1 %v12623_v48  ;;  %2311 = vrot.lane.b32.xlu1 %v14133_v46, %s12979_s16 }
 0x646   : > { %2339 = vrot.lane.b32.xlu0 %v14157_v39, %s17180_s12  ;;  %3426 = vmatprep.mubr.bf16.mxu1 %v12624_v22  ;;  %v12635_v22 = vld [vmem:[%s17122_s3 + $0x270] ss:$52 sps:$4 sm:$0xff]  }
 0x647   : > { %v14392_v45 = vpop.permute.xlu1 %2131  ;;  %v14394_v9 = vpop.permute.xlu0 %2141 }
 0x649   : > { %2299 = vrot.lane.b32.xlu1 %v14157_v39, %s17185_s22 }
 0x64a   : > { %2401 = vrot.lane.b32.xlu0 %v14038_v62, %s17195_s30 }
 0x64b   : > { %v14406_v4 = vpop.permute.xlu1 %2191  ;;  %v14408_v52 = vpop.permute.xlu0 %2193 }
 0x64c   : > { %v2205_v36 = vsel %vm985_vm14, %v14386_v47, %v14406_v4 }
 0x64d   : > { %3427 = vmatmul.mubr.bf16.gmra.mrb[36].mxu1 %v12626_v2  ;;  %2251 = vrot.lane.b32.xlu1 %v14157_v39, %s17188_s23 }
 0x64e   : > { %2377 = vrot.lane.b32.xlu0 %v14117_v53, %s17177_s24  ;;  %3434 = vmatprep.mubr.bf16.mxu1 %v12627_v42  ;;  %v12636_v42 = vld [vmem:[%s17122_s3 + $0x2dc] ss:$52 sps:$4 sm:$0xff]  }
 0x64f   : > { %v14414_v33 = vpop.permute.xlu1 %2143  ;;  %v14416_v16 = vpop.permute.xlu0 %2145 }
 0x651   : > { %2313 = vrot.lane.b32.xlu1 %v14145_v12, %s12979_s16 }
 0x652   : > { %2407 = vrot.lane.b32.xlu0 %v14133_v46, %s17195_s30 }
 0x653   : > { %v14428_v54 = vpop.permute.xlu1 %2195  ;;  %v14430_v29 = vpop.permute.xlu0 %2197 }
 0x654   : > { %v2206_v47 = vsel %vm985_vm14, %v14408_v52, %v14428_v54  ;;  %v12665_v52 = vld [vmem:[%s17122_s3 + $0x14] ss:$52 sps:$4 sm:$0xff]  }
 0x655   : > { %3435 = vmatmul.mubr.bf16.gmra.mrb[40].mxu1 %v12629_v38  ;;  %2315 = vrot.lane.b32.xlu1 %v14157_v39, %s12979_s16 }
 0x656   : > { %2347 = vrot.lane.b32.xlu0 %v14117_v53, %s17196_s27  ;;  %3442 = vmatprep.mubr.bf16.mxu1 %v12630_v59  ;;  %v12638_v59 = vld [vmem:[%s17122_s3 + $0x2d8] ss:$52 sps:$4 sm:$0xff]  }
 0x657   : > { %v14436_v11 = vpop.permute.xlu1 %2147  ;;  %v14438_v5 = vpop.permute.xlu0 %2149 }
 0x659   : > { %2403 = vrot.lane.b32.xlu1 %v14117_v53, %s17195_s30 }
 0x65a   : > { %2409 = vrot.lane.b32.xlu0 %v14086_v44, %s17195_s30 }
 0x65b   : > { %v14450_v40 = vpop.permute.xlu1 %2199  ;;  %v14452_v37 = vpop.permute.xlu0 %2095 }
 0x65c   : > { %17197 = vst [vmem:[#allocation12_spill] sm:$0xff] %v14452_v37  ;;  %10257 = vmatprep.subr.bf16.mxu1 %v14452_v37 }
 0x65d   : > { %3443 = vmatmul.mubr.bf16.gmra.mrb[44].mxu1 %v12632_v50  ;;  %2405 = vrot.lane.b32.xlu1 %v14064_v15, %s17195_s30 }
 0x65e   : > { %2349 = vrot.lane.b32.xlu0 %v14064_v15, %s17196_s27  ;;  %3450 = vmatprep.mubr.bf16.mxu1 %v12633_v35 }
 0x65f   : > { %v2072_v7 = vpop.permute.xlu1 %2071  ;;  %v14459_v48 = vpop.permute.xlu0 %2261 }
 0x660   : > { %10258 = vmatpush3.bf16.msra.mxu1 %v2072_v7  ;;  %v12641_v7 = vld [vmem:[%s17122_s3 + $0xc] ss:$52 sps:$4 sm:$0xff]  }
 0x661   : > { %2345 = vrot.lane.b32.xlu1 %v14038_v62, %s17196_s27  ;;  %10259 = vmatprep.subr.bf16.mxu1 %v14231_v56 }
 0x662   : > { %2381 = vrot.lane.b32.xlu0 %v14145_v12, %s17177_s24 }
 0x663   : > { %v14469_v2 = vpop.permute.xlu1 %2151  ;;  %v14471_v15 = vpop.permute.xlu0 %2107 }
 0x664   : > { %17198 = vst [vmem:[#allocation13_spill] sm:$0xff] %v14471_v15  ;;  %10260 = vmatpush3.bf16.msra.mxu1 %v14221_v58  ;;  %v12657_v58 = vld [vmem:[%s17122_s3 + $0x27c] ss:$52 sps:$4 sm:$0xff]  }
 0x665   : > { %3451 = vmatmul.mubr.bf16.gmra.mrb[48].mxu1 %v12635_v22  ;;  %2379 = vrot.lane.b32.xlu1 %v14133_v46, %s17177_s24 }
 0x666   : > { %2415 = vrot.lane.b32.xlu0 %v14157_v39, %s17195_s30  ;;  %10261 = vmatprep.subr.bf16.mxu1 %v14257_v8  ;;  %v12656_v8 = vld [vmem:[%s17122_s3 + $0x210] ss:$52 sps:$4 sm:$0xff]  }
 0x667   : > { %v14482_v62 = vpop.permute.xlu1 %2203  ;;  %v14484_v38 = vpop.permute.xlu0 %2213  ;;  %3458 = vmatprep.mubr.bf16.mxu1 %v12636_v42 }
 0x668   : > { %10262 = vmatpush3.bf16.msra.mxu1 %v14255_v61 }
 0x669   : > { %2411 = vrot.lane.b32.xlu1 %v14145_v12, %s17195_s30  ;;  %10263 = vmatprep.subr.bf16.mxu1 %v14292_v60 }
 0x66a   : > { %2273 = vrot.lane.b32.xlu0 %v14100_v51, %s17181_s15 }
 0x66b   : > { %v14495_v50 = vpop.permute.xlu1 %2155  ;;  %v14497_v35 = vpop.permute.xlu0 %2265 }
 0x66c   : > { %10264 = vmatpush3.bf16.msra.mxu1 %v14290_v23  ;;  %v2181_v23 = vsel %vm970_vm13, %v14302_v27, %v14300_v63  ;;  %v14531_v63 = vsel %vm940_vm11, %v14312_v0, %v14310_v32  ;;  %v14548_v0 = vsel %vm940_vm11, %v14348_v31, %v14346_v24  ;;  %v12653_v24 = vld [vmem:[%s17122_s3 + $0x1a8] ss:$52 sps:$4 sm:$0xff]  }
 0x66d   : > { %3459 = vmatmul.mubr.bf16.gmra.mrb[52].mxu1 %v12638_v59  ;;  %2351 = vrot.lane.b32.xlu1 %v14133_v46, %s17196_s27  ;;  %v12639_v59 = vld [vmem:[%s17122_s3 + $0x8] ss:$52 sps:$4 sm:$0xff]   ;;  %17200 = vst [vmem:[#allocation15_spill] sm:$0xff] %v14531_v63  ;;  %17201 = vst [vmem:[#allocation16_spill] sm:$0xff] %v14548_v0 }
 0x66e   : > { %2225 = vrot.lane.b32.xlu0 %v14100_v51, %s17182_s14  ;;  %10265 = vmatprep.subr.bf16.mxu1 %v14471_v15  ;;  %v12654_v32 = vld [vmem:[%s17122_s3 + $0x214] ss:$52 sps:$4 sm:$0xff]  }
 0x66f   : > { %v14508_v22 = vpop.permute.xlu1 %2083  ;;  %v14510_v42 = vpop.permute.xlu0 %2217  ;;  %3499 = vmatprep.mubr.bf16.mxu1 %v12641_v7 }
 0x670   : > { %17199 = vst [vmem:[#allocation14_spill] sm:$0xff] %v14508_v22  ;;  %10266 = vmatpush3.bf16.msra.mxu1 %v14508_v22  ;;  %v12642_v22 = vld [vmem:[%s17122_s3 + $0x74] ss:$52 sps:$4 sm:$0xff]  }
 0x671   : > { %2353 = vrot.lane.b32.xlu1 %v14086_v44, %s17196_s27  ;;  %10315 = vmatprep.subr.bf16.mxu1 %v2181_v23  ;;  %v2182_v44 = vsel %vm970_vm13, %v14335_v19, %v14333_v55  ;;  %v2183_v55 = vsel %vm970_vm13, %v14361_v41, %v14359_v14 }
 0x672   : > { %2355 = vrot.lane.b32.xlu0 %v14145_v12, %s17196_s27 }
 0x673   : > { %v14523_v15 = vpop.permute.xlu1 %2263  ;;  %v2322_v7 = vpop.permute.xlu0 %2321 }
 0x674   : > { %v2329_v61 = vsel %vm850_vm5, %v14205_v6, %v2322_v7 }
 0x675   : > { %3500 = vmatmul.mubr.bf16.vlgmr.msra.gmra.mrb[56].mxu1 %v12639_v59  ;;  %2383 = vrot.lane.b32.xlu1 %v14157_v39, %s17177_s24  ;;  %v12644_v59 = vld [vmem:[%s17122_s3 + $0x70] ss:$52 sps:$4 sm:$0xff]   ;;  %s17278_s24 = smov 126  }
 0x676   : > { %10316 = vmatpush3.bf16.msra.mxu1 %v14531_v63  ;;  %2389 = vrot.lane.b32.xlu0 %v14117_v53, %s17175_s25 }
 0x677   : > { %10317 = vmatprep.subr.bf16.mxu1 %v2182_v44  ;;  %v14541_v23 = vpop.permute.xlu1 %2215  ;;  %v14543_v27 = vpop.permute.xlu0 %2271  ;;  %3507 = vmatprep.mubr.bf16.mxu1 %v12642_v22  ;;  %v12645_v22 = vld [vmem:[%s17122_s3 + $0xdc] ss:$52 sps:$4 sm:$0xff]   ;;  %v14571_v44 = vsel %vm940_vm11, %v14372_v43, %v14370_v34  ;;  %v12647_v43 = vld [vmem:[%s17122_s3 + $0xd8] ss:$52 sps:$4 sm:$0xff]  }
 0x678   : > { %17202 = vst [vmem:[#allocation17_spill] sm:$0xff] %v14571_v44  ;;  %v12651_v34 = vld [vmem:[%s17122_s3 + $0x1ac] ss:$52 sps:$4 sm:$0xff]  }
 0x679   : > { %2359 = vrot.lane.b32.xlu1 %v14157_v39, %s17196_s27 }
 0x67a   : > { %10318 = vmatpush3.bf16.msra.mxu1 %v14548_v0  ;;  %2297 = vrot.lane.b32.xlu0 %v14100_v51, %s17185_s22  ;;  %v12650_v0 = vld [vmem:[%s17122_s3 + $0x140] ss:$52 sps:$4 sm:$0xff]  }
 0x67b   : > { %10319 = vmatprep.subr.bf16.mxu1 %v2183_v55  ;;  %v14561_v19 = vpop.permute.xlu1 %2267  ;;  %v14563_v31 = vpop.permute.xlu0 %2223 }
 0x67d   : > { %2365 = vrot.lane.b32.xlu1 %v14117_v53, %s12980_s19  ;;  %3508 = vmatmul.mubr.bf16.gmra.mrb[60].mxu1 %v12644_v59  ;;  %v12648_v53 = vld [vmem:[%s17122_s3 + $0x144] ss:$52 sps:$4 sm:$0xff]  }
 0x67e   : > { %10320 = vmatpush3.bf16.msra.mxu1 %v14571_v44  ;;  %2249 = vrot.lane.b32.xlu0 %v14100_v51, %s17188_s23 }
 0x67f   : > { %v14578_v14 = vpop.permute.xlu1 %2219  ;;  %v14580_v41 = vpop.permute.xlu0 %2325  ;;  %3515 = vmatprep.mubr.bf16.mxu1 %v12645_v22 }
 0x681   : > { %2413 = vrot.lane.b32.xlu1 %v14100_v51, %s17195_s30 }
 0x682   : > { %2391 = vrot.lane.b32.xlu0 %v14133_v46, %s17175_s25 }
 0x683   : > { %v14592_v59 = vpop.permute.xlu1 %2269  ;;  %v14594_v55 = vpop.permute.xlu0 %2287 }
 0x685   : > { %3516 = vmatmul.mubr.bf16.gmra.mrb[64].mxu1 %v12647_v43  ;;  %2435 = vrot.lane.b32.xlu1 %v2322_v7, %s17195_s30 }
 0x686   : > { %2357 = vrot.lane.b32.xlu0 %v14100_v51, %s17196_s27  ;;  %3523 = vmatprep.mubr.bf16.mxu1 %v12648_v53  ;;  %s17276_s27 = smov 88  }
 0x687   : > { %v14599_v22 = vpop.permute.xlu1 %2221  ;;  %v14601_v44 = vpop.permute.xlu0 %2239 }
 0x68b   : > { %v14609_v63 = vpop.permute.xlu1 %2323  ;;  %v14611_v43 = vpop.permute.xlu0 %2289 }
 0x68d   : > { %3524 = vmatmul.mubr.bf16.gmra.mrb[68].mxu1 %v12650_v0 }
 0x68e   : > { %3531 = vmatprep.mubr.bf16.mxu1 %v12651_v34 }
 0x68f   : > { %v14613_v51 = vpop.permute.xlu1 %2275  ;;  %v14615_v53 = vpop.permute.xlu0 %2241 }
 0x693   : > { %v14623_v60 = vpop.permute.xlu1 %2227  ;;  %v2334_v37 = vpop.permute.xlu0 %2333 }
 0x694   : > { %2451 = vrot.lane.b32.xlu0 %v2334_v37, %s17195_s30 }
 0x695   : > { %3532 = vmatmul.mubr.bf16.gmra.mrb[72].mxu1 %v12653_v24 }
 0x696   : > { %3539 = vmatprep.mubr.bf16.mxu1 %v12654_v32 }
 0x697   : > { %v14626_v34 = vpop.permute.xlu1 %2285  ;;  %v14628_v0 = vpop.permute.xlu0 %2293 }
 0x698   : > { %2433 = vrot.lane.b32.xlu0 %v2329_v61, %s17195_s30 }
 0x69b   : > { %v14639_v56 = vpop.permute.xlu1 %2237  ;;  %v2178_v32 = vpop.permute.xlu0 %2177 }
 0x69c   : > { %v2184_v24 = vsel %vm970_vm13, %v2178_v32, %v14384_v18  ;;  %v12659_v18 = vld [vmem:[%s17122_s3 + $0x278] ss:$52 sps:$4 sm:$0xff]  }
 0x69d   : > { %3540 = vmatmul.mubr.bf16.gmra.mrb[76].mxu1 %v12656_v8  ;;  %10321 = vmatprep.subr.bf16.mxu1 %v2184_v24  ;;  %v2157_v24 = vsel %vm955_vm12, %v14394_v9, %v14414_v33  ;;  %v2207_v9 = vsel %vm985_vm14, %v14430_v29, %v14450_v40 }
 0x69e   : > { %3547 = vmatprep.mubr.bf16.mxu1 %v12657_v58  ;;  %v12660_v58 = vld [vmem:[%s17122_s3 + $0x2e4] ss:$52 sps:$4 sm:$0xff]  }
 0x69f   : > { %v14643_v6 = vpop.permute.xlu1 %2327  ;;  %v2130_v61 = vpop.permute.xlu0 %2129 }
 0x6a0   : > { %v14647_v7 = vsel %vm940_vm11, %v2130_v61, %v14392_v45  ;;  %v2158_v61 = vsel %vm955_vm12, %v14416_v16, %v14436_v11  ;;  %v2159_v11 = vsel %vm955_vm12, %v14438_v5, %v14469_v2  ;;  %v12663_v5 = vld [vmem:[%s17122_s3 + $0x10] ss:$52 sps:$4 sm:$0xff]   ;;  %v2277_v2 = vsel %vm1030_vm1, %v14459_v48, %v14523_v15 }
 0x6a1   : > { %17203 = vst [vmem:[#allocation18_spill] sm:$0xff] %v14647_v7  ;;  %10322 = vmatpush3.bf16.msra.mxu1 %v14647_v7  ;;  %v12662_v7 = vld [vmem:[%s17122_s3 + $0x2e0] ss:$52 sps:$4 sm:$0xff]   ;;  %v2278_v48 = vsel %vm1030_vm1, %v14497_v35, %v14561_v19  ;;  %v2279_v35 = vsel %vm1030_vm1, %v14592_v59, %v14543_v27  ;;  %v2231_v27 = vsel %vm1000_vm15, %v14599_v22, %v14563_v31 }
 0x6a2   : > { %10323 = vmatprep.subr.bf16.mxu1 %v2205_v36  ;;  %v12672_v31 = vld [vmem:[%s17122_s3 + $0x14c] ss:$52 sps:$4 sm:$0xff]  }
 0x6a3   : > { %v14659_v8 = vpop.permute.xlu1 %2291  ;;  %v14661_v32 = vpop.permute.xlu0 %2245 }
 0x6a5   : > { %3548 = vmatmul.mubr.bf16.gmra.mrb[80].mxu1 %v12659_v18  ;;  %v2341_v18 = vsel %vm865_vm6, %v14215_v26, %v2334_v37 }
 0x6a6   : > { %10324 = vmatpush3.bf16.msra.mxu1 %v2157_v24  ;;  %3555 = vmatprep.mubr.bf16.mxu1 %v12660_v58  ;;  %v2230_v24 = vsel %vm1000_vm15, %v14510_v42, %v14578_v14  ;;  %v2330_v42 = vsel %vm850_vm5, %v14229_v3, %v14609_v63 }
 0x6a7   : > { %10325 = vmatprep.subr.bf16.mxu1 %v2206_v47  ;;  %v14669_v36 = vpop.permute.xlu1 %2243 }
 0x6a8   : > { %v2336_v4 = vpop.permute.xlu0 %2335 }
 0x6a9   : > { %v2342_v3 = vsel %vm865_vm6, %v14241_v21, %v2336_v4 }
 0x6aa   : > { %10326 = vmatpush3.bf16.msra.mxu1 %v2158_v61  ;;  %v2331_v61 = vsel %vm850_vm5, %v14265_v25, %v14580_v41  ;;  %v12674_v25 = vld [vmem:[%s17122_s3 + $0x148] ss:$52 sps:$4 sm:$0xff]  }
 0x6ab   : > { %10327 = vmatprep.subr.bf16.mxu1 %v2207_v9  ;;  %v2310_v33 = vpop.permute.xlu1 %2309 }
 0x6ac   : > { %v2202_v54 = vpop.permute.xlu0 %2201  ;;  %2419 = vrot.lane.b32.xlu1 %v2310_v33, %s17195_s30  ;;  %v2317_v16 = vsel %vm715_vm3, %v14203_v49, %v2310_v33 }
 0x6ad   : > { %3556 = vmatmul.mubr.bf16.gmra.mrb[84].mxu1 %v12662_v7  ;;  %2417 = vrot.lane.b32.xlu0 %v2317_v16, %s17195_s30  ;;  %v2208_v29 = vsel %vm985_vm14, %v2202_v54, %v14482_v62  ;;  %v12666_v62 = vld [vmem:[%s17122_s3 + $0x7c] ss:$52 sps:$4 sm:$0xff]  }
 0x6ae   : > { %10328 = vmatpush3.bf16.msra.mxu1 %v2159_v11  ;;  %3596 = vmatprep.mubr.bf16.mxu1 %v12665_v52 }
 0x6af   : > { %10329 = vmatprep.subr.bf16.mxu1 %v2208_v29  ;;  %v14692_v40 = vpop.permute.xlu1 %2295  ;;  %v12678_v29 = vld [vmem:[%s17122_s3 + $0x21c] ss:$52 sps:$4 sm:$0xff]  }
 0x6b0   : > { %v2154_v58 = vpop.permute.xlu0 %2153  ;;  %2449 = vrot.lane.b32.xlu1 %v2341_v18, %s17195_s30 }
 0x6b1   : > { %v2160_v49 = vsel %vm955_vm12, %v2154_v58, %v14495_v50  ;;  %v2229_v50 = vsel %vm1000_vm15, %v14484_v38, %v14541_v23  ;;  %v12668_v38 = vld [vmem:[%s17122_s3 + $0x78] ss:$52 sps:$4 sm:$0xff]  }
 0x6b2   : > { %10330 = vmatpush3.bf16.msra.mxu1 %v2160_v49  ;;  %v12669_v23 = vld [vmem:[%s17122_s3 + $0xe4] ss:$52 sps:$4 sm:$0xff]  }
 0x6b3   : > { %10379 = vmatprep.subr.bf16.mxu1 %v2277_v2  ;;  %v14708_v26 = vpop.permute.xlu1 %2247  ;;  %v12680_v49 = vld [vmem:[%s17122_s3 + $0x218] ss:$52 sps:$4 sm:$0xff]  }
 0x6b4   : > { %v2338_v37 = vpop.permute.xlu0 %2337  ;;  %2439 = vrot.lane.b32.xlu1 %v14609_v63, %s17195_s30 }
 0x6b5   : > { %3597 = vmatmul.mubr.bf16.vlgmr.msra.gmra.mrb[88].mxu1 %v12663_v5  ;;  %v2343_v9 = vsel %vm865_vm6, %v14273_v30, %v2338_v37  ;;  %v2332_v30 = vsel %vm850_vm5, %v14279_v57, %v14643_v6  ;;  %v12677_v57 = vld [vmem:[%s17122_s3 + $0x1b0] ss:$52 sps:$4 sm:$0xff]  }
 0x6b6   : > { %10380 = vmatpush3.bf16.msra.mxu1 %v2229_v50  ;;  %3604 = vmatprep.mubr.bf16.mxu1 %v12666_v62  ;;  %v12681_v5 = vld [vmem:[%s17122_s3 + $0x284] ss:$52 sps:$4 sm:$0xff]  }
 0x6b7   : > { %10381 = vmatprep.subr.bf16.mxu1 %v2278_v48  ;;  %v2312_v15 = vpop.permute.xlu1 %2311 }
 0x6b8   : > { %v14718_v7 = vpop.permute.xlu0 %2339  ;;  %2423 = vrot.lane.b32.xlu0 %v2312_v15, %s17195_s30  ;;  %2455 = vrot.lane.b32.xlu1 %v2336_v4, %s17195_s30  ;;  %v2318_v14 = vsel %vm715_vm3, %v14239_v1, %v2312_v15  ;;  %v12671_v1 = vld [vmem:[%s17122_s3 + $0xe0] ss:$52 sps:$4 sm:$0xff]   ;;  %v2301_v15 = vsel %vm1051_vm2, %v14626_v34, %v14594_v55  ;;  %v2253_v55 = vsel %vm1015_vm0, %v14639_v56, %v14601_v44  ;;  %v12686_v56 = vld [vmem:[%s17122_s3 + $0x2e8] ss:$52 sps:$4 sm:$0xff]  }
 0x6b9   : > { %v2344_v2 = vsel %vm865_vm6, %v14321_v10, %v14718_v7  ;;  %v2302_v34 = vsel %vm1051_vm2, %v14611_v43, %v14659_v8  ;;  %v2303_v43 = vsel %vm1051_vm2, %v14628_v0, %v14692_v40  ;;  %v12689_v8 = vld [vmem:[%s17122_s3 + $0x1c] ss:$52 sps:$4 sm:$0xff]  }
 0x6ba   : > { %10382 = vmatpush3.bf16.msra.mxu1 %v2230_v24 }
 0x6bb   : > { %10383 = vmatprep.subr.bf16.mxu1 %v2279_v35  ;;  %v14734_v19 = vpop.permute.xlu1 %2299 }
 0x6bc   : > { %v14741_v47 = vpop.permute.xlu0 %2401  ;;  %2437 = vrot.lane.b32.xlu0 %v2330_v42, %s17195_s30  ;;  %2421 = vrot.lane.b32.xlu1 %v2318_v14, %s17195_s30  ;;  %v17204_v42 = vld [vmem:[#allocation6_spill] sm:$0xff] }
 0x6bd   : > { %3605 = vmatmul.mubr.bf16.gmra.mrb[92].mxu1 %v12668_v38  ;;  %v2254_v38 = vsel %vm1015_vm0, %v14615_v53, %v14669_v36  ;;  %v2255_v53 = vsel %vm1015_vm0, %v14661_v32, %v14708_v26  ;;  %v12687_v26 = vld [vmem:[%s17122_s3 + $0x18] ss:$52 sps:$4 sm:$0xff]  }
 0x6be   : > { %10384 = vmatpush3.bf16.msra.mxu1 %v2231_v27  ;;  %3612 = vmatprep.mubr.bf16.mxu1 %v12669_v23 }
 0x6bf   : > { %v14748_v59 = vpop.permute.xlu1 %2251 }
 0x6c0   : > { %v14752_v63 = vpop.permute.xlu0 %2377  ;;  %2453 = vrot.lane.b32.xlu0 %v2342_v3, %s17195_s30  ;;  %2459 = vrot.lane.b32.xlu1 %v2338_v37, %s17195_s30  ;;  %v12692_v3 = vld [vmem:[%s17122_s3 + $0x80] ss:$52 sps:$4 sm:$0xff]  }
 0x6c3   : > { %v2314_v22 = vpop.permute.xlu1 %2313 }
 0x6c4   : > { %v14765_v21 = vpop.permute.xlu0 %2407  ;;  %2443 = vrot.lane.b32.xlu0 %v14580_v41, %s17195_s30  ;;  %2441 = vrot.lane.b32.xlu1 %v2331_v61, %s17195_s30  ;;  %v2319_v52 = vsel %vm715_vm3, %v14263_v13, %v2314_v22  ;;  %v12675_v41 = vld [vmem:[%s17122_s3 + $0x1b4] ss:$52 sps:$4 sm:$0xff]  }
 0x6c5   : > { %3613 = vmatmul.mubr.bf16.gmra.mrb[96].mxu1 %v12671_v1  ;;  %v17205_v1 = vld [vmem:[#allocation3_spill] sm:$0xff] }
 0x6c6   : > { %3620 = vmatprep.mubr.bf16.mxu1 %v12672_v31 }
 0x6c7   : > { %v2316_v4 = vpop.permute.xlu1 %2315 }
 0x6c8   : > { %v2348_v33 = vpop.permute.xlu0 %2347  ;;  %2457 = vrot.lane.b32.xlu0 %v2343_v9, %s17195_s30  ;;  %2425 = vrot.lane.b32.xlu1 %v2319_v52, %s17195_s30  ;;  %v2320_v50 = vsel %vm715_vm3, %v14319_v28, %v2316_v4  ;;  %v12684_v28 = vld [vmem:[%s17122_s3 + $0x2ec] ss:$52 sps:$4 sm:$0xff]   ;;  %v12695_v52 = vld [vmem:[%s17122_s3 + $0xe8] ss:$52 sps:$4 sm:$0xff]   ;;  %vm17208_vm3 = vcmask 547840  }
 0x6c9   : > { %vm17209_vm5 = vmmov %vm17208_vm3 }
 0x6ca   : > { %vm17210_vm6 = vmmov %vm17208_vm3 }
 0x6cb   : > { %v14782_v54 = vpop.permute.xlu1 %2403  ;;  %vm17211_vm11 = vmmov %vm17208_vm3 }
 0x6cc   : > { %v14787_v13 = vpop.permute.xlu0 %2409  ;;  %2445 = vrot.lane.b32.xlu0 %v2332_v30, %s17195_s30  ;;  %2447 = vrot.lane.b32.xlu1 %v14643_v6, %s17195_s30  ;;  %v17207_v30 = vld [vmem:[#allocation5_spill] sm:$0xff]  ;;  %vm17212_vm12 = vmmov %vm17208_vm3 }
 0x6cd   : > { %3621 = vmatmul.mubr.bf16.gmra.mrb[100].mxu1 %v12674_v25  ;;  %v12696_v25 = vld [vmem:[%s17122_s3 + $0x154] ss:$52 sps:$4 sm:$0xff]   ;;  %vm17213_vm13 = vmmov %vm17208_vm3 }
 0x6ce   : > { %3628 = vmatprep.mubr.bf16.mxu1 %v12675_v41  ;;  %vm17215_vm14 = vmmov %vm17208_vm3 }
 0x6cf   : > { %v14792_v16 = vpop.permute.xlu1 %2405 }
 0x6d0   : > { %v14794_v11 = vpop.permute.xlu0 %2349  ;;  %2427 = vrot.lane.b32.xlu0 %v2314_v22, %s17195_s30  ;;  %2367 = vrot.lane.b32.xlu1 %v14133_v46, %s12980_s19 }
 0x6d3   : > { %v2346_v6 = vpop.permute.xlu1 %2345 }
 0x6d4   : > { %v14805_v18 = vpop.permute.xlu0 %2381  ;;  %2393 = vrot.lane.b32.xlu0 %v14145_v12, %s17175_s25  ;;  %2463 = vrot.lane.b32.xlu1 %v14718_v7, %s17195_s30 }
 0x6d5   : > { %3629 = vmatmul.mubr.bf16.gmra.mrb[104].mxu1 %v12677_v57  ;;  %v2387_v14 = vsel %vm910_vm9, %v17204_v42, %v14805_v18 }
 0x6d6   : > { %3636 = vmatprep.mubr.bf16.mxu1 %v12678_v29 }
 0x6d7   : > { %v2380_v46 = vpop.permute.xlu1 %2379 }
 0x6d8   : > { %v14811_v58 = vpop.permute.xlu0 %2415  ;;  %2431 = vrot.lane.b32.xlu0 %v2316_v4, %s17195_s30  ;;  %2369 = vrot.lane.b32.xlu1 %v14145_v12, %s12980_s19  ;;  %v2386_v35 = vsel %vm910_vm9, %v14249_v17, %v2380_v46  ;;  %v17206_v4 = vld [vmem:[#allocation2_spill] sm:$0xff] }
 0x6db   : > { %v14830_v37 = vpop.permute.xlu1 %2411 }
 0x6dc   : > { %v2274_v62 = vpop.permute.xlu0 %2273  ;;  %2461 = vrot.lane.b32.xlu0 %v2344_v2, %s17195_s30  ;;  %2371 = vrot.lane.b32.xlu1 %v14157_v39, %s12980_s19 }
 0x6dd   : > { %v2280_v12 = vsel %vm1030_vm1, %v2274_v62, %v14613_v51  ;;  %3637 = vmatmul.mubr.bf16.gmra.mrb[108].mxu1 %v12680_v49  ;;  %v12683_v51 = vld [vmem:[%s17122_s3 + $0x280] ss:$52 sps:$4 sm:$0xff]   ;;  %v12698_v49 = vld [vmem:[%s17122_s3 + $0x150] ss:$52 sps:$4 sm:$0xff]  }
 0x6de   : > { %10385 = vmatprep.subr.bf16.mxu1 %v2280_v12  ;;  %3644 = vmatprep.mubr.bf16.mxu1 %v12681_v5  ;;  %v12699_v12 = vld [vmem:[%s17122_s3 + $0x1bc] ss:$52 sps:$4 sm:$0xff]  }
 0x6df   : > { %v2352_v7 = vpop.permute.xlu1 %2351 }
 0x6e0   : > { %v2226_v48 = vpop.permute.xlu0 %2225  ;;  %2395 = vrot.lane.b32.xlu0 %v14157_v39, %s17175_s25  ;;  %2429 = vrot.lane.b32.xlu1 %v2320_v50, %s17195_s30  ;;  %v2385_v39 = vsel %vm910_vm9, %v14223_v20, %v14752_v63  ;;  %v2361_v20 = vsel %vm1090_vm7, %v2346_v6, %v2348_v33  ;;  %v2362_v36 = vsel %vm1090_vm7, %v14794_v11, %v2352_v7  ;;  %s12997_s25 = smov 65  }
 0x6e1   : > { %v2232_v10 = vsel %vm1000_vm15, %v2226_v48, %v14623_v60  ;;  %v2545_v48 = vsel %vm17209_vm5, %v14741_v47, %v14782_v54  ;;  %v12702_v47 = vld [vmem:[%s17122_s3 + $0x224] ss:$52 sps:$4 sm:$0xff]   ;;  %vm17216_vm15 = vmmov %vm17208_vm3 }
 0x6e2   : > { %10386 = vmatpush3.bf16.msra.mxu1 %v2232_v10 }
 0x6e3   : > { %10387 = vmatprep.subr.bf16.mxu1 %v2301_v15  ;;  %v2354_v44 = vpop.permute.xlu1 %2353 }
 0x6e4   : > { %v2356_v60 = vpop.permute.xlu0 %2355  ;;  %2497 = vrot.lane.b32.xlu0 %v2385_v39, %s17195_s30  ;;  %2499 = vrot.lane.b32.xlu1 %v14752_v63, %s17195_s30  ;;  %v12693_v63 = vld [vmem:[%s17122_s3 + $0xec] ss:$52 sps:$4 sm:$0xff]  }
 0x6e5   : > { %3645 = vmatmul.mubr.bf16.gmra.mrb[112].mxu1 %v12683_v51 }
 0x6e6   : > { %10388 = vmatpush3.bf16.msra.mxu1 %v2253_v55  ;;  %3652 = vmatprep.mubr.bf16.mxu1 %v12684_v28  ;;  %v12701_v28 = vld [vmem:[%s17122_s3 + $0x1b8] ss:$52 sps:$4 sm:$0xff]  }
 0x6e7   : > { %10389 = vmatprep.subr.bf16.mxu1 %v2302_v34  ;;  %v14886_v17 = vpop.permute.xlu1 %2383 }
 0x6e8   : > { %v2390_v24 = vpop.permute.xlu0 %2389  ;;  %2465 = vrot.lane.b32.xlu0 %v2361_v20, %s17195_s30  ;;  %2467 = vrot.lane.b32.xlu1 %v2348_v33, %s17195_s30  ;;  %v12704_v20 = vld [vmem:[%s17122_s3 + $0x220] ss:$52 sps:$4 sm:$0xff]  }
 0x6e9   : > { %v2397_v31 = vsel %vm925_vm10, %v17205_v1, %v2390_v24 }
 0x6ea   : > { %10390 = vmatpush3.bf16.msra.mxu1 %v2254_v38 }
 0x6eb   : > { %10391 = vmatprep.subr.bf16.mxu1 %v2303_v43  ;;  %v14904_v27 = vpop.permute.xlu1 %2359 }
 0x6ec   : > { %v2298_v23 = vpop.permute.xlu0 %2297  ;;  %2501 = vrot.lane.b32.xlu0 %v2386_v35, %s17195_s30  ;;  %2503 = vrot.lane.b32.xlu1 %v2380_v46, %s17195_s30 }
 0x6ed   : > { %v2304_v0 = vsel %vm1051_vm2, %v2298_v23, %v14734_v19  ;;  %3653 = vmatmul.mubr.bf16.gmra.mrb[116].mxu1 %v12686_v56  ;;  %v12690_v19 = vld [vmem:[%s17122_s3 + $0x84] ss:$52 sps:$4 sm:$0xff]   ;;  %v12705_v56 = vld [vmem:[%s17122_s3 + $0x28c] ss:$52 sps:$4 sm:$0xff]  }
 0x6ee   : > { %10392 = vmatpush3.bf16.msra.mxu1 %v2255_v53  ;;  %3693 = vmatprep.mubr.bf16.mxu1 %v12689_v8 }
 0x6ef   : > { %10393 = vmatprep.subr.bf16.mxu1 %v2304_v0  ;;  %v2366_v22 = vpop.permute.xlu1 %2365  ;;  %v12707_v0 = vld [vmem:[%s17122_s3 + $0x288] ss:$52 sps:$4 sm:$0xff]  }
 0x6f0   : > { %v2250_v40 = vpop.permute.xlu0 %2249  ;;  %2471 = vrot.lane.b32.xlu1 %v2352_v7, %s17195_s30  ;;  %2469 = vrot.lane.b32.xlu0 %v2362_v36, %s17195_s30  ;;  %v2373_v9 = vsel %vm784_vm4, %v17206_v4, %v2366_v22 }
 0x6f1   : > { %v2256_v32 = vsel %vm1015_vm0, %v2250_v40, %v14748_v59  ;;  %v2363_v59 = vsel %vm1090_vm7, %v2354_v44, %v2356_v60  ;;  %vm17217_vm0 = vmmov %vm17208_vm3 }
 0x6f2   : > { %10394 = vmatpush3.bf16.msra.mxu1 %v2256_v32  ;;  %v12708_v32 = vld [vmem:[%s17122_s3 + $0x2f4] ss:$52 sps:$4 sm:$0xff]   ;;  %vm17220_vm1 = vmmov %vm17217_vm0 }
 0x6f3   : > { %v14933_v41 = vpop.permute.xlu1 %2413  ;;  %vm17221_vm2 = vmmov %vm17217_vm0 }
 0x6f4   : > { %2505 = vrot.lane.b32.xlu0 %v2387_v14, %s17195_s30  ;;  %2507 = vrot.lane.b32.xlu1 %v14805_v18, %s17195_s30  ;;  %v2392_v61 = vpop.permute.xlu0 %2391  ;;  %vm17223_vm8 = vmmov %vm17217_vm0 }
 0x6f5   : > { %3694 = vmatmul.mubr.bf16.vlgmr.msra.gmra.mrb[120].mxu1 %v12687_v26  ;;  %v2398_v11 = vsel %vm925_vm10, %v17207_v30, %v2392_v61  ;;  %vm17227_vm5 = vmmov %vm17217_vm0 }
 0x6f6   : > { %3701 = vmatprep.mubr.bf16.mxu1 %v12690_v19 }
 0x6f7   : > { %v2436_v6 = vpop.permute.xlu1 %2435 }
 0x6f8   : > { %2473 = vrot.lane.b32.xlu0 %v2363_v59, %s17195_s30  ;;  %2475 = vrot.lane.b32.xlu1 %v2356_v60, %s17195_s30  ;;  %v14928_v33 = vpop.permute.xlu0 %2357 }
 0x6fc   : > { %2511 = vrot.lane.b32.xlu1 %v14886_v17, %s17195_s30  ;;  %2513 = vrot.lane.b32.xlu0 %v2397_v31, %s17195_s30  ;;  %v12710_v31 = vld [vmem:[%s17122_s3 + $0x2f0] ss:$52 sps:$4 sm:$0xff]  }
 0x6fd   : > { %3702 = vmatmul.mubr.bf16.gmra.mrb[124].mxu1 %v12692_v3 }
 0x6fe   : > { %3709 = vmatprep.mubr.bf16.mxu1 %v12693_v63 }
 0x700   : > { %2479 = vrot.lane.b32.xlu1 %v14904_v27, %s17195_s30  ;;  %2481 = vrot.lane.b32.xlu0 %v2373_v9, %s17195_s30 }
 0x704   : > { %2515 = vrot.lane.b32.xlu1 %v2390_v24, %s17195_s30  ;;  %2517 = vrot.lane.b32.xlu0 %v2398_v11, %s17195_s30 }
 0x705   : > { %3710 = vmatmul.mubr.bf16.gmra.mrb[128].mxu1 %v12695_v52 }
 0x706   : > { %v14939_v57 = vpop.permute.xlu0 %2451  ;;  %3717 = vmatprep.mubr.bf16.mxu1 %v12696_v25 }
 0x708   : > { %2483 = vrot.lane.b32.xlu1 %v2366_v22, %s17195_s30  ;;  %v10203_v29 = vpop.f32.mrb[24].mxu1 }
 0x709   : > { %v10204_v18 = vpop.f32.mrb[25].mxu1 }
 0x70a   : > { %v2434_v46 = vpop.permute.xlu0 %2433  ;;  %v14945_v5 = vadd.f32 %v10204_v18, %v10203_v29  ;;  %v10206_v2 = vpop.f32.mrb[26].mxu1  ;;  %v2546_v29 = vsel %vm17211_vm11, %v14792_v16, %v14765_v21  ;;  %v2547_v21 = vsel %vm17213_vm13, %v14787_v13, %v14830_v37  ;;  %v2548_v13 = vsel %vm17216_vm15, %v14933_v41, %v14811_v58  ;;  %vm17232_vm11 = vmmov %vm17217_vm0 }
 0x70b   : > { %v2553_v62 = vsel %vm17208_vm3, %v2434_v46, %v2436_v6  ;;  %v10207_v50 = vpop.f32.mrb[27].mxu1  ;;  %vm17224_vm3 = vmmov %vm17217_vm0 }
 0x70c   : > { %2519 = vrot.lane.b32.xlu1 %v2392_v61, %s17195_s30  ;;  %10443 = vmatprep.subr.bf16.mxu1 %v2553_v62  ;;  %v14955_v10 = vadd.f32 %v10207_v50, %v10206_v2  ;;  %v12713_v61 = vld [vmem:[%s17122_s3 + $0x24] ss:$52 sps:$4 sm:$0xff]   ;;  %vm17241_vm13 = vmmov %vm17217_vm0 }
 0x70d   : > { %10444 = vmatpush3.bf16.msra.mxu1 %v2545_v48  ;;  %vm17249_vm15 = vmmov %vm17217_vm0 }
 0x70e   : > { %3718 = vmatmul.mubr.bf16.gmra.mrb[132].mxu1 %v12698_v49 }
 0x70f   : > { %3725 = vmatprep.mubr.bf16.mxu1 %v12699_v12 }
 0x710   : > { %v10209_v51 = vpop.f32.mrb[28].mxu1 }
 0x711   : > { %v10210_v15 = vpop.f32.mrb[29].mxu1 }
 0x712   : > { %v14960_v39 = vadd.f32 %v10210_v15, %v10209_v51  ;;  %v10212_v7 = vpop.f32.mrb[30].mxu1 }
 0x713   : > { %v10213_v54 = vpop.f32.mrb[31].mxu1 }
 0x714   : > { %v14965_v60 = vadd.f32 %v10213_v54, %v10212_v7 }
 0x716   : > { %3726 = vmatmul.mubr.bf16.gmra.mrb[136].mxu1 %v12701_v28 }
 0x717   : > { %3733 = vmatprep.mubr.bf16.mxu1 %v12702_v47 }
 0x718   : > { %v10215_v55 = vpop.f32.mrb[32].mxu1 }
 0x719   : > { %v10216_v34 = vpop.f32.mrb[33].mxu1 }
 0x71a   : > { %v14970_v24 = vadd.f32 %v10216_v34, %v10215_v55  ;;  %v10218_v38 = vpop.f32.mrb[34].mxu1 }
 0x71b   : > { %v10219_v44 = vpop.f32.mrb[35].mxu1 }
 0x71c   : > { %v14975_v43 = vadd.f32 %v10219_v44, %v10218_v38 }
 0x71e   : > { %v14977_v8 = vpop.permute.xlu1 %2419  ;;  %3734 = vmatmul.mubr.bf16.gmra.mrb[140].mxu1 %v12704_v20 }
 0x71f   : > { %3741 = vmatprep.mubr.bf16.mxu1 %v12705_v56  ;;  %v2418_v42 = vpop.permute.xlu0 %2417 }
 0x720   : > { %v10221_v35 = vpop.f32.mrb[36].mxu1  ;;  %v2549_v58 = vsel %vm17220_vm1, %v2418_v42, %v14977_v8  ;;  %vm17250_vm1 = vmmov %vm17217_vm0 }
 0x721   : > { %v10222_v23 = vpop.f32.mrb[37].mxu1 }
 0x722   : > { %v2450_v53 = vpop.permute.xlu1 %2449  ;;  %v14982_v36 = vadd.f32 %v10222_v23, %v10221_v35  ;;  %v10224_v40 = vpop.f32.mrb[38].mxu1 }
 0x723   : > { %v10225_v26 = vpop.f32.mrb[39].mxu1  ;;  %v2557_v35 = vsel %vm17217_vm0, %v2450_v53, %v14939_v57 }
 0x724   : > { %v14987_v19 = vadd.f32 %v10225_v26, %v10224_v40  ;;  %v17219_v26 = vld [vmem:[#allocation4_spill] sm:$0xff] }
 0x726   : > { %v2440_v14 = vpop.permute.xlu1 %2439  ;;  %3742 = vmatmul.mubr.bf16.gmra.mrb[144].mxu1 %v12707_v0 }
 0x727   : > { %3749 = vmatprep.mubr.bf16.mxu1 %v12708_v32 }
 0x728   : > { %v10227_v59 = vpop.f32.mrb[40].mxu1 }
 0x729   : > { %v10228_v3 = vpop.f32.mrb[41].mxu1 }
 0x72a   : > { %v2456_v63 = vpop.permute.xlu1 %2455  ;;  %v14989_v1 = vpop.permute.xlu0 %2423  ;;  %v14994_v22 = vadd.f32 %v10228_v3, %v10227_v59 }
 0x72b   : > { %v10230_v4 = vpop.f32.mrb[42].mxu1 }
 0x72c   : > { %v10231_v9 = vpop.f32.mrb[43].mxu1 }
 0x72d   : > { %v14999_v52 = vadd.f32 %v10231_v9, %v10230_v4 }
 0x72e   : > { %v2422_v25 = vpop.permute.xlu1 %2421  ;;  %v2438_v30 = vpop.permute.xlu0 %2437  ;;  %3750 = vmatmul.mubr.bf16.gmra.mrb[148].mxu1 %v12710_v31 }
 0x72f   : > { %v2554_v11 = vsel %vm17210_vm6, %v2438_v30, %v2440_v14  ;;  %3790 = vmatprep.mubr.bf16.mxu1 %v12713_v61  ;;  %v17222_v61 = vld [vmem:[#allocation12_spill] sm:$0xff]  ;;  %v2550_v8 = vsel %vm17223_vm8, %v2422_v25, %v14989_v1  ;;  %vm17231_vm6 = vmmov %vm17217_vm0 }
 0x730   : > { %10445 = vmatprep.subr.bf16.mxu1 %v2554_v11  ;;  %v10233_v6 = vpop.f32.mrb[44].mxu1  ;;  %v2388_v4 = vsel %vm910_vm9, %v17222_v61, %v14886_v17  ;;  %vm17225_vm9 = vmmov %vm17217_vm0 }
 0x731   : > { %10446 = vmatpush3.bf16.msra.mxu1 %v2546_v29  ;;  %v10234_v18 = vpop.f32.mrb[45].mxu1  ;;  %vm17253_vm8 = vmmov %vm17217_vm0 }
 0x732   : > { %v2460_v46 = vpop.permute.xlu1 %2459  ;;  %v2454_v49 = vpop.permute.xlu0 %2453  ;;  %v15005_v2 = vadd.f32 %v10234_v18, %v10233_v6  ;;  %v2364_v6 = vsel %vm1090_vm7, %v14928_v33, %v14904_v27  ;;  %vm17228_vm7 = vmmov %vm17217_vm0 }
 0x733   : > { %v10236_v62 = vpop.f32.mrb[46].mxu1  ;;  %v2558_v57 = vsel %vm17221_vm2, %v2454_v49, %v2456_v63  ;;  %vm17252_vm2 = vmmov %vm17217_vm0 }
 0x734   : > { %v10237_v12 = vpop.f32.mrb[47].mxu1 }
 0x735   : > { %v15007_v50 = vadd.f32 %v10237_v12, %v10236_v62  ;;  %v17226_v62 = vld [vmem:[#allocation8_spill] sm:$0xff] }
 0x736   : > { %v2442_v48 = vpop.permute.xlu1 %2441  ;;  %v2444_v51 = vpop.permute.xlu0 %2443 }
 0x737   : > { %v2555_v15 = vsel %vm17212_vm12, %v2442_v48, %v2444_v51  ;;  %vm3345_vm12 = vcmask 523264  }
 0x738   : > { %10447 = vmatprep.subr.bf16.mxu1 %v2555_v15  ;;  %v10239_v16 = vpop.f32.mrb[48].mxu1 }
 0x739   : > { %10448 = vmatpush3.bf16.msra.mxu1 %v2547_v21  ;;  %v10240_v28 = vpop.f32.mrb[49].mxu1 }
 0x73a   : > { %v2426_v7 = vpop.permute.xlu1 %2425  ;;  %v2458_v47 = vpop.permute.xlu0 %2457  ;;  %v15013_v54 = vadd.f32 %v10240_v28, %v10239_v16  ;;  %v17229_v28 = vld [vmem:[#allocation7_spill] sm:$0xff] }
 0x73b   : > { %v10242_v55 = vpop.f32.mrb[50].mxu1  ;;  %v2559_v63 = vsel %vm17224_vm3, %v2458_v47, %v2460_v46  ;;  %v12711_v47 = vld [vmem:[%s17122_s3 + $0x20] ss:$52 sps:$4 sm:$0xff]   ;;  %vm17255_vm3 = vmmov %vm17217_vm0 }
 0x73c   : > { %17214 = vst [vmem:[#allocation6_spill] sm:$0xff] %v15013_v54  ;;  %v10243_v34 = vpop.f32.mrb[51].mxu1 }
 0x73d   : > { %v15015_v20 = vadd.f32 %v10243_v34, %v10242_v55 }
 0x73e   : > { %v2448_v38 = vpop.permute.xlu1 %2447  ;;  %v2446_v56 = vpop.permute.xlu0 %2445 }
 0x73f   : > { %v2556_v44 = vsel %vm17215_vm14, %v2446_v56, %v2448_v38  ;;  %v12714_v38 = vld [vmem:[%s17122_s3 + $0x8c] ss:$52 sps:$4 sm:$0xff]   ;;  %vm17243_vm14 = vmmov %vm17217_vm0 }
 0x740   : > { %10449 = vmatprep.subr.bf16.mxu1 %v2556_v44  ;;  %v10245_v37 = vpop.f32.mrb[52].mxu1 }
 0x741   : > { %10450 = vmatpush3.bf16.msra.mxu1 %v2548_v13  ;;  %v10246_v23 = vpop.f32.mrb[53].mxu1 }
 0x742   : > { %v2368_v0 = vpop.permute.xlu1 %2367  ;;  %10451 = vmatprep.subr.bf16.mxu1 %v2557_v35  ;;  %v2428_v40 = vpop.permute.xlu0 %2427  ;;  %v15023_v32 = vadd.f32 %v10246_v23, %v10245_v37  ;;  %v17230_v37 = vld [vmem:[#allocation13_spill] sm:$0xff] }
 0x743   : > { %2487 = vrot.lane.b32.xlu1 %v2368_v0, %s17195_s30  ;;  %v2374_v14 = vsel %vm784_vm4, %v17219_v26, %v2368_v0  ;;  %v10248_v59 = vpop.f32.mrb[54].mxu1  ;;  %v2551_v1 = vsel %vm17225_vm9, %v2426_v7, %v2428_v40  ;;  %vm17256_vm9 = vmmov %vm17217_vm0 }
 0x744   : > { %17218 = vst [vmem:[#allocation3_spill] sm:$0xff] %v15023_v32  ;;  %2485 = vrot.lane.b32.xlu0 %v2374_v14, %s17195_s30  ;;  %v10249_v41 = vpop.f32.mrb[55].mxu1 }
 0x745   : > { %10452 = vmatpush3.bf16.msra.mxu1 %v2549_v58  ;;  %v15032_v53 = vadd.f32 %v10249_v41, %v10248_v59  ;;  %v17233_v41 = vld [vmem:[#allocation9_spill] sm:$0xff] }
 0x746   : > { %v2464_v3 = vpop.permute.xlu1 %2463  ;;  %10453 = vmatprep.subr.bf16.mxu1 %v2558_v57  ;;  %v2394_v31 = vpop.permute.xlu0 %2393  ;;  %v17234_v57 = vld [vmem:[#allocation14_spill] sm:$0xff] }
 0x747   : > { %2523 = vrot.lane.b32.xlu1 %v2394_v31, %s17195_s30  ;;  %v2399_v12 = vsel %vm925_vm10, %v17226_v62, %v2394_v31  ;;  %v12716_v31 = vld [vmem:[%s17122_s3 + $0x88] ss:$52 sps:$4 sm:$0xff]  }
 0x748   : > { %2509 = vrot.lane.b32.xlu0 %v2388_v4, %s17195_s30  ;;  %v10267_v42 = vpop.f32.mrb[56].mxu1 }
 0x749   : > { %10454 = vmatpush3.bf16.msra.mxu1 %v2550_v8  ;;  %v10268_v9 = vpop.f32.mrb[57].mxu1  ;;  %v12717_v8 = vld [vmem:[%s17122_s3 + $0xf4] ss:$52 sps:$4 sm:$0xff]  }
 0x74a   : > { %v2370_v30 = vpop.permute.xlu1 %2369  ;;  %10455 = vmatprep.subr.bf16.mxu1 %v2559_v63  ;;  %v2432_v11 = vpop.permute.xlu0 %2431  ;;  %v15042_v29 = vadd.f32 %v10268_v9, %v10267_v42 }
 0x74b   : > { %2491 = vrot.lane.b32.xlu1 %v2370_v30, %s17195_s30  ;;  %v10270_v17 = vpop.f32.mrb[58].mxu1  ;;  %v2375_v7 = vsel %vm784_vm4, %v17229_v28, %v2370_v30  ;;  %v17235_v30 = vld [vmem:[#allocation10_spill] sm:$0xff] }
 0x74c   : > { %2477 = vrot.lane.b32.xlu0 %v2364_v6, %s17195_s30  ;;  %v10271_v25 = vpop.f32.mrb[59].mxu1  ;;  %v17237_v6 = vld [vmem:[#allocation15_spill] sm:$0xff] }
 0x74d   : > { %10456 = vmatpush3.bf16.msra.mxu1 %v2551_v1  ;;  %v15050_v18 = vadd.f32 %v10271_v25, %v10270_v17 }
 0x74e   : > { %v2372_v46 = vpop.permute.xlu1 %2371  ;;  %v2462_v49 = vpop.permute.xlu0 %2461 }
 0x74f   : > { %v2560_v48 = vsel %vm17227_vm5, %v2462_v49, %v2464_v3  ;;  %v2376_v3 = vsel %vm784_vm4, %v17234_v57, %v2372_v46  ;;  %vm17236_vm4 = vmmov %vm17217_vm0  ;;  %v2729_v57 = vld [vmem:[%s17127_s8] sm:$0xff] }
 0x750   : > { %2521 = vrot.lane.b32.xlu0 %v2399_v12, %s17195_s30  ;;  %10457 = vmatprep.subr.bf16.mxu1 %v2560_v48  ;;  %v10273_v27 = vpop.f32.mrb[60].mxu1  ;;  %v17239_v12 = vld [vmem:[#allocation11_spill] sm:$0xff]  ;;  %v12719_v48 = vld [vmem:[%s17122_s3 + $0xf0] ss:$52 sps:$4 sm:$0xff]   ;;  %vm17257_vm5 = vmmov %vm17217_vm0 }
 0x751   : > { %v10274_v33 = vpop.f32.mrb[61].mxu1 }
 0x752   : > { %v2430_v51 = vpop.permute.xlu1 %2429  ;;  %v2396_v15 = vpop.permute.xlu0 %2395  ;;  %v15056_v21 = vadd.f32 %v10274_v33, %v10273_v27  ;;  %v12744_v33 = vld [vmem:[%s17122_s3 + $0x30] ss:$52 sps:$4 sm:$0xff]  }
 0x753   : > { %v2552_v16 = vsel %vm17228_vm7, %v2430_v51, %v2432_v11  ;;  %2527 = vrot.lane.b32.xlu1 %v2396_v15, %s17195_s30  ;;  %v10276_v55 = vpop.f32.mrb[62].mxu1  ;;  %v2400_v35 = vsel %vm925_vm10, %v17230_v37, %v2396_v15  ;;  %vm17238_vm10 = vmmov %vm17217_vm0  ;;  %v17240_v51 = vld [vmem:[#allocation16_spill] sm:$0xff]  ;;  %11001 = vmatprep.mubr.msk.bf16.mxu0 %vm3345_vm12, %v12744_v33 }
 0x754   : > { %2489 = vrot.lane.b32.xlu0 %v2375_v7, %s17195_s30  ;;  %10458 = vmatpush3.bf16.msra.mxu1 %v2552_v16  ;;  %v10277_v34 = vpop.f32.mrb[63].mxu1  ;;  %v12720_v16 = vld [vmem:[%s17122_s3 + $0x15c] ss:$52 sps:$4 sm:$0xff]   ;;  %vm17258_vm7 = vmmov %vm17217_vm0 }
 0x755   : > { %v15069_v56 = vadd.f32 %v10277_v34, %v10276_v55  ;;  %v17242_v34 = vld [vmem:[#allocation17_spill] sm:$0xff] }
 0x756   : > { %v2500_v44 = vpop.permute.xlu1 %2499  ;;  %v2498_v13 = vpop.permute.xlu0 %2497 }
 0x757   : > { %3791 = vmatmul.mubr.bf16.vlgmr.msra.gmra.mrb[152].mxu1 %v12711_v47  ;;  %2495 = vrot.lane.b32.xlu1 %v2372_v46, %s17195_s30  ;;  %v2569_v23 = vsel %vm17231_vm6, %v2498_v13, %v2500_v44  ;;  %vm17259_vm6 = vmmov %vm17217_vm0 }
 0x758   : > { %2525 = vrot.lane.b32.xlu0 %v2400_v35, %s17195_s30  ;;  %10507 = vmatprep.subr.bf16.mxu1 %v2569_v23  ;;  %v10279_v0 = vpop.f32.mrb[64].mxu1 }
 0x759   : > { %3798 = vmatprep.mubr.bf16.mxu1 %v12714_v38  ;;  %v10280_v40 = vpop.f32.mrb[65].mxu1  ;;  %v2730_v38 = vld [vmem:[%s17127_s8 + $0x8] sm:$0xff] }
 0x75a   : > { %v2468_v26 = vpop.permute.xlu1 %2467  ;;  %v2466_v14 = vpop.permute.xlu0 %2465  ;;  %v15076_v59 = vadd.f32 %v10280_v40, %v10279_v0 }
 0x75b   : > { %v2561_v58 = vsel %vm17232_vm11, %v2466_v14, %v2468_v26  ;;  %2531 = vrot.lane.b32.xlu1 %v17233_v41, %s17195_s30  ;;  %v10282_v61 = vpop.f32.mrb[66].mxu1  ;;  %v17244_v26 = vld [vmem:[#allocation18_spill] sm:$0xff]  ;;  %v2732_v14 = vld [vmem:[%s17127_s8 + $0x18] sm:$0xff]  ;;  %vm17260_vm11 = vmmov %vm17217_vm0 }
 0x75c   : > { %2493 = vrot.lane.b32.xlu0 %v2376_v3, %s17195_s30  ;;  %10508 = vmatpush3.bf16.msra.mxu1 %v2561_v58  ;;  %v10283_v4 = vpop.f32.mrb[67].mxu1  ;;  %v12723_v58 = vld [vmem:[%s17122_s3 + $0x1c4] ss:$52 sps:$4 sm:$0xff]  }
 0x75d   : > { %v15090_v42 = vadd.f32 %v10283_v4, %v10282_v61  ;;  %v2731_v4 = vld [vmem:[%s17127_s8 + $0x10] sm:$0xff] }
 0x75e   : > { %v2504_v63 = vpop.permute.xlu1 %2503  ;;  %v2502_v9 = vpop.permute.xlu0 %2501 }
 0x75f   : > { %3799 = vmatmul.mubr.bf16.gmra.mrb[156].mxu1 %v12716_v31  ;;  %2535 = vrot.lane.b32.xlu1 %v17235_v30, %s17195_s30  ;;  %v2570_v11 = vsel %vm17236_vm4, %v2502_v9, %v2504_v63  ;;  %v2734_v31 = vld [vmem:[%s17127_s8 + $0x28] sm:$0xff]  ;;  %v12725_v9 = vld [vmem:[%s17122_s3 + $0x1c0] ss:$52 sps:$4 sm:$0xff]   ;;  %vm17261_vm4 = vmmov %vm17217_vm0 }
 0x760   : > { %2529 = vrot.lane.b32.xlu0 %v17237_v6, %s17195_s30  ;;  %10509 = vmatprep.subr.bf16.mxu1 %v2570_v11  ;;  %v10285_v17 = vpop.f32.mrb[68].mxu1  ;;  %v2736_v11 = vld [vmem:[%s17127_s8 + $0x38] sm:$0xff]  ;;  %v12726_v6 = vld [vmem:[%s17122_s3 + $0x22c] ss:$52 sps:$4 sm:$0xff]  }
 0x761   : > { %3806 = vmatprep.mubr.bf16.mxu1 %v12717_v8  ;;  %v10286_v1 = vpop.f32.mrb[69].mxu1 }
 0x762   : > { %v2472_v25 = vpop.permute.xlu1 %2471  ;;  %v2470_v46 = vpop.permute.xlu0 %2469  ;;  %v15097_v49 = vadd.f32 %v10286_v1, %v10285_v17  ;;  %v2733_v1 = vld [vmem:[%s17127_s8 + $0x20] sm:$0xff] }
 0x763   : > { %v2562_v62 = vsel %vm17238_vm10, %v2470_v46, %v2472_v25  ;;  %2539 = vrot.lane.b32.xlu1 %v17239_v12, %s17195_s30  ;;  %v10288_v27 = vpop.f32.mrb[70].mxu1  ;;  %v2738_v46 = vld [vmem:[%s17127_s8 + $0x48] sm:$0xff]  ;;  %v2735_v12 = vld [vmem:[%s17127_s8 + $0x30] sm:$0xff]  ;;  %vm17262_vm10 = vmmov %vm17217_vm0 }
 0x764   : > { %2533 = vrot.lane.b32.xlu0 %v17240_v51, %s17195_s30  ;;  %10510 = vmatpush3.bf16.msra.mxu1 %v2562_v62  ;;  %v10289_v15 = vpop.f32.mrb[71].mxu1  ;;  %v12728_v51 = vld [vmem:[%s17122_s3 + $0x228] ss:$52 sps:$4 sm:$0xff]  }
 0x765   : > { %v15113_v28 = vadd.f32 %v10289_v15, %v10288_v27 }
 0x766   : > { %v2508_v7 = vpop.permute.xlu1 %2507  ;;  %v2506_v47 = vpop.permute.xlu0 %2505 }
 0x767   : > { %3807 = vmatmul.mubr.bf16.gmra.mrb[160].mxu1 %v12719_v48  ;;  %2543 = vrot.lane.b32.xlu1 %v14392_v45, %s17195_s30  ;;  %v2571_v55 = vsel %vm17241_vm13, %v2506_v47, %v2508_v7  ;;  %v12722_v45 = vld [vmem:[%s17122_s3 + $0x158] ss:$52 sps:$4 sm:$0xff]   ;;  %v12729_v7 = vld [vmem:[%s17122_s3 + $0x294] ss:$52 sps:$4 sm:$0xff]   ;;  %vm17263_vm13 = vmmov %vm17217_vm0 }
 0x768   : > { %2537 = vrot.lane.b32.xlu0 %v17242_v34, %s17195_s30  ;;  %10511 = vmatprep.subr.bf16.mxu1 %v2571_v55  ;;  %v10291_v44 = vpop.f32.mrb[72].mxu1  ;;  %v2737_v55 = vld [vmem:[%s17127_s8 + $0x40] sm:$0xff]  ;;  %v2742_v34 = vld [vmem:[%s17127_s8 + $0x68] sm:$0xff] }
 0x769   : > { %3814 = vmatprep.mubr.bf16.mxu1 %v12720_v16  ;;  %v10292_v13 = vpop.f32.mrb[73].mxu1  ;;  %v2740_v16 = vld [vmem:[%s17127_s8 + $0x58] sm:$0xff] }
 0x76a   : > { %v2476_v37 = vpop.permute.xlu1 %2475  ;;  %v2474_v35 = vpop.permute.xlu0 %2473  ;;  %v15124_v23 = vadd.f32 %v10292_v13, %v10291_v44  ;;  %v2739_v44 = vld [vmem:[%s17127_s8 + $0x50] sm:$0xff] }
 0x76b   : > { %v2563_v0 = vsel %vm17243_vm14, %v2474_v35, %v2476_v37  ;;  %2752 = vperm.xlu1 %12322, %v2730_v38   ;;  %v10294_v40 = vpop.f32.mrb[74].mxu1  ;;  %vm9363_vm14 = vcmask 5120  }
 0x76c   : > { %2541 = vrot.lane.b32.xlu0 %v17244_v26, %s17195_s30  ;;  %10512 = vmatpush3.bf16.msra.mxu1 %v2563_v0  ;;  %v10295_v41 = vpop.f32.mrb[75].mxu1  ;;  %v12731_v0 = vld [vmem:[%s17122_s3 + $0x290] ss:$52 sps:$4 sm:$0xff]  }
 0x76d   : > { %v15141_v3 = vadd.f32 %v10295_v41, %v10294_v40  ;;  %v2744_v40 = vld [vmem:[%s17127_s8 + $0x78] sm:$0xff] }
 0x76e   : > { %v12732_v26 = vld [vmem:[%s17122_s3 + $0x2fc] ss:$52 sps:$4 sm:$0xff]  }
 0x76f   : > { %3815 = vmatmul.mubr.bf16.gmra.mrb[164].mxu1 %v12722_v45  ;;  %2762 = vperm.xlu1 %12322, %v2732_v14  }
 0x770   : > { %2747 = vperm.xlu0 %12321, %v2729_v57   ;;  %3822 = vmatprep.mubr.bf16.mxu1 %v12723_v58  ;;  %v10297_v61 = vpop.f32.mrb[76].mxu1  ;;  %v2741_v58 = vld [vmem:[%s17127_s8 + $0x60] sm:$0xff]  ;;  %v2743_v57 = vld [vmem:[%s17127_s8 + $0x70] sm:$0xff] }
 0x771   : > { %v10298_v8 = vpop.f32.mrb[77].mxu1 }
 0x772   : > { %v15149_v63 = vadd.f32 %v10298_v8, %v10297_v61  ;;  %v10300_v30 = vpop.f32.mrb[78].mxu1  ;;  %v12734_v8 = vld [vmem:[%s17122_s3 + $0x2f8] ss:$52 sps:$4 sm:$0xff]  }
 0x773   : > { %2772 = vperm.xlu1 %12322, %v2734_v31   ;;  %v10301_v17 = vpop.f32.mrb[79].mxu1 }
 0x774   : > { %2757 = vperm.xlu0 %12321, %v2731_v4   ;;  %v15163_v25 = vadd.f32 %v10301_v17, %v10300_v30 }
 0x777   : > { %3823 = vmatmul.mubr.bf16.gmra.mrb[168].mxu1 %v12725_v9  ;;  %2782 = vperm.xlu1 %12322, %v2736_v11   ;;  %v12737_v11 = vld [vmem:[%s17122_s3 + $0x2c] ss:$52 sps:$4 sm:$0xff]  }
 0x778   : > { %2767 = vperm.xlu0 %12321, %v2733_v1   ;;  %3830 = vmatprep.mubr.bf16.mxu1 %v12726_v6  ;;  %v10303_v62 = vpop.f32.mrb[80].mxu1 }
 0x779   : > { %v10304_v48 = vpop.f32.mrb[81].mxu1 }
 0x77a   : > { %v15171_v27 = vadd.f32 %v10304_v48, %v10303_v62  ;;  %v10306_v33 = vpop.f32.mrb[82].mxu1 }
 0x77b   : > { %2792 = vperm.xlu1 %12322, %v2738_v46   ;;  %v10307_v15 = vpop.f32.mrb[83].mxu1 }
 0x77c   : > { %17245 = vst [vmem:[#allocation2_spill] sm:$0xff] %v15171_v27  ;;  %2777 = vperm.xlu0 %12321, %v2735_v12   ;;  %v15182_v47 = vadd.f32 %v10307_v15, %v10306_v33  ;;  %v2512_v33 = vpop.permute.xlu1 %2511 }
 0x77f   : > { %3831 = vmatmul.mubr.bf16.gmra.mrb[172].mxu1 %v12728_v51  ;;  %2802 = vperm.xlu1 %12322, %v2740_v16  }
 0x780   : > { %2787 = vperm.xlu0 %12321, %v2737_v55   ;;  %3838 = vmatprep.mubr.bf16.mxu1 %v12729_v7  ;;  %v10309_v38 = vpop.f32.mrb[84].mxu1 }
 0x781   : > { %v10310_v13 = vpop.f32.mrb[85].mxu1 }
 0x782   : > { %v15193_v37 = vadd.f32 %v10310_v13, %v10309_v38  ;;  %v10312_v35 = vpop.f32.mrb[86].mxu1 }
 0x783   : > { %2812 = vperm.xlu1 %12322, %v2742_v34   ;;  %v10313_v45 = vpop.f32.mrb[87].mxu1  ;;  %v2480_v34 = vpop.permute.xlu1 %2479 }
 0x784   : > { %17246 = vst [vmem:[#allocation5_spill] sm:$0xff] %v15193_v37  ;;  %2797 = vperm.xlu0 %12321, %v2739_v44   ;;  %v15204_v14 = vadd.f32 %v10313_v45, %v10312_v35 }
 0x786   : > { %17247 = vst [vmem:[#allocation4_spill] sm:$0xff] %v15204_v14 }
 0x787   : > { %3839 = vmatmul.mubr.bf16.gmra.mrb[176].mxu1 %v12731_v0  ;;  %2822 = vperm.xlu1 %12322, %v2744_v40   ;;  %v2516_v40 = vpop.permute.xlu1 %2515 }
 0x788   : > { %2807 = vperm.xlu0 %12321, %v2741_v58   ;;  %3846 = vmatprep.mubr.bf16.mxu1 %v12732_v26  ;;  %v10331_v41 = vpop.f32.mrb[88].mxu1  ;;  %v2514_v26 = vpop.permute.xlu0 %2513 }
 0x789   : > { %v10332_v31 = vpop.f32.mrb[89].mxu1 }
 0x78a   : > { %v15212_v61 = vadd.f32 %v10332_v31, %v10331_v41  ;;  %v10334_v4 = vpop.f32.mrb[90].mxu1 }
 0x78b   : > { %v10335_v9 = vpop.f32.mrb[91].mxu1 }
 0x78c   : > { %2817 = vperm.xlu0 %12321, %v2743_v57   ;;  %v15217_v30 = vadd.f32 %v10335_v9, %v10334_v4  ;;  %v2484_v4 = vpop.permute.xlu1 %2483  ;;  %v2482_v9 = vpop.permute.xlu0 %2481 }
 0x78f   : > { %3847 = vmatmul.mubr.bf16.gmra.mrb[180].mxu1 %v12734_v8 }
 0x790   : > { %v10337_v6 = vpop.f32.mrb[92].mxu1  ;;  %3887 = vmatprep.mubr.bf16.mxu1 %v12737_v11 }
 0x791   : > { %v10338_v17 = vpop.f32.mrb[93].mxu1 }
 0x792   : > { %v15222_v1 = vadd.f32 %v10338_v17, %v10337_v6  ;;  %v10340_v46 = vpop.f32.mrb[94].mxu1  ;;  %v2520_v17 = vpop.permute.xlu1 %2519 }
 0x793   : > { %v10341_v62 = vpop.f32.mrb[95].mxu1 }
 0x794   : > { %v15224_v12 = vadd.f32 %v10341_v62, %v10340_v46  ;;  %v2518_v62 = vpop.permute.xlu0 %2517 }
 0x798   : > { %v10343_v48 = vpop.f32.mrb[96].mxu1 }
 0x799   : > { %v10344_v51 = vpop.f32.mrb[97].mxu1 }
 0x79a   : > { %v15226_v15 = vadd.f32 %v10344_v51, %v10343_v48  ;;  %v10346_v16 = vpop.f32.mrb[98].mxu1 }
 0x79b   : > { %v10347_v7 = vpop.f32.mrb[99].mxu1 }
 0x79c   : > { %v15228_v55 = vadd.f32 %v10347_v7, %v10346_v16 }
 0x7a0   : > { %v10349_v38 = vpop.f32.mrb[100].mxu1 }
 0x7a1   : > { %v10350_v44 = vpop.f32.mrb[101].mxu1 }
 0x7a2   : > { %v15230_v13 = vadd.f32 %v10350_v44, %v10349_v38  ;;  %v10352_v35 = vpop.f32.mrb[102].mxu1 }
 0x7a3   : > { %v10353_v0 = vpop.f32.mrb[103].mxu1 }
 0x7a4   : > { %v15232_v45 = vadd.f32 %v10353_v0, %v10352_v35 }
 0x7a8   : > { %v10355_v58 = vpop.f32.mrb[104].mxu1 }
 0x7a9   : > { %v10356_v41 = vpop.f32.mrb[105].mxu1 }
 0x7aa   : > { %v15234_v57 = vadd.f32 %v10356_v41, %v10355_v58  ;;  %v10358_v31 = vpop.f32.mrb[106].mxu1 }
 0x7ab   : > { %v10359_v8 = vpop.f32.mrb[107].mxu1 }
 0x7ac   : > { %v15236_v11 = vadd.f32 %v10359_v8, %v10358_v31 }
 0x7b0   : > { %v10361_v6 = vpop.f32.mrb[108].mxu1 }
 0x7b1   : > { %v10362_v46 = vpop.f32.mrb[109].mxu1 }
 0x7b2   : > { %v15238_v48 = vadd.f32 %v10362_v46, %v10361_v6  ;;  %v10364_v51 = vpop.f32.mrb[110].mxu1 }
 0x7b3   : > { %v10365_v16 = vpop.f32.mrb[111].mxu1 }
 0x7b4   : > { %v15240_v7 = vadd.f32 %v10365_v16, %v10364_v51  ;;  %v2573_v51 = vsel %vm17250_vm1, %v2514_v26, %v2516_v40 }
 0x7b5   : > { %v2488_v38 = vpop.permute.xlu1 %2487 }
 0x7b6   : > { %v2486_v44 = vpop.permute.xlu0 %2485 }
 0x7b7   : > { %v2566_v40 = vsel %vm17255_vm3, %v2486_v44, %v2488_v38 }
 0x7b8   : > { %v10367_v35 = vpop.f32.mrb[112].mxu1 }
 0x7b9   : > { %v10368_v0 = vpop.f32.mrb[113].mxu1  ;;  %v2524_v31 = vpop.permute.xlu1 %2523 }
 0x7ba   : > { %v2510_v58 = vpop.permute.xlu0 %2509  ;;  %v15242_v41 = vadd.f32 %v10368_v0, %v10367_v35  ;;  %v10370_v37 = vpop.f32.mrb[114].mxu1 }
 0x7bb   : > { %v2572_v8 = vsel %vm17249_vm15, %v2510_v58, %v2512_v33  ;;  %v10371_v32 = vpop.f32.mrb[115].mxu1  ;;  %v2565_v33 = vsel %vm17252_vm2, %v2482_v9, %v2484_v4 }
 0x7bc   : > { %17248 = vst [vmem:[#allocation12_spill] sm:$0xff] %v15242_v41  ;;  %10513 = vmatprep.subr.bf16.mxu1 %v2572_v8  ;;  %v15245_v27 = vadd.f32 %v10371_v32, %v10370_v37  ;;  %v2574_v32 = vsel %vm17253_vm8, %v2518_v62, %v2520_v17 }
 0x7bd   : > { %v2492_v14 = vpop.permute.xlu1 %2491 }
 0x7be   : > { %v2478_v6 = vpop.permute.xlu0 %2477 }
 0x7bf   : > { %v2564_v46 = vsel %vm17217_vm0, %v2478_v6, %v2480_v34 }
 0x7c0   : > { %10514 = vmatpush3.bf16.msra.mxu1 %v2564_v46  ;;  %v10373_v16 = vpop.f32.mrb[116].mxu1 }
 0x7c1   : > { %10515 = vmatprep.subr.bf16.mxu1 %v2573_v51  ;;  %v10374_v54 = vpop.f32.mrb[117].mxu1 }
 0x7c2   : > { %v2522_v35 = vpop.permute.xlu0 %2521  ;;  %v15249_v0 = vadd.f32 %v10374_v54, %v10373_v16  ;;  %v10376_v41 = vpop.f32.mrb[118].mxu1 }
 0x7c3   : > { %v10377_v58 = vpop.f32.mrb[119].mxu1  ;;  %v2575_v26 = vsel %vm17256_vm9, %v2522_v35, %v2524_v31  ;;  %v12735_v35 = vld [vmem:[%s17122_s3 + $0x28] ss:$52 sps:$4 sm:$0xff]  }
 0x7c4   : > { %17251 = vst [vmem:[#allocation8_spill] sm:$0xff] %v15249_v0  ;;  %10516 = vmatpush3.bf16.msra.mxu1 %v2565_v33  ;;  %v15253_v37 = vadd.f32 %v10377_v58, %v10376_v41 }
 0x7c5   : > { %v2528_v34 = vpop.permute.xlu1 %2527  ;;  %10517 = vmatprep.subr.bf16.mxu1 %v2574_v32 }
 0x7c6   : > { %17254 = vst [vmem:[#allocation7_spill] sm:$0xff] %v15253_v37  ;;  %v2490_v8 = vpop.permute.xlu0 %2489 }
 0x7c7   : > { %v2567_v17 = vsel %vm17257_vm5, %v2490_v8, %v2492_v14  ;;  %v12738_v14 = vld [vmem:[%s17122_s3 + $0x94] ss:$52 sps:$4 sm:$0xff]  }
 0x7c8   : > { %10518 = vmatpush3.bf16.msra.mxu1 %v2566_v40  ;;  %v10395_v6 = vpop.f32.mrb[120].mxu1 }
 0x7c9   : > { %v2496_v54 = vpop.permute.xlu1 %2495  ;;  %10519 = vmatprep.subr.bf16.mxu1 %v2575_v26  ;;  %v10396_v46 = vpop.f32.mrb[121].mxu1 }
 0x7ca   : > { %v2526_v51 = vpop.permute.xlu0 %2525  ;;  %v15257_v4 = vadd.f32 %v10396_v46, %v10395_v6  ;;  %v10398_v9 = vpop.f32.mrb[122].mxu1 }
 0x7cb   : > { %v2576_v62 = vsel %vm17258_vm7, %v2526_v51, %v2528_v34  ;;  %v10399_v41 = vpop.f32.mrb[123].mxu1 }
 0x7cc   : > { %10520 = vmatpush3.bf16.msra.mxu1 %v2567_v17  ;;  %v15261_v16 = vadd.f32 %v10399_v41, %v10398_v9  ;;  %v12740_v9 = vld [vmem:[%s17122_s3 + $0x90] ss:$52 sps:$4 sm:$0xff]  }
 0x7cd   : > { %v2532_v38 = vpop.permute.xlu1 %2531  ;;  %10521 = vmatprep.subr.bf16.mxu1 %v2576_v62  ;;  %v12741_v62 = vld [vmem:[%s17122_s3 + $0xfc] ss:$52 sps:$4 sm:$0xff]  }
 0x7ce   : > { %v2494_v44 = vpop.permute.xlu0 %2493 }
 0x7cf   : > { %v2568_v31 = vsel %vm17259_vm6, %v2494_v44, %v2496_v54 }
 0x7d0   : > { %10522 = vmatpush3.bf16.msra.mxu1 %v2568_v31  ;;  %v10401_v33 = vpop.f32.mrb[124].mxu1 }
 0x7d1   : > { %v2536_v58 = vpop.permute.xlu1 %2535  ;;  %v10402_v32 = vpop.f32.mrb[125].mxu1 }
 0x7d2   : > { %v2530_v34 = vpop.permute.xlu0 %2529  ;;  %v15270_v8 = vadd.f32 %v10402_v32, %v10401_v33  ;;  %v10404_v40 = vpop.f32.mrb[126].mxu1 }
 0x7d3   : > { %3888 = vmatmul.mubr.bf16.vlgmr.msra.gmra.mrb[184].mxu1 %v12735_v35  ;;  %v2577_v26 = vsel %vm17260_vm11, %v2530_v34, %v2532_v38  ;;  %v10405_v6 = vpop.f32.mrb[127].mxu1 }
 0x7d4   : > { %10993 = vmatprep.subr.bf16.mxu0 %v2577_v26  ;;  %3895 = vmatprep.mubr.bf16.mxu1 %v12738_v14  ;;  %v15273_v54 = vadd.f32 %v10405_v6, %v10404_v40  ;;  %v12745_v6 = vld [vmem:[%s17122_s3 + $0x98] ss:$52 sps:$4 sm:$0xff]  }
 0x7d5   : > { %10994 = vmatpush3.bf16.msra.mxu0 %v2577_v26  ;;  %v2540_v17 = vpop.permute.xlu1 %2539  ;;  %v12743_v26 = vld [vmem:[%s17122_s3 + $0xf8] ss:$52 sps:$4 sm:$0xff]  }
 0x7d6   : > { %v2534_v46 = vpop.permute.xlu0 %2533 }
 0x7d7   : > { %v2578_v51 = vsel %vm17261_vm4, %v2534_v46, %v2536_v58  ;;  %v12746_v46 = vld [vmem:[%s17122_s3 + $0x164] ss:$52 sps:$4 sm:$0xff]  }
 0x7d8   : > { %10995 = vmatprep.subr.bf16.mxu0 %v2578_v51  ;;  %v10407_v41 = vpop.f32.mrb[128].mxu1 }
 0x7d9   : > { %10996 = vmatpush3.bf16.msra.mxu0 %v2578_v51  ;;  %v10408_v38 = vpop.f32.mrb[129].mxu1  ;;  %v2544_v32 = vpop.permute.xlu1 %2543  ;;  %v12749_v51 = vld [vmem:[%s17122_s3 + $0x100] ss:$52 sps:$4 sm:$0xff]  }
 0x7da   : > { %v2538_v44 = vpop.permute.xlu0 %2537  ;;  %v15282_v31 = vadd.f32 %v10408_v38, %v10407_v41  ;;  %v10410_v35 = vpop.f32.mrb[130].mxu1 }
 0x7db   : > { %3896 = vmatmul.mubr.bf16.gmra.mrb[188].mxu1 %v12740_v9  ;;  %v2579_v14 = vsel %vm17262_vm10, %v2538_v44, %v2540_v17  ;;  %v10411_v33 = vpop.f32.mrb[131].mxu1 }
 0x7dc   : > { %10997 = vmatprep.subr.bf16.mxu0 %v2579_v14  ;;  %3903 = vmatprep.mubr.bf16.mxu1 %v12741_v62  ;;  %v15285_v58 = vadd.f32 %v10411_v33, %v10410_v35  ;;  %v12748_v35 = vld [vmem:[%s17122_s3 + $0x160] ss:$52 sps:$4 sm:$0xff]  }
 0x7dd   : > { %10998 = vmatpush3.bf16.msra.mxu0 %v2579_v14  ;;  %v12750_v14 = vld [vmem:[%s17122_s3 + $0x168] ss:$52 sps:$4 sm:$0xff]   ;;  %v12751_v33 = vld [vmem:[%s17122_s3 + $0x1cc] ss:$52 sps:$4 sm:$0xff]  }
 0x7de   : > { %v2542_v34 = vpop.permute.xlu0 %2541 }
 0x7df   : > { %v2580_v40 = vsel %vm17263_vm13, %v2542_v34, %v2544_v32  ;;  %v12754_v32 = vld [vmem:[%s17122_s3 + $0x1d0] ss:$52 sps:$4 sm:$0xff]  }
 0x7e0   : > { %10999 = vmatprep.subr.bf16.mxu0 %v2580_v40 }
 0x7e1   : > { %11000 = vmatpush3.bf16.msra.mxu0 %v2580_v40  ;;  %v10413_v9 = vpop.f32.mrb[132].mxu1 }
 0x7e2   : > { %v10414_v17 = vpop.f32.mrb[133].mxu1 }
 0x7e3   : > { %3904 = vmatmul.mubr.bf16.gmra.mrb[192].mxu1 %v12743_v26  ;;  %v15300_v62 = vadd.f32 %v10414_v17, %v10413_v9  ;;  %v10416_v41 = vpop.f32.mrb[134].mxu1 }
 0x7e4   : > { %11002 = vmatmul.mubr.msk.bf16.vlgmr.msra.gmra.mrb[8].mxu0 %vm3345_vm12, %v12745_v6  ;;  %3911 = vmatprep.mubr.bf16.mxu1 %v12746_v46  ;;  %v10417_v38 = vpop.f32.mrb[135].mxu1 }
 0x7e5   : > { %11005 = vmatprep.mubr.msk.bf16.mxu0 %vm3345_vm12, %v12749_v51  ;;  %v15304_v44 = vadd.f32 %v10417_v38, %v10416_v41 }
 0x7e9   : > { %v10419_v34 = vpop.f32.mrb[136].mxu1 }
 0x7ea   : > { %v2753_v40 = vpop.permute.xlu1 %2752  ;;  %v10420_v26 = vpop.f32.mrb[137].mxu1 }
 0x7eb   : > { %v3408_v6 = vadd.f32 %v14955_v10, %v2753_v40  ;;  %3912 = vmatmul.mubr.bf16.gmra.mrb[196].mxu1 %v12748_v35  ;;  %v15319_v46 = vadd.f32 %v10420_v26, %v10419_v34  ;;  %v10422_v51 = vpop.f32.mrb[138].mxu1  ;;  %v12753_v35 = vld [vmem:[%s17122_s3 + $0x1c8] ss:$52 sps:$4 sm:$0xff]   ;;  %v12762_v34 = vld [vmem:[%s17122_s3 + $0x2a0] ss:$52 sps:$4 sm:$0xff]  }
 0x7ec   : > { %11006 = vmatmul.mubr.msk.bf16.gmra.mrb[12].mxu0 %vm3345_vm12, %v12750_v14  ;;  %3919 = vmatprep.mubr.bf16.mxu1 %v12751_v33  ;;  %v10423_v9 = vpop.f32.mrb[139].mxu1  ;;  %v12756_v33 = vld [vmem:[%s17122_s3 + $0x234] ss:$52 sps:$4 sm:$0xff]  }
 0x7ed   : > { %v3505_v17 = vadd.f32 %v15050_v18, %v3408_v6  ;;  %11009 = vmatprep.mubr.msk.bf16.mxu0 %vm3345_vm12, %v12754_v32  ;;  %v15324_v41 = vadd.f32 %v10423_v9, %v10422_v51  ;;  %v12755_v18 = vld [vmem:[%s17122_s3 + $0x238] ss:$52 sps:$4 sm:$0xff]  }
 0x7ee   : > { %v2763_v38 = vpop.permute.xlu1 %2762 }
 0x7ef   : > { %v3602_v0 = vadd.f32 %v15217_v30, %v3505_v17  ;;  %v3416_v37 = vadd.f32 %v14965_v60, %v2763_v38  ;;  %v2748_v10 = vpop.permute.xlu0 %2747 }
 0x7f0   : > { %v3405_v14 = vadd.f32 %v14945_v5, %v2748_v10 }
 0x7f1   : > { %v15339_v32 = vadd.f32 %v15261_v16, %v3602_v0  ;;  %v3513_v60 = vadd.f32 %v15069_v56, %v3416_v37  ;;  %v10425_v30 = vpop.f32.mrb[140].mxu1 }
 0x7f2   : > { %v3502_v5 = vadd.f32 %v15042_v29, %v3405_v14  ;;  %v2773_v40 = vpop.permute.xlu1 %2772  ;;  %v10426_v26 = vpop.f32.mrb[141].mxu1 }
 0x7f3   : > { %v3610_v6 = vadd.f32 %v15224_v12, %v3513_v60  ;;  %v3424_v51 = vadd.f32 %v14975_v43, %v2773_v40  ;;  %3920 = vmatmul.mubr.bf16.gmra.mrb[200].mxu1 %v12753_v35  ;;  %v2758_v9 = vpop.permute.xlu0 %2757  ;;  %v15348_v17 = vadd.f32 %v10426_v26, %v10425_v30  ;;  %v10428_v0 = vpop.f32.mrb[142].mxu1 }
 0x7f4   : > { %v3599_v56 = vadd.f32 %v15212_v61, %v3502_v5  ;;  %v3413_v37 = vadd.f32 %v14960_v39, %v2758_v9  ;;  %11010 = vmatmul.mubr.msk.bf16.gmra.mrb[16].mxu0 %vm3345_vm12, %v12755_v18  ;;  %3927 = vmatprep.mubr.bf16.mxu1 %v12756_v33  ;;  %v10429_v16 = vpop.f32.mrb[143].mxu1 }
 0x7f5   : > { %v15354_v29 = vadd.f32 %v15273_v54, %v3610_v6  ;;  %v3521_v12 = vadd.f32 %v15090_v42, %v3424_v51  ;;  %v10430_v38 = vadd.f32 %v10429_v16, %v10428_v0  ;;  %11013 = vmatprep.mubr.msk.bf16.mxu0 %vm3345_vm12, %v12762_v34  ;;  %v12758_v54 = vld [vmem:[%s17122_s3 + $0x230] ss:$52 sps:$4 sm:$0xff]  }
 0x7f6   : > { %v3510_v43 = vadd.f32 %v15056_v21, %v3413_v37  ;;  %v2783_v10 = vpop.permute.xlu1 %2782  ;;  %v15360_v35 = vadd.f32 %v15257_v4, %v3599_v56  ;;  %v12759_v21 = vld [vmem:[%s17122_s3 + $0x29c] ss:$52 sps:$4 sm:$0xff]   ;;  %v12761_v37 = vld [vmem:[%s17122_s3 + $0x298] ss:$52 sps:$4 sm:$0xff]  }
 0x7f7   : > { %v3618_v39 = vadd.f32 %v15228_v55, %v3521_v12  ;;  %v3432_v61 = vadd.f32 %v14987_v19, %v2783_v10  ;;  %v2768_v14 = vpop.permute.xlu0 %2767  ;;  %v12763_v4 = vld [vmem:[%s17122_s3 + $0x308] ss:$52 sps:$4 sm:$0xff]  }
 0x7f8   : > { %v3607_v42 = vadd.f32 %v15222_v1, %v3510_v43  ;;  %v3421_v18 = vadd.f32 %v14970_v24, %v2768_v14 }
 0x7f9   : > { %v15376_v55 = vadd.f32 %v15285_v58, %v3618_v39  ;;  %v3529_v19 = vadd.f32 %v15113_v28, %v3432_v61  ;;  %v10431_v33 = vpop.f32.mrb[144].mxu1 }
 0x7fa   : > { %v3518_v60 = vadd.f32 %v15076_v59, %v3421_v18  ;;  %v2793_v30 = vpop.permute.xlu1 %2792  ;;  %v10432_v1 = vpop.f32.mrb[145].mxu1  ;;  %v15381_v24 = vadd.f32 %v15270_v8, %v3607_v42 }
 0x7fb   : > { %v3626_v34 = vadd.f32 %v15232_v45, %v3529_v19  ;;  %v3440_v5 = vadd.f32 %v14999_v52, %v2793_v30  ;;  %3928 = vmatmul.mubr.bf16.gmra.mrb[204].mxu1 %v12758_v54  ;;  %v2778_v40 = vpop.permute.xlu0 %2777  ;;  %v10433_v26 = vadd.f32 %v10432_v1, %v10431_v33  ;;  %v10434_v6 = vpop.f32.mrb[146].mxu1  ;;  %v17266_v30 = vld [vmem:[#allocation2_spill] sm:$0xff] }
 0x7fc   : > { %v3615_v58 = vadd.f32 %v15226_v15, %v3518_v60  ;;  %v3429_v28 = vadd.f32 %v14982_v36, %v2778_v40  ;;  %3935 = vmatprep.mubr.bf16.mxu1 %v12759_v21  ;;  %v10435_v51 = vpop.f32.mrb[147].mxu1  ;;  %11014 = vmatmul.mubr.msk.bf16.gmra.mrb[20].mxu0 %vm3345_vm12, %v12763_v4  ;;  %v17265_v60 = vld [vmem:[#allocation4_spill] sm:$0xff]  ;;  %vm9359_vm12 = vcmask 7168  }
 0x7fd   : > { %v15389_v59 = vadd.f32 %v15304_v44, %v3626_v34  ;;  %v3537_v8 = vadd.f32 %v15141_v3, %v3440_v5  ;;  %v10436_v45 = vadd.f32 %v10435_v51, %v10434_v6  ;;  %v17268_v5 = vld [vmem:[#allocation12_spill] sm:$0xff]  ;;  %v17269_v6 = vld [vmem:[#allocation3_spill] sm:$0xff] }
 0x7fe   : > { %v3526_v52 = vadd.f32 %v15097_v49, %v3429_v28  ;;  %v2803_v9 = vpop.permute.xlu1 %2802  ;;  %v15394_v0 = vadd.f32 %v15282_v31, %v3615_v58  ;;  %v12764_v49 = vld [vmem:[%s17122_s3 + $0x304] ss:$52 sps:$4 sm:$0xff]  }
 0x7ff   : > { %v3634_v15 = vadd.f32 %v15236_v11, %v3537_v8  ;;  %v3448_v36 = vadd.f32 %v15007_v50, %v2803_v9  ;;  %v2788_v56 = vpop.permute.xlu0 %2787 }
 0x800   : > { %v3623_v44 = vadd.f32 %v15230_v13, %v3526_v52  ;;  %v3437_v3 = vadd.f32 %v14994_v22, %v2788_v56 }
 0x801   : > { %v15407_v31 = vadd.f32 %v15324_v41, %v3634_v15  ;;  %v3545_v11 = vadd.f32 %v15163_v25, %v3448_v36  ;;  %v10437_v16 = vpop.f32.mrb[148].mxu1 }
 0x802   : > { %v3534_v50 = vadd.f32 %v15124_v23, %v3437_v3  ;;  %v2813_v12 = vpop.permute.xlu1 %2812  ;;  %v10438_v43 = vpop.f32.mrb[149].mxu1  ;;  %v15412_v10 = vadd.f32 %v15300_v62, %v3623_v44 }
 0x803   : > { %v3642_v13 = vadd.f32 %v15240_v7, %v3545_v11  ;;  %v3456_v22 = vadd.f32 %v15015_v20, %v2813_v12  ;;  %3936 = vmatmul.mubr.bf16.gmra.mrb[208].mxu1 %v12761_v37  ;;  %v2798_v39 = vpop.permute.xlu0 %2797  ;;  %v10439_v61 = vadd.f32 %v10438_v43, %v10437_v16  ;;  %v10440_v14 = vpop.f32.mrb[150].mxu1 }
 0x804   : > { %v3631_v41 = vadd.f32 %v15234_v57, %v3534_v50  ;;  %v3445_v25 = vadd.f32 %v15005_v2, %v2798_v39  ;;  %v10441_v54 = vpop.f32.mrb[151].mxu1  ;;  %3943 = vmatprep.mubr.bf16.mxu1 %v12764_v49  ;;  %v12766_v2 = vld [vmem:[%s17122_s3 + $0x300] ss:$52 sps:$4 sm:$0xff]  }
 0x805   : > { %v15418_v23 = vadd.f32 %v10430_v38, %v3642_v13  ;;  %v3553_v42 = vadd.f32 %v15182_v47, %v3456_v22  ;;  %v10442_v62 = vadd.f32 %v10441_v54, %v10440_v14  ;;  %v17264_v38 = vld [vmem:[#allocation6_spill] sm:$0xff] }
 0x806   : > { %v3542_v18 = vadd.f32 %v15149_v63, %v3445_v25  ;;  %v2823_v7 = vpop.permute.xlu1 %2822  ;;  %v3728_v20 = vadd.f32 %v15319_v46, %v3631_v41 }
 0x807   : > { %v3650_v21 = vadd.f32 %v15245_v27, %v3553_v42  ;;  %v3464_v4 = vadd.f32 %v15032_v53, %v2823_v7  ;;  %v2808_v19 = vpop.permute.xlu0 %2807  ;;  %v17267_v27 = vld [vmem:[#allocation7_spill] sm:$0xff] }
 0x808   : > { %v3639_v57 = vadd.f32 %v15238_v48, %v3542_v18  ;;  %v3453_v33 = vadd.f32 %v17264_v38, %v2808_v19  ;;  %v17270_v48 = vld [vmem:[#allocation5_spill] sm:$0xff] }
 0x809   : > { %v15430_v47 = vadd.f32 %v10436_v45, %v3650_v21  ;;  %v3561_v63 = vadd.f32 %v17265_v60, %v3464_v4  ;;  %v17271_v45 = vld [vmem:[#allocation8_spill] sm:$0xff] }
 0x80a   : > { %v3550_v1 = vadd.f32 %v17266_v30, %v3453_v33  ;;  %v3736_v46 = vadd.f32 %v15348_v17, %v3639_v57 }
 0x80b   : > { %v3658_v34 = vadd.f32 %v17267_v27, %v3561_v63  ;;  %3944 = vmatmul.mubr.bf16.gmra.mrb[212].mxu1 %v12766_v2  ;;  %v2818_v53 = vpop.permute.xlu0 %2817 }
 0x80c   : > { %v3647_v40 = vadd.f32 %v17268_v5, %v3550_v1  ;;  %v3461_v58 = vadd.f32 %v17269_v6, %v2818_v53 }
 0x80d   : > { %v15438_v28 = vadd.f32 %v10442_v62, %v3658_v34 }
 0x80e   : > { %v3558_v51 = vadd.f32 %v17270_v48, %v3461_v58  ;;  %v3744_v8 = vadd.f32 %v10433_v26, %v3647_v40 }
 0x810   : > { %v3655_v52 = vadd.f32 %v17271_v45, %v3558_v51 }
 0x812   : > { %v3752_v9 = vadd.f32 %v10439_v61, %v3655_v52 }
 0x82a   : > { %v10459_v15 = vpop.f32.mrb[152].mxu1 }
 0x82b   : > { %v10460_v36 = vpop.f32.mrb[153].mxu1 }
 0x82c   : > { %v10461_v56 = vadd.f32 %v10460_v36, %v10459_v15  ;;  %v10462_v17 = vpop.f32.mrb[154].mxu1 }
 0x82d   : > { %v10463_v37 = vpop.f32.mrb[155].mxu1 }
 0x82e   : > { %v15443_v44 = vadd.f32 %v10461_v56, %v15360_v35  ;;  %v10464_v3 = vadd.f32 %v10463_v37, %v10462_v17 }
 0x830   : > { %v15446_v49 = vadd.f32 %v10464_v3, %v15339_v32 }
 0x832   : > { %v10465_v11 = vpop.f32.mrb[156].mxu1 }
 0x833   : > { %v10466_v16 = vpop.f32.mrb[157].mxu1 }
 0x834   : > { %v10467_v50 = vadd.f32 %v10466_v16, %v10465_v11  ;;  %v10468_v12 = vpop.f32.mrb[158].mxu1 }
 0x835   : > { %v10469_v26 = vpop.f32.mrb[159].mxu1 }
 0x836   : > { %v15449_v43 = vadd.f32 %v10467_v50, %v15381_v24  ;;  %v10470_v13 = vadd.f32 %v10469_v26, %v10468_v12 }
 0x838   : > { %v15452_v22 = vadd.f32 %v10470_v13, %v15354_v29 }
 0x83a   : > { %v10471_v39 = vpop.f32.mrb[160].mxu1 }
 0x83b   : > { %v10472_v61 = vpop.f32.mrb[161].mxu1 }
 0x83c   : > { %v10473_v35 = vadd.f32 %v10472_v61, %v10471_v39  ;;  %v10474_v14 = vpop.f32.mrb[162].mxu1 }
 0x83d   : > { %v10475_v41 = vpop.f32.mrb[163].mxu1 }
 0x83e   : > { %v15455_v32 = vadd.f32 %v10473_v35, %v15394_v0  ;;  %v10476_v25 = vadd.f32 %v10475_v41, %v10474_v14 }
 0x840   : > { %v15458_v54 = vadd.f32 %v10476_v25, %v15376_v55 }
 0x842   : > { %v10477_v42 = vpop.f32.mrb[164].mxu1 }
 0x843   : > { %v10478_v62 = vpop.f32.mrb[165].mxu1 }
 0x844   : > { %v10479_v24 = vadd.f32 %v10478_v62, %v10477_v42  ;;  %v10480_v18 = vpop.f32.mrb[166].mxu1 }
 0x845   : > { %v10481_v7 = vpop.f32.mrb[167].mxu1 }
 0x846   : > { %v15461_v29 = vadd.f32 %v10479_v24, %v15412_v10  ;;  %v10482_v21 = vadd.f32 %v10481_v7, %v10480_v18 }
 0x848   : > { %v15464_v4 = vadd.f32 %v10482_v21, %v15389_v59 }
 0x84a   : > { %v10483_v19 = vpop.f32.mrb[168].mxu1 }
 0x84b   : > { %v10484_v2 = vpop.f32.mrb[169].mxu1 }
 0x84c   : > { %v10485_v0 = vadd.f32 %v10484_v2, %v10483_v19  ;;  %v10486_v57 = vpop.f32.mrb[170].mxu1 }
 0x84d   : > { %v10487_v38 = vpop.f32.mrb[171].mxu1 }
 0x84e   : > { %v15466_v33 = vadd.f32 %v10485_v0, %v3728_v20  ;;  %v10488_v55 = vadd.f32 %v10487_v38, %v10486_v57 }
 0x850   : > { %v15469_v60 = vadd.f32 %v10488_v55, %v15407_v31 }
 0x852   : > { %v10489_v63 = vpop.f32.mrb[172].mxu1 }
 0x853   : > { %v10490_v30 = vpop.f32.mrb[173].mxu1 }
 0x854   : > { %v10491_v1 = vadd.f32 %v10490_v30, %v10489_v63  ;;  %v10492_v10 = vpop.f32.mrb[174].mxu1 }
 0x855   : > { %v10493_v27 = vpop.f32.mrb[175].mxu1 }
 0x856   : > { %v15471_v34 = vadd.f32 %v10491_v1, %v3736_v46  ;;  %v10494_v59 = vadd.f32 %v10493_v27, %v10492_v10 }
 0x858   : > { %v15474_v53 = vadd.f32 %v10494_v59, %v15418_v23 }
 0x85a   : > { %v10495_v5 = vpop.f32.mrb[176].mxu1 }
 0x85b   : > { %v10496_v40 = vpop.f32.mrb[177].mxu1 }
 0x85c   : > { %v10497_v6 = vadd.f32 %v10496_v40, %v10495_v5  ;;  %v10498_v20 = vpop.f32.mrb[178].mxu1 }
 0x85d   : > { %v10499_v58 = vpop.f32.mrb[179].mxu1 }
 0x85e   : > { %v15476_v48 = vadd.f32 %v10497_v6, %v3744_v8  ;;  %v10500_v31 = vadd.f32 %v10499_v58, %v10498_v20 }
 0x860   : > { %v15479_v51 = vadd.f32 %v10500_v31, %v15430_v47 }
 0x862   : > { %v10501_v45 = vpop.f32.mrb[180].mxu1 }
 0x863   : > { %v10502_v52 = vpop.f32.mrb[181].mxu1 }
 0x864   : > { %v10503_v15 = vadd.f32 %v10502_v52, %v10501_v45  ;;  %v10504_v46 = vpop.f32.mrb[182].mxu1 }
 0x865   : > { %v10505_v36 = vpop.f32.mrb[183].mxu1 }
 0x866   : > { %v15481_v56 = vadd.f32 %v10503_v15, %v3752_v9  ;;  %v10506_v23 = vadd.f32 %v10505_v36, %v10504_v46 }
 0x868   : > { %v15484_v17 = vadd.f32 %v10506_v23, %v15438_v28 }
 0x8a6   : > { %v10523_v37 = vpop.f32.mrb[184].mxu1 }
 0x8a7   : > { %v10524_v3 = vpop.f32.mrb[185].mxu1 }
 0x8a8   : > { %v10525_v11 = vadd.f32 %v10524_v3, %v10523_v37  ;;  %v10526_v8 = vpop.f32.mrb[186].mxu1 }
 0x8a9   : > { %v10527_v16 = vpop.f32.mrb[187].mxu1 }
 0x8aa   : > { %v10528_v50 = vadd.f32 %v10527_v16, %v10526_v8  ;;  %v3890_v47 = vadd.f32 %v10525_v11, %v15443_v44 }
 0x8ac   : > { %v3893_v12 = vadd.f32 %v10528_v50, %v15446_v49 }
 0x8ae   : > { %v10529_v26 = vpop.f32.mrb[188].mxu1 }
 0x8af   : > { %v10530_v13 = vpop.f32.mrb[189].mxu1 }
 0x8b0   : > { %v10531_v39 = vadd.f32 %v10530_v13, %v10529_v26  ;;  %v10532_v61 = vpop.f32.mrb[190].mxu1 }
 0x8b1   : > { %v10533_v9 = vpop.f32.mrb[191].mxu1 }
 0x8b2   : > { %v10534_v35 = vadd.f32 %v10533_v9, %v10532_v61  ;;  %v3898_v14 = vadd.f32 %v10531_v39, %v15449_v43 }
 0x8b4   : > { %v3901_v28 = vadd.f32 %v10534_v35, %v15452_v22 }
 0x8b6   : > { %v10535_v41 = vpop.f32.mrb[192].mxu1 }
 0x8b7   : > { %v10536_v25 = vpop.f32.mrb[193].mxu1  ;;  %v11003_v42 = vpop.f32.mrb[8].mxu0 }
 0x8b8   : > { %v10537_v62 = vadd.f32 %v10536_v25, %v10535_v41  ;;  %v15490_v24 = vadd.f32 %v11003_v42, %v3898_v14  ;;  %v10538_v18 = vpop.f32.mrb[194].mxu1  ;;  %v3986_v44 = vpop.f32.mrb[9].mxu0 }
 0x8b9   : > { %v15492_v7 = vadd.f32 %v3986_v44, %v3890_v47  ;;  %v10539_v49 = vpop.f32.mrb[195].mxu1  ;;  %v11004_v21 = vpop.f32.mrb[10].mxu0 }
 0x8ba   : > { %v10540_v19 = vadd.f32 %v10539_v49, %v10538_v18  ;;  %v15494_v2 = vadd.f32 %v11004_v21, %v3901_v28  ;;  %v3989_v0 = vpop.f32.mrb[11].mxu0  ;;  %v3906_v43 = vadd.f32 %v10537_v62, %v15455_v32  ;;  %v4051_v22 = vmax.f32 %v15490_v24, 0.0 }
 0x8bb   : > { %v15497_v57 = vadd.f32 %v3989_v0, %v3893_v12  ;;  %v4049_v63 = vmax.f32 %v15492_v7, 0.0 }
 0x8bc   : > { %v4052_v38 = vmax.f32 %v15494_v2, 0.0  ;;  %v3909_v55 = vadd.f32 %v10540_v19, %v15458_v54 }
 0x8bd   : > { %v4050_v30 = vmax.f32 %v15497_v57, 0.0 }
 0x8be   : > { %v12468_v1 = vpack.i.bf16 %v4052_v38, %v4051_v22  ;;  %v10541_v10 = vpop.f32.mrb[196].mxu1 }
 0x8bf   : > { %v12463_v32 = vpack.i.bf16 %v4050_v30, %v4049_v63  ;;  %v10542_v27 = vpop.f32.mrb[197].mxu1  ;;  %v11007_v59 = vpop.f32.mrb[12].mxu0 }
 0x8c0   : > { %v10543_v5 = vadd.f32 %v10542_v27, %v10541_v10  ;;  %v10544_v40 = vpop.f32.mrb[198].mxu1  ;;  %v4002_v54 = vpop.f32.mrb[13].mxu0  ;;  %12469 = vrot.lane.b32.xlu1 %v12468_v1, %s12979_s16 }
 0x8c1   : > { %v15513_v6 = vadd.f32 %v4002_v54, %v3906_v43  ;;  %v10545_v20 = vpop.f32.mrb[199].mxu1  ;;  %v11008_v58 = vpop.f32.mrb[14].mxu0  ;;  %12464 = vrot.lane.b32.xlu0 %v12463_v32, %s12979_s16 }
 0x8c2   : > { %v3914_v31 = vadd.f32 %v10543_v5, %v15461_v29  ;;  %v10546_v45 = vadd.f32 %v10545_v20, %v10544_v40  ;;  %v4005_v52 = vpop.f32.mrb[15].mxu0 }
 0x8c3   : > { %v15517_v15 = vadd.f32 %v4005_v52, %v3909_v55  ;;  %v4053_v23 = vmax.f32 %v15513_v6, 0.0 }
 0x8c4   : > { %v15519_v46 = vadd.f32 %v11007_v59, %v3914_v31  ;;  %v3917_v36 = vadd.f32 %v10546_v45, %v15464_v4 }
 0x8c5   : > { %v4054_v37 = vmax.f32 %v15517_v15, 0.0 }
 0x8c6   : > { %v15524_v3 = vadd.f32 %v11008_v58, %v3917_v36  ;;  %v10547_v11 = vpop.f32.mrb[200].mxu1  ;;  %v4055_v50 = vmax.f32 %v15519_v46, 0.0 }
 0x8c7   : > { %v12473_v29 = vpack.i.bf16 %v4054_v37, %v4053_v23  ;;  %v10548_v8 = vpop.f32.mrb[201].mxu1  ;;  %v11011_v16 = vpop.f32.mrb[16].mxu0 }
 0x8c8   : > { %v4056_v47 = vmax.f32 %v15524_v3, 0.0  ;;  %v10549_v12 = vadd.f32 %v10548_v8, %v10547_v11  ;;  %v10550_v4 = vpop.f32.mrb[202].mxu1  ;;  %v4018_v26 = vpop.f32.mrb[17].mxu0 }
 0x8c9   : > { %v10551_v13 = vpop.f32.mrb[203].mxu1  ;;  %12474 = vrot.lane.b32.xlu0 %v12473_v29, %s12979_s16  ;;  %v11012_v39 = vpop.f32.mrb[18].mxu0 }
 0x8ca   : > { %v12478_v61 = vpack.i.bf16 %v4056_v47, %v4055_v50  ;;  %v10552_v9 = vadd.f32 %v10551_v13, %v10550_v4  ;;  %v3922_v35 = vadd.f32 %v10549_v12, %v15466_v33  ;;  %v4021_v14 = vpop.f32.mrb[19].mxu0 }
 0x8cc   : > { %v15538_v28 = vadd.f32 %v4018_v26, %v3922_v35  ;;  %12479 = vrot.lane.b32.xlu1 %v12478_v61, %s12979_s16  ;;  %v3925_v41 = vadd.f32 %v10552_v9, %v15469_v60 }
 0x8ce   : > { %v15542_v25 = vadd.f32 %v4021_v14, %v3925_v41  ;;  %v10553_v42 = vpop.f32.mrb[204].mxu1  ;;  %v4057_v44 = vmax.f32 %v15538_v28, 0.0 }
 0x8cf   : > { %v10554_v62 = vpop.f32.mrb[205].mxu1  ;;  %v11015_v18 = vpop.f32.mrb[20].mxu0 }
 0x8d0   : > { %v4058_v49 = vmax.f32 %v15542_v25, 0.0  ;;  %v10555_v21 = vadd.f32 %v10554_v62, %v10553_v42  ;;  %v10556_v19 = vpop.f32.mrb[206].mxu1  ;;  %v4034_v0 = vpop.f32.mrb[21].mxu0 }
 0x8d1   : > { %v10557_v33 = vpop.f32.mrb[207].mxu1  ;;  %v11016_v43 = vpop.f32.mrb[22].mxu0 }
 0x8d2   : > { %v12483_v55 = vpack.i.bf16 %v4058_v49, %v4057_v44  ;;  %v3930_v60 = vadd.f32 %v10555_v21, %v15471_v34  ;;  %v10558_v1 = vadd.f32 %v10557_v33, %v10556_v19  ;;  %v4037_v10 = vpop.f32.mrb[23].mxu0 }
 0x8d4   : > { %v15551_v32 = vadd.f32 %v11011_v16, %v3930_v60  ;;  %v3933_v27 = vadd.f32 %v10558_v1, %v15474_v53  ;;  %12484 = vrot.lane.b32.xlu0 %v12483_v55, %s12979_s16 }
 0x8d6   : > { %v15555_v59 = vadd.f32 %v11012_v39, %v3933_v27  ;;  %v10559_v5 = vpop.f32.mrb[208].mxu1  ;;  %v4059_v54 = vmax.f32 %v15551_v32, 0.0 }
 0x8d7   : > { %v10560_v40 = vpop.f32.mrb[209].mxu1 }
 0x8d8   : > { %v4060_v20 = vmax.f32 %v15555_v59, 0.0  ;;  %v10561_v58 = vadd.f32 %v10560_v40, %v10559_v5  ;;  %v10562_v31 = vpop.f32.mrb[210].mxu1 }
 0x8d9   : > { %v10563_v45 = vpop.f32.mrb[211].mxu1 }
 0x8da   : > { %v12488_v34 = vpack.i.bf16 %v4060_v20, %v4059_v54  ;;  %v10564_v52 = vadd.f32 %v10563_v45, %v10562_v31  ;;  %v3938_v53 = vadd.f32 %v10561_v58, %v15476_v48 }
 0x8dc   : > { %v15564_v36 = vadd.f32 %v4034_v0, %v3938_v53  ;;  %12489 = vrot.lane.b32.xlu1 %v12488_v34, %s12979_s16  ;;  %v3941_v11 = vadd.f32 %v10564_v52, %v15479_v51 }
 0x8de   : > { %v15568_v29 = vadd.f32 %v4037_v10, %v3941_v11  ;;  %v10565_v8 = vpop.f32.mrb[212].mxu1  ;;  %v4061_v12 = vmax.f32 %v15564_v36, 0.0 }
 0x8df   : > { %v10566_v16 = vpop.f32.mrb[213].mxu1 }
 0x8e0   : > { %v4062_v4 = vmax.f32 %v15568_v29, 0.0  ;;  %v10567_v26 = vadd.f32 %v10566_v16, %v10565_v8  ;;  %v10568_v13 = vpop.f32.mrb[214].mxu1 }
 0x8e1   : > { %v10569_v39 = vpop.f32.mrb[215].mxu1 }
 0x8e2   : > { %v12493_v61 = vpack.i.bf16 %v4062_v4, %v4061_v12  ;;  %v3946_v48 = vadd.f32 %v10567_v26, %v15481_v56  ;;  %v10570_v9 = vadd.f32 %v10569_v39, %v10568_v13 }
 0x8e4   : > { %v4043_v35 = vadd.f32 %v11015_v18, %v3946_v48  ;;  %v3949_v14 = vadd.f32 %v10570_v9, %v15484_v17  ;;  %12494 = vrot.lane.b32.xlu0 %v12493_v61, %s12979_s16 }
 0x8e6   : > { %v4046_v51 = vadd.f32 %v11016_v43, %v3949_v14  ;;  %v4063_v41 = vmax.f32 %v4043_v35, 0.0 }
 0x8e8   : > { %v4064_v42 = vmax.f32 %v4046_v51, 0.0 }
 0x8ea   : > { %v12498_v62 = vpack.i.bf16 %v4064_v42, %v4063_v41 }
 0x8ec   : > { %12499 = vrot.lane.b32.xlu1 %v12498_v62, %s12979_s16 }
 0x932   : > { %v12470_v21 = vpop.permute.xlu1 %12469 }
 0x933   : > { %v12472_v19 = vunpack.i.h.bf16 %v12470_v21  ;;  %v12471_v0 = vunpack.i.l.bf16 %v12470_v21  ;;  %v12465_v33 = vpop.permute.xlu0 %12464 }
 0x934   : > { %v12467_v55 = vunpack.i.h.bf16 %v12465_v33  ;;  %v12466_v60 = vunpack.i.l.bf16 %v12465_v33 }
 0x935   : > { %v4132_v56 = vmax.f32 %v4052_v38, %v12472_v19  ;;  %v4131_v17 = vmax.f32 %v4051_v22, %v12471_v0 }
 0x936   : > { %v4130_v18 = vmax.f32 %v4050_v30, %v12467_v55  ;;  %v4129_v43 = vmax.f32 %v4049_v63, %v12466_v60 }
 0x937   : > { %v12508_v1 = vpack.i.bf16 %v4132_v56, %v4131_v17 }
 0x938   : > { %v12503_v10 = vpack.i.bf16 %v4130_v18, %v4129_v43 }
 0x939   : > { %12509 = vrot.lane.b32.xlu1 %v12508_v1, %s12980_s19 }
 0x93a   : > { %12504 = vrot.lane.b32.xlu0 %v12503_v10, %s12980_s19 }
 0x93b   : > { %v12475_v27 = vpop.permute.xlu0 %12474 }
 0x93c   : > { %v12477_v5 = vunpack.i.h.bf16 %v12475_v27  ;;  %v12476_v40 = vunpack.i.l.bf16 %v12475_v27 }
 0x93e   : > { %v4134_v2 = vmax.f32 %v4054_v37, %v12477_v5  ;;  %v4133_v24 = vmax.f32 %v4053_v23, %v12476_v40  ;;  %v12480_v57 = vpop.permute.xlu1 %12479 }
 0x93f   : > { %v12482_v22 = vunpack.i.h.bf16 %v12480_v57  ;;  %v12481_v38 = vunpack.i.l.bf16 %v12480_v57 }
 0x940   : > { %v12513_v7 = vpack.i.bf16 %v4134_v2, %v4133_v24 }
 0x941   : > { %v4136_v63 = vmax.f32 %v4056_v47, %v12482_v22  ;;  %v4135_v30 = vmax.f32 %v4055_v50, %v12481_v38 }
 0x942   : > { %12514 = vrot.lane.b32.xlu0 %v12513_v7, %s12980_s19 }
 0x943   : > { %v12518_v58 = vpack.i.bf16 %v4136_v63, %v4135_v30 }
 0x945   : > { %12519 = vrot.lane.b32.xlu1 %v12518_v58, %s12980_s19 }
 0x946   : > { %v12485_v15 = vpop.permute.xlu0 %12484 }
 0x947   : > { %v12487_v37 = vunpack.i.h.bf16 %v12485_v15  ;;  %v12486_v31 = vunpack.i.l.bf16 %v12485_v15 }
 0x949   : > { %v4138_v6 = vmax.f32 %v4058_v49, %v12487_v37  ;;  %v4137_v23 = vmax.f32 %v4057_v44, %v12486_v31  ;;  %v12767_v31 = vld [vmem:[%s17123_s4 + $0xc0] sm:$0xff]  }
 0x94a   : > { %11129 = vmatprep.mubr.bf16.mxu0 %v12767_v31  ;;  %v12783_v31 = vld [vmem:[%s17123_s4 + $0x140] sm:$0xff]  }
 0x94b   : > { %v12523_v45 = vpack.i.bf16 %v4138_v6, %v4137_v23 }
 0x94d   : > { %12524 = vrot.lane.b32.xlu0 %v12523_v45, %s12980_s19 }
 0x94e   : > { %v12490_v3 = vpop.permute.xlu1 %12489 }
 0x94f   : > { %v12492_v46 = vunpack.i.h.bf16 %v12490_v3  ;;  %v12491_v50 = vunpack.i.l.bf16 %v12490_v3 }
 0x951   : > { %v4140_v47 = vmax.f32 %v4060_v20, %v12492_v46  ;;  %v4139_v34 = vmax.f32 %v4059_v54, %v12491_v50 }
 0x953   : > { %v12528_v52 = vpack.i.bf16 %v4140_v47, %v4139_v34 }
 0x955   : > { %12529 = vrot.lane.b32.xlu1 %v12528_v52, %s12980_s19 }
 0x956   : > { %v12495_v25 = vpop.permute.xlu0 %12494 }
 0x957   : > { %v12497_v49 = vunpack.i.h.bf16 %v12495_v25  ;;  %v12496_v53 = vunpack.i.l.bf16 %v12495_v25 }
 0x959   : > { %v4142_v28 = vmax.f32 %v4062_v4, %v12497_v49  ;;  %v4141_v44 = vmax.f32 %v4061_v12, %v12496_v53 }
 0x95b   : > { %v12533_v36 = vpack.i.bf16 %v4142_v28, %v4141_v44 }
 0x95d   : > { %12534 = vrot.lane.b32.xlu0 %v12533_v36, %s12980_s19 }
 0x95e   : > { %v12500_v11 = vpop.permute.xlu1 %12499 }
 0x95f   : > { %v12502_v29 = vunpack.i.h.bf16 %v12500_v11  ;;  %v12501_v8 = vunpack.i.l.bf16 %v12500_v11 }
 0x961   : > { %v4144_v16 = vmax.f32 %v4064_v42, %v12502_v29  ;;  %v4143_v59 = vmax.f32 %v4063_v41, %v12501_v8  ;;  %v12768_v29 = vld [vmem:[%s17123_s4 + $0xc8] sm:$0xff]  }
 0x963   : > { %v12538_v20 = vpack.i.bf16 %v4144_v16, %v4143_v59 }
 0x965   : > { %12539 = vrot.lane.b32.xlu1 %v12538_v20, %s12980_s19 }
 0x9ab   : > { %v12510_v32 = vpop.permute.xlu1 %12509 }
 0x9ac   : > { %v12512_v54 = vunpack.i.h.bf16 %v12510_v32  ;;  %v12511_v26 = vunpack.i.l.bf16 %v12510_v32  ;;  %v12505_v13 = vpop.permute.xlu0 %12504 }
 0x9ad   : > { %v12507_v39 = vunpack.i.h.bf16 %v12505_v13  ;;  %v12506_v61 = vunpack.i.l.bf16 %v12505_v13  ;;  %v12771_v13 = vld [vmem:[%s17123_s4 + $0xe0] sm:$0xff]  }
 0x9ae   : > { %v4212_v48 = vmax.f32 %v4132_v56, %v12512_v54  ;;  %v4211_v4 = vmax.f32 %v4131_v17, %v12511_v26  ;;  %v12770_v54 = vld [vmem:[%s17123_s4 + $0xd8] sm:$0xff]  }
 0x9af   : > { %v4210_v12 = vmax.f32 %v4130_v18, %v12507_v39  ;;  %v4209_v9 = vmax.f32 %v4129_v43, %v12506_v61 }
 0x9b0   : > { %v15608_v35 = vpack.c.bf16 %v4212_v48, %v4211_v4  ;;  %v12772_v48 = vld [vmem:[%s17123_s4 + $0xe8] sm:$0xff]  }
 0x9b1   : > { %v15610_v14 = vpack.c.bf16 %v4210_v12, %v4209_v9  ;;  %v12773_v9 = vld [vmem:[%s17123_s4 + $0xf0] sm:$0xff]  }
 0x9b2   : > { %4857 = vrot.lane.b32.xlu1 %v15608_v35, %s17180_s12 }
 0x9b3   : > { %4855 = vrot.lane.b32.xlu0 %v15610_v14, %s17180_s12 }
 0x9b4   : > { %v12515_v51 = vpop.permute.xlu0 %12514 }
 0x9b5   : > { %v12517_v41 = vunpack.i.h.bf16 %v12515_v51  ;;  %v12516_v42 = vunpack.i.l.bf16 %v12515_v51 }
 0x9b7   : > { %v4214_v62 = vmax.f32 %v4134_v2, %v12517_v41  ;;  %v4213_v21 = vmax.f32 %v4133_v24, %v12516_v42  ;;  %v12520_v19 = vpop.permute.xlu1 %12519  ;;  %v12774_v42 = vld [vmem:[%s17123_s4 + $0xf8] sm:$0xff]  }
 0x9b8   : > { %v12522_v0 = vunpack.i.h.bf16 %v12520_v19  ;;  %v12521_v33 = vunpack.i.l.bf16 %v12520_v19 }
 0x9b9   : > { %v15616_v55 = vpack.c.bf16 %v4214_v62, %v4213_v21  ;;  %v12775_v21 = vld [vmem:[%s17123_s4 + $0x100] sm:$0xff]  }
 0x9ba   : > { %v4216_v60 = vmax.f32 %v4136_v63, %v12522_v0  ;;  %v4215_v56 = vmax.f32 %v4135_v30, %v12521_v33  ;;  %v12776_v33 = vld [vmem:[%s17123_s4 + $0x108] sm:$0xff]  }
 0x9bb   : > { %4859 = vrot.lane.b32.xlu0 %v15616_v55, %s17180_s12 }
 0x9bc   : > { %v15620_v17 = vpack.c.bf16 %v4216_v60, %v4215_v56  ;;  %v12777_v56 = vld [vmem:[%s17123_s4 + $0x110] sm:$0xff]  }
 0x9be   : > { %4861 = vrot.lane.b32.xlu1 %v15620_v17, %s17180_s12 }
 0x9bf   : > { %v12525_v18 = vpop.permute.xlu0 %12524 }
 0x9c0   : > { %v12527_v43 = vunpack.i.h.bf16 %v12525_v18  ;;  %v12526_v1 = vunpack.i.l.bf16 %v12525_v18 }
 0x9c2   : > { %v4218_v10 = vmax.f32 %v4138_v6, %v12527_v43  ;;  %v4217_v27 = vmax.f32 %v4137_v23, %v12526_v1  ;;  %v12778_v1 = vld [vmem:[%s17123_s4 + $0x118] sm:$0xff]  }
 0x9c4   : > { %v15624_v5 = vpack.c.bf16 %v4218_v10, %v4217_v27 }
 0x9c6   : > { %4863 = vrot.lane.b32.xlu0 %v15624_v5, %s17180_s12 }
 0x9c7   : > { %v12530_v40 = vpop.permute.xlu1 %12529 }
 0x9c8   : > { %v12532_v2 = vunpack.i.h.bf16 %v12530_v40  ;;  %v12531_v24 = vunpack.i.l.bf16 %v12530_v40  ;;  %v12779_v40 = vld [vmem:[%s17123_s4 + $0x120] sm:$0xff]  }
 0x9ca   : > { %v4220_v57 = vmax.f32 %v4140_v47, %v12532_v2  ;;  %v4219_v22 = vmax.f32 %v4139_v34, %v12531_v24 }
 0x9cc   : > { %v15628_v38 = vpack.c.bf16 %v4220_v57, %v4219_v22  ;;  %v12780_v57 = vld [vmem:[%s17123_s4 + $0x128] sm:$0xff]  }
 0x9ce   : > { %4865 = vrot.lane.b32.xlu1 %v15628_v38, %s17180_s12 }
 0x9cf   : > { %v12535_v7 = vpop.permute.xlu0 %12534 }
 0x9d0   : > { %v12537_v63 = vunpack.i.h.bf16 %v12535_v7  ;;  %v12536_v30 = vunpack.i.l.bf16 %v12535_v7  ;;  %v12781_v7 = vld [vmem:[%s17123_s4 + $0x130] sm:$0xff]  }
 0x9d2   : > { %v4222_v58 = vmax.f32 %v4142_v28, %v12537_v63  ;;  %v4221_v15 = vmax.f32 %v4141_v44, %v12536_v30 }
 0x9d4   : > { %v15632_v37 = vpack.c.bf16 %v4222_v58, %v4221_v15  ;;  %v12782_v58 = vld [vmem:[%s17123_s4 + $0x138] sm:$0xff]  }
 0x9d6   : > { %4867 = vrot.lane.b32.xlu0 %v15632_v37, %s17180_s12 }
 0x9d7   : > { %v12540_v6 = vpop.permute.xlu1 %12539 }
 0x9d8   : > { %v12542_v23 = vunpack.i.h.bf16 %v12540_v6  ;;  %v12541_v45 = vunpack.i.l.bf16 %v12540_v6 }
 0x9da   : > { %v4224_v3 = vmax.f32 %v4144_v16, %v12542_v23  ;;  %v4223_v46 = vmax.f32 %v4143_v59, %v12541_v45  ;;  %5057 = vrot.lane.b32.xlu0 %v15610_v14, %s17179_s20  ;;  %v12769_v59 = vld [vmem:[%s17123_s4 + $0xd0] sm:$0xff]   ;;  %v12784_v45 = vld [vmem:[%s17123_s4 + $0x148] sm:$0xff]  }
 0x9dc   : > { %v15641_v50 = vpack.c.bf16 %v4224_v3, %v4223_v46 }
 0x9de   : > { %4869 = vrot.lane.b32.xlu1 %v15641_v50, %s17180_s12  ;;  %5061 = vrot.lane.b32.xlu0 %v15616_v55, %s17179_s20  ;;  %s17272_s12 = smov 107  }
 0x9e2   : > { %5059 = vrot.lane.b32.xlu1 %v15608_v35, %s17179_s20  ;;  %5065 = vrot.lane.b32.xlu0 %v15624_v5, %s17179_s20 }
 0x9e6   : > { %5063 = vrot.lane.b32.xlu1 %v15620_v17, %s17179_s20  ;;  %5069 = vrot.lane.b32.xlu0 %v15632_v37, %s17179_s20 }
 0x9ea   : > { %5067 = vrot.lane.b32.xlu1 %v15628_v38, %s17179_s20  ;;  %5259 = vrot.lane.b32.xlu0 %v15610_v14, %s12980_s19 }
 0x9ee   : > { %5071 = vrot.lane.b32.xlu1 %v15641_v50, %s17179_s20  ;;  %5263 = vrot.lane.b32.xlu0 %v15616_v55, %s12980_s19  ;;  %s17273_s20 = smov 106  }
 0x9f2   : > { %5261 = vrot.lane.b32.xlu1 %v15608_v35, %s12980_s19  ;;  %5267 = vrot.lane.b32.xlu0 %v15624_v5, %s12980_s19 }
 0x9f6   : > { %5265 = vrot.lane.b32.xlu1 %v15620_v17, %s12980_s19  ;;  %5271 = vrot.lane.b32.xlu0 %v15632_v37, %s12980_s19 }
 0x9fa   : > { %5269 = vrot.lane.b32.xlu1 %v15628_v38, %s12980_s19  ;;  %5461 = vrot.lane.b32.xlu0 %v15610_v14, %s17272_s12 }
 0x9fe   : > { %5273 = vrot.lane.b32.xlu1 %v15641_v50, %s12980_s19  ;;  %5465 = vrot.lane.b32.xlu0 %v15616_v55, %s17272_s12  ;;  %s17274_s19 = smov 105  }
 0xa02   : > { %5463 = vrot.lane.b32.xlu1 %v15608_v35, %s17272_s12  ;;  %5469 = vrot.lane.b32.xlu0 %v15624_v5, %s17272_s12 }
 0xa06   : > { %5467 = vrot.lane.b32.xlu1 %v15620_v17, %s17272_s12  ;;  %5473 = vrot.lane.b32.xlu0 %v15632_v37, %s17272_s12 }
 0xa0a   : > { %5471 = vrot.lane.b32.xlu1 %v15628_v38, %s17272_s12  ;;  %5663 = vrot.lane.b32.xlu0 %v15610_v14, %s17273_s20 }
 0xa0e   : > { %5475 = vrot.lane.b32.xlu1 %v15641_v50, %s17272_s12  ;;  %5667 = vrot.lane.b32.xlu0 %v15616_v55, %s17273_s20 }
 0xa12   : > { %5665 = vrot.lane.b32.xlu1 %v15608_v35, %s17273_s20  ;;  %5671 = vrot.lane.b32.xlu0 %v15624_v5, %s17273_s20 }
 0xa16   : > { %5669 = vrot.lane.b32.xlu1 %v15620_v17, %s17273_s20  ;;  %5675 = vrot.lane.b32.xlu0 %v15632_v37, %s17273_s20 }
 0xa1a   : > { %5673 = vrot.lane.b32.xlu1 %v15628_v38, %s17273_s20  ;;  %5865 = vrot.lane.b32.xlu0 %v15610_v14, %s17274_s19 }
 0xa1e   : > { %5677 = vrot.lane.b32.xlu1 %v15641_v50, %s17273_s20  ;;  %5869 = vrot.lane.b32.xlu0 %v15616_v55, %s17274_s19  ;;  %s13001_s20 = smov 46  }
 0xa22   : > { %5867 = vrot.lane.b32.xlu1 %v15608_v35, %s17274_s19  ;;  %5873 = vrot.lane.b32.xlu0 %v15624_v5, %s17274_s19 }
 0xa24   : > { %v4858_v34 = vpop.permute.xlu1 %4857 }
 0xa25   : > { %v4856_v47 = vpop.permute.xlu0 %4855 }
 0xa26   : > { %5871 = vrot.lane.b32.xlu1 %v15620_v17, %s17274_s19  ;;  %5877 = vrot.lane.b32.xlu0 %v15632_v37, %s17274_s19 }
 0xa27   : > { %11113 = vmatprep.subr.bf16.mxu0 %v4856_v47 }
 0xa28   : > { %11114 = vmatpush3.bf16.msra.mxu0 %v4856_v47  ;;  %v12785_v47 = vld [vmem:[%s17123_s4 + $0x150] sm:$0xff]  }
 0xa29   : > { %11115 = vmatprep.subr.bf16.mxu0 %v4858_v34 }
 0xa2a   : > { %5875 = vrot.lane.b32.xlu1 %v15628_v38, %s17274_s19  ;;  %6067 = vrot.lane.b32.xlu0 %v15610_v14, %s17275_s13 }
 0xa2c   : > { %11116 = vmatpush3.bf16.msra.mxu0 %v4858_v34 }
 0xa2d   : > { %v4860_v52 = vpop.permute.xlu0 %4859 }
 0xa2e   : > { %5879 = vrot.lane.b32.xlu1 %v15641_v50, %s17274_s19  ;;  %6071 = vrot.lane.b32.xlu0 %v15616_v55, %s17275_s13  ;;  %s13002_s19 = smov 45  }
 0xa2f   : > { %11117 = vmatprep.subr.bf16.mxu0 %v4860_v52 }
 0xa30   : > { %11118 = vmatpush3.bf16.msra.mxu0 %v4860_v52  ;;  %v4862_v25 = vpop.permute.xlu1 %4861 }
 0xa31   : > { %11119 = vmatprep.subr.bf16.mxu0 %v4862_v25 }
 0xa32   : > { %6069 = vrot.lane.b32.xlu1 %v15608_v35, %s17275_s13  ;;  %6075 = vrot.lane.b32.xlu0 %v15624_v5, %s17275_s13 }
 0xa34   : > { %11120 = vmatpush3.bf16.msra.mxu0 %v4862_v25  ;;  %v12786_v25 = vld [vmem:[%s17123_s4 + $0x158] sm:$0xff]  }
 0xa36   : > { %6073 = vrot.lane.b32.xlu1 %v15620_v17, %s17275_s13  ;;  %6079 = vrot.lane.b32.xlu0 %v15632_v37, %s17275_s13 }
 0xa38   : > { %v4864_v49 = vpop.permute.xlu0 %4863 }
 0xa39   : > { %11121 = vmatprep.subr.bf16.mxu0 %v4864_v49 }
 0xa3a   : > { %6077 = vrot.lane.b32.xlu1 %v15628_v38, %s17275_s13  ;;  %6269 = vrot.lane.b32.xlu0 %v15610_v14, %s17276_s27 }
 0xa3b   : > { %11122 = vmatpush3.bf16.msra.mxu0 %v4864_v49 }
 0xa3e   : > { %6081 = vrot.lane.b32.xlu1 %v15641_v50, %s17275_s13  ;;  %6273 = vrot.lane.b32.xlu0 %v15616_v55, %s17276_s27  ;;  %s12998_s13 = smov 64  }
 0xa40   : > { %v4866_v53 = vpop.permute.xlu1 %4865 }
 0xa41   : > { %11123 = vmatprep.subr.bf16.mxu0 %v4866_v53 }
 0xa42   : > { %6271 = vrot.lane.b32.xlu1 %v15608_v35, %s17276_s27  ;;  %6277 = vrot.lane.b32.xlu0 %v15624_v5, %s17276_s27 }
 0xa43   : > { %11124 = vmatpush3.bf16.msra.mxu0 %v4866_v53  ;;  %v12787_v53 = vld [vmem:[%s17123_s4 + $0x160] sm:$0xff]  }
 0xa46   : > { %6275 = vrot.lane.b32.xlu1 %v15620_v17, %s17276_s27  ;;  %6281 = vrot.lane.b32.xlu0 %v15632_v37, %s17276_s27 }
 0xa48   : > { %v4868_v28 = vpop.permute.xlu0 %4867 }
 0xa49   : > { %11125 = vmatprep.subr.bf16.mxu0 %v4868_v28 }
 0xa4a   : > { %6279 = vrot.lane.b32.xlu1 %v15628_v38, %s17276_s27  ;;  %6471 = vrot.lane.b32.xlu0 %v15610_v14, %s17277_s29 }
 0xa4b   : > { %11126 = vmatpush3.bf16.msra.mxu0 %v4868_v28 }
 0xa4c   : > { %v5058_v44 = vpop.permute.xlu0 %5057 }
 0xa4e   : > { %6283 = vrot.lane.b32.xlu1 %v15641_v50, %s17276_s27  ;;  %6475 = vrot.lane.b32.xlu0 %v15616_v55, %s17277_s29  ;;  %s13000_s27 = smov 47  }
 0xa50   : > { %v4870_v36 = vpop.permute.xlu1 %4869  ;;  %v5062_v11 = vpop.permute.xlu0 %5061 }
 0xa51   : > { %11127 = vmatprep.subr.bf16.mxu0 %v4870_v36 }
 0xa52   : > { %6473 = vrot.lane.b32.xlu1 %v15608_v35, %s17277_s29  ;;  %6479 = vrot.lane.b32.xlu0 %v15624_v5, %s17277_s29 }
 0xa53   : > { %11128 = vmatpush3.bf16.msra.mxu0 %v4870_v36  ;;  %v12788_v36 = vld [vmem:[%s17123_s4 + $0x168] sm:$0xff]  }
 0xa54   : > { %11145 = vmatprep.subr.bf16.mxu0 %v5058_v44  ;;  %v5060_v8 = vpop.permute.xlu1 %5059  ;;  %v5066_v16 = vpop.permute.xlu0 %5065 }
 0xa56   : > { %11130 = vmatmul.mubr.bf16.vlgmr.msra.gmra.mrb[24].mxu0 %v12768_v29  ;;  %6477 = vrot.lane.b32.xlu1 %v15620_v17, %s17277_s29  ;;  %v12789_v29 = vld [vmem:[%s17123_s4 + $0x170] sm:$0xff]  }
 0xa57   : > { %6483 = vrot.lane.b32.xlu0 %v15632_v37, %s17277_s29  ;;  %11146 = vmatpush3.bf16.msra.mxu0 %v5058_v44 }
 0xa58   : > { %11147 = vmatprep.subr.bf16.mxu0 %v5060_v8  ;;  %v5064_v20 = vpop.permute.xlu1 %5063  ;;  %v5070_v32 = vpop.permute.xlu0 %5069  ;;  %11133 = vmatprep.mubr.bf16.mxu0 %v12769_v59  ;;  %v12790_v59 = vld [vmem:[%s17123_s4 + $0x178] sm:$0xff]  }
 0xa5a   : > { %6481 = vrot.lane.b32.xlu1 %v15628_v38, %s17277_s29 }
 0xa5b   : > { %6673 = vrot.lane.b32.xlu0 %v15610_v14, %s17182_s14  ;;  %11148 = vmatpush3.bf16.msra.mxu0 %v5060_v8 }
 0xa5c   : > { %11149 = vmatprep.subr.bf16.mxu0 %v5062_v11  ;;  %v5260_v26 = vpop.permute.xlu0 %5259  ;;  %v5068_v39 = vpop.permute.xlu1 %5067 }
 0xa5e   : > { %11134 = vmatmul.mubr.bf16.gmra.mrb[28].mxu0 %v12770_v54  ;;  %6485 = vrot.lane.b32.xlu1 %v15641_v50, %s17277_s29  ;;  %v12791_v54 = vld [vmem:[%s17123_s4 + $0x180] sm:$0xff]  }
 0xa5f   : > { %6677 = vrot.lane.b32.xlu0 %v15616_v55, %s17182_s14  ;;  %11150 = vmatpush3.bf16.msra.mxu0 %v5062_v11 }
 0xa60   : > { %11151 = vmatprep.subr.bf16.mxu0 %v5064_v20  ;;  %v5264_v61 = vpop.permute.xlu0 %5263  ;;  %11137 = vmatprep.mubr.bf16.mxu0 %v12771_v13  ;;  %v5072_v4 = vpop.permute.xlu1 %5071 }
 0xa62   : > { %6675 = vrot.lane.b32.xlu1 %v15608_v35, %s17182_s14 }
 0xa63   : > { %6681 = vrot.lane.b32.xlu0 %v15624_v5, %s17182_s14  ;;  %11152 = vmatpush3.bf16.msra.mxu0 %v5064_v20 }
 0xa64   : > { %11153 = vmatprep.subr.bf16.mxu0 %v5066_v16  ;;  %v15794_v12 = vpop.permute.xlu0 %5267  ;;  %v5262_v41 = vpop.permute.xlu1 %5261 }
 0xa66   : > { %11138 = vmatmul.mubr.bf16.gmra.mrb[32].mxu0 %v12772_v48  ;;  %6679 = vrot.lane.b32.xlu1 %v15620_v17, %s17182_s14  ;;  %v12793_v48 = vld [vmem:[%s17123_s4 + $0x190] sm:$0xff]  }
 0xa67   : > { %6685 = vrot.lane.b32.xlu0 %v15632_v37, %s17182_s14  ;;  %11154 = vmatpush3.bf16.msra.mxu0 %v5066_v16 }
 0xa68   : > { %11155 = vmatprep.subr.bf16.mxu0 %v5068_v39  ;;  %v15803_v51 = vpop.permute.xlu0 %5271  ;;  %11141 = vmatprep.mubr.bf16.mxu0 %v12773_v9  ;;  %v5266_v19 = vpop.permute.xlu1 %5265  ;;  %v12794_v9 = vld [vmem:[%s17123_s4 + $0x198] sm:$0xff]  }
 0xa6a   : > { %6683 = vrot.lane.b32.xlu1 %v15628_v38, %s17182_s14 }
 0xa6b   : > { %6875 = vrot.lane.b32.xlu0 %v15610_v14, %s17188_s23  ;;  %11156 = vmatpush3.bf16.msra.mxu0 %v5068_v39  ;;  %v12792_v39 = vld [vmem:[%s17123_s4 + $0x188] sm:$0xff]  }
 0xa6c   : > { %11157 = vmatprep.subr.bf16.mxu0 %v5070_v32  ;;  %v15812_v62 = vpop.permute.xlu0 %5461  ;;  %v5270_v18 = vpop.permute.xlu1 %5269 }
 0xa6e   : > { %11142 = vmatmul.mubr.bf16.gmra.mrb[36].mxu0 %v12774_v42  ;;  %6687 = vrot.lane.b32.xlu1 %v15641_v50, %s17182_s14  ;;  %s12996_s14 = smov 66  }
 0xa6f   : > { %6879 = vrot.lane.b32.xlu0 %v15616_v55, %s17188_s23  ;;  %11158 = vmatpush3.bf16.msra.mxu0 %v5070_v32 }
 0xa70   : > { %11159 = vmatprep.subr.bf16.mxu0 %v5072_v4  ;;  %v15821_v0 = vpop.permute.xlu0 %5465  ;;  %11161 = vmatprep.mubr.bf16.mxu0 %v12775_v21  ;;  %v5274_v10 = vpop.permute.xlu1 %5273  ;;  %v12796_v21 = vld [vmem:[%s17123_s4 + $0x1a8] sm:$0xff]  }
 0xa72   : > { %6877 = vrot.lane.b32.xlu1 %v15608_v35, %s17188_s23 }
 0xa73   : > { %6883 = vrot.lane.b32.xlu0 %v15624_v5, %s17188_s23  ;;  %11160 = vmatpush3.bf16.msra.mxu0 %v5072_v4 }
 0xa74   : > { %11177 = vmatprep.subr.bf16.mxu0 %v5260_v26  ;;  %v15830_v60 = vpop.permute.xlu0 %5469  ;;  %v5464_v24 = vpop.permute.xlu1 %5463 }
 0xa76   : > { %11162 = vmatmul.mubr.bf16.vlgmr.msra.gmra.mrb[24].mxu0 %v12776_v33  ;;  %6881 = vrot.lane.b32.xlu1 %v15620_v17, %s17188_s23  ;;  %v12797_v33 = vld [vmem:[%s17123_s4 + $0x1b0] sm:$0xff]  }
 0xa77   : > { %6887 = vrot.lane.b32.xlu0 %v15632_v37, %s17188_s23  ;;  %11178 = vmatpush3.bf16.msra.mxu0 %v5260_v26 }
 0xa78   : > { %11179 = vmatprep.subr.bf16.mxu0 %v5262_v41  ;;  %v15839_v43 = vpop.permute.xlu0 %5473  ;;  %11165 = vmatprep.mubr.bf16.mxu0 %v12777_v56  ;;  %v5468_v63 = vpop.permute.xlu1 %5467 }
 0xa7a   : > { %6885 = vrot.lane.b32.xlu1 %v15628_v38, %s17188_s23 }
 0xa7b   : > { %7077 = vrot.lane.b32.xlu0 %v15610_v14, %s17181_s15  ;;  %11180 = vmatpush3.bf16.msra.mxu0 %v5262_v41  ;;  %v12795_v41 = vld [vmem:[%s17123_s4 + $0x1a0] sm:$0xff]  }
 0xa7c   : > { %11181 = vmatprep.subr.bf16.mxu0 %v5264_v61  ;;  %v15848_v27 = vpop.permute.xlu0 %5663  ;;  %v5472_v6 = vpop.permute.xlu1 %5471 }
 0xa7e   : > { %11166 = vmatmul.mubr.bf16.gmra.mrb[28].mxu0 %v12778_v1  ;;  %6889 = vrot.lane.b32.xlu1 %v15641_v50, %s17188_s23  ;;  %s10186_s23 = sshll.u32 %s17280_s18, 5 }
 0xa7f   : > { %7081 = vrot.lane.b32.xlu0 %v15616_v55, %s17181_s15  ;;  %11182 = vmatpush3.bf16.msra.mxu0 %v5264_v61 }
 0xa80   : > { %11183 = vmatprep.subr.bf16.mxu0 %v5266_v19  ;;  %v15857_v2 = vpop.permute.xlu0 %5667  ;;  %11169 = vmatprep.mubr.bf16.mxu0 %v12779_v40  ;;  %v5476_v3 = vpop.permute.xlu1 %5475  ;;  %v12800_v40 = vld [vmem:[%s17123_s4 + $0x1c8] sm:$0xff]  }
 0xa82   : > { %7079 = vrot.lane.b32.xlu1 %v15608_v35, %s17181_s15 }
 0xa83   : > { %7085 = vrot.lane.b32.xlu0 %v15624_v5, %s17181_s15  ;;  %11184 = vmatpush3.bf16.msra.mxu0 %v5266_v19 }
 0xa84   : > { %11185 = vmatprep.subr.bf16.mxu0 %v15794_v12  ;;  %v15867_v22 = vpop.permute.xlu0 %5671  ;;  %v15919_v52 = vpop.permute.xlu1 %5665 }
 0xa86   : > { %11170 = vmatmul.mubr.bf16.gmra.mrb[32].mxu0 %v12780_v57  ;;  %7083 = vrot.lane.b32.xlu1 %v15620_v17, %s17181_s15 }
 0xa87   : > { %7089 = vrot.lane.b32.xlu0 %v15632_v37, %s17181_s15  ;;  %11186 = vmatpush3.bf16.msra.mxu0 %v15794_v12 }
 0xa88   : > { %11187 = vmatprep.subr.bf16.mxu0 %v5270_v18  ;;  %v15877_v30 = vpop.permute.xlu0 %5675  ;;  %11173 = vmatprep.mubr.bf16.mxu0 %v12781_v7  ;;  %v15939_v28 = vpop.permute.xlu1 %5669  ;;  %v12802_v7 = vld [vmem:[%s17123_s4 + $0x1d8] sm:$0xff]  }
 0xa8a   : > { %7087 = vrot.lane.b32.xlu1 %v15628_v38, %s17181_s15 }
 0xa8b   : > { %7279 = vrot.lane.b32.xlu0 %v15610_v14, %s17185_s22  ;;  %11188 = vmatpush3.bf16.msra.mxu0 %v5270_v18  ;;  %v12798_v18 = vld [vmem:[%s17123_s4 + $0x1b8] sm:$0xff]  }
 0xa8c   : > { %11189 = vmatprep.subr.bf16.mxu0 %v15803_v51  ;;  %v15887_v15 = vpop.permute.xlu0 %5865  ;;  %v15956_v8 = vpop.permute.xlu1 %5673 }
 0xa8e   : > { %11174 = vmatmul.mubr.bf16.gmra.mrb[36].mxu0 %v12782_v58  ;;  %7091 = vrot.lane.b32.xlu1 %v15641_v50, %s17181_s15 }
 0xa8f   : > { %7283 = vrot.lane.b32.xlu0 %v15616_v55, %s17185_s22  ;;  %11190 = vmatpush3.bf16.msra.mxu0 %v15803_v51 }
 0xa90   : > { %11191 = vmatprep.subr.bf16.mxu0 %v5274_v10  ;;  %v15897_v23 = vpop.permute.xlu0 %5869  ;;  %11193 = vmatprep.mubr.bf16.mxu0 %v12783_v31  ;;  %v15972_v20 = vpop.permute.xlu1 %5677 }
 0xa92   : > { %7281 = vrot.lane.b32.xlu1 %v15608_v35, %s17185_s22 }
 0xa93   : > { %7287 = vrot.lane.b32.xlu0 %v15624_v5, %s17185_s22  ;;  %11192 = vmatpush3.bf16.msra.mxu0 %v5274_v10 }
 0xa94   : > { %11209 = vmatprep.subr.bf16.mxu0 %v15812_v62  ;;  %v15907_v46 = vpop.permute.xlu0 %5873  ;;  %v15987_v13 = vpop.permute.xlu1 %5867 }
 0xa96   : > { %11194 = vmatmul.mubr.bf16.vlgmr.msra.gmra.mrb[24].mxu0 %v12784_v45  ;;  %7285 = vrot.lane.b32.xlu1 %v15620_v17, %s17185_s22 }
 0xa97   : > { %7291 = vrot.lane.b32.xlu0 %v15632_v37, %s17185_s22  ;;  %11210 = vmatpush3.bf16.msra.mxu0 %v15812_v62 }
 0xa98   : > { %11211 = vmatprep.subr.bf16.mxu0 %v5464_v24  ;;  %v15917_v34 = vpop.permute.xlu0 %5877  ;;  %11197 = vmatprep.mubr.bf16.mxu0 %v12785_v47  ;;  %v16007_v4 = vpop.permute.xlu1 %5871 }
 0xa9a   : > { %7289 = vrot.lane.b32.xlu1 %v15628_v38, %s17185_s22 }
 0xa9b   : > { %7481 = vrot.lane.b32.xlu0 %v15610_v14, %s17195_s30  ;;  %11212 = vmatpush3.bf16.msra.mxu0 %v5464_v24 }
 0xa9c   : > { %11213 = vmatprep.subr.bf16.mxu0 %v15821_v0  ;;  %v15929_v49 = vpop.permute.xlu0 %6067  ;;  %v16026_v42 = vpop.permute.xlu1 %5875 }
 0xa9e   : > { %11198 = vmatmul.mubr.bf16.gmra.mrb[28].mxu0 %v12786_v25  ;;  %7293 = vrot.lane.b32.xlu1 %v15641_v50, %s17185_s22 }
 0xa9f   : > { %7485 = vrot.lane.b32.xlu0 %v15616_v55, %s17195_s30  ;;  %11214 = vmatpush3.bf16.msra.mxu0 %v15821_v0 }
 0xaa0   : > { %11215 = vmatprep.subr.bf16.mxu0 %v5468_v63  ;;  %v15941_v44 = vpop.permute.xlu0 %6071  ;;  %11201 = vmatprep.mubr.bf16.mxu0 %v12787_v53  ;;  %v16044_v19 = vpop.permute.xlu1 %5879 }
 0xaa2   : > { %7483 = vrot.lane.b32.xlu1 %v15608_v35, %s17195_s30 }
 0xaa3   : > { %7489 = vrot.lane.b32.xlu0 %v15624_v5, %s17195_s30  ;;  %11216 = vmatpush3.bf16.msra.mxu0 %v5468_v63 }
 0xaa4   : > { %11217 = vmatprep.subr.bf16.mxu0 %v15830_v60  ;;  %v15951_v11 = vpop.permute.xlu0 %6075  ;;  %v16060_v56 = vpop.permute.xlu1 %6069 }
 0xaa6   : > { %11202 = vmatmul.mubr.bf16.gmra.mrb[32].mxu0 %v12788_v36  ;;  %7487 = vrot.lane.b32.xlu1 %v15620_v17, %s17195_s30  ;;  %v12808_v36 = vld [vmem:[%s17123_s4 + $0x208] sm:$0xff]  }
 0xaa7   : > { %7493 = vrot.lane.b32.xlu0 %v15632_v37, %s17195_s30  ;;  %11218 = vmatpush3.bf16.msra.mxu0 %v15830_v60 }
 0xaa8   : > { %11219 = vmatprep.subr.bf16.mxu0 %v5472_v6  ;;  %v15963_v16 = vpop.permute.xlu0 %6079  ;;  %11205 = vmatprep.mubr.bf16.mxu0 %v12789_v29  ;;  %v16081_v10 = vpop.permute.xlu1 %6073  ;;  %v12809_v29 = vld [vmem:[%s17123_s4 + $0x210] sm:$0xff]  }
 0xaaa   : > { %7491 = vrot.lane.b32.xlu1 %v15628_v38, %s17195_s30 }
 0xaab   : > { %7683 = vrot.lane.b32.xlu0 %v15610_v14, %s12996_s14  ;;  %11220 = vmatpush3.bf16.msra.mxu0 %v5472_v6  ;;  %v12804_v6 = vld [vmem:[%s17123_s4 + $0x1e8] sm:$0xff]  }
 0xaac   : > { %11221 = vmatprep.subr.bf16.mxu0 %v15839_v43  ;;  %v15975_v32 = vpop.permute.xlu0 %6269  ;;  %v16100_v57 = vpop.permute.xlu1 %6077 }
 0xaae   : > { %11206 = vmatmul.mubr.bf16.gmra.mrb[36].mxu0 %v12790_v59  ;;  %7495 = vrot.lane.b32.xlu1 %v15641_v50, %s17195_s30 }
 0xaaf   : > { %7687 = vrot.lane.b32.xlu0 %v15616_v55, %s12996_s14  ;;  %11222 = vmatpush3.bf16.msra.mxu0 %v15839_v43  ;;  %v12799_v43 = vld [vmem:[%s17123_s4 + $0x1c0] sm:$0xff]  }
 0xab0   : > { %11223 = vmatprep.subr.bf16.mxu0 %v5476_v3  ;;  %v15985_v26 = vpop.permute.xlu0 %6273  ;;  %11225 = vmatprep.mubr.bf16.mxu0 %v12791_v54  ;;  %v16118_v63 = vpop.permute.xlu1 %6081  ;;  %v12810_v54 = vld [vmem:[%s17123_s4 + $0x218] sm:$0xff]  }
 0xab2   : > { %7685 = vrot.lane.b32.xlu1 %v15608_v35, %s12996_s14 }
 0xab3   : > { %7691 = vrot.lane.b32.xlu0 %v15624_v5, %s12996_s14  ;;  %11224 = vmatpush3.bf16.msra.mxu0 %v5476_v3 }
 0xab4   : > { %11241 = vmatprep.subr.bf16.mxu0 %v15848_v27  ;;  %v15997_v61 = vpop.permute.xlu0 %6277  ;;  %v16134_v31 = vpop.permute.xlu1 %6271 }
 0xab6   : > { %11226 = vmatmul.mubr.bf16.vlgmr.msra.gmra.mrb[24].mxu0 %v12792_v39  ;;  %7689 = vrot.lane.b32.xlu1 %v15620_v17, %s12996_s14 }
 0xab7   : > { %7695 = vrot.lane.b32.xlu0 %v15632_v37, %s12996_s14  ;;  %11242 = vmatpush3.bf16.msra.mxu0 %v15848_v27 }
 0xab8   : > { %11243 = vmatprep.subr.bf16.mxu0 %v15919_v52  ;;  %v16010_v12 = vpop.permute.xlu0 %6281  ;;  %11229 = vmatprep.mubr.bf16.mxu0 %v12793_v48  ;;  %v16155_v3 = vpop.permute.xlu1 %6275 }
 0xaba   : > { %7693 = vrot.lane.b32.xlu1 %v15628_v38, %s12996_s14 }
 0xabb   : > { %7885 = vrot.lane.b32.xlu0 %v15610_v14, %s12997_s25  ;;  %11244 = vmatpush3.bf16.msra.mxu0 %v15919_v52  ;;  %v12806_v52 = vld [vmem:[%s17123_s4 + $0x1f8] sm:$0xff]  }
 0xabc   : > { %11245 = vmatprep.subr.bf16.mxu0 %v15857_v2  ;;  %v16021_v51 = vpop.permute.xlu0 %6471  ;;  %v16174_v53 = vpop.permute.xlu1 %6279 }
 0xabe   : > { %11230 = vmatmul.mubr.bf16.gmra.mrb[28].mxu0 %v12794_v9  ;;  %7697 = vrot.lane.b32.xlu1 %v15641_v50, %s12996_s14 }
 0xabf   : > { %7889 = vrot.lane.b32.xlu0 %v15616_v55, %s12997_s25  ;;  %11246 = vmatpush3.bf16.msra.mxu0 %v15857_v2  ;;  %v12801_v2 = vld [vmem:[%s17123_s4 + $0x1d0] sm:$0xff]  }
 0xac0   : > { %11247 = vmatprep.subr.bf16.mxu0 %v15939_v28  ;;  %v16034_v62 = vpop.permute.xlu0 %6475  ;;  %11233 = vmatprep.mubr.bf16.mxu0 %v12795_v41 }
 0xac2   : > { %7887 = vrot.lane.b32.xlu1 %v15608_v35, %s12997_s25 }
 0xac3   : > { %7893 = vrot.lane.b32.xlu0 %v15624_v5, %s12997_s25  ;;  %11248 = vmatpush3.bf16.msra.mxu0 %v15939_v28 }
 0xac4   : > { %11249 = vmatprep.subr.bf16.mxu0 %v15867_v22  ;;  %v16047_v0 = vpop.permute.xlu0 %6479 }
 0xac6   : > { %11234 = vmatmul.mubr.bf16.gmra.mrb[32].mxu0 %v12796_v21  ;;  %7891 = vrot.lane.b32.xlu1 %v15620_v17, %s12997_s25  ;;  %v12814_v21 = vld [vmem:[%s17123_s4 + $0x238] sm:$0xff]  }
 0xac7   : > { %7897 = vrot.lane.b32.xlu0 %v15632_v37, %s12997_s25  ;;  %11250 = vmatpush3.bf16.msra.mxu0 %v15867_v22 }
 0xac8   : > { %11251 = vmatprep.subr.bf16.mxu0 %v15956_v8  ;;  %11237 = vmatprep.mubr.bf16.mxu0 %v12797_v33 }
 0xac9   : > { %v16058_v60 = vpop.permute.xlu0 %6483 }
 0xaca   : > { %7895 = vrot.lane.b32.xlu1 %v15628_v38, %s12997_s25 }
 0xacb   : > { %8087 = vrot.lane.b32.xlu0 %v15610_v14, %s12998_s13  ;;  %11252 = vmatpush3.bf16.msra.mxu0 %v15956_v8 }
 0xacc   : > { %11253 = vmatprep.subr.bf16.mxu0 %v15877_v30 }
 0xacd   : > { %v16074_v1 = vpop.permute.xlu0 %6673 }
 0xace   : > { %11238 = vmatmul.mubr.bf16.gmra.mrb[36].mxu0 %v12798_v18  ;;  %7899 = vrot.lane.b32.xlu1 %v15641_v50, %s12997_s25 }
 0xacf   : > { %8091 = vrot.lane.b32.xlu0 %v15616_v55, %s12998_s13  ;;  %11254 = vmatpush3.bf16.msra.mxu0 %v15877_v30  ;;  %v12803_v30 = vld [vmem:[%s17123_s4 + $0x1e0] sm:$0xff]  }
 0xad0   : > { %11255 = vmatprep.subr.bf16.mxu0 %v15972_v20  ;;  %11257 = vmatprep.mubr.bf16.mxu0 %v12799_v43 }
 0xad1   : > { %v16084_v27 = vpop.permute.xlu0 %6677 }
 0xad2   : > { %8089 = vrot.lane.b32.xlu1 %v15608_v35, %s12998_s13 }
 0xad3   : > { %8095 = vrot.lane.b32.xlu0 %v15624_v5, %s12998_s13  ;;  %11256 = vmatpush3.bf16.msra.mxu0 %v15972_v20 }
 0xad4   : > { %11273 = vmatprep.subr.bf16.mxu0 %v15887_v15 }
 0xad5   : > { %v16098_v24 = vpop.permute.xlu0 %6681 }
 0xad6   : > { %11258 = vmatmul.mubr.bf16.vlgmr.msra.gmra.mrb[24].mxu0 %v12800_v40  ;;  %8093 = vrot.lane.b32.xlu1 %v15620_v17, %s12998_s13 }
 0xad7   : > { %8099 = vrot.lane.b32.xlu0 %v15632_v37, %s12998_s13  ;;  %11274 = vmatpush3.bf16.msra.mxu0 %v15887_v15 }
 0xad8   : > { %11275 = vmatprep.subr.bf16.mxu0 %v15987_v13  ;;  %11261 = vmatprep.mubr.bf16.mxu0 %v12801_v2 }
 0xad9   : > { %v16108_v22 = vpop.permute.xlu0 %6685 }
 0xada   : > { %8097 = vrot.lane.b32.xlu1 %v15628_v38, %s12998_s13 }
 0xadb   : > { %8289 = vrot.lane.b32.xlu0 %v15610_v14, %s12999_s26  ;;  %11276 = vmatpush3.bf16.msra.mxu0 %v15987_v13 }
 0xadc   : > { %11277 = vmatprep.subr.bf16.mxu0 %v15897_v23 }
 0xadd   : > { %v16124_v58 = vpop.permute.xlu0 %6875 }
 0xade   : > { %11262 = vmatmul.mubr.bf16.gmra.mrb[28].mxu0 %v12802_v7  ;;  %8101 = vrot.lane.b32.xlu1 %v15641_v50, %s12998_s13  ;;  %v12818_v7 = vld [vmem:[%s17123_s4 + $0x258] sm:$0xff]  }
 0xadf   : > { %8293 = vrot.lane.b32.xlu0 %v15616_v55, %s12999_s26  ;;  %11278 = vmatpush3.bf16.msra.mxu0 %v15897_v23  ;;  %v12805_v23 = vld [vmem:[%s17123_s4 + $0x1f0] sm:$0xff]  }
 0xae0   : > { %11279 = vmatprep.subr.bf16.mxu0 %v16007_v4  ;;  %11265 = vmatprep.mubr.bf16.mxu0 %v12803_v30 }
 0xae1   : > { %v16132_v15 = vpop.permute.xlu0 %6879 }
 0xae2   : > { %8291 = vrot.lane.b32.xlu1 %v15608_v35, %s12999_s26 }
 0xae3   : > { %11280 = vmatpush3.bf16.msra.mxu0 %v16007_v4  ;;  %8297 = vrot.lane.b32.xlu0 %v15624_v5, %s12999_s26  ;;  %v12812_v4 = vld [vmem:[%s17123_s4 + $0x228] sm:$0xff]  }
 0xae4   : > { %11281 = vmatprep.subr.bf16.mxu0 %v15907_v46 }
 0xae5   : > { %v16148_v45 = vpop.permute.xlu0 %6883 }
 0xae6   : > { %11266 = vmatmul.mubr.bf16.gmra.mrb[32].mxu0 %v12804_v6  ;;  %8295 = vrot.lane.b32.xlu1 %v15620_v17, %s12999_s26  ;;  %v12820_v6 = vld [vmem:[%s17123_s4 + $0x268] sm:$0xff]  }
 0xae7   : > { %11282 = vmatpush3.bf16.msra.mxu0 %v15907_v46  ;;  %8301 = vrot.lane.b32.xlu0 %v15632_v37, %s12999_s26  ;;  %v12807_v46 = vld [vmem:[%s17123_s4 + $0x200] sm:$0xff]  }
 0xae8   : > { %11283 = vmatprep.subr.bf16.mxu0 %v16026_v42  ;;  %11269 = vmatprep.mubr.bf16.mxu0 %v12805_v23  ;;  %v12821_v23 = vld [vmem:[%s17123_s4 + $0x270] sm:$0xff]  }
 0xae9   : > { %v16158_v47 = vpop.permute.xlu0 %6887 }
 0xaea   : > { %8299 = vrot.lane.b32.xlu1 %v15628_v38, %s12999_s26 }
 0xaeb   : > { %11284 = vmatpush3.bf16.msra.mxu0 %v16026_v42  ;;  %8491 = vrot.lane.b32.xlu0 %v15610_v14, %s13000_s27 }
 0xaec   : > { %11285 = vmatprep.subr.bf16.mxu0 %v15917_v34 }
 0xaed   : > { %v16172_v25 = vpop.permute.xlu0 %7077 }
 0xaee   : > { %11270 = vmatmul.mubr.bf16.gmra.mrb[36].mxu0 %v12806_v52  ;;  %8303 = vrot.lane.b32.xlu1 %v15641_v50, %s12999_s26  ;;  %s13003_s26 = smov 44  }
 0xaef   : > { %11286 = vmatpush3.bf16.msra.mxu0 %v15917_v34  ;;  %8495 = vrot.lane.b32.xlu0 %v15616_v55, %s13000_s27  ;;  %v16192_v34 = vpop.permute.xlu1 %6283 }
 0xaf0   : > { %11287 = vmatprep.subr.bf16.mxu0 %v16044_v19  ;;  %11289 = vmatprep.mubr.bf16.mxu0 %v12807_v46 }
 0xaf1   : > { %v16182_v28 = vpop.permute.xlu0 %7081 }
 0xaf2   : > { %8493 = vrot.lane.b32.xlu1 %v15608_v35, %s13000_s27 }
 0xaf3   : > { %11288 = vmatpush3.bf16.msra.mxu0 %v16044_v19  ;;  %8499 = vrot.lane.b32.xlu0 %v15624_v5, %s13000_s27  ;;  %v16208_v20 = vpop.permute.xlu1 %6473  ;;  %v12815_v19 = vld [vmem:[%s17123_s4 + $0x240] sm:$0xff]  }
 0xaf4   : > { %11305 = vmatprep.subr.bf16.mxu0 %v15929_v49 }
 0xaf5   : > { %v16198_v8 = vpop.permute.xlu0 %7085 }
 0xaf6   : > { %11290 = vmatmul.mubr.bf16.vlgmr.msra.gmra.mrb[24].mxu0 %v12808_v36  ;;  %8497 = vrot.lane.b32.xlu1 %v15620_v17, %s13000_s27  ;;  %v12822_v36 = vld [vmem:[%s17123_s4 + $0x278] sm:$0xff]  }
 0xaf7   : > { %11306 = vmatpush3.bf16.msra.mxu0 %v15929_v49  ;;  %8503 = vrot.lane.b32.xlu0 %v15632_v37, %s13000_s27  ;;  %v12811_v49 = vld [vmem:[%s17123_s4 + $0x220] sm:$0xff]   ;;  %v16229_v39 = vpop.permute.xlu1 %6477 }
 0xaf8   : > { %11307 = vmatprep.subr.bf16.mxu0 %v16060_v56  ;;  %11293 = vmatprep.mubr.bf16.mxu0 %v12809_v29 }
 0xaf9   : > { %v16206_v59 = vpop.permute.xlu0 %7089 }
 0xafa   : > { %8501 = vrot.lane.b32.xlu1 %v15628_v38, %s13000_s27 }
 0xafb   : > { %11308 = vmatpush3.bf16.msra.mxu0 %v16060_v56  ;;  %4322 = vrot.lane.b32.xlu0 %v15610_v14, %s12979_s16  ;;  %v16248_v41 = vpop.permute.xlu1 %6481  ;;  %v12846_v56 = vld [vmem:[%s17123_s4 + $0x40] sm:$0xff]  }
 0xafc   : > { %11309 = vmatprep.subr.bf16.mxu0 %v15941_v44  ;;  %11033 = vmatprep.mubr.bf16.mxu1 %v12846_v56 }
 0xafd   : > { %v16222_v13 = vpop.permute.xlu0 %7279 }
 0xafe   : > { %11294 = vmatmul.mubr.bf16.gmra.mrb[28].mxu0 %v12810_v54  ;;  %8505 = vrot.lane.b32.xlu1 %v15641_v50, %s13000_s27 }
 0xaff   : > { %11310 = vmatpush3.bf16.msra.mxu0 %v15941_v44  ;;  %4324 = vrot.lane.b32.xlu0 %v15608_v35, %s12979_s16  ;;  %v12813_v44 = vld [vmem:[%s17123_s4 + $0x230] sm:$0xff]  }
 0xb00   : > { %11311 = vmatprep.subr.bf16.mxu0 %v16081_v10  ;;  %11297 = vmatprep.mubr.bf16.mxu0 %v12811_v49  ;;  %v12824_v49 = vld [vmem:[%s17123_s4 + $0x288] sm:$0xff]  }
 0xb01   : > { %v16232_v48 = vpop.permute.xlu0 %7283 }
 0xb02   : > { %8693 = vrot.lane.b32.xlu1 %v15610_v14, %s13001_s20 }
 0xb03   : > { %11312 = vmatpush3.bf16.msra.mxu0 %v16081_v10  ;;  %4326 = vrot.lane.b32.xlu0 %v15616_v55, %s12979_s16  ;;  %v12816_v10 = vld [vmem:[%s17123_s4 + $0x248] sm:$0xff]  }
 0xb04   : > { %11313 = vmatprep.subr.bf16.mxu0 %v15951_v11 }
 0xb05   : > { %v16246_v9 = vpop.permute.xlu0 %7287 }
 0xb06   : > { %11298 = vmatmul.mubr.bf16.gmra.mrb[32].mxu0 %v12812_v4  ;;  %8695 = vrot.lane.b32.xlu1 %v15608_v35, %s13001_s20 }
 0xb07   : > { %11314 = vmatpush3.bf16.msra.mxu0 %v15951_v11  ;;  %4328 = vrot.lane.b32.xlu0 %v15620_v17, %s12979_s16  ;;  %v16266_v11 = vpop.permute.xlu1 %6485 }
 0xb08   : > { %11315 = vmatprep.subr.bf16.mxu0 %v16100_v57  ;;  %11301 = vmatprep.mubr.bf16.mxu0 %v12813_v44 }
 0xb09   : > { %v16256_v42 = vpop.permute.xlu0 %7291 }
 0xb0a   : > { %8697 = vrot.lane.b32.xlu1 %v15616_v55, %s13001_s20 }
 0xb0b   : > { %11316 = vmatpush3.bf16.msra.mxu0 %v16100_v57  ;;  %4330 = vrot.lane.b32.xlu0 %v15624_v5, %s12979_s16  ;;  %v16285_v43 = vpop.permute.xlu1 %6675 }
 0xb0c   : > { %11317 = vmatprep.subr.bf16.mxu0 %v15963_v16 }
 0xb0d   : > { %v16272_v33 = vpop.permute.xlu0 %7481 }
 0xb0e   : > { %11302 = vmatmul.mubr.bf16.gmra.mrb[36].mxu0 %v12814_v21  ;;  %8699 = vrot.lane.b32.xlu1 %v15620_v17, %s13001_s20  ;;  %v12826_v21 = vld [vmem:[%s17123_s4 + $0x298] sm:$0xff]  }
 0xb0f   : > { %11318 = vmatpush3.bf16.msra.mxu0 %v15963_v16  ;;  %4332 = vrot.lane.b32.xlu0 %v15628_v38, %s12979_s16  ;;  %v12817_v16 = vld [vmem:[%s17123_s4 + $0x250] sm:$0xff]   ;;  %v16306_v2 = vpop.permute.xlu1 %6679 }
 0xb10   : > { %11319 = vmatprep.subr.bf16.mxu0 %v16118_v63  ;;  %11321 = vmatprep.mubr.bf16.mxu0 %v12815_v19  ;;  %v12827_v19 = vld [vmem:[%s17123_s4 + $0x2a0] sm:$0xff]  }
 0xb11   : > { %v16283_v18 = vpop.permute.xlu0 %7485 }
 0xb12   : > { %8701 = vrot.lane.b32.xlu1 %v15624_v5, %s13001_s20 }
 0xb13   : > { %11320 = vmatpush3.bf16.msra.mxu0 %v16118_v63  ;;  %4334 = vrot.lane.b32.xlu0 %v15632_v37, %s12979_s16  ;;  %v16325_v30 = vpop.permute.xlu1 %6683 }
 0xb14   : > { %11337 = vmatprep.subr.bf16.mxu0 %v15975_v32 }
 0xb15   : > { %v16299_v40 = vpop.permute.xlu0 %7489 }
 0xb16   : > { %11322 = vmatmul.mubr.bf16.vlgmr.msra.gmra.mrb[24].mxu0 %v12816_v10  ;;  %8703 = vrot.lane.b32.xlu1 %v15628_v38, %s13001_s20 }
 0xb17   : > { %11338 = vmatpush3.bf16.msra.mxu0 %v15975_v32  ;;  %4336 = vrot.lane.b32.xlu0 %v15641_v50, %s12979_s16  ;;  %v12819_v32 = vld [vmem:[%s17123_s4 + $0x260] sm:$0xff]  }
 0xb18   : > { %11339 = vmatprep.subr.bf16.mxu0 %v16134_v31  ;;  %11325 = vmatprep.mubr.bf16.mxu0 %v12817_v16  ;;  %v12828_v16 = vld [vmem:[%s17123_s4 + $0x2a8] sm:$0xff]  }
 0xb19   : > { %v16309_v57 = vpop.permute.xlu0 %7493 }
 0xb1a   : > { %8705 = vrot.lane.b32.xlu1 %v15632_v37, %s13001_s20 }
 0xb1b   : > { %11340 = vmatpush3.bf16.msra.mxu0 %v16134_v31  ;;  %8895 = vrot.lane.b32.xlu0 %v15610_v14, %s13002_s19 }
 0xb1c   : > { %11341 = vmatprep.subr.bf16.mxu0 %v15985_v26 }
 0xb1d   : > { %v16323_v63 = vpop.permute.xlu0 %7683 }
 0xb1e   : > { %11326 = vmatmul.mubr.bf16.gmra.mrb[28].mxu0 %v12818_v7  ;;  %8707 = vrot.lane.b32.xlu1 %v15641_v50, %s13001_s20 }
 0xb1f   : > { %11342 = vmatpush3.bf16.msra.mxu0 %v15985_v26  ;;  %8899 = vrot.lane.b32.xlu0 %v15616_v55, %s13002_s19  ;;  %v16343_v26 = vpop.permute.xlu1 %6687 }
 0xb20   : > { %11343 = vmatprep.subr.bf16.mxu0 %v16155_v3  ;;  %11329 = vmatprep.mubr.bf16.mxu0 %v12819_v32 }
 0xb21   : > { %v16333_v31 = vpop.permute.xlu0 %7687 }
 0xb22   : > { %8897 = vrot.lane.b32.xlu1 %v15608_v35, %s13002_s19 }
 0xb23   : > { %11344 = vmatpush3.bf16.msra.mxu0 %v16155_v3  ;;  %8903 = vrot.lane.b32.xlu0 %v15624_v5, %s13002_s19  ;;  %v16359_v46 = vpop.permute.xlu1 %6877 }
 0xb24   : > { %11345 = vmatprep.subr.bf16.mxu0 %v15997_v61 }
 0xb25   : > { %v16349_v52 = vpop.permute.xlu0 %7691 }
 0xb26   : > { %11330 = vmatmul.mubr.bf16.gmra.mrb[32].mxu0 %v12820_v6  ;;  %8901 = vrot.lane.b32.xlu1 %v15620_v17, %s13002_s19  ;;  %v12830_v6 = vld [vmem:[%s17123_s4 + $0x2b8] sm:$0xff]  }
 0xb27   : > { %11346 = vmatpush3.bf16.msra.mxu0 %v15997_v61  ;;  %8907 = vrot.lane.b32.xlu0 %v15632_v37, %s13002_s19  ;;  %v12823_v61 = vld [vmem:[%s17123_s4 + $0x280] sm:$0xff]  }
 0xb28   : > { %11347 = vmatprep.subr.bf16.mxu0 %v16174_v53  ;;  %11333 = vmatprep.mubr.bf16.mxu0 %v12821_v23 }
 0xb29   : > { %v16357_v3 = vpop.permute.xlu0 %7695 }
 0xb2a   : > { %8905 = vrot.lane.b32.xlu1 %v15628_v38, %s13002_s19 }
 0xb2b   : > { %11348 = vmatpush3.bf16.msra.mxu0 %v16174_v53  ;;  %4653 = vrot.lane.b32.xlu0 %v15610_v14, %s17278_s24  ;;  %v16380_v53 = vpop.permute.xlu1 %6881 }
 0xb2c   : > { %11349 = vmatprep.subr.bf16.mxu0 %v16010_v12 }
 0xb2d   : > { %v16373_v29 = vpop.permute.xlu0 %7885 }
 0xb2e   : > { %11334 = vmatmul.mubr.bf16.gmra.mrb[36].mxu0 %v12822_v36  ;;  %8909 = vrot.lane.b32.xlu1 %v15641_v50, %s13002_s19  ;;  %s386_s19 = scalar_lea.vmem %s17130_s11, %s10186_s23 }
 0xb2f   : > { %11350 = vmatpush3.bf16.msra.mxu0 %v16010_v12  ;;  %4655 = vrot.lane.b32.xlu0 %v15608_v35, %s17278_s24  ;;  %v12825_v12 = vld [vmem:[%s17123_s4 + $0x290] sm:$0xff]   ;;  %v16399_v44 = vpop.permute.xlu1 %6885 }
 0xb30   : > { %11351 = vmatprep.subr.bf16.mxu0 %v16192_v34  ;;  %11353 = vmatprep.mubr.bf16.mxu0 %v12823_v61  ;;  %v12832_v61 = vld [vmem:[%s17123_s4 + $0x2c8] sm:$0xff]  }
 0xb31   : > { %v16383_v54 = vpop.permute.xlu0 %7889 }
 0xb32   : > { %9097 = vrot.lane.b32.xlu1 %v15610_v14, %s13003_s26 }
 0xb33   : > { %11352 = vmatpush3.bf16.msra.mxu0 %v16192_v34  ;;  %4657 = vrot.lane.b32.xlu0 %v15616_v55, %s17278_s24 }
 0xb34   : > { %11369 = vmatprep.subr.bf16.mxu0 %v16021_v51 }
 0xb35   : > { %v16397_v4 = vpop.permute.xlu0 %7893 }
 0xb36   : > { %11354 = vmatmul.mubr.bf16.vlgmr.msra.gmra.mrb[24].mxu0 %v12824_v49  ;;  %9099 = vrot.lane.b32.xlu1 %v15608_v35, %s13003_s26  ;;  %v12833_v49 = vld [vmem:[%s17123_s4 + $0x2d0] sm:$0xff]  }
 0xb37   : > { %11370 = vmatpush3.bf16.msra.mxu0 %v16021_v51  ;;  %4659 = vrot.lane.b32.xlu0 %v15620_v17, %s17278_s24  ;;  %v16417_v51 = vpop.permute.xlu1 %6889 }
 0xb38   : > { %11371 = vmatprep.subr.bf16.mxu0 %v16208_v20  ;;  %11357 = vmatprep.mubr.bf16.mxu0 %v12825_v12 }
 0xb39   : > { %v16407_v34 = vpop.permute.xlu0 %7897 }
 0xb3a   : > { %9101 = vrot.lane.b32.xlu1 %v15616_v55, %s13003_s26 }
 0xb3b   : > { %11372 = vmatpush3.bf16.msra.mxu0 %v16208_v20  ;;  %4661 = vrot.lane.b32.xlu0 %v15624_v5, %s17278_s24  ;;  %v16433_v10 = vpop.permute.xlu1 %7079 }
 0xb3c   : > { %11373 = vmatprep.subr.bf16.mxu0 %v16034_v62 }
 0xb3d   : > { %v16423_v56 = vpop.permute.xlu0 %8087 }
 0xb3e   : > { %11358 = vmatmul.mubr.bf16.gmra.mrb[28].mxu0 %v12826_v21  ;;  %9103 = vrot.lane.b32.xlu1 %v15620_v17, %s13003_s26  ;;  %v12835_v21 = vld [vmem:[%s17123_s4 + $0x2e0] sm:$0xff]  }
 0xb3f   : > { %11374 = vmatpush3.bf16.msra.mxu0 %v16034_v62  ;;  %4663 = vrot.lane.b32.xlu0 %v15628_v38, %s17278_s24  ;;  %v12829_v62 = vld [vmem:[%s17123_s4 + $0x2b0] sm:$0xff]  }
 0xb40   : > { %11375 = vmatprep.subr.bf16.mxu0 %v16229_v39  ;;  %11361 = vmatprep.mubr.bf16.mxu0 %v12827_v19 }
 0xb41   : > { %v16431_v20 = vpop.permute.xlu0 %8091 }
 0xb42   : > { %9105 = vrot.lane.b32.xlu1 %v15624_v5, %s13003_s26 }
 0xb43   : > { %11376 = vmatpush3.bf16.msra.mxu0 %v16229_v39  ;;  %4665 = vrot.lane.b32.xlu0 %v15632_v37, %s17278_s24  ;;  %v16454_v39 = vpop.permute.xlu1 %7083 }
 0xb44   : > { %11377 = vmatprep.subr.bf16.mxu0 %v16047_v0 }
 0xb45   : > { %v16447_v7 = vpop.permute.xlu0 %8095 }
 0xb46   : > { %11362 = vmatmul.mubr.bf16.gmra.mrb[32].mxu0 %v12828_v16  ;;  %9107 = vrot.lane.b32.xlu1 %v15628_v38, %s13003_s26  ;;  %v12837_v16 = vld [vmem:[%s17123_s4 + $0x2f0] sm:$0xff]  }
 0xb47   : > { %11378 = vmatpush3.bf16.msra.mxu0 %v16047_v0  ;;  %4667 = vrot.lane.b32.xlu0 %v15641_v50, %s17278_s24  ;;  %v12831_v0 = vld [vmem:[%s17123_s4 + $0x2c0] sm:$0xff]   ;;  %v16471_v36 = vpop.permute.xlu1 %7087 }
 0xb48   : > { %11379 = vmatprep.subr.bf16.mxu0 %v16248_v41  ;;  %11365 = vmatprep.mubr.bf16.mxu0 %v12829_v62 }
 0xb49   : > { %v16457_v32 = vpop.permute.xlu0 %8099 }
 0xb4a   : > { %9109 = vrot.lane.b32.xlu1 %v15632_v37, %s13003_s26 }
 0xb4b   : > { %11380 = vmatpush3.bf16.msra.mxu0 %v16248_v41 }
 0xb4c   : > { %11381 = vmatprep.subr.bf16.mxu0 %v16058_v60 }
 0xb4d   : > { %v16469_v23 = vpop.permute.xlu0 %8289 }
 0xb4e   : > { %11366 = vmatmul.mubr.bf16.gmra.mrb[36].mxu0 %v12830_v6  ;;  %9111 = vrot.lane.b32.xlu1 %v15641_v50, %s13003_s26  ;;  %v12839_v6 = vld [vmem:[%s17123_s4 + $0x300] sm:$0xff]  }
 0xb4f   : > { %11382 = vmatpush3.bf16.msra.mxu0 %v16058_v60  ;;  %11385 = vmatprep.mubr.bf16.mxu0 %v12831_v0 }
 0xb50   : > { %11383 = vmatprep.subr.bf16.mxu0 %v16266_v11 }
 0xb51   : > { %v16477_v41 = vpop.permute.xlu0 %8293 }
 0xb53   : > { %11384 = vmatpush3.bf16.msra.mxu0 %v16266_v11  ;;  %v12834_v11 = vld [vmem:[%s17123_s4 + $0x2d8] sm:$0xff]  }
 0xb54   : > { %11401 = vmatprep.subr.bf16.mxu0 %v16074_v1 }
 0xb55   : > { %v16487_v12 = vpop.permute.xlu0 %8297 }
 0xb56   : > { %11386 = vmatmul.mubr.bf16.vlgmr.msra.gmra.mrb[24].mxu0 %v12832_v61  ;;  %v12841_v61 = vld [vmem:[%s17123_s4 + $0x310] sm:$0xff]  }
 0xb57   : > { %11402 = vmatpush3.bf16.msra.mxu0 %v16074_v1  ;;  %11389 = vmatprep.mubr.bf16.mxu0 %v12833_v49 }
 0xb58   : > { %11403 = vmatprep.subr.bf16.mxu0 %v16285_v43 }
 0xb59   : > { %v16491_v60 = vpop.permute.xlu0 %8301 }
 0xb5b   : > { %11404 = vmatpush3.bf16.msra.mxu0 %v16285_v43  ;;  %v12836_v43 = vld [vmem:[%s17123_s4 + $0x2e8] sm:$0xff]  }
 0xb5c   : > { %11405 = vmatprep.subr.bf16.mxu0 %v16084_v27 }
 0xb5d   : > { %v16501_v19 = vpop.permute.xlu0 %8491 }
 0xb5e   : > { %11390 = vmatmul.mubr.bf16.gmra.mrb[28].mxu0 %v12834_v11  ;;  %v12843_v11 = vld [vmem:[%s17123_s4 + $0x320] sm:$0xff]  }
 0xb5f   : > { %11406 = vmatpush3.bf16.msra.mxu0 %v16084_v27  ;;  %11393 = vmatprep.mubr.bf16.mxu0 %v12835_v21 }
 0xb60   : > { %11407 = vmatprep.subr.bf16.mxu0 %v16306_v2 }
 0xb61   : > { %v16505_v1 = vpop.permute.xlu0 %8495 }
 0xb63   : > { %11408 = vmatpush3.bf16.msra.mxu0 %v16306_v2  ;;  %v12838_v2 = vld [vmem:[%s17123_s4 + $0x2f8] sm:$0xff]  }
 0xb64   : > { %11409 = vmatprep.subr.bf16.mxu0 %v16098_v24 }
 0xb65   : > { %v16515_v62 = vpop.permute.xlu0 %8499 }
 0xb66   : > { %11394 = vmatmul.mubr.bf16.gmra.mrb[32].mxu0 %v12836_v43  ;;  %v12845_v43 = vld [vmem:[%s17123_s4 + $0x330] sm:$0xff]  }
 0xb67   : > { %11410 = vmatpush3.bf16.msra.mxu0 %v16098_v24  ;;  %11397 = vmatprep.mubr.bf16.mxu0 %v12837_v16 }
 0xb68   : > { %11411 = vmatprep.subr.bf16.mxu0 %v16325_v30 }
 0xb69   : > { %v16519_v27 = vpop.permute.xlu0 %8503 }
 0xb6b   : > { %11412 = vmatpush3.bf16.msra.mxu0 %v16325_v30  ;;  %v12840_v30 = vld [vmem:[%s17123_s4 + $0x308] sm:$0xff]  }
 0xb6c   : > { %11413 = vmatprep.subr.bf16.mxu0 %v16108_v22 }
 0xb6d   : > { %v4323_v0 = vpop.permute.xlu0 %4322 }
 0xb6e   : > { %11017 = vmatprep.subr.bf16.mxu1 %v4323_v0  ;;  %11398 = vmatmul.mubr.bf16.gmra.mrb[36].mxu0 %v12838_v2  ;;  %v12848_v2 = vld [vmem:[%s17123_s4 + $0x48] sm:$0xff]  }
 0xb6f   : > { %11018 = vmatpush3.bf16.msra.mxu1 %v4323_v0  ;;  %11414 = vmatpush3.bf16.msra.mxu0 %v16108_v22  ;;  %v12850_v0 = vld [vmem:[%s17123_s4 + $0x50] sm:$0xff]  }
 0xb70   : > { %11415 = vmatprep.subr.bf16.mxu0 %v16343_v26  ;;  %11417 = vmatprep.mubr.bf16.mxu0 %v12839_v6  ;;  %v12849_v6 = vld [vmem:[%s17123_s4 + $0x340] sm:$0xff]  }
 0xb71   : > { %v4325_v24 = vpop.permute.xlu0 %4324 }
 0xb72   : > { %11019 = vmatprep.subr.bf16.mxu1 %v4325_v24 }
 0xb73   : > { %11020 = vmatpush3.bf16.msra.mxu1 %v4325_v24  ;;  %11416 = vmatpush3.bf16.msra.mxu0 %v16343_v26  ;;  %v12842_v26 = vld [vmem:[%s17123_s4 + $0x318] sm:$0xff]   ;;  %v12851_v24 = vld [vmem:[%s17123_s4 + $0x348] sm:$0xff]  }
 0xb74   : > { %11433 = vmatprep.subr.bf16.mxu0 %v16124_v58 }
 0xb75   : > { %v4327_v49 = vpop.permute.xlu0 %4326 }
 0xb76   : > { %11021 = vmatprep.subr.bf16.mxu1 %v4327_v49  ;;  %11418 = vmatmul.mubr.bf16.vlgmr.msra.gmra.mrb[24].mxu0 %v12840_v30  ;;  %v12852_v30 = vld [vmem:[%s17123_s4 + $0x58] sm:$0xff]  }
 0xb77   : > { %11022 = vmatpush3.bf16.msra.mxu1 %v4327_v49  ;;  %11434 = vmatpush3.bf16.msra.mxu0 %v16124_v58  ;;  %v12856_v49 = vld [vmem:[%s17123_s4 + $0x68] sm:$0xff]  }
 0xb78   : > { %11435 = vmatprep.subr.bf16.mxu0 %v16359_v46  ;;  %11421 = vmatprep.mubr.bf16.mxu0 %v12841_v61  ;;  %v12854_v61 = vld [vmem:[%s17123_s4 + $0x60] sm:$0xff]  }
 0xb79   : > { %v4329_v22 = vpop.permute.xlu0 %4328 }
 0xb7a   : > { %11023 = vmatprep.subr.bf16.mxu1 %v4329_v22 }
 0xb7b   : > { %11024 = vmatpush3.bf16.msra.mxu1 %v4329_v22  ;;  %11436 = vmatpush3.bf16.msra.mxu0 %v16359_v46  ;;  %v12844_v46 = vld [vmem:[%s17123_s4 + $0x328] sm:$0xff]   ;;  %v12858_v22 = vld [vmem:[%s17123_s4 + $0x70] sm:$0xff]  }
 0xb7c   : > { %11437 = vmatprep.subr.bf16.mxu0 %v16132_v15 }
 0xb7d   : > { %v4331_v21 = vpop.permute.xlu0 %4330 }
 0xb7e   : > { %11025 = vmatprep.subr.bf16.mxu1 %v4331_v21  ;;  %11422 = vmatmul.mubr.bf16.gmra.mrb[28].mxu0 %v12842_v26 }
 0xb7f   : > { %11026 = vmatpush3.bf16.msra.mxu1 %v4331_v21  ;;  %11438 = vmatpush3.bf16.msra.mxu0 %v16132_v15 }
 0xb80   : > { %11439 = vmatprep.subr.bf16.mxu0 %v16380_v53  ;;  %11425 = vmatprep.mubr.bf16.mxu0 %v12843_v11  ;;  %v12864_v11 = vld [vmem:[%s17123_s4 + $0x8] sm:$0xff]  }
 0xb81   : > { %v4333_v58 = vpop.permute.xlu0 %4332 }
 0xb82   : > { %11027 = vmatprep.subr.bf16.mxu1 %v4333_v58 }
 0xb83   : > { %11028 = vmatpush3.bf16.msra.mxu1 %v4333_v58  ;;  %11440 = vmatpush3.bf16.msra.mxu0 %v16380_v53  ;;  %v12847_v53 = vld [vmem:[%s17123_s4 + $0x338] sm:$0xff]   ;;  %v12867_v58 = vld [vmem:[%s17123_s4 + $0x390] sm:$0xff]  }
 0xb84   : > { %11441 = vmatprep.subr.bf16.mxu0 %v16148_v45 }
 0xb85   : > { %v4335_v16 = vpop.permute.xlu0 %4334 }
 0xb86   : > { %11029 = vmatprep.subr.bf16.mxu1 %v4335_v16  ;;  %11426 = vmatmul.mubr.bf16.gmra.mrb[32].mxu0 %v12844_v46 }
 0xb87   : > { %11030 = vmatpush3.bf16.msra.mxu1 %v4335_v16  ;;  %11442 = vmatpush3.bf16.msra.mxu0 %v16148_v45  ;;  %v12869_v16 = vld [vmem:[%s17123_s4 + $0x3a0] sm:$0xff]  }
 0xb88   : > { %11443 = vmatprep.subr.bf16.mxu0 %v16399_v44  ;;  %11429 = vmatprep.mubr.bf16.mxu0 %v12845_v43 }
 0xb89   : > { %v4337_v15 = vpop.permute.xlu0 %4336 }
 0xb8a   : > { %11031 = vmatprep.subr.bf16.mxu1 %v4337_v15 }
 0xb8b   : > { %11032 = vmatpush3.bf16.msra.mxu1 %v4337_v15  ;;  %11444 = vmatpush3.bf16.msra.mxu0 %v16399_v44 }
 0xb8c   : > { %11049 = vmatprep.subr.bf16.mxu1 %v15610_v14  ;;  %11445 = vmatprep.subr.bf16.mxu0 %v16158_v47 }
 0xb8d   : > { %v16570_v45 = vpop.permute.xlu0 %8895 }
 0xb8e   : > { %11430 = vmatmul.mubr.bf16.gmra.mrb[36].mxu0 %v12847_v53  ;;  %11034 = vmatmul.mubr.bf16.vlgmr.msra.gmra.mrb[216].mxu1 %v12848_v2  ;;  %v12870_v53 = vld [vmem:[%s17123_s4 + $0x3a8] sm:$0xff]   ;;  %v12871_v2 = vld [vmem:[%s17123_s4 + $0x3b0] sm:$0xff]  }
 0xb8f   : > { %11050 = vmatpush3.bf16.msra.mxu1 %v15610_v14  ;;  %11446 = vmatpush3.bf16.msra.mxu0 %v16158_v47  ;;  %v12853_v47 = vld [vmem:[%s17123_s4 + $0x350] sm:$0xff]  }
 0xb90   : > { %11051 = vmatprep.subr.bf16.mxu1 %v15608_v35  ;;  %11447 = vmatprep.subr.bf16.mxu0 %v16417_v51 }
 0xb91   : > { %v16582_v44 = vpop.permute.xlu0 %8899  ;;  %11449 = vmatprep.mubr.bf16.mxu0 %v12849_v6  ;;  %11037 = vmatprep.mubr.bf16.mxu1 %v12850_v0  ;;  %v12872_v0 = vld [vmem:[%s17123_s4 + $0x3b8] sm:$0xff]  }
 0xb93   : > { %11052 = vmatpush3.bf16.msra.mxu1 %v15608_v35  ;;  %11448 = vmatpush3.bf16.msra.mxu0 %v16417_v51  ;;  %v12855_v51 = vld [vmem:[%s17123_s4 + $0x358] sm:$0xff]  }
 0xb94   : > { %11053 = vmatprep.subr.bf16.mxu1 %v15616_v55  ;;  %11465 = vmatprep.subr.bf16.mxu0 %v16172_v25 }
 0xb95   : > { %v16594_v14 = vpop.permute.xlu0 %8903 }
 0xb96   : > { %11450 = vmatmul.mubr.bf16.vlgmr.msra.gmra.mrb[24].mxu0 %v12851_v24  ;;  %11038 = vmatmul.mubr.bf16.gmra.mrb[220].mxu1 %v12852_v30  ;;  %v12873_v24 = vld [vmem:[%s17123_s4 + $0x3c0] sm:$0xff]  }
 0xb97   : > { %11054 = vmatpush3.bf16.msra.mxu1 %v15616_v55  ;;  %11466 = vmatpush3.bf16.msra.mxu0 %v16172_v25  ;;  %v12857_v25 = vld [vmem:[%s17123_s4 + $0x360] sm:$0xff]  }
 0xb98   : > { %11055 = vmatprep.subr.bf16.mxu1 %v15620_v17  ;;  %11467 = vmatprep.subr.bf16.mxu0 %v16433_v10 }
 0xb99   : > { %v16606_v35 = vpop.permute.xlu0 %8907  ;;  %11453 = vmatprep.mubr.bf16.mxu0 %v12853_v47  ;;  %11041 = vmatprep.mubr.bf16.mxu1 %v12854_v61  ;;  %v12875_v47 = vld [vmem:[%s17123_s4 + $0x3d0] sm:$0xff]  }
 0xb9b   : > { %11056 = vmatpush3.bf16.msra.mxu1 %v15620_v17  ;;  %11468 = vmatpush3.bf16.msra.mxu0 %v16433_v10  ;;  %v12859_v17 = vld [vmem:[%s17123_s4 + $0x368] sm:$0xff]   ;;  %v12860_v10 = vld [vmem:[%s17123_s4 + $0x78] sm:$0xff]  }
 0xb9c   : > { %11057 = vmatprep.subr.bf16.mxu1 %v15624_v5  ;;  %11469 = vmatprep.subr.bf16.mxu0 %v16182_v28 }
 0xb9d   : > { %v4654_v55 = vpop.permute.xlu0 %4653 }
 0xb9e   : > { %11454 = vmatmul.mubr.bf16.gmra.mrb[28].mxu0 %v12855_v51  ;;  %11042 = vmatmul.mubr.bf16.gmra.mrb[224].mxu1 %v12856_v49  ;;  %v12877_v51 = vld [vmem:[%s17123_s4 + $0x3e0] sm:$0xff]  }
 0xb9f   : > { %11058 = vmatpush3.bf16.msra.mxu1 %v15624_v5  ;;  %11470 = vmatpush3.bf16.msra.mxu0 %v16182_v28  ;;  %v12861_v5 = vld [vmem:[%s17123_s4 + $0x370] sm:$0xff]   ;;  %v12862_v28 = vld [vmem:[%s17123_s4] sm:$0xff]  }
 0xba0   : > { %11059 = vmatprep.subr.bf16.mxu1 %v15628_v38  ;;  %11471 = vmatprep.subr.bf16.mxu0 %v16454_v39 }
 0xba1   : > { %11457 = vmatprep.mubr.bf16.mxu0 %v12857_v25  ;;  %11045 = vmatprep.mubr.bf16.mxu1 %v12858_v22  ;;  %v4656_v26 = vpop.permute.xlu0 %4655  ;;  %v12881_v22 = vld [vmem:[%s17123_s4 + $0x400] sm:$0xff]  }
 0xba3   : > { %11060 = vmatpush3.bf16.msra.mxu1 %v15628_v38  ;;  %11472 = vmatpush3.bf16.msra.mxu0 %v16454_v39  ;;  %v12863_v39 = vld [vmem:[%s17123_s4 + $0x378] sm:$0xff]  }
 0xba4   : > { %11061 = vmatprep.subr.bf16.mxu1 %v15632_v37  ;;  %11473 = vmatprep.subr.bf16.mxu0 %v16198_v8 }
 0xba5   : > { %v4658_v38 = vpop.permute.xlu0 %4657 }
 0xba6   : > { %11458 = vmatmul.mubr.bf16.gmra.mrb[32].mxu0 %v12859_v17  ;;  %11046 = vmatmul.mubr.bf16.gmra.mrb[228].mxu1 %v12860_v10  ;;  %v12883_v10 = vld [vmem:[%s17123_s4 + $0x410] sm:$0xff]  }
 0xba7   : > { %11062 = vmatpush3.bf16.msra.mxu1 %v15632_v37  ;;  %11474 = vmatpush3.bf16.msra.mxu0 %v16198_v8  ;;  %v12865_v37 = vld [vmem:[%s17123_s4 + $0x380] sm:$0xff]   ;;  %v7092_v8 = vpop.permute.xlu1 %7091 }
 0xba8   : > { %11063 = vmatprep.subr.bf16.mxu1 %v15641_v50  ;;  %11475 = vmatprep.subr.bf16.mxu0 %v16471_v36 }
 0xba9   : > { %11461 = vmatprep.mubr.bf16.mxu0 %v12861_v5  ;;  %11065 = vmatprep.mubr.bf16.mxu1 %v12862_v28  ;;  %v4660_v21 = vpop.permute.xlu0 %4659  ;;  %v12885_v5 = vld [vmem:[%s17123_s4 + $0x420] sm:$0xff]  }
 0xbab   : > { %11064 = vmatpush3.bf16.msra.mxu1 %v15641_v50  ;;  %11476 = vmatpush3.bf16.msra.mxu0 %v16471_v36  ;;  %v12866_v50 = vld [vmem:[%s17123_s4 + $0x388] sm:$0xff]   ;;  %v7282_v46 = vpop.permute.xlu1 %7281 }
 0xbac   : > { %11081 = vmatprep.subr.bf16.mxu1 %v4654_v55  ;;  %11477 = vmatprep.subr.bf16.mxu0 %v16206_v59 }
 0xbad   : > { %v4662_v36 = vpop.permute.xlu0 %4661 }
 0xbae   : > { %11462 = vmatmul.mubr.bf16.gmra.mrb[36].mxu0 %v12863_v39  ;;  %11066 = vmatmul.mubr.bf16.vlgmr.msra.gmra.mrb[216].mxu1 %v12864_v11  ;;  %v12889_v11 = vld [vmem:[%s17123_s4 + $0x440] sm:$0xff]  }
 0xbaf   : > { %11082 = vmatpush3.bf16.msra.mxu1 %v4654_v55  ;;  %11478 = vmatpush3.bf16.msra.mxu0 %v16206_v59  ;;  %v12868_v59 = vld [vmem:[%s17123_s4 + $0x398] sm:$0xff]   ;;  %v7286_v15 = vpop.permute.xlu1 %7285  ;;  %v12879_v55 = vld [vmem:[%s17123_s4 + $0x3f0] sm:$0xff]  }
 0xbb0   : > { %11083 = vmatprep.subr.bf16.mxu1 %v4656_v26  ;;  %11479 = vmatprep.subr.bf16.mxu0 %v7092_v8 }
 0xbb1   : > { %11481 = vmatprep.mubr.bf16.mxu0 %v12865_v37  ;;  %v4664_v43 = vpop.permute.xlu0 %4663 }
 0xbb3   : > { %11084 = vmatpush3.bf16.msra.mxu1 %v4656_v26  ;;  %11480 = vmatpush3.bf16.msra.mxu0 %v7092_v8  ;;  %v7290_v6 = vpop.permute.xlu1 %7289  ;;  %v12891_v8 = vld [vmem:[%s17123_s4 + $0x450] sm:$0xff]  }
 0xbb4   : > { %11085 = vmatprep.subr.bf16.mxu1 %v4658_v38  ;;  %11497 = vmatprep.subr.bf16.mxu0 %v16222_v13 }
 0xbb6   : > { %11482 = vmatmul.mubr.bf16.vlgmr.msra.gmra.mrb[24].mxu0 %v12866_v50  ;;  %v12892_v50 = vld [vmem:[%s17123_s4 + $0x458] sm:$0xff]  }
 0xbb7   : > { %11086 = vmatpush3.bf16.msra.mxu1 %v4658_v38  ;;  %11498 = vmatpush3.bf16.msra.mxu0 %v16222_v13  ;;  %v4666_v13 = vpop.permute.xlu0 %4665  ;;  %v7294_v30 = vpop.permute.xlu1 %7293  ;;  %v12887_v38 = vld [vmem:[%s17123_s4 + $0x430] sm:$0xff]  }
 0xbb8   : > { %11087 = vmatprep.subr.bf16.mxu1 %v4660_v21  ;;  %11499 = vmatprep.subr.bf16.mxu0 %v7282_v46 }
 0xbb9   : > { %11485 = vmatprep.mubr.bf16.mxu0 %v12867_v58  ;;  %v12893_v58 = vld [vmem:[%s17123_s4 + $0x460] sm:$0xff]  }
 0xbbb   : > { %11088 = vmatpush3.bf16.msra.mxu1 %v4660_v21  ;;  %11500 = vmatpush3.bf16.msra.mxu0 %v7282_v46  ;;  %v7484_v61 = vpop.permute.xlu1 %7483  ;;  %v12932_v46 = vld [vmem:[%s17123_s4 + $0x20] sm:$0xff]  }
 0xbbc   : > { %11089 = vmatprep.subr.bf16.mxu1 %v4662_v36  ;;  %11501 = vmatprep.subr.bf16.mxu0 %v16232_v48 }
 0xbbe   : > { %11486 = vmatmul.mubr.bf16.gmra.mrb[28].mxu0 %v12868_v59  ;;  %v12894_v59 = vld [vmem:[%s17123_s4 + $0x468] sm:$0xff]  }
 0xbbf   : > { %11090 = vmatpush3.bf16.msra.mxu1 %v4662_v36  ;;  %11502 = vmatpush3.bf16.msra.mxu0 %v16232_v48  ;;  %v4668_v48 = vpop.permute.xlu0 %4667  ;;  %v7488_v49 = vpop.permute.xlu1 %7487  ;;  %v12930_v36 = vld [vmem:[%s17123_s4 + $0x18] sm:$0xff]  }
 0xbc0   : > { %11091 = vmatprep.subr.bf16.mxu1 %v4664_v43  ;;  %11503 = vmatprep.subr.bf16.mxu0 %v7286_v15 }
 0xbc1   : > { %11489 = vmatprep.mubr.bf16.mxu0 %v12869_v16  ;;  %v12895_v16 = vld [vmem:[%s17123_s4 + $0x470] sm:$0xff]  }
 0xbc3   : > { %11092 = vmatpush3.bf16.msra.mxu1 %v4664_v43  ;;  %11504 = vmatpush3.bf16.msra.mxu0 %v7286_v15  ;;  %v7492_v25 = vpop.permute.xlu1 %7491  ;;  %v12934_v43 = vld [vmem:[%s17123_s4 + $0x28] sm:$0xff]   ;;  %v12936_v15 = vld [vmem:[%s17123_s4 + $0x30] sm:$0xff]  }
 0xbc4   : > { %11093 = vmatprep.subr.bf16.mxu1 %v4666_v13  ;;  %11505 = vmatprep.subr.bf16.mxu0 %v16246_v9 }
 0xbc6   : > { %11490 = vmatmul.mubr.bf16.gmra.mrb[32].mxu0 %v12870_v53  ;;  %v12938_v53 = vld [vmem:[%s17123_s4 + $0x38] sm:$0xff]  }
 0xbc7   : > { %11094 = vmatpush3.bf16.msra.mxu1 %v4666_v13  ;;  %11506 = vmatpush3.bf16.msra.mxu0 %v16246_v9  ;;  %v12874_v9 = vld [vmem:[%s17123_s4 + $0x3c8] sm:$0xff]   ;;  %v7496_v17 = vpop.permute.xlu1 %7495  ;;  %v12896_v13 = vld [vmem:[%s17123_s4 + $0x478] sm:$0xff]  }
 0xbc8   : > { %11095 = vmatprep.subr.bf16.mxu1 %v4668_v48  ;;  %11507 = vmatprep.subr.bf16.mxu0 %v7290_v6 }
 0xbc9   : > { %11493 = vmatprep.mubr.bf16.mxu0 %v12871_v2  ;;  %v12897_v2 = vld [vmem:[%s17123_s4 + $0x480] sm:$0xff]  }
 0xbcb   : > { %11096 = vmatpush3.bf16.msra.mxu1 %v4668_v48  ;;  %11508 = vmatpush3.bf16.msra.mxu0 %v7290_v6  ;;  %v7686_v26 = vpop.permute.xlu1 %7685  ;;  %v12940_v6 = vld [vmem:[%s17123_s4 + $0x80] sm:$0xff]   ;;  %v12898_v48 = vld [vmem:[%s17123_s4 + $0x488] sm:$0xff]  }
 0xbcc   : > { %11509 = vmatprep.subr.bf16.mxu0 %v16256_v42 }
 0xbce   : > { %11494 = vmatmul.mubr.bf16.gmra.mrb[36].mxu0 %v12872_v0  ;;  %v12942_v0 = vld [vmem:[%s17123_s4 + $0x88] sm:$0xff]  }
 0xbcf   : > { %11510 = vmatpush3.bf16.msra.mxu0 %v16256_v42  ;;  %11513 = vmatprep.mubr.bf16.mxu0 %v12873_v24  ;;  %v12876_v42 = vld [vmem:[%s17123_s4 + $0x3d8] sm:$0xff]   ;;  %v7690_v28 = vpop.permute.xlu1 %7689  ;;  %v12899_v24 = vld [vmem:[%s17123_s4 + $0x490] sm:$0xff]  }
 0xbd0   : > { %11511 = vmatprep.subr.bf16.mxu0 %v7294_v30 }
 0xbd3   : > { %11512 = vmatpush3.bf16.msra.mxu0 %v7294_v30  ;;  %v7694_v39 = vpop.permute.xlu1 %7693  ;;  %v12944_v30 = vld [vmem:[%s17123_s4 + $0x90] sm:$0xff]  }
 0xbd4   : > { %11529 = vmatprep.subr.bf16.mxu0 %v16272_v33 }
 0xbd6   : > { %11514 = vmatmul.mubr.bf16.vlgmr.msra.gmra.mrb[24].mxu0 %v12874_v9  ;;  %v12900_v9 = vld [vmem:[%s17123_s4 + $0x498] sm:$0xff]  }
 0xbd7   : > { %11530 = vmatpush3.bf16.msra.mxu0 %v16272_v33  ;;  %11517 = vmatprep.mubr.bf16.mxu0 %v12875_v47  ;;  %v12878_v33 = vld [vmem:[%s17123_s4 + $0x3e8] sm:$0xff]   ;;  %v7698_v37 = vpop.permute.xlu1 %7697  ;;  %v12946_v47 = vld [vmem:[%s17123_s4 + $0x98] sm:$0xff]  }
 0xbd8   : > { %11531 = vmatprep.subr.bf16.mxu0 %v7484_v61 }
 0xbdb   : > { %11532 = vmatpush3.bf16.msra.mxu0 %v7484_v61  ;;  %v7888_v21 = vpop.permute.xlu1 %7887 }
 0xbdc   : > { %11533 = vmatprep.subr.bf16.mxu0 %v16283_v18 }
 0xbde   : > { %11518 = vmatmul.mubr.bf16.gmra.mrb[28].mxu0 %v12876_v42 }
 0xbdf   : > { %11534 = vmatpush3.bf16.msra.mxu0 %v16283_v18  ;;  %11521 = vmatprep.mubr.bf16.mxu0 %v12877_v51  ;;  %v12880_v18 = vld [vmem:[%s17123_s4 + $0x3f8] sm:$0xff]   ;;  %v12948_v51 = vld [vmem:[%s17123_s4 + $0xa0] sm:$0xff]  }
 0xbe0   : > { %11535 = vmatprep.subr.bf16.mxu0 %v7488_v49 }
 0xbe3   : > { %11536 = vmatpush3.bf16.msra.mxu0 %v7488_v49  ;;  %v12902_v49 = vld [vmem:[%s17123_s4 + $0x4a8] sm:$0xff]  }
 0xbe4   : > { %11537 = vmatprep.subr.bf16.mxu0 %v16299_v40 }
 0xbe6   : > { %11522 = vmatmul.mubr.bf16.gmra.mrb[32].mxu0 %v12878_v33  ;;  %v12950_v33 = vld [vmem:[%s17123_s4 + $0xa8] sm:$0xff]  }
 0xbe7   : > { %11538 = vmatpush3.bf16.msra.mxu0 %v16299_v40  ;;  %11525 = vmatprep.mubr.bf16.mxu0 %v12879_v55  ;;  %v12882_v40 = vld [vmem:[%s17123_s4 + $0x408] sm:$0xff]  }
 0xbe8   : > { %11539 = vmatprep.subr.bf16.mxu0 %v7492_v25 }
 0xbeb   : > { %11540 = vmatpush3.bf16.msra.mxu0 %v7492_v25  ;;  %v12952_v25 = vld [vmem:[%s17123_s4 + $0xb0] sm:$0xff]  }
 0xbec   : > { %11541 = vmatprep.subr.bf16.mxu0 %v16309_v57 }
 0xbee   : > { %11526 = vmatmul.mubr.bf16.gmra.mrb[36].mxu0 %v12880_v18  ;;  %v12904_v18 = vld [vmem:[%s17123_s4 + $0x4b8] sm:$0xff]  }
 0xbef   : > { %11542 = vmatpush3.bf16.msra.mxu0 %v16309_v57  ;;  %11545 = vmatprep.mubr.bf16.mxu0 %v12881_v22  ;;  %v12884_v57 = vld [vmem:[%s17123_s4 + $0x418] sm:$0xff]  }
 0xbf0   : > { %11543 = vmatprep.subr.bf16.mxu0 %v7496_v17  ;;  %v12954_v22 = vld [vmem:[%s17123_s4 + $0xb8] sm:$0xff]  }
 0xbf3   : > { %11544 = vmatpush3.bf16.msra.mxu0 %v7496_v17  ;;  %v12905_v17 = vld [vmem:[%s17123_s4 + $0x4c0] sm:$0xff]  }
 0xbf4   : > { %11561 = vmatprep.subr.bf16.mxu0 %v16323_v63 }
 0xbf6   : > { %11546 = vmatmul.mubr.bf16.vlgmr.msra.gmra.mrb[24].mxu0 %v12882_v40  ;;  %v12906_v40 = vld [vmem:[%s17123_s4 + $0x4c8] sm:$0xff]  }
 0xbf7   : > { %11562 = vmatpush3.bf16.msra.mxu0 %v16323_v63  ;;  %11549 = vmatprep.mubr.bf16.mxu0 %v12883_v10  ;;  %v12886_v63 = vld [vmem:[%s17123_s4 + $0x428] sm:$0xff]  }
 0xbf8   : > { %11563 = vmatprep.subr.bf16.mxu0 %v7686_v26 }
 0xbfb   : > { %11564 = vmatpush3.bf16.msra.mxu0 %v7686_v26  ;;  %v12907_v26 = vld [vmem:[%s17123_s4 + $0x4d0] sm:$0xff]  }
 0xbfc   : > { %11565 = vmatprep.subr.bf16.mxu0 %v16333_v31 }
 0xbfe   : > { %11550 = vmatmul.mubr.bf16.gmra.mrb[28].mxu0 %v12884_v57  ;;  %v12908_v57 = vld [vmem:[%s17123_s4 + $0x4d8] sm:$0xff]  }
 0xbff   : > { %11566 = vmatpush3.bf16.msra.mxu0 %v16333_v31  ;;  %11553 = vmatprep.mubr.bf16.mxu0 %v12885_v5  ;;  %v12888_v31 = vld [vmem:[%s17123_s4 + $0x438] sm:$0xff]   ;;  %v12909_v5 = vld [vmem:[%s17123_s4 + $0x4e0] sm:$0xff]  }
 0xc00   : > { %11567 = vmatprep.subr.bf16.mxu0 %v7690_v28 }
 0xc03   : > { %11568 = vmatpush3.bf16.msra.mxu0 %v7690_v28 }
 0xc04   : > { %11569 = vmatprep.subr.bf16.mxu0 %v16349_v52 }
 0xc06   : > { %11554 = vmatmul.mubr.bf16.gmra.mrb[32].mxu0 %v12886_v63  ;;  %v12911_v63 = vld [vmem:[%s17123_s4 + $0x4f0] sm:$0xff]  }
 0xc07   : > { %11570 = vmatpush3.bf16.msra.mxu0 %v16349_v52  ;;  %11557 = vmatprep.mubr.bf16.mxu0 %v12887_v38  ;;  %v12890_v52 = vld [vmem:[%s17123_s4 + $0x448] sm:$0xff]  }
 0xc08   : > { %11571 = vmatprep.subr.bf16.mxu0 %v7694_v39 }
 0xc0b   : > { %11572 = vmatpush3.bf16.msra.mxu0 %v7694_v39 }
 0xc0c   : > { %11573 = vmatprep.subr.bf16.mxu0 %v16357_v3 }
 0xc0e   : > { %11558 = vmatmul.mubr.bf16.gmra.mrb[36].mxu0 %v12888_v31  ;;  %v12913_v31 = vld [vmem:[%s17123_s4 + $0x500] sm:$0xff]  }
 0xc0f   : > { %11574 = vmatpush3.bf16.msra.mxu0 %v16357_v3  ;;  %11577 = vmatprep.mubr.bf16.mxu0 %v12889_v11  ;;  %v12928_v3 = vld [vmem:[%s17123_s4 + $0x10] sm:$0xff]   ;;  %v12914_v11 = vld [vmem:[%s17123_s4 + $0x508] sm:$0xff]  }
 0xc10   : > { %11575 = vmatprep.subr.bf16.mxu0 %v7698_v37  ;;  %11069 = vmatprep.mubr.bf16.mxu1 %v12928_v3 }
 0xc11   : > { %11070 = vmatmul.mubr.bf16.gmra.mrb[220].mxu1 %v12930_v36  ;;  %v12920_v36 = vld [vmem:[%s17123_s4 + $0x538] sm:$0xff]  }
 0xc12   : > { %11073 = vmatprep.mubr.bf16.mxu1 %v12932_v46  ;;  %v12923_v46 = vld [vmem:[%s17123_s4 + $0x550] sm:$0xff]  }
 0xc13   : > { %11576 = vmatpush3.bf16.msra.mxu0 %v7698_v37  ;;  %v12915_v37 = vld [vmem:[%s17123_s4 + $0x510] sm:$0xff]  }
 0xc14   : > { %11593 = vmatprep.subr.bf16.mxu0 %v16373_v29 }
 0xc16   : > { %11578 = vmatmul.mubr.bf16.vlgmr.msra.gmra.mrb[24].mxu0 %v12890_v52 }
 0xc17   : > { %11594 = vmatpush3.bf16.msra.mxu0 %v16373_v29  ;;  %11581 = vmatprep.mubr.bf16.mxu0 %v12891_v8  ;;  %v7892_v29 = vpop.permute.xlu1 %7891  ;;  %v12917_v8 = vld [vmem:[%s17123_s4 + $0x520] sm:$0xff]  }
 0xc18   : > { %11595 = vmatprep.subr.bf16.mxu0 %v7888_v21 }
 0xc19   : > { %11074 = vmatmul.mubr.bf16.gmra.mrb[224].mxu1 %v12934_v43 }
 0xc1a   : > { %11077 = vmatprep.mubr.bf16.mxu1 %v12936_v15  ;;  %v12926_v15 = vld [vmem:[%s17123_s4 + $0x568] sm:$0xff]  }
 0xc1b   : > { %11596 = vmatpush3.bf16.msra.mxu0 %v7888_v21 }
 0xc1c   : > { %11597 = vmatprep.subr.bf16.mxu0 %v16383_v54 }
 0xc1e   : > { %11582 = vmatmul.mubr.bf16.gmra.mrb[28].mxu0 %v12892_v50  ;;  %v12919_v50 = vld [vmem:[%s17123_s4 + $0x530] sm:$0xff]  }
 0xc1f   : > { %11598 = vmatpush3.bf16.msra.mxu0 %v16383_v54  ;;  %11585 = vmatprep.mubr.bf16.mxu0 %v12893_v58  ;;  %v7896_v54 = vpop.permute.xlu1 %7895  ;;  %v12921_v58 = vld [vmem:[%s17123_s4 + $0x540] sm:$0xff]  }
 0xc20   : > { %11599 = vmatprep.subr.bf16.mxu0 %v7892_v29 }
 0xc21   : > { %11078 = vmatmul.mubr.bf16.gmra.mrb[228].mxu1 %v12938_v53 }
 0xc22   : > { %11097 = vmatprep.mubr.bf16.mxu1 %v12940_v6 }
 0xc23   : > { %11600 = vmatpush3.bf16.msra.mxu0 %v7892_v29 }
 0xc24   : > { %11601 = vmatprep.subr.bf16.mxu0 %v16397_v4 }
 0xc26   : > { %11586 = vmatmul.mubr.bf16.gmra.mrb[32].mxu0 %v12894_v59 }
 0xc27   : > { %11602 = vmatpush3.bf16.msra.mxu0 %v16397_v4  ;;  %11589 = vmatprep.mubr.bf16.mxu0 %v12895_v16  ;;  %v7900_v4 = vpop.permute.xlu1 %7899  ;;  %v12925_v16 = vld [vmem:[%s17123_s4 + $0x560] sm:$0xff]  }
 0xc28   : > { %11603 = vmatprep.subr.bf16.mxu0 %v7896_v54 }
 0xc29   : > { %11098 = vmatmul.mubr.bf16.vlgmr.msra.gmra.mrb[216].mxu1 %v12942_v0 }
 0xc2a   : > { %11101 = vmatprep.mubr.bf16.mxu1 %v12944_v30  ;;  %v12937_v30 = vld [vmem:[%s17123_s4 + $0x598] sm:$0xff]  }
 0xc2b   : > { %11604 = vmatpush3.bf16.msra.mxu0 %v7896_v54 }
 0xc2c   : > { %11605 = vmatprep.subr.bf16.mxu0 %v16407_v34 }
 0xc2e   : > { %11590 = vmatmul.mubr.bf16.gmra.mrb[36].mxu0 %v12896_v13  ;;  %v12927_v13 = vld [vmem:[%s17123_s4 + $0x570] sm:$0xff]  }
 0xc2f   : > { %11606 = vmatpush3.bf16.msra.mxu0 %v16407_v34  ;;  %11609 = vmatprep.mubr.bf16.mxu0 %v12897_v2  ;;  %v8090_v34 = vpop.permute.xlu1 %8089  ;;  %v12929_v2 = vld [vmem:[%s17123_s4 + $0x578] sm:$0xff]  }
 0xc30   : > { %11607 = vmatprep.subr.bf16.mxu0 %v7900_v4 }
 0xc31   : > { %11102 = vmatmul.mubr.bf16.gmra.mrb[220].mxu1 %v12946_v47 }
 0xc32   : > { %11105 = vmatprep.mubr.bf16.mxu1 %v12948_v51  ;;  %v12947_v51 = vld [vmem:[%s17123_s4 + $0x5c0] sm:$0xff]  }
 0xc33   : > { %11608 = vmatpush3.bf16.msra.mxu0 %v7900_v4  ;;  %v8094_v61 = vpop.permute.xlu1 %8093  ;;  %v12931_v4 = vld [vmem:[%s17123_s4 + $0x580] sm:$0xff]  }
 0xc34   : > { %11625 = vmatprep.subr.bf16.mxu0 %v16423_v56 }
 0xc36   : > { %11610 = vmatmul.mubr.bf16.vlgmr.msra.gmra.mrb[24].mxu0 %v12898_v48  ;;  %v12933_v48 = vld [vmem:[%s17123_s4 + $0x588] sm:$0xff]  }
 0xc37   : > { %11626 = vmatpush3.bf16.msra.mxu0 %v16423_v56  ;;  %11613 = vmatprep.mubr.bf16.mxu0 %v12899_v24  ;;  %v12901_v56 = vld [vmem:[%s17123_s4 + $0x4a0] sm:$0xff]   ;;  %v8098_v42 = vpop.permute.xlu1 %8097  ;;  %v12935_v24 = vld [vmem:[%s17123_s4 + $0x590] sm:$0xff]  }
 0xc38   : > { %11627 = vmatprep.subr.bf16.mxu0 %v8090_v34 }
 0xc39   : > { %11106 = vmatmul.mubr.bf16.gmra.mrb[224].mxu1 %v12950_v33  ;;  %v12951_v33 = vld [vmem:[%s17123_s4 + $0x5d0] sm:$0xff]  }
 0xc3a   : > { %11109 = vmatprep.mubr.bf16.mxu1 %v12952_v25 }
 0xc3b   : > { %11628 = vmatpush3.bf16.msra.mxu0 %v8090_v34  ;;  %v8102_v55 = vpop.permute.xlu1 %8101 }
 0xc3c   : > { %11629 = vmatprep.subr.bf16.mxu0 %v16431_v20 }
 0xc3e   : > { %11614 = vmatmul.mubr.bf16.gmra.mrb[28].mxu0 %v12900_v9  ;;  %v12939_v9 = vld [vmem:[%s17123_s4 + $0x5a0] sm:$0xff]  }
 0xc3f   : > { %11630 = vmatpush3.bf16.msra.mxu0 %v16431_v20  ;;  %11617 = vmatprep.mubr.bf16.mxu0 %v12901_v56  ;;  %v12903_v20 = vld [vmem:[%s17123_s4 + $0x4b0] sm:$0xff]  }
 0xc40   : > { %11631 = vmatprep.subr.bf16.mxu0 %v8094_v61 }
 0xc41   : > { %11110 = vmatmul.mubr.bf16.gmra.mrb[228].mxu1 %v12954_v22 }
 0xc43   : > { %11632 = vmatpush3.bf16.msra.mxu0 %v8094_v61  ;;  %v12943_v61 = vld [vmem:[%s17123_s4 + $0x5b0] sm:$0xff]  }
 0xc44   : > { %11633 = vmatprep.subr.bf16.mxu0 %v16447_v7 }
 0xc46   : > { %11618 = vmatmul.mubr.bf16.gmra.mrb[32].mxu0 %v12902_v49  ;;  %v12949_v49 = vld [vmem:[%s17123_s4 + $0x5c8] sm:$0xff]  }
 0xc47   : > { %11634 = vmatpush3.bf16.msra.mxu0 %v16447_v7  ;;  %11621 = vmatprep.mubr.bf16.mxu0 %v12903_v20  ;;  %v8292_v7 = vpop.permute.xlu1 %8291 }
 0xc48   : > { %11635 = vmatprep.subr.bf16.mxu0 %v8098_v42 }
 0xc4b   : > { %11636 = vmatpush3.bf16.msra.mxu0 %v8098_v42  ;;  %v8296_v10 = vpop.permute.xlu1 %8295 }
 0xc4c   : > { %11637 = vmatprep.subr.bf16.mxu0 %v16457_v32 }
 0xc4e   : > { %11622 = vmatmul.mubr.bf16.gmra.mrb[36].mxu0 %v12904_v18  ;;  %v12956_v18 = vld [vmem:[%s17123_s4 + $0x5e8] sm:$0xff]  }
 0xc4f   : > { %11638 = vmatpush3.bf16.msra.mxu0 %v16457_v32  ;;  %11641 = vmatprep.mubr.bf16.mxu0 %v12905_v17  ;;  %v8300_v32 = vpop.permute.xlu1 %8299  ;;  %v12957_v17 = vld [vmem:[%s17123_s4 + $0x5f0] sm:$0xff]  }
 0xc50   : > { %11639 = vmatprep.subr.bf16.mxu0 %v8102_v55 }
 0xc53   : > { %11640 = vmatpush3.bf16.msra.mxu0 %v8102_v55  ;;  %v8304_v28 = vpop.permute.xlu1 %8303  ;;  %v12955_v55 = vld [vmem:[%s17123_s4 + $0x5e0] sm:$0xff]  }
 0xc54   : > { %11657 = vmatprep.subr.bf16.mxu0 %v16469_v23 }
 0xc56   : > { %11642 = vmatmul.mubr.bf16.vlgmr.msra.gmra.mrb[24].mxu0 %v12906_v40  ;;  %v12958_v40 = vld [vmem:[%s17123_s4 + $0x5f8] sm:$0xff]  }
 0xc57   : > { %11658 = vmatpush3.bf16.msra.mxu0 %v16469_v23  ;;  %11645 = vmatprep.mubr.bf16.mxu0 %v12907_v26  ;;  %v12910_v23 = vld [vmem:[%s17123_s4 + $0x4e8] sm:$0xff]   ;;  %v8494_v38 = vpop.permute.xlu1 %8493 }
 0xc58   : > { %11659 = vmatprep.subr.bf16.mxu0 %v8292_v7 }
 0xc5b   : > { %11660 = vmatpush3.bf16.msra.mxu0 %v8292_v7  ;;  %v8498_v39 = vpop.permute.xlu1 %8497 }
 0xc5c   : > { %11661 = vmatprep.subr.bf16.mxu0 %v16477_v41 }
 0xc5e   : > { %11646 = vmatmul.mubr.bf16.gmra.mrb[28].mxu0 %v12908_v57  ;;  %v12961_v57 = vld [vmem:[%s17123_s4 + $0x610] sm:$0xff]  }
 0xc5f   : > { %11662 = vmatpush3.bf16.msra.mxu0 %v16477_v41  ;;  %11649 = vmatprep.mubr.bf16.mxu0 %v12909_v5  ;;  %v12912_v41 = vld [vmem:[%s17123_s4 + $0x4f8] sm:$0xff]  }
 0xc60   : > { %11663 = vmatprep.subr.bf16.mxu0 %v8296_v10  ;;  %v12962_v5 = vld [vmem:[%s17123_s4 + $0x618] sm:$0xff]  }
 0xc63   : > { %11664 = vmatpush3.bf16.msra.mxu0 %v8296_v10  ;;  %v12959_v10 = vld [vmem:[%s17123_s4 + $0x600] sm:$0xff]  }
 0xc64   : > { %11665 = vmatprep.subr.bf16.mxu0 %v16487_v12 }
 0xc66   : > { %11650 = vmatmul.mubr.bf16.gmra.mrb[32].mxu0 %v12910_v23  ;;  %v12964_v23 = vld [vmem:[%s17123_s4 + $0x628] sm:$0xff]  }
 0xc67   : > { %11666 = vmatpush3.bf16.msra.mxu0 %v16487_v12  ;;  %11653 = vmatprep.mubr.bf16.mxu0 %v12911_v63  ;;  %v8502_v12 = vpop.permute.xlu1 %8501  ;;  %v12965_v63 = vld [vmem:[%s17123_s4 + $0x630] sm:$0xff]  }
 0xc68   : > { %11667 = vmatprep.subr.bf16.mxu0 %v8300_v32 }
 0xc6b   : > { %11668 = vmatpush3.bf16.msra.mxu0 %v8300_v32  ;;  %v8506_v52 = vpop.permute.xlu1 %8505  ;;  %v12960_v32 = vld [vmem:[%s17123_s4 + $0x608] sm:$0xff]  }
 0xc6c   : > { %11669 = vmatprep.subr.bf16.mxu0 %v16491_v60 }
 0xc6e   : > { %11654 = vmatmul.mubr.bf16.gmra.mrb[36].mxu0 %v12912_v41 }
 0xc6f   : > { %11670 = vmatpush3.bf16.msra.mxu0 %v16491_v60  ;;  %11673 = vmatprep.mubr.bf16.mxu0 %v12913_v31  ;;  %v12916_v60 = vld [vmem:[%s17123_s4 + $0x518] sm:$0xff]   ;;  %v8694_v21 = vpop.permute.xlu1 %8693 }
 0xc70   : > { %11671 = vmatprep.subr.bf16.mxu0 %v8304_v28  ;;  %v12966_v31 = vld [vmem:[%s17123_s4 + $0x638] sm:$0xff]  }
 0xc73   : > { %11672 = vmatpush3.bf16.msra.mxu0 %v8304_v28  ;;  %v8696_v3 = vpop.permute.xlu1 %8695  ;;  %v12963_v28 = vld [vmem:[%s17123_s4 + $0x620] sm:$0xff]  }
 0xc74   : > { %11689 = vmatprep.subr.bf16.mxu0 %v16501_v19 }
 0xc76   : > { %11674 = vmatmul.mubr.bf16.vlgmr.msra.gmra.mrb[24].mxu0 %v12914_v11 }
 0xc77   : > { %11690 = vmatpush3.bf16.msra.mxu0 %v16501_v19  ;;  %11677 = vmatprep.mubr.bf16.mxu0 %v12915_v37  ;;  %v12918_v19 = vld [vmem:[%s17123_s4 + $0x528] sm:$0xff]  }
 0xc78   : > { %11691 = vmatprep.subr.bf16.mxu0 %v8494_v38 }
 0xc7b   : > { %11692 = vmatpush3.bf16.msra.mxu0 %v8494_v38 }
 0xc7c   : > { %11693 = vmatprep.subr.bf16.mxu0 %v16505_v1 }
 0xc7e   : > { %11678 = vmatmul.mubr.bf16.gmra.mrb[28].mxu0 %v12916_v60 }
 0xc7f   : > { %11694 = vmatpush3.bf16.msra.mxu0 %v16505_v1  ;;  %11681 = vmatprep.mubr.bf16.mxu0 %v12917_v8  ;;  %v8698_v1 = vpop.permute.xlu1 %8697 }
 0xc80   : > { %11695 = vmatprep.subr.bf16.mxu0 %v8498_v39 }
 0xc83   : > { %11696 = vmatpush3.bf16.msra.mxu0 %v8498_v39  ;;  %v8700_v29 = vpop.permute.xlu1 %8699 }
 0xc84   : > { %11697 = vmatprep.subr.bf16.mxu0 %v16515_v62 }
 0xc86   : > { %11682 = vmatmul.mubr.bf16.gmra.mrb[32].mxu0 %v12918_v19 }
 0xc87   : > { %11698 = vmatpush3.bf16.msra.mxu0 %v16515_v62  ;;  %11685 = vmatprep.mubr.bf16.mxu0 %v12919_v50  ;;  %v12922_v62 = vld [vmem:[%s17123_s4 + $0x548] sm:$0xff]   ;;  %v8702_v59 = vpop.permute.xlu1 %8701 }
 0xc88   : > { %11699 = vmatprep.subr.bf16.mxu0 %v8502_v12 }
 0xc8b   : > { %11700 = vmatpush3.bf16.msra.mxu0 %v8502_v12  ;;  %v8704_v43 = vpop.permute.xlu1 %8703 }
 0xc8c   : > { %11701 = vmatprep.subr.bf16.mxu0 %v16519_v27 }
 0xc8e   : > { %11686 = vmatmul.mubr.bf16.gmra.mrb[36].mxu0 %v12920_v36 }
 0xc8f   : > { %11702 = vmatpush3.bf16.msra.mxu0 %v16519_v27  ;;  %11705 = vmatprep.mubr.bf16.mxu0 %v12921_v58  ;;  %v12924_v27 = vld [vmem:[%s17123_s4 + $0x558] sm:$0xff]   ;;  %v8706_v54 = vpop.permute.xlu1 %8705 }
 0xc90   : > { %11703 = vmatprep.subr.bf16.mxu0 %v8506_v52 }
 0xc93   : > { %11704 = vmatpush3.bf16.msra.mxu0 %v8506_v52  ;;  %v8708_v53 = vpop.permute.xlu1 %8707 }
 0xc94   : > { %11721 = vmatprep.subr.bf16.mxu0 %v8694_v21 }
 0xc96   : > { %11706 = vmatmul.mubr.bf16.vlgmr.msra.gmra.mrb[24].mxu0 %v12922_v62 }
 0xc97   : > { %11722 = vmatpush3.bf16.msra.mxu0 %v8694_v21  ;;  %11709 = vmatprep.mubr.bf16.mxu0 %v12923_v46  ;;  %v8898_v6 = vpop.permute.xlu1 %8897  ;;  %v9236_v46 = vld [vmem:[%s17128_s9 + $0x10] sm:$0xff] }
 0xc98   : > { %11723 = vmatprep.subr.bf16.mxu0 %v8696_v3 }
 0xc9b   : > { %11724 = vmatpush3.bf16.msra.mxu0 %v8696_v3  ;;  %v8902_v0 = vpop.permute.xlu1 %8901 }
 0xc9c   : > { %11725 = vmatprep.subr.bf16.mxu0 %v8698_v1 }
 0xc9e   : > { %11710 = vmatmul.mubr.bf16.gmra.mrb[28].mxu0 %v12924_v27 }
 0xc9f   : > { %11726 = vmatpush3.bf16.msra.mxu0 %v8698_v1  ;;  %11713 = vmatprep.mubr.bf16.mxu0 %v12925_v16  ;;  %v8906_v34 = vpop.permute.xlu1 %8905 }
 0xca0   : > { %11727 = vmatprep.subr.bf16.mxu0 %v8700_v29 }
 0xca3   : > { %11728 = vmatpush3.bf16.msra.mxu0 %v8700_v29  ;;  %v8910_v47 = vpop.permute.xlu1 %8909  ;;  %v12967_v29 = vld [vmem:[%s17124_s5] sm:$0xff]  }
 0xca4   : > { %11729 = vmatprep.subr.bf16.mxu0 %v8702_v59  ;;  %11833 = vmatprep.mubr.bf16.mxu1 %v12967_v29 }
 0xca6   : > { %11714 = vmatmul.mubr.bf16.gmra.mrb[32].mxu0 %v12926_v15  ;;  %v9237_v15 = vld [vmem:[%s17128_s9 + $0x18] sm:$0xff] }
 0xca7   : > { %11730 = vmatpush3.bf16.msra.mxu0 %v8702_v59  ;;  %11717 = vmatprep.mubr.bf16.mxu0 %v12927_v13  ;;  %v9098_v56 = vpop.permute.xlu1 %9097 }
 0xca8   : > { %11731 = vmatprep.subr.bf16.mxu0 %v8704_v43 }
 0xcab   : > { %11732 = vmatpush3.bf16.msra.mxu0 %v8704_v43  ;;  %v9100_v42 = vpop.permute.xlu1 %9099  ;;  %v9234_v43 = vld [vmem:[%s17128_s9] sm:$0xff] }
 0xcac   : > { %11733 = vmatprep.subr.bf16.mxu0 %v8706_v54 }
 0xcae   : > { %11718 = vmatmul.mubr.bf16.gmra.mrb[36].mxu0 %v12929_v2 }
 0xcaf   : > { %11734 = vmatpush3.bf16.msra.mxu0 %v8706_v54  ;;  %11737 = vmatprep.mubr.bf16.mxu0 %v12931_v4  ;;  %v9235_v4 = vld [vmem:[%s17128_s9 + $0x8] sm:$0xff] }
 0xcb0   : > { %11735 = vmatprep.subr.bf16.mxu0 %v8708_v53 }
 0xcb3   : > { %11736 = vmatpush3.bf16.msra.mxu0 %v8708_v53 }
 0xcb4   : > { %11753 = vmatprep.subr.bf16.mxu0 %v16570_v45 }
 0xcb6   : > { %11738 = vmatmul.mubr.bf16.vlgmr.msra.gmra.mrb[24].mxu0 %v12933_v48 }
 0xcb7   : > { %11754 = vmatpush3.bf16.msra.mxu0 %v16570_v45  ;;  %11741 = vmatprep.mubr.bf16.mxu0 %v12935_v24  ;;  %v12941_v45 = vld [vmem:[%s17123_s4 + $0x5a8] sm:$0xff]  }
 0xcb8   : > { %11755 = vmatprep.subr.bf16.mxu0 %v8898_v6 }
 0xcbb   : > { %11756 = vmatpush3.bf16.msra.mxu0 %v8898_v6 }
 0xcbc   : > { %11757 = vmatprep.subr.bf16.mxu0 %v16582_v44 }
 0xcbe   : > { %11742 = vmatmul.mubr.bf16.gmra.mrb[28].mxu0 %v12937_v30 }
 0xcbf   : > { %11758 = vmatpush3.bf16.msra.mxu0 %v16582_v44  ;;  %11745 = vmatprep.mubr.bf16.mxu0 %v12939_v9  ;;  %v12945_v44 = vld [vmem:[%s17123_s4 + $0x5b8] sm:$0xff]  }
 0xcc0   : > { %11759 = vmatprep.subr.bf16.mxu0 %v8902_v0 }
 0xcc3   : > { %11760 = vmatpush3.bf16.msra.mxu0 %v8902_v0 }
 0xcc4   : > { %11761 = vmatprep.subr.bf16.mxu0 %v16594_v14 }
 0xcc6   : > { %11746 = vmatmul.mubr.bf16.gmra.mrb[32].mxu0 %v12941_v45 }
 0xcc7   : > { %11762 = vmatpush3.bf16.msra.mxu0 %v16594_v14  ;;  %11749 = vmatprep.mubr.bf16.mxu0 %v12943_v61  ;;  %v9102_v14 = vpop.permute.xlu1 %9101  ;;  %v9240_v61 = vld [vmem:[%s17128_s9 + $0x30] sm:$0xff] }
 0xcc8   : > { %11763 = vmatprep.subr.bf16.mxu0 %v8906_v34 }
 0xccb   : > { %11764 = vmatpush3.bf16.msra.mxu0 %v8906_v34  ;;  %v9104_v20 = vpop.permute.xlu1 %9103 }
 0xccc   : > { %11765 = vmatprep.subr.bf16.mxu0 %v16606_v35 }
 0xcce   : > { %11750 = vmatmul.mubr.bf16.gmra.mrb[36].mxu0 %v12945_v44 }
 0xccf   : > { %11766 = vmatpush3.bf16.msra.mxu0 %v16606_v35  ;;  %11769 = vmatprep.mubr.bf16.mxu0 %v12947_v51  ;;  %v12953_v35 = vld [vmem:[%s17123_s4 + $0x5d8] sm:$0xff]   ;;  %v9106_v25 = vpop.permute.xlu1 %9105 }
 0xcd0   : > { %11767 = vmatprep.subr.bf16.mxu0 %v8910_v47 }
 0xcd3   : > { %11768 = vmatpush3.bf16.msra.mxu0 %v8910_v47  ;;  %v9108_v22 = vpop.permute.xlu1 %9107 }
 0xcd4   : > { %11785 = vmatprep.subr.bf16.mxu0 %v9098_v56 }
 0xcd6   : > { %11770 = vmatmul.mubr.bf16.vlgmr.msra.gmra.mrb[24].mxu0 %v12949_v49 }
 0xcd7   : > { %11786 = vmatpush3.bf16.msra.mxu0 %v9098_v56  ;;  %11773 = vmatprep.mubr.bf16.mxu0 %v12951_v33  ;;  %v9110_v7 = vpop.permute.xlu1 %9109  ;;  %v9241_v33 = vld [vmem:[%s17128_s9 + $0x38] sm:$0xff] }
 0xcd8   : > { %11787 = vmatprep.subr.bf16.mxu0 %v9100_v42 }
 0xcdb   : > { %11788 = vmatpush3.bf16.msra.mxu0 %v9100_v42  ;;  %v9112_v26 = vpop.permute.xlu1 %9111  ;;  %v9238_v42 = vld [vmem:[%s17128_s9 + $0x20] sm:$0xff] }
 0xcdc   : > { %11789 = vmatprep.subr.bf16.mxu0 %v9102_v14 }
 0xcde   : > { %11774 = vmatmul.mubr.bf16.gmra.mrb[28].mxu0 %v12953_v35 }
 0xcdf   : > { %11790 = vmatpush3.bf16.msra.mxu0 %v9102_v14  ;;  %11777 = vmatprep.mubr.bf16.mxu0 %v12955_v55 }
 0xce0   : > { %11791 = vmatprep.subr.bf16.mxu0 %v9104_v20 }
 0xce3   : > { %11792 = vmatpush3.bf16.msra.mxu0 %v9104_v20 }
 0xce4   : > { %11793 = vmatprep.subr.bf16.mxu0 %v9106_v25 }
 0xce6   : > { %11778 = vmatmul.mubr.bf16.gmra.mrb[32].mxu0 %v12956_v18  ;;  %v9239_v18 = vld [vmem:[%s17128_s9 + $0x28] sm:$0xff] }
 0xce7   : > { %11794 = vmatpush3.bf16.msra.mxu0 %v9106_v25  ;;  %11781 = vmatprep.mubr.bf16.mxu0 %v12957_v17 }
 0xce8   : > { %11795 = vmatprep.subr.bf16.mxu0 %v9108_v22 }
 0xceb   : > { %11796 = vmatpush3.bf16.msra.mxu0 %v9108_v22 }
 0xcec   : > { %11797 = vmatprep.subr.bf16.mxu0 %v9110_v7 }
 0xcee   : > { %11782 = vmatmul.mubr.bf16.gmra.mrb[36].mxu0 %v12958_v40 }
 0xcef   : > { %11798 = vmatpush3.bf16.msra.mxu0 %v9110_v7  ;;  %11801 = vmatprep.mubr.bf16.mxu0 %v12959_v10 }
 0xcf0   : > { %11799 = vmatprep.subr.bf16.mxu0 %v9112_v26 }
 0xcf3   : > { %11800 = vmatpush3.bf16.msra.mxu0 %v9112_v26 }
 0xcf6   : > { %11802 = vmatmul.mubr.bf16.vlgmr.msra.gmra.mrb[24].mxu0 %v12960_v32 }
 0xcf7   : > { %11805 = vmatprep.mubr.bf16.mxu0 %v12961_v57 }
 0xcfc   : > { %v11099_v38 = vpop.f32.mrb[216].mxu1 }
 0xcfd   : > { %v4711_v41 = vpop.f32.mrb[217].mxu1 }
 0xcfe   : > { %11806 = vmatmul.mubr.bf16.gmra.mrb[28].mxu0 %v12962_v5  ;;  %v11100_v39 = vpop.f32.mrb[218].mxu1 }
 0xcff   : > { %11809 = vmatprep.mubr.bf16.mxu0 %v12963_v28  ;;  %v4714_v12 = vpop.f32.mrb[219].mxu1  ;;  %v9244_v28 = vld [vmem:[%s17128_s9 + $0x50] sm:$0xff] }
 0xd04   : > { %v11103_v11 = vpop.f32.mrb[220].mxu1 }
 0xd05   : > { %v4727_v37 = vpop.f32.mrb[221].mxu1 }
 0xd06   : > { %11810 = vmatmul.mubr.bf16.gmra.mrb[32].mxu0 %v12964_v23  ;;  %v11104_v52 = vpop.f32.mrb[222].mxu1 }
 0xd07   : > { %11813 = vmatprep.mubr.bf16.mxu0 %v12965_v63  ;;  %v4730_v60 = vpop.f32.mrb[223].mxu1 }
 0xd0c   : > { %v11107_v8 = vpop.f32.mrb[224].mxu1 }
 0xd0d   : > { %v4743_v21 = vpop.f32.mrb[225].mxu1 }
 0xd0e   : > { %11814 = vmatmul.mubr.bf16.gmra.mrb[36].mxu0 %v12966_v31  ;;  %v17028_v19 = vpop.f32.mrb[226].mxu1 }
 0xd0f   : > { %v17030_v3 = vpop.f32.mrb[227].mxu1 }
 0xd14   : > { %v17032_v50 = vpop.f32.mrb[228].mxu1 }
 0xd15   : > { %v17034_v1 = vpop.f32.mrb[229].mxu1 }
 0xd16   : > { %v17036_v36 = vpop.f32.mrb[230].mxu1 }
 0xd17   : > { %v17038_v58 = vpop.f32.mrb[231].mxu1 }
 0xdc9   : > { %v11803_v62 = vpop.f32.mrb[24].mxu0 }
 0xdca   : > { %v11853_v59 = vadd.f32 %v11803_v62, %v11099_v38  ;;  %v9155_v27 = vpop.f32.mrb[25].mxu0  ;;  %v9242_v38 = vld [vmem:[%s17128_s9 + $0x40] sm:$0xff] }
 0xdcb   : > { %v11854_v16 = vadd.f32 %v9155_v27, %v4711_v41  ;;  %v11804_v54 = vpop.f32.mrb[26].mxu0 }
 0xdcc   : > { %v9252_v13 = vadd.f32 %v11853_v59, %v9236_v46  ;;  %v11855_v53 = vadd.f32 %v11804_v54, %v11100_v39  ;;  %v9158_v2 = vpop.f32.mrb[27].mxu0 }
 0xdcd   : > { %v9250_v6 = vadd.f32 %v11854_v16, %v9234_v43  ;;  %v11856_v48 = vadd.f32 %v9158_v2, %v4714_v12  ;;  %v9245_v12 = vld [vmem:[%s17128_s9 + $0x58] sm:$0xff] }
 0xdce   : > { %v9253_v0 = vadd.f32 %v11855_v53, %v9237_v15  ;;  %v9268_v34 = vmax.f32 %v9252_v13, 0.0 }
 0xdcf   : > { %v9251_v24 = vadd.f32 %v11856_v48, %v9235_v4  ;;  %v9266_v9 = vmax.f32 %v9250_v6, 0.0  ;;  %v9249_v6 = vld [vmem:[%s17128_s9 + $0x78] sm:$0xff] }
 0xdd0   : > { %v9269_v30 = vmax.f32 %v9253_v0, 0.0 }
 0xdd1   : > { %v9267_v47 = vmax.f32 %v9251_v24, 0.0  ;;  %v11807_v45 = vpop.f32.mrb[28].mxu0 }
 0xdd2   : > { %v11857_v56 = vadd.f32 %v11807_v45, %v11103_v11  ;;  %v9171_v44 = vpop.f32.mrb[29].mxu0  ;;  %v9287_v51 = vpack.c.bf16 %v9269_v30, %v9268_v34 }
 0xdd3   : > { %v11858_v14 = vadd.f32 %v9171_v44, %v4727_v37  ;;  %v11808_v49 = vpop.f32.mrb[30].mxu0  ;;  %v9286_v20 = vpack.c.bf16 %v9267_v47, %v9266_v9 }
 0xdd4   : > { %v9256_v35 = vadd.f32 %v11857_v56, %v9240_v61  ;;  %v11859_v55 = vadd.f32 %v11808_v49, %v11104_v52  ;;  %v9174_v25 = vpop.f32.mrb[31].mxu0 }
 0xdd5   : > { %v9254_v22 = vadd.f32 %v11858_v14, %v9238_v42  ;;  %v11860_v17 = vadd.f32 %v9174_v25, %v4730_v60  ;;  %11817 = vmatprep.subr.bf16.mxu1 %v9286_v20  ;;  %v9294_v14 = vld [vmem:[%s17129_s10] sm:$0xff] }
 0xdd6   : > { %v9257_v7 = vadd.f32 %v11859_v55, %v9241_v33  ;;  %11818 = vmatpush3.bf16.msra.mxu1 %v9286_v20  ;;  %v9272_v10 = vmax.f32 %v9256_v35, 0.0  ;;  %v9297_v33 = vld [vmem:[%s17129_s10 + $0x18] sm:$0x3f]  ;;  %v9295_v55 = vld [vmem:[%s17129_s10 + $0x8] sm:$0xff] }
 0xdd7   : > { %v9255_v40 = vadd.f32 %v11860_v17, %v9239_v18  ;;  %11819 = vmatprep.subr.bf16.mxu1 %v9287_v51  ;;  %v9270_v32 = vmax.f32 %v9254_v22, 0.0 }
 0xdd8   : > { %v9273_v26 = vmax.f32 %v9257_v7, 0.0 }
 0xdd9   : > { %v9271_v57 = vmax.f32 %v9255_v40, 0.0  ;;  %v11811_v5 = vpop.f32.mrb[32].mxu0 }
 0xdda   : > { %v11861_v23 = vadd.f32 %v11811_v5, %v11107_v8  ;;  %v9187_v63 = vpop.f32.mrb[33].mxu0  ;;  %11820 = vmatpush3.bf16.msra.mxu1 %v9287_v51  ;;  %v9289_v41 = vpack.c.bf16 %v9273_v26, %v9272_v10  ;;  %v9243_v8 = vld [vmem:[%s17128_s9 + $0x48] sm:$0xff]  ;;  %v9296_v51 = vld [vmem:[%s17129_s10 + $0x10] sm:$0xff] }
 0xddb   : > { %v11862_v39 = vadd.f32 %v9187_v63, %v4743_v21  ;;  %v11812_v31 = vpop.f32.mrb[34].mxu0  ;;  %v9288_v11 = vpack.c.bf16 %v9271_v57, %v9270_v32 }
 0xddc   : > { %v9260_v37 = vadd.f32 %v11861_v23, %v9244_v28  ;;  %v11863_v52 = vadd.f32 %v11812_v31, %v17028_v19  ;;  %v9190_v60 = vpop.f32.mrb[35].mxu0  ;;  %v9248_v19 = vld [vmem:[%s17128_s9 + $0x70] sm:$0xff] }
 0xddd   : > { %v9258_v29 = vadd.f32 %v11862_v39, %v9242_v38  ;;  %v11864_v62 = vadd.f32 %v9190_v60, %v17030_v3  ;;  %11821 = vmatprep.subr.bf16.mxu1 %v9288_v11  ;;  %v9246_v3 = vld [vmem:[%s17128_s9 + $0x60] sm:$0xff] }
 0xdde   : > { %v9261_v46 = vadd.f32 %v11863_v52, %v9245_v12  ;;  %11822 = vmatpush3.bf16.msra.mxu1 %v9288_v11  ;;  %v9276_v59 = vmax.f32 %v9260_v37, 0.0 }
 0xddf   : > { %v9259_v21 = vadd.f32 %v11864_v62, %v9243_v8  ;;  %11823 = vmatprep.subr.bf16.mxu1 %v9289_v41  ;;  %v9274_v43 = vmax.f32 %v9258_v29, 0.0 }
 0xde0   : > { %v9277_v27 = vmax.f32 %v9261_v46, 0.0 }
 0xde1   : > { %v9275_v16 = vmax.f32 %v9259_v21, 0.0  ;;  %v11815_v54 = vpop.f32.mrb[36].mxu0 }
 0xde2   : > { %v11865_v15 = vadd.f32 %v11815_v54, %v17032_v50  ;;  %v9203_v13 = vpop.f32.mrb[37].mxu0  ;;  %11824 = vmatpush3.bf16.msra.mxu1 %v9289_v41  ;;  %v9291_v53 = vpack.c.bf16 %v9277_v27, %v9276_v59  ;;  %v9247_v50 = vld [vmem:[%s17128_s9 + $0x68] sm:$0xff] }
 0xde3   : > { %v11866_v2 = vadd.f32 %v9203_v13, %v17034_v1  ;;  %v11816_v4 = vpop.f32.mrb[38].mxu0  ;;  %v9290_v48 = vpack.c.bf16 %v9275_v16, %v9274_v43 }
 0xde4   : > { %v9264_v0 = vadd.f32 %v11865_v15, %v9248_v19  ;;  %v11867_v24 = vadd.f32 %v11816_v4, %v17036_v36  ;;  %v9206_v34 = vpop.f32.mrb[39].mxu0 }
 0xde5   : > { %v9262_v30 = vadd.f32 %v11866_v2, %v9246_v3  ;;  %v11868_v9 = vadd.f32 %v9206_v34, %v17038_v58  ;;  %11825 = vmatprep.subr.bf16.mxu1 %v9290_v48  ;;  %v12968_v58 = vld [vmem:[%s17124_s5 + $0x8] sm:$0x7f]  }
 0xde6   : > { %v9265_v47 = vadd.f32 %v11867_v24, %v9249_v6  ;;  %11826 = vmatpush3.bf16.msra.mxu1 %v9290_v48  ;;  %v9280_v45 = vmax.f32 %v9264_v0, 0.0 }
 0xde7   : > { %v9263_v1 = vadd.f32 %v11868_v9, %v9247_v50  ;;  %11827 = vmatprep.subr.bf16.mxu1 %v9291_v53  ;;  %v9278_v56 = vmax.f32 %v9262_v30, 0.0 }
 0xde8   : > { %v9281_v61 = vmax.f32 %v9265_v47, 0.0 }
 0xde9   : > { %v9279_v44 = vmax.f32 %v9263_v1, 0.0 }
 0xdea   : > { %11828 = vmatpush3.bf16.msra.mxu1 %v9291_v53  ;;  %v9293_v36 = vpack.c.bf16 %v9281_v61, %v9280_v45 }
 0xdeb   : > { %v9292_v42 = vpack.c.bf16 %v9279_v44, %v9278_v56 }
 0xded   : > { %11829 = vmatprep.subr.bf16.mxu1 %v9292_v42 }
 0xdee   : > { %11830 = vmatpush3.bf16.msra.mxu1 %v9292_v42 }
 0xdef   : > { %11831 = vmatprep.subr.bf16.mxu1 %v9293_v36 }
 0xdf2   : > { %11832 = vmatpush3.bf16.msra.mxu1 %v9293_v36 }
 0xdf5   : > { %11834 = vmatmul.mubr.bf16.vlgmr.msra.gmra.mrb[232].mxu1 %v12968_v58 }
 0xec8   : > { %v11835_v49 = vpop.f32.mrb[232].mxu1 }
 0xec9   : > { %v9353_v20 = vadd.f32 %v11835_v49, %v9296_v51  ;;  %v9344_v35 = vpop.f32.mrb[233].mxu1 }
 0xeca   : > { %v9345_v25 = vadd.f32 %v9344_v35, %v9294_v14  ;;  %v11836_v18 = vpop.f32.mrb[234].mxu1 }
 0xecb   : > { %9362 = vst.msk [vmem:[%s386_s19 + $0x10] sm:$0xff] %vm9359_vm12, %v9353_v20  ;;  %v9356_v22 = vadd.f32 %v11836_v18, %v9297_v33  ;;  %v9347_v17 = vpop.f32.mrb[235].mxu1 }
 0xecc   : > { %9360 = vst.msk [vmem:[%s386_s19] sm:$0xff] %vm9359_vm12, %v9345_v25  ;;  %v9348_v7 = vadd.f32 %v9347_v17, %v9295_v55 }
 0xecd   : > { %9364 = vst.msk [vmem:[%s386_s19 + $0x18] sm:$0x3f] %vm9363_vm14, %v9356_v22 }
 0xece   : > { %9361 = vst.msk [vmem:[%s386_s19 + $0x8] sm:$0xff] %vm9359_vm12, %v9348_v7 }
 0xecf PF: > { %s21_s17 = sadd.s32 1, %s12975_s17  }
 0xed0   : > { %p18_p4 = scmp.ge.s32.totalorder %s21_s17, 4  }
 0xed2   :  { %20 = sbr.rel (!%p18_p4) target bundleno = 1 (0x1), region = 118 }

</bundles_post_ra>
